<compile_context>
chip_gen: v6e
topology: v6e:2x2x1
jax: 0.10.0
libtpu: 0.0.40
codegen_flags: <defaults>
</compile_context>

<pallas_src>
import functools

import jax
import jax.numpy as jnp
from jax.experimental import pallas as pl
from jax.experimental.pallas import tpu as pltpu


# ----------------------------------------------------------------------------
# Kernel A: fused stem = 3x (1x1 conv + folded BN + ReLU) with concatenated
# output channels, plus the 3x3/stride-2 max-pool branch (same input x).
# ----------------------------------------------------------------------------
def _stem_kernel(x_ref, w_ref, b_ref, y_ref, p_ref, *, H, W):
    # x_ref: (H*W, Cin) f32      w_ref: (Cin, Cout) bf16 (BN scale folded in)
    # b_ref: (1, Cout)  f32      y_ref: (H*W, Cout) f32
    # p_ref: (Ho*Wo, Cin) f32    (3x3/s2 valid max-pool of x)
    xm = x_ref[...]

    # 1x1 conv == plain matmul over channels; bf16 MXU inputs, f32 accumulate.
    acc = jnp.dot(xm.astype(jnp.bfloat16), w_ref[...],
                  preferred_element_type=jnp.float32)
    y_ref[...] = jnp.maximum(acc + b_ref[...], 0.0)

    # 3x3 / stride-2 valid max-pool, done on the flat (H*W, Cin) view with
    # only static contiguous slices (no strided ref reads, no -inf init).
    Ho = (H - 3) // 2 + 1
    Wo = (W - 3) // 2 + 1
    out_rows = []
    for ho in range(Ho):
        slab = xm[(2 * ho) * W:(2 * ho + 3) * W]          # 3 image rows, contiguous
        rmax = jnp.maximum(jnp.maximum(slab[0:W], slab[W:2 * W]),
                           slab[2 * W:3 * W])             # (W, Cin)
        for wo in range(Wo):
            out_rows.append(jnp.max(rmax[2 * wo:2 * wo + 3], axis=0,
                                    keepdims=True))       # (1, Cin)
    p_ref[...] = jnp.concatenate(out_rows, axis=0)        # (Ho*Wo, Cin)


def stem_forward(x_flat, w, b, H, W):
    N, HW, Cin = x_flat.shape
    Cout = w.shape[1]
    Ho = (H - 3) // 2 + 1
    Wo = (W - 3) // 2 + 1
    kernel = functools.partial(_stem_kernel, H=H, W=W)
    return pl.pallas_call(
        kernel,
        out_shape=(jax.ShapeDtypeStruct((N, HW, Cout), jnp.float32),
                   jax.ShapeDtypeStruct((N, Ho * Wo, Cin), jnp.float32)),
        grid=(N,),
        in_specs=[
            pl.BlockSpec((None, HW, Cin), lambda n: (n, 0, 0)),
            pl.BlockSpec((Cin, Cout), lambda n: (0, 0)),
            pl.BlockSpec((1, Cout), lambda n: (0, 0)),
        ],
        out_specs=(pl.BlockSpec((None, HW, Cout), lambda n: (n, 0, 0)),
                   pl.BlockSpec((None, Ho * Wo, Cin), lambda n: (n, 0, 0))),
        compiler_params=pltpu.CompilerParams(
            dimension_semantics=("parallel",)),
    )(x_flat, w, b)


# ----------------------------------------------------------------------------
# Kernel B: generic im2col-conv = one fat matmul + bias + ReLU.
# ----------------------------------------------------------------------------
def _matmul_bias_relu_kernel(x_ref, w_ref, b_ref, o_ref):
    # x_ref: (M, K) bf16   w_ref: (K, Cout) bf16   b_ref: (1, Cout) f32
    acc = jnp.dot(x_ref[...], w_ref[...], preferred_element_type=jnp.float32)
    o_ref[...] = jnp.maximum(acc + b_ref[...], 0.0)


def conv_as_matmul_forward(patches, w, b):
    # patches: (N, M, K) bf16, w: (K, Cout) bf16, b: (1, Cout) f32
    N, M, K = patches.shape
    Cout = w.shape[1]
    return pl.pallas_call(
        _matmul_bias_relu_kernel,
        out_shape=jax.ShapeDtypeStruct((N, M, Cout), jnp.float32),
        grid=(N,),
        in_specs=[
            pl.BlockSpec((None, M, K), lambda n: (n, 0, 0)),
            pl.BlockSpec((K, Cout), lambda n: (0, 0)),
            pl.BlockSpec((1, Cout), lambda n: (0, 0)),
        ],
        out_specs=pl.BlockSpec((None, M, Cout), lambda n: (n, 0, 0)),
        compiler_params=pltpu.CompilerParams(
            dimension_semantics=("parallel",)),
    )(patches, w, b)


# ----------------------------------------------------------------------------
# Kernel C: the three final 3x3/stride-2 convs (branch heads), fused into one
# kernel that emits the concatenated [384 | 256 | 256] channel slab.
# ----------------------------------------------------------------------------
def _heads_kernel(p0_ref, p1_ref, p2_ref, w0_ref, w1_ref, w2_ref, b_ref, o_ref):
    y0 = jnp.dot(p0_ref[...], w0_ref[...], preferred_element_type=jnp.float32)
    y1 = jnp.dot(p1_ref[...], w1_ref[...], preferred_element_type=jnp.float32)
    y2 = jnp.dot(p2_ref[...], w2_ref[...], preferred_element_type=jnp.float32)
    y = jnp.concatenate([y0, y1, y2], axis=-1) + b_ref[...]
    o_ref[...] = jnp.maximum(y, 0.0)


def heads_forward(p0, p1, p2, w0, w1, w2, b):
    N, M, K = p0.shape
    C0, C1, C2 = w0.shape[1], w1.shape[1], w2.shape[1]
    Cout = C0 + C1 + C2
    return pl.pallas_call(
        _heads_kernel,
        out_shape=jax.ShapeDtypeStruct((N, M, Cout), jnp.float32),
        grid=(N,),
        in_specs=[
            pl.BlockSpec((None, M, K), lambda n: (n, 0, 0)),
            pl.BlockSpec((None, M, K), lambda n: (n, 0, 0)),
            pl.BlockSpec((None, M, K), lambda n: (n, 0, 0)),
            pl.BlockSpec((K, C0), lambda n: (0, 0)),
            pl.BlockSpec((K, C1), lambda n: (0, 0)),
            pl.BlockSpec((K, C2), lambda n: (0, 0)),
            pl.BlockSpec((1, Cout), lambda n: (0, 0)),
        ],
        out_specs=pl.BlockSpec((None, M, Cout), lambda n: (n, 0, 0)),
        compiler_params=pltpu.CompilerParams(
            dimension_semantics=("parallel",)),
    )(p0, p1, p2, w0, w1, w2, b)


# ----------------------------------------------------------------------------
# Wrapper-side layout plumbing.
# ----------------------------------------------------------------------------
def _im2col_3x3(x, stride):
    """(N, H, W, C) -> (N, Ho*Wo, 9*C) patches, feature order (kh, kw, ci).

    One-time pre-strided copy done in the wrapper (plain XLA), so the Pallas
    kernels only see contiguous lane-dense blocks and a single fat matmul.
    """
    N, H, W, C = x.shape
    Ho = (H - 3) // stride + 1
    Wo = (W - 3) // stride + 1
    taps = []
    for kh in range(3):
        for kw in range(3):
            taps.append(jax.lax.slice(
                x,
                (0, kh, kw, 0),
                (N, kh + (Ho - 1) * stride + 1, kw + (Wo - 1) * stride + 1, C),
                (1, stride, stride, 1)))
    patches = jnp.concatenate(taps, axis=-1)              # (N, Ho, Wo, 9*C)
    return patches.reshape(N, Ho * Wo, 9 * C)


def fold_bn_into_conv(w, scale, bias):
    """PyTorch-layout conv weight + folded BN -> ((KH*KW*Cin, Cout) bf16, bias f32)."""
    Cout, Cin, KH, KW = w.shape
    wf = w * scale[:, None, None, None]                   # fold BN scale (f32 math)
    wf = jnp.transpose(wf, (2, 3, 1, 0)).reshape(KH * KW * Cin, Cout)
    return wf.astype(jnp.bfloat16), bias.reshape(1, Cout).astype(jnp.float32)


def prepare_mixed_7a_params(params):
    w00, b00 = fold_bn_into_conv(*params["b0_0"])
    w10, b10 = fold_bn_into_conv(*params["b1_0"])
    w20, b20 = fold_bn_into_conv(*params["b2_0"])
    w01, b01 = fold_bn_into_conv(*params["b0_1"])
    w11, b11 = fold_bn_into_conv(*params["b1_1"])
    w21, b21 = fold_bn_into_conv(*params["b2_1"])
    w22, b22 = fold_bn_into_conv(*params["b2_2"])
    return {
        "stem_w": jnp.concatenate([w00, w10, w20], axis=1),   # (896, 768) bf16
        "stem_b": jnp.concatenate([b00, b10, b20], axis=1),   # (1, 768) f32
        "mid_w": w21, "mid_b": b21,                           # (2304, 256)
        "head_w0": w01, "head_w1": w11, "head_w2": w22,       # (2304, {384,256,256})
        "head_b": jnp.concatenate([b01, b11, b22], axis=1),   # (1, 896)
    }


# ----------------------------------------------------------------------------
# Parameter construction (deterministic, synthetic; matches BatchNorm2d(eps=1e-3)).
# ----------------------------------------------------------------------------
def make_basic_conv_params(key, cin, cout, k):
    k1, k2, k3, k4, k5 = jax.random.split(key, 5)
    w = jax.random.normal(k1, (cout, cin, k, k), jnp.float32) * 0.05
    gamma = jax.random.uniform(k2, (cout,), jnp.float32, 0.5, 1.5)
    beta = jax.random.normal(k3, (cout,), jnp.float32) * 0.1
    run_mean = jax.random.normal(k4, (cout,), jnp.float32) * 0.1
    run_var = jax.random.uniform(k5, (cout,), jnp.float32, 0.5, 1.5)
    eps = 1e-3
    scale = gamma / jnp.sqrt(run_var + eps)
    bias = beta - run_mean * scale
    return (w, scale, bias)


def make_mixed_7a_params(key):
    keys = jax.random.split(key, 7)
    return {
        "b0_0": make_basic_conv_params(keys[0], 896, 256, 1),
        "b0_1": make_basic_conv_params(keys[1], 256, 384, 3),
        "b1_0": make_basic_conv_params(keys[2], 896, 256, 1),
        "b1_1": make_basic_conv_params(keys[3], 256, 256, 3),
        "b2_0": make_basic_conv_params(keys[4], 896, 256, 1),
        "b2_1": make_basic_conv_params(keys[5], 256, 256, 3),
        "b2_2": make_basic_conv_params(keys[6], 256, 256, 3),
    }


# ----------------------------------------------------------------------------
# Mixed_7a forward (Pallas) and pure-JAX reference.
# ----------------------------------------------------------------------------
def mixed_7a_pallas(x_nchw, params):
    kp = prepare_mixed_7a_params(params)
    N, C, H, W = x_nchw.shape
    Ho = (H - 3) // 2 + 1
    Wo = (W - 3) // 2 + 1

    c0 = params["b0_0"][0].shape[0]          # 256
    c1 = params["b1_0"][0].shape[0]          # 256
    c2 = params["b2_0"][0].shape[0]          # 256

    x = jnp.transpose(x_nchw, (0, 2, 3, 1))  # NHWC, f32
    x_flat = x.reshape(N, H * W, C)

    # Kernel A: fused 3x(1x1 conv) with concatenated Cout + 3x3/s2 max-pool.
    y768, pooled = stem_forward(x_flat, kp["stem_w"], kp["stem_b"], H, W)

    # Branch-2 middle conv (3x3, s=1, p=1, 256->256): wrapper im2col + matmul kernel.
    x2 = y768[:, :, c0 + c1:c0 + c1 + c2].reshape(N, H, W, c2)
    x2p = jnp.pad(x2, ((0, 0), (1, 1), (1, 1), (0, 0)))
    p_mid = _im2col_3x3(x2p, stride=1).astype(jnp.bfloat16)
    y2 = conv_as_matmul_forward(p_mid, kp["mid_w"], kp["mid_b"])   # (N, H*W, 256)

    # Final 3x3/stride-2 convs of the three branches, fused into one kernel.
    b0_in = y768[:, :, 0:c0].reshape(N, H, W, c0)
    b1_in = y768[:, :, c0:c0 + c1].reshape(N, H, W, c1)
    b2_in = y2.reshape(N, H, W, c2)
    p0 = _im2col_3x3(b0_in, stride=2).astype(jnp.bfloat16)
    p1 = _im2col_3x3(b1_in, stride=2).astype(jnp.bfloat16)
    p2 = _im2col_3x3(b2_in, stride=2).astype(jnp.bfloat16)
    heads = heads_forward(p0, p1, p2, kp["head_w0"], kp["head_w1"],
                          kp["head_w2"], kp["head_b"])             # (N, Ho*Wo, 896)

    out = jnp.concatenate([heads, pooled], axis=-1)                # (N, Ho*Wo, 1792)
    out = out.reshape(N, Ho, Wo, heads.shape[-1] + pooled.shape[-1])
    return jnp.transpose(out, (0, 3, 1, 2))                        # back to NCHW


def mixed_7a_ref(x_nchw, params):
    """Reference with identical numerics: folded BN, bf16 matmul inputs, f32 accumulate."""
    x = jnp.transpose(x_nchw, (0, 2, 3, 1))

    def cbr(inp, w, scale, bias, stride, padding):
        wf = (w * scale[:, None, None, None]).astype(jnp.bfloat16)
        wf = jnp.transpose(wf, (2, 3, 1, 0))  # HWIO
        y = jax.lax.conv_general_dilated(
            inp.astype(jnp.bfloat16), wf,
            window_strides=(stride, stride),
            padding=[(padding, padding), (padding, padding)],
            dimension_numbers=("NHWC", "HWIO", "NHWC"),
            preferred_element_type=jnp.float32)
        return jnp.maximum(y + bias, 0.0)

    b0 = cbr(x, *params["b0_0"], 1, 0)
    b0 = cbr(b0, *params["b0_1"], 2, 0)
    b1 = cbr(x, *params["b1_0"], 1, 0)
    b1 = cbr(b1, *params["b1_1"], 2, 0)
    b2 = cbr(x, *params["b2_0"], 1, 0)
    b2 = cbr(b2, *params["b2_1"], 1, 1)
    b2 = cbr(b2, *params["b2_2"], 2, 0)
    b3 = jax.lax.reduce_window(x, -jnp.inf, jax.lax.max,
                               (1, 3, 3, 1), (1, 2, 2, 1), "VALID")
    out = jnp.concatenate([b0, b1, b2, b3], axis=-1)
    return jnp.transpose(out, (0, 3, 1, 2))


if __name__ == "__main__":
    key = jax.random.PRNGKey(0)
    k_x, k_p = jax.random.split(key)

    # Channels are fixed to 896 by the module definition; small spatial size.
    N, C, H, W = 2, 896, 9, 9
    x = jax.random.normal(k_x, (N, C, H, W), jnp.float32)
    params = make_mixed_7a_params(k_p)

    fwd = jax.jit(mixed_7a_pallas)
    ref_fn = jax.jit(mixed_7a_ref)

    out = jax.block_until_ready(fwd(x, params))
    ref = jax.block_until_ready(ref_fn(x, params))

    assert out.shape == (N, 384 + 256 + 256 + 896, 4, 4), out.shape
    max_err = float(jnp.max(jnp.abs(out - ref)))
    # Both paths use bf16 MXU inputs with f32 accumulation; only summation-order
    # and occasional 1-ulp bf16 re-rounding differences remain.
    assert jnp.allclose(out, ref, rtol=1e-2, atol=1e-2), max_err

    print("KERNEL_OK")
</pallas_src>

<mosaic_0001>
module attributes {stable_mosaic.version = 11 : i64} {
  func.func @_stem_kernel(%arg0: i32, %arg1: memref<1x81x896xf32, #tpu.memory_space<vmem>>, %arg2: memref<896x768xbf16, #tpu.memory_space<vmem>>, %arg3: memref<1x768xf32, #tpu.memory_space<vmem>>, %arg4: memref<1x81x768xf32, #tpu.memory_space<vmem>>, %arg5: memref<1x16x896xf32, #tpu.memory_space<vmem>>) attributes {dimension_semantics = [#tpu.dimension_semantics<parallel>], iteration_bounds = array<i64: 2>, scalar_prefetch = 0 : i64, scratch_operands = 0 : i64, tpu.core_type = #tpu.core_type<tc>, window_params = [{transform_indices = @transform_0, window_bounds = array<i64: 1, 81, 896>}, {pipeline_mode = #tpu.pipeline_mode<synchronous>, transform_indices = @transform_1, window_bounds = array<i64: 896, 768>}, {pipeline_mode = #tpu.pipeline_mode<synchronous>, transform_indices = @transform_2, window_bounds = array<i64: 1, 768>}, {transform_indices = @transform_3, window_bounds = array<i64: 1, 81, 768>}, {transform_indices = @transform_4, window_bounds = array<i64: 1, 16, 896>}]} {
    %c0 = arith.constant 0 : index
    %c0_0 = arith.constant 0 : index
    %c0_1 = arith.constant 0 : index
    %0 = vector.load %arg1[%c0, %c0_0, %c0_1] : memref<1x81x896xf32, #tpu.memory_space<vmem>>, vector<1x81x896xf32>
    %1 = vector.shape_cast %0 : vector<1x81x896xf32> to vector<81x896xf32>
    %2 = arith.truncf %1 : vector<81x896xf32> to vector<81x896xbf16>
    %c0_2 = arith.constant 0 : index
    %c0_3 = arith.constant 0 : index
    %3 = vector.load %arg2[%c0_2, %c0_3] : memref<896x768xbf16, #tpu.memory_space<vmem>>, vector<896x768xbf16>
    %cst = arith.constant dense<0.000000e+00> : vector<81x768xf32>
    %4 = tpu.matmul %2, %3, %cst {dimension_numbers = #tpu.dot_dimension_numbers<[1], [0], [0], [1], [0, 0, 1, 1], [], []>} : vector<81x896xbf16>, vector<896x768xbf16>, vector<81x768xf32> -> vector<81x768xf32>
    %c0_4 = arith.constant 0 : index
    %c0_5 = arith.constant 0 : index
    %5 = vector.load %arg3[%c0_4, %c0_5] : memref<1x768xf32, #tpu.memory_space<vmem>>, vector<1x768xf32>
    %6 = vector.broadcast %5 : vector<1x768xf32> to vector<81x768xf32>
    %7 = arith.addf %4, %6 : vector<81x768xf32>
    %cst_6 = arith.constant 0.000000e+00 : f32
    %8 = vector.broadcast %cst_6 : f32 to vector<81x768xf32>
    %9 = arith.maximumf %7, %8 : vector<81x768xf32>
    %c0_7 = arith.constant 0 : index
    %c0_8 = arith.constant 0 : index
    %c0_9 = arith.constant 0 : index
    %10 = vector.load %arg4[%c0_7, %c0_8, %c0_9] : memref<1x81x768xf32, #tpu.memory_space<vmem>>, vector<1x81x768xf32>
    %11 = vector.shape_cast %10 : vector<1x81x768xf32> to vector<81x768xf32>
    %12 = vector.shape_cast %9 : vector<81x768xf32> to vector<1x81x768xf32>
    tpu.vector_store %arg4[%c0_7, %c0_8, %c0_9], %12 {strides = array<i32>} : memref<1x81x768xf32, #tpu.memory_space<vmem>>, vector<1x81x768xf32>,
    %13 = vector.extract_strided_slice %1 {offsets = [0, 0], sizes = [27, 896], strides = [1, 1]} : vector<81x896xf32> to vector<27x896xf32>
    %14 = vector.extract_strided_slice %13 {offsets = [0, 0], sizes = [9, 896], strides = [1, 1]} : vector<27x896xf32> to vector<9x896xf32>
    %15 = vector.extract_strided_slice %13 {offsets = [9, 0], sizes = [9, 896], strides = [1, 1]} : vector<27x896xf32> to vector<9x896xf32>
    %16 = arith.maximumf %14, %15 : vector<9x896xf32>
    %17 = vector.extract_strided_slice %13 {offsets = [18, 0], sizes = [9, 896], strides = [1, 1]} : vector<27x896xf32> to vector<9x896xf32>
    %18 = arith.maximumf %16, %17 : vector<9x896xf32>
    %19 = vector.extract_strided_slice %18 {offsets = [0, 0], sizes = [3, 896], strides = [1, 1]} : vector<9x896xf32> to vector<3x896xf32>
    %cst_10 = arith.constant dense<0xFF800000> : vector<896xf32>
    %20 = vector.multi_reduction <maximumf>, %19, %cst_10 [0] : vector<3x896xf32> to vector<896xf32>
    %21 = vector.shape_cast %20 : vector<896xf32> to vector<1x896xf32>
    %22 = vector.extract_strided_slice %18 {offsets = [2, 0], sizes = [3, 896], strides = [1, 1]} : vector<9x896xf32> to vector<3x896xf32>
    %cst_11 = arith.constant dense<0xFF800000> : vector<896xf32>
    %23 = vector.multi_reduction <maximumf>, %22, %cst_11 [0] : vector<3x896xf32> to vector<896xf32>
    %24 = vector.shape_cast %23 : vector<896xf32> to vector<1x896xf32>
    %25 = vector.extract_strided_slice %18 {offsets = [4, 0], sizes = [3, 896], strides = [1, 1]} : vector<9x896xf32> to vector<3x896xf32>
    %cst_12 = arith.constant dense<0xFF800000> : vector<896xf32>
    %26 = vector.multi_reduction <maximumf>, %25, %cst_12 [0] : vector<3x896xf32> to vector<896xf32>
    %27 = vector.shape_cast %26 : vector<896xf32> to vector<1x896xf32>
    %28 = vector.extract_strided_slice %18 {offsets = [6, 0], sizes = [3, 896], strides = [1, 1]} : vector<9x896xf32> to vector<3x896xf32>
    %cst_13 = arith.constant dense<0xFF800000> : vector<896xf32>
    %29 = vector.multi_reduction <maximumf>, %28, %cst_13 [0] : vector<3x896xf32> to vector<896xf32>
    %30 = vector.shape_cast %29 : vector<896xf32> to vector<1x896xf32>
    %31 = vector.extract_strided_slice %1 {offsets = [18, 0], sizes = [27, 896], strides = [1, 1]} : vector<81x896xf32> to vector<27x896xf32>
    %32 = vector.extract_strided_slice %31 {offsets = [0, 0], sizes = [9, 896], strides = [1, 1]} : vector<27x896xf32> to vector<9x896xf32>
    %33 = vector.extract_strided_slice %31 {offsets = [9, 0], sizes = [9, 896], strides = [1, 1]} : vector<27x896xf32> to vector<9x896xf32>
    %34 = arith.maximumf %32, %33 : vector<9x896xf32>
    %35 = vector.extract_strided_slice %31 {offsets = [18, 0], sizes = [9, 896], strides = [1, 1]} : vector<27x896xf32> to vector<9x896xf32>
    %36 = arith.maximumf %34, %35 : vector<9x896xf32>
    %37 = vector.extract_strided_slice %36 {offsets = [0, 0], sizes = [3, 896], strides = [1, 1]} : vector<9x896xf32> to vector<3x896xf32>
    %cst_14 = arith.constant dense<0xFF800000> : vector<896xf32>
    %38 = vector.multi_reduction <maximumf>, %37, %cst_14 [0] : vector<3x896xf32> to vector<896xf32>
    %39 = vector.shape_cast %38 : vector<896xf32> to vector<1x896xf32>
    %40 = vector.extract_strided_slice %36 {offsets = [2, 0], sizes = [3, 896], strides = [1, 1]} : vector<9x896xf32> to vector<3x896xf32>
    %cst_15 = arith.constant dense<0xFF800000> : vector<896xf32>
    %41 = vector.multi_reduction <maximumf>, %40, %cst_15 [0] : vector<3x896xf32> to vector<896xf32>
    %42 = vector.shape_cast %41 : vector<896xf32> to vector<1x896xf32>
    %43 = vector.extract_strided_slice %36 {offsets = [4, 0], sizes = [3, 896], strides = [1, 1]} : vector<9x896xf32> to vector<3x896xf32>
    %cst_16 = arith.constant dense<0xFF800000> : vector<896xf32>
    %44 = vector.multi_reduction <maximumf>, %43, %cst_16 [0] : vector<3x896xf32> to vector<896xf32>
    %45 = vector.shape_cast %44 : vector<896xf32> to vector<1x896xf32>
    %46 = vector.extract_strided_slice %36 {offsets = [6, 0], sizes = [3, 896], strides = [1, 1]} : vector<9x896xf32> to vector<3x896xf32>
    %cst_17 = arith.constant dense<0xFF800000> : vector<896xf32>
    %47 = vector.multi_reduction <maximumf>, %46, %cst_17 [0] : vector<3x896xf32> to vector<896xf32>
    %48 = vector.shape_cast %47 : vector<896xf32> to vector<1x896xf32>
    %49 = vector.extract_strided_slice %1 {offsets = [36, 0], sizes = [27, 896], strides = [1, 1]} : vector<81x896xf32> to vector<27x896xf32>
    %50 = vector.extract_strided_slice %49 {offsets = [0, 0], sizes = [9, 896], strides = [1, 1]} : vector<27x896xf32> to vector<9x896xf32>
    %51 = vector.extract_strided_slice %49 {offsets = [9, 0], sizes = [9, 896], strides = [1, 1]} : vector<27x896xf32> to vector<9x896xf32>
    %52 = arith.maximumf %50, %51 : vector<9x896xf32>
    %53 = vector.extract_strided_slice %49 {offsets = [18, 0], sizes = [9, 896], strides = [1, 1]} : vector<27x896xf32> to vector<9x896xf32>
    %54 = arith.maximumf %52, %53 : vector<9x896xf32>
    %55 = vector.extract_strided_slice %54 {offsets = [0, 0], sizes = [3, 896], strides = [1, 1]} : vector<9x896xf32> to vector<3x896xf32>
    %cst_18 = arith.constant dense<0xFF800000> : vector<896xf32>
    %56 = vector.multi_reduction <maximumf>, %55, %cst_18 [0] : vector<3x896xf32> to vector<896xf32>
    %57 = vector.shape_cast %56 : vector<896xf32> to vector<1x896xf32>
    %58 = vector.extract_strided_slice %54 {offsets = [2, 0], sizes = [3, 896], strides = [1, 1]} : vector<9x896xf32> to vector<3x896xf32>
    %cst_19 = arith.constant dense<0xFF800000> : vector<896xf32>
    %59 = vector.multi_reduction <maximumf>, %58, %cst_19 [0] : vector<3x896xf32> to vector<896xf32>
    %60 = vector.shape_cast %59 : vector<896xf32> to vector<1x896xf32>
    %61 = vector.extract_strided_slice %54 {offsets = [4, 0], sizes = [3, 896], strides = [1, 1]} : vector<9x896xf32> to vector<3x896xf32>
    %cst_20 = arith.constant dense<0xFF800000> : vector<896xf32>
    %62 = vector.multi_reduction <maximumf>, %61, %cst_20 [0] : vector<3x896xf32> to vector<896xf32>
    %63 = vector.shape_cast %62 : vector<896xf32> to vector<1x896xf32>
    %64 = vector.extract_strided_slice %54 {offsets = [6, 0], sizes = [3, 896], strides = [1, 1]} : vector<9x896xf32> to vector<3x896xf32>
    %cst_21 = arith.constant dense<0xFF800000> : vector<896xf32>
    %65 = vector.multi_reduction <maximumf>, %64, %cst_21 [0] : vector<3x896xf32> to vector<896xf32>
    %66 = vector.shape_cast %65 : vector<896xf32> to vector<1x896xf32>
    %67 = vector.extract_strided_slice %1 {offsets = [54, 0], sizes = [27, 896], strides = [1, 1]} : vector<81x896xf32> to vector<27x896xf32>
    %68 = vector.extract_strided_slice %67 {offsets = [0, 0], sizes = [9, 896], strides = [1, 1]} : vector<27x896xf32> to vector<9x896xf32>
    %69 = vector.extract_strided_slice %67 {offsets = [9, 0], sizes = [9, 896], strides = [1, 1]} : vector<27x896xf32> to vector<9x896xf32>
    %70 = arith.maximumf %68, %69 : vector<9x896xf32>
    %71 = vector.extract_strided_slice %67 {offsets = [18, 0], sizes = [9, 896], strides = [1, 1]} : vector<27x896xf32> to vector<9x896xf32>
    %72 = arith.maximumf %70, %71 : vector<9x896xf32>
    %73 = vector.extract_strided_slice %72 {offsets = [0, 0], sizes = [3, 896], strides = [1, 1]} : vector<9x896xf32> to vector<3x896xf32>
    %cst_22 = arith.constant dense<0xFF800000> : vector<896xf32>
    %74 = vector.multi_reduction <maximumf>, %73, %cst_22 [0] : vector<3x896xf32> to vector<896xf32>
    %75 = vector.shape_cast %74 : vector<896xf32> to vector<1x896xf32>
    %76 = vector.extract_strided_slice %72 {offsets = [2, 0], sizes = [3, 896], strides = [1, 1]} : vector<9x896xf32> to vector<3x896xf32>
    %cst_23 = arith.constant dense<0xFF800000> : vector<896xf32>
    %77 = vector.multi_reduction <maximumf>, %76, %cst_23 [0] : vector<3x896xf32> to vector<896xf32>
    %78 = vector.shape_cast %77 : vector<896xf32> to vector<1x896xf32>
    %79 = vector.extract_strided_slice %72 {offsets = [4, 0], sizes = [3, 896], strides = [1, 1]} : vector<9x896xf32> to vector<3x896xf32>
    %cst_24 = arith.constant dense<0xFF800000> : vector<896xf32>
    %80 = vector.multi_reduction <maximumf>, %79, %cst_24 [0] : vector<3x896xf32> to vector<896xf32>
    %81 = vector.shape_cast %80 : vector<896xf32> to vector<1x896xf32>
    %82 = vector.extract_strided_slice %72 {offsets = [6, 0], sizes = [3, 896], strides = [1, 1]} : vector<9x896xf32> to vector<3x896xf32>
    %cst_25 = arith.constant dense<0xFF800000> : vector<896xf32>
    %83 = vector.multi_reduction <maximumf>, %82, %cst_25 [0] : vector<3x896xf32> to vector<896xf32>
    %84 = vector.shape_cast %83 : vector<896xf32> to vector<1x896xf32>
    %85 = tpu.concatenate %21, %24, %27, %30, %39, %42, %45, %48, %57, %60, %63, %66, %75, %78, %81, %84 in 0 : vector<1x896xf32>, vector<1x896xf32>, vector<1x896xf32>, vector<1x896xf32>, vector<1x896xf32>, vector<1x896xf32>, vector<1x896xf32>, vector<1x896xf32>, vector<1x896xf32>, vector<1x896xf32>, vector<1x896xf32>, vector<1x896xf32>, vector<1x896xf32>, vector<1x896xf32>, vector<1x896xf32>, vector<1x896xf32> -> vector<16x896xf32>
    %c0_26 = arith.constant 0 : index
    %c0_27 = arith.constant 0 : index
    %c0_28 = arith.constant 0 : index
    %86 = vector.load %arg5[%c0_26, %c0_27, %c0_28] : memref<1x16x896xf32, #tpu.memory_space<vmem>>, vector<1x16x896xf32>
    %87 = vector.shape_cast %86 : vector<1x16x896xf32> to vector<16x896xf32>
    %88 = vector.shape_cast %85 : vector<16x896xf32> to vector<1x16x896xf32>
    tpu.vector_store %arg5[%c0_26, %c0_27, %c0_28], %88 {strides = array<i32>} : memref<1x16x896xf32, #tpu.memory_space<vmem>>, vector<1x16x896xf32>,
    return
  }
  func.func @transform_0(%arg0: i32) -> (i32, i32, i32) {
    %c0_i32 = arith.constant 0 : i32
    %c0_i32_0 = arith.constant 0 : i32
    %c0_i32_1 = arith.constant 0 : i32
    return %arg0, %c0_i32, %c0_i32_0 : i32, i32, i32
  }
  func.func @transform_1(%arg0: i32) -> (i32, i32) {
    %c0_i32 = arith.constant 0 : i32
    %c0_i32_0 = arith.constant 0 : i32
    %c0_i32_1 = arith.constant 0 : i32
    return %c0_i32, %c0_i32_0 : i32, i32
  }
  func.func @transform_2(%arg0: i32) -> (i32, i32) {
    %c0_i32 = arith.constant 0 : i32
    %c0_i32_0 = arith.constant 0 : i32
    %c0_i32_1 = arith.constant 0 : i32
    return %c0_i32, %c0_i32_0 : i32, i32
  }
  func.func @transform_3(%arg0: i32) -> (i32, i32, i32) {
    %c0_i32 = arith.constant 0 : i32
    %c0_i32_0 = arith.constant 0 : i32
    %c0_i32_1 = arith.constant 0 : i32
    return %arg0, %c0_i32, %c0_i32_0 : i32, i32, i32
  }
  func.func @transform_4(%arg0: i32) -> (i32, i32, i32) {
    %c0_i32 = arith.constant 0 : i32
    %c0_i32_0 = arith.constant 0 : i32
    %c0_i32_1 = arith.constant 0 : i32
    return %arg0, %c0_i32, %c0_i32_0 : i32, i32, i32
  }
}

module attributes {stable_mosaic.version = 11 : i64} {
  func.func @_matmul_bias_relu_kernel(%arg0: i32, %arg1: memref<1x81x2304xbf16, #tpu.memory_space<vmem>>, %arg2: memref<2304x256xbf16, #tpu.memory_space<vmem>>, %arg3: memref<1x256xf32, #tpu.memory_space<vmem>>, %arg4: memref<1x81x256xf32, #tpu.memory_space<vmem>>) attributes {dimension_semantics = [#tpu.dimension_semantics<parallel>], iteration_bounds = array<i64: 2>, scalar_prefetch = 0 : i64, scratch_operands = 0 : i64, tpu.core_type = #tpu.core_type<tc>, window_params = [{transform_indices = @transform_0, window_bounds = array<i64: 1, 81, 2304>}, {pipeline_mode = #tpu.pipeline_mode<synchronous>, transform_indices = @transform_1, window_bounds = array<i64: 2304, 256>}, {pipeline_mode = #tpu.pipeline_mode<synchronous>, transform_indices = @transform_2, window_bounds = array<i64: 1, 256>}, {transform_indices = @transform_3, window_bounds = array<i64: 1, 81, 256>}]} {
    %c0 = arith.constant 0 : index
    %c0_0 = arith.constant 0 : index
    %c0_1 = arith.constant 0 : index
    %0 = vector.load %arg1[%c0, %c0_0, %c0_1] : memref<1x81x2304xbf16, #tpu.memory_space<vmem>>, vector<1x81x2304xbf16>
    %1 = vector.shape_cast %0 : vector<1x81x2304xbf16> to vector<81x2304xbf16>
    %c0_2 = arith.constant 0 : index
    %c0_3 = arith.constant 0 : index
    %2 = vector.load %arg2[%c0_2, %c0_3] : memref<2304x256xbf16, #tpu.memory_space<vmem>>, vector<2304x256xbf16>
    %cst = arith.constant dense<0.000000e+00> : vector<81x256xf32>
    %3 = tpu.matmul %1, %2, %cst {dimension_numbers = #tpu.dot_dimension_numbers<[1], [0], [0], [1], [0, 0, 1, 1], [], []>} : vector<81x2304xbf16>, vector<2304x256xbf16>, vector<81x256xf32> -> vector<81x256xf32>
    %c0_4 = arith.constant 0 : index
    %c0_5 = arith.constant 0 : index
    %4 = vector.load %arg3[%c0_4, %c0_5] : memref<1x256xf32, #tpu.memory_space<vmem>>, vector<1x256xf32>
    %5 = vector.broadcast %4 : vector<1x256xf32> to vector<81x256xf32>
    %6 = arith.addf %3, %5 : vector<81x256xf32>
    %cst_6 = arith.constant 0.000000e+00 : f32
    %7 = vector.broadcast %cst_6 : f32 to vector<81x256xf32>
    %8 = arith.maximumf %6, %7 : vector<81x256xf32>
    %c0_7 = arith.constant 0 : index
    %c0_8 = arith.constant 0 : index
    %c0_9 = arith.constant 0 : index
    %9 = vector.load %arg4[%c0_7, %c0_8, %c0_9] : memref<1x81x256xf32, #tpu.memory_space<vmem>>, vector<1x81x256xf32>
    %10 = vector.shape_cast %9 : vector<1x81x256xf32> to vector<81x256xf32>
    %11 = vector.shape_cast %8 : vector<81x256xf32> to vector<1x81x256xf32>
    tpu.vector_store %arg4[%c0_7, %c0_8, %c0_9], %11 {strides = array<i32>} : memref<1x81x256xf32, #tpu.memory_space<vmem>>, vector<1x81x256xf32>,
    return
  }
  func.func @transform_0(%arg0: i32) -> (i32, i32, i32) {
    %c0_i32 = arith.constant 0 : i32
    %c0_i32_0 = arith.constant 0 : i32
    %c0_i32_1 = arith.constant 0 : i32
    return %arg0, %c0_i32, %c0_i32_0 : i32, i32, i32
  }
  func.func @transform_1(%arg0: i32) -> (i32, i32) {
    %c0_i32 = arith.constant 0 : i32
    %c0_i32_0 = arith.constant 0 : i32
    %c0_i32_1 = arith.constant 0 : i32
    return %c0_i32, %c0_i32_0 : i32, i32
  }
  func.func @transform_2(%arg0: i32) -> (i32, i32) {
    %c0_i32 = arith.constant 0 : i32
    %c0_i32_0 = arith.constant 0 : i32
    %c0_i32_1 = arith.constant 0 : i32
    return %c0_i32, %c0_i32_0 : i32, i32
  }
  func.func @transform_3(%arg0: i32) -> (i32, i32, i32) {
    %c0_i32 = arith.constant 0 : i32
    %c0_i32_0 = arith.constant 0 : i32
    %c0_i32_1 = arith.constant 0 : i32
    return %arg0, %c0_i32, %c0_i32_0 : i32, i32, i32
  }
}

module attributes {stable_mosaic.version = 11 : i64} {
  func.func @_heads_kernel(%arg0: i32, %arg1: memref<1x16x2304xbf16, #tpu.memory_space<vmem>>, %arg2: memref<1x16x2304xbf16, #tpu.memory_space<vmem>>, %arg3: memref<1x16x2304xbf16, #tpu.memory_space<vmem>>, %arg4: memref<2304x384xbf16, #tpu.memory_space<vmem>>, %arg5: memref<2304x256xbf16, #tpu.memory_space<vmem>>, %arg6: memref<2304x256xbf16, #tpu.memory_space<vmem>>, %arg7: memref<1x896xf32, #tpu.memory_space<vmem>>, %arg8: memref<1x16x896xf32, #tpu.memory_space<vmem>>) attributes {dimension_semantics = [#tpu.dimension_semantics<parallel>], iteration_bounds = array<i64: 2>, scalar_prefetch = 0 : i64, scratch_operands = 0 : i64, tpu.core_type = #tpu.core_type<tc>, window_params = [{transform_indices = @transform_0, window_bounds = array<i64: 1, 16, 2304>}, {transform_indices = @transform_1, window_bounds = array<i64: 1, 16, 2304>}, {transform_indices = @transform_2, window_bounds = array<i64: 1, 16, 2304>}, {pipeline_mode = #tpu.pipeline_mode<synchronous>, transform_indices = @transform_3, window_bounds = array<i64: 2304, 384>}, {pipeline_mode = #tpu.pipeline_mode<synchronous>, transform_indices = @transform_4, window_bounds = array<i64: 2304, 256>}, {pipeline_mode = #tpu.pipeline_mode<synchronous>, transform_indices = @transform_5, window_bounds = array<i64: 2304, 256>}, {pipeline_mode = #tpu.pipeline_mode<synchronous>, transform_indices = @transform_6, window_bounds = array<i64: 1, 896>}, {transform_indices = @transform_7, window_bounds = array<i64: 1, 16, 896>}]} {
    %c0 = arith.constant 0 : index
    %c0_0 = arith.constant 0 : index
    %c0_1 = arith.constant 0 : index
    %0 = vector.load %arg1[%c0, %c0_0, %c0_1] : memref<1x16x2304xbf16, #tpu.memory_space<vmem>>, vector<1x16x2304xbf16>
    %1 = vector.shape_cast %0 : vector<1x16x2304xbf16> to vector<16x2304xbf16>
    %c0_2 = arith.constant 0 : index
    %c0_3 = arith.constant 0 : index
    %2 = vector.load %arg4[%c0_2, %c0_3] : memref<2304x384xbf16, #tpu.memory_space<vmem>>, vector<2304x384xbf16>
    %cst = arith.constant dense<0.000000e+00> : vector<16x384xf32>
    %3 = tpu.matmul %1, %2, %cst {dimension_numbers = #tpu.dot_dimension_numbers<[1], [0], [0], [1], [0, 0, 1, 1], [], []>} : vector<16x2304xbf16>, vector<2304x384xbf16>, vector<16x384xf32> -> vector<16x384xf32>
    %c0_4 = arith.constant 0 : index
    %c0_5 = arith.constant 0 : index
    %c0_6 = arith.constant 0 : index
    %4 = vector.load %arg2[%c0_4, %c0_5, %c0_6] : memref<1x16x2304xbf16, #tpu.memory_space<vmem>>, vector<1x16x2304xbf16>
    %5 = vector.shape_cast %4 : vector<1x16x2304xbf16> to vector<16x2304xbf16>
    %c0_7 = arith.constant 0 : index
    %c0_8 = arith.constant 0 : index
    %6 = vector.load %arg5[%c0_7, %c0_8] : memref<2304x256xbf16, #tpu.memory_space<vmem>>, vector<2304x256xbf16>
    %cst_9 = arith.constant dense<0.000000e+00> : vector<16x256xf32>
    %7 = tpu.matmul %5, %6, %cst_9 {dimension_numbers = #tpu.dot_dimension_numbers<[1], [0], [0], [1], [0, 0, 1, 1], [], []>} : vector<16x2304xbf16>, vector<2304x256xbf16>, vector<16x256xf32> -> vector<16x256xf32>
    %c0_10 = arith.constant 0 : index
    %c0_11 = arith.constant 0 : index
    %c0_12 = arith.constant 0 : index
    %8 = vector.load %arg3[%c0_10, %c0_11, %c0_12] : memref<1x16x2304xbf16, #tpu.memory_space<vmem>>, vector<1x16x2304xbf16>
    %9 = vector.shape_cast %8 : vector<1x16x2304xbf16> to vector<16x2304xbf16>
    %c0_13 = arith.constant 0 : index
    %c0_14 = arith.constant 0 : index
    %10 = vector.load %arg6[%c0_13, %c0_14] : memref<2304x256xbf16, #tpu.memory_space<vmem>>, vector<2304x256xbf16>
    %cst_15 = arith.constant dense<0.000000e+00> : vector<16x256xf32>
    %11 = tpu.matmul %9, %10, %cst_15 {dimension_numbers = #tpu.dot_dimension_numbers<[1], [0], [0], [1], [0, 0, 1, 1], [], []>} : vector<16x2304xbf16>, vector<2304x256xbf16>, vector<16x256xf32> -> vector<16x256xf32>
    %12 = tpu.concatenate %3, %7, %11 in 1 : vector<16x384xf32>, vector<16x256xf32>, vector<16x256xf32> -> vector<16x896xf32>
    %c0_16 = arith.constant 0 : index
    %c0_17 = arith.constant 0 : index
    %13 = vector.load %arg7[%c0_16, %c0_17] : memref<1x896xf32, #tpu.memory_space<vmem>>, vector<1x896xf32>
    %14 = vector.broadcast %13 : vector<1x896xf32> to vector<16x896xf32>
    %15 = arith.addf %12, %14 : vector<16x896xf32>
    %cst_18 = arith.constant 0.000000e+00 : f32
    %16 = vector.broadcast %cst_18 : f32 to vector<16x896xf32>
    %17 = arith.maximumf %15, %16 : vector<16x896xf32>
    %c0_19 = arith.constant 0 : index
    %c0_20 = arith.constant 0 : index
    %c0_21 = arith.constant 0 : index
    %18 = vector.load %arg8[%c0_19, %c0_20, %c0_21] : memref<1x16x896xf32, #tpu.memory_space<vmem>>, vector<1x16x896xf32>
    %19 = vector.shape_cast %18 : vector<1x16x896xf32> to vector<16x896xf32>
    %20 = vector.shape_cast %17 : vector<16x896xf32> to vector<1x16x896xf32>
    tpu.vector_store %arg8[%c0_19, %c0_20, %c0_21], %20 {strides = array<i32>} : memref<1x16x896xf32, #tpu.memory_space<vmem>>, vector<1x16x896xf32>,
    return
  }
  func.func @transform_0(%arg0: i32) -> (i32, i32, i32) {
    %c0_i32 = arith.constant 0 : i32
    %c0_i32_0 = arith.constant 0 : i32
    %c0_i32_1 = arith.constant 0 : i32
    return %arg0, %c0_i32, %c0_i32_0 : i32, i32, i32
  }
  func.func @transform_1(%arg0: i32) -> (i32, i32, i32) {
    %c0_i32 = arith.constant 0 : i32
    %c0_i32_0 = arith.constant 0 : i32
    %c0_i32_1 = arith.constant 0 : i32
    return %arg0, %c0_i32, %c0_i32_0 : i32, i32, i32
  }
  func.func @transform_2(%arg0: i32) -> (i32, i32, i32) {
    %c0_i32 = arith.constant 0 : i32
    %c0_i32_0 = arith.constant 0 : i32
    %c0_i32_1 = arith.constant 0 : i32
    return %arg0, %c0_i32, %c0_i32_0 : i32, i32, i32
  }
  func.func @transform_3(%arg0: i32) -> (i32, i32) {
    %c0_i32 = arith.constant 0 : i32
    %c0_i32_0 = arith.constant 0 : i32
    %c0_i32_1 = arith.constant 0 : i32
    return %c0_i32, %c0_i32_0 : i32, i32
  }
  func.func @transform_4(%arg0: i32) -> (i32, i32) {
    %c0_i32 = arith.constant 0 : i32
    %c0_i32_0 = arith.constant 0 : i32
    %c0_i32_1 = arith.constant 0 : i32
    return %c0_i32, %c0_i32_0 : i32, i32
  }
  func.func @transform_5(%arg0: i32) -> (i32, i32) {
    %c0_i32 = arith.constant 0 : i32
    %c0_i32_0 = arith.constant 0 : i32
    %c0_i32_1 = arith.constant 0 : i32
    return %c0_i32, %c0_i32_0 : i32, i32
  }
  func.func @transform_6(%arg0: i32) -> (i32, i32) {
    %c0_i32 = arith.constant 0 : i32
    %c0_i32_0 = arith.constant 0 : i32
    %c0_i32_1 = arith.constant 0 : i32
    return %c0_i32, %c0_i32_0 : i32, i32
  }
  func.func @transform_7(%arg0: i32) -> (i32, i32, i32) {
    %c0_i32 = arith.constant 0 : i32
    %c0_i32_0 = arith.constant 0 : i32
    %c0_i32_1 = arith.constant 0 : i32
    return %arg0, %c0_i32, %c0_i32_0 : i32, i32, i32
  }
}

</mosaic_0001>

<bundles_post_ra>
// kernel: mixed_7a_pallas.3
= control target key start
LH: loop header
LB: loop body
LE: loop exit
PB: predicated region body
PF: predicated region fallthrough
CT: control target
= control target key end

     0   :  { %s6016_s15 = smov 0   ;;  %s8733_s0 = inlined_call_operand.vmem [shape: f32[2,81,896], index: 0, kind: input, shape index: {}]   ;;  %s8734_s1 = inlined_call_operand.vmem [shape: bf16[896,768], index: 1, kind: input, shape index: {}]   ;;  %s8735_s2 = inlined_call_operand.vmem [shape: f32[1,768], index: 2, kind: input, shape index: {}]   ;;  %s8736_s3 = inlined_call_operand.vmem [shape: f32[2,81,768], index: 3, kind: output, shape index: {0}]   ;;  %s8737_s4 = inlined_call_operand.vmem [shape: f32[2,16,896], index: 4, kind: output, shape index: {1}]  }
   0x1 LB: > { %s5115_s16 = sadd.s32 4294967295, %s5988_s15   ;;  %p5119_p0 = scmp.ge.s32.totalorder %s5988_s15, 1  ;;  %s5988_s15 = sphi %s6016_s15, %s15_s15  }
   0x2   : > { %p165_p1 = scmp.lt.s32.totalorder %s5988_s15, 3 }
   0x4   : > { %p166_p2 = pnand %p5119_p0, %p165_p1 }
   0x6   : > { %169 = sbr.rel (%p166_p2) target bundleno = 765 (0x2fd), region = 32 }
   0xb   : > { %v5473_v0 = vld [vmem:[%s8734_s1 + $0x154] ss:$24 sps:$4 sm:$0xff]   ;;  %v5477_v2 = vld [vmem:[%s8734_s1 + $0x150] ss:$24 sps:$4 sm:$0xff]   ;;  %v5479_v4 = vld [vmem:[%s8734_s1 + $0x124] ss:$24 sps:$4 sm:$0xff]  }
   0xc   : > { %v5475_v1 = vld [vmem:[%s8734_s1 + $0x454] ss:$24 sps:$4 sm:$0xff]   ;;  %2379 = vmatprep.subr.bf16.mxu0 %v5473_v0  ;;  %v5478_v3 = vld [vmem:[%s8734_s1 + $0x450] ss:$24 sps:$4 sm:$0xff]   ;;  %v5481_v5 = vld [vmem:[%s8734_s1 + $0x424] ss:$24 sps:$4 sm:$0xff]  }
   0xd   : > { %2470 = vmatprep.subr.bf16.mxu1 %v5475_v1  ;;  %2380 = vmatpush1.bf16.msra.mxu0 %v5477_v2  ;;  %v5483_v6 = vld [vmem:[%s8734_s1 + $0x120] ss:$24 sps:$4 sm:$0xff]   ;;  %v5485_v8 = vld [vmem:[%s8734_s1 + $0xf4] ss:$24 sps:$4 sm:$0xff]   ;;  %v5489_v10 = vld [vmem:[%s8734_s1 + $0xf0] ss:$24 sps:$4 sm:$0xff]  }
   0xe   : > { %2471 = vmatpush1.bf16.msra.mxu1 %v5478_v3  ;;  %2381 = vmatprep.subr.bf16.mxu0 %v5479_v4  ;;  %v5484_v7 = vld [vmem:[%s8734_s1 + $0x420] ss:$24 sps:$4 sm:$0xff]   ;;  %v5487_v9 = vld [vmem:[%s8734_s1 + $0x3f4] ss:$24 sps:$4 sm:$0xff]   ;;  %v5490_v11 = vld [vmem:[%s8734_s1 + $0x3f0] ss:$24 sps:$4 sm:$0xff]  }
   0xf   : > { %2472 = vmatprep.subr.bf16.mxu1 %v5481_v5  ;;  %v5491_v12 = vld [vmem:[%s8734_s1 + $0xc4] ss:$24 sps:$4 sm:$0xff]   ;;  %v5495_v14 = vld [vmem:[%s8734_s1 + $0xc0] ss:$24 sps:$4 sm:$0xff]   ;;  %v5497_v16 = vld [vmem:[%s8734_s1 + $0x94] ss:$24 sps:$4 sm:$0xff]  }
  0x10   : > { %v5493_v13 = vld [vmem:[%s8734_s1 + $0x3c4] ss:$24 sps:$4 sm:$0xff]   ;;  %v5496_v15 = vld [vmem:[%s8734_s1 + $0x3c0] ss:$24 sps:$4 sm:$0xff]   ;;  %v5499_v17 = vld [vmem:[%s8734_s1 + $0x394] ss:$24 sps:$4 sm:$0xff]  }
  0x11   : > { %2382 = vmatpush1.bf16.msra.mxu0 %v5483_v6  ;;  %v5501_v18 = vld [vmem:[%s8734_s1 + $0x90] ss:$24 sps:$4 sm:$0xff]   ;;  %v5503_v20 = vld [vmem:[%s8734_s1 + $0x64] ss:$24 sps:$4 sm:$0xff]   ;;  %v5507_v22 = vld [vmem:[%s8734_s1 + $0x60] ss:$24 sps:$4 sm:$0xff]  }
  0x12   : > { %2473 = vmatpush1.bf16.msra.mxu1 %v5484_v7  ;;  %2383 = vmatprep.subr.bf16.mxu0 %v5485_v8  ;;  %v5502_v19 = vld [vmem:[%s8734_s1 + $0x390] ss:$24 sps:$4 sm:$0xff]   ;;  %v5505_v21 = vld [vmem:[%s8734_s1 + $0x364] ss:$24 sps:$4 sm:$0xff]   ;;  %v5508_v23 = vld [vmem:[%s8734_s1 + $0x360] ss:$24 sps:$4 sm:$0xff]  }
  0x13   : > { %2474 = vmatprep.subr.bf16.mxu1 %v5487_v9  ;;  %v5509_v24 = vld [vmem:[%s8734_s1 + $0x34] ss:$24 sps:$4 sm:$0xff]   ;;  %v5513_v26 = vld [vmem:[%s8734_s1 + $0x30] ss:$24 sps:$4 sm:$0xff]   ;;  %v5515_v28 = vld [vmem:[%s8734_s1 + $0x4] ss:$24 sps:$4 sm:$0xff]  }
  0x14   : > { %v5511_v25 = vld [vmem:[%s8734_s1 + $0x334] ss:$24 sps:$4 sm:$0xff]   ;;  %v5514_v27 = vld [vmem:[%s8734_s1 + $0x330] ss:$24 sps:$4 sm:$0xff]   ;;  %v5517_v29 = vld [vmem:[%s8734_s1 + $0x304] ss:$24 sps:$4 sm:$0xff]  }
  0x15   : > { %2384 = vmatpush1.bf16.msra.mxu0 %v5489_v10  ;;  %v5519_v30 = vld [vmem:[%s8734_s1] ss:$24 sps:$4 sm:$0xff]   ;;  %p196_p3 = scmp.lt.s32.totalorder %s5115_s16, 1  ;;  %v5521_v32 = vld [vmem:[%s8734_s1 + $0x2d4] ss:$24 sps:$4 sm:$0xff]   ;;  %vm3617_vm0 = vcmask 1046528  }
  0x16   : > { %2475 = vmatpush1.bf16.msra.mxu1 %v5490_v11  ;;  %2385 = vmatprep.subr.bf16.mxu0 %v5491_v12  ;;  %v5520_v31 = vld [vmem:[%s8734_s1 + $0x300] ss:$24 sps:$4 sm:$0xff]   ;;  %v5523_v33 = vld [vmem:[%s8734_s1 + $0x5d4] ss:$24 sps:$4 sm:$0xff]   ;;  %v5525_v34 = vld [vmem:[%s8734_s1 + $0x2d0] ss:$24 sps:$4 sm:$0xff]  }
  0x17   : > { %2476 = vmatprep.subr.bf16.mxu1 %v5493_v13  ;;  %v5526_v35 = vld [vmem:[%s8734_s1 + $0x5d0] ss:$24 sps:$4 sm:$0xff]   ;;  %s8904_s16 = smov (!%p196_p3, %s5115_s16), 1  ;;  %v5527_v36 = vld [vmem:[%s8734_s1 + $0x2a4] ss:$24 sps:$4 sm:$0xff]   ;;  %vm3674_vm1 = vcmask 1045504  }
  0x18   : > { %v5529_v37 = vld [vmem:[%s8734_s1 + $0x5a4] ss:$24 sps:$4 sm:$0xff]   ;;  %v5531_v38 = vld [vmem:[%s8734_s1 + $0x2a0] ss:$24 sps:$4 sm:$0xff]   ;;  %s5461_s23 = smul.u32 616, %s8904_s16  ;;  %vm3724_vm2 = vcmask 1042432  }
  0x19   : > { %2386 = vmatpush1.bf16.msra.mxu0 %v5495_v14  ;;  %v5532_v39 = vld [vmem:[%s8734_s1 + $0x5a0] ss:$24 sps:$4 sm:$0xff]   ;;  %v5533_v40 = vld [vmem:[%s8734_s1 + $0x274] ss:$24 sps:$4 sm:$0xff]   ;;  %v5537_v42 = vld [vmem:[%s8734_s1 + $0x270] ss:$24 sps:$4 sm:$0xff]  }
  0x1a   : > { %2477 = vmatpush1.bf16.msra.mxu1 %v5496_v15  ;;  %2387 = vmatprep.subr.bf16.mxu0 %v5497_v16  ;;  %v5535_v41 = vld [vmem:[%s8734_s1 + $0x574] ss:$24 sps:$4 sm:$0xff]   ;;  %v5538_v43 = vld [vmem:[%s8734_s1 + $0x570] ss:$24 sps:$4 sm:$0xff]   ;;  %s6166_s10 = scalar_lea.vmem %s8733_s0, %s5461_s23  ;;  %v5539_v44 = vld [vmem:[%s8734_s1 + $0x244] ss:$24 sps:$4 sm:$0xff]  }
  0x1b   : > { %2478 = vmatprep.subr.bf16.mxu1 %v5499_v17  ;;  %v5541_v45 = vld [vmem:[%s8734_s1 + $0x544] ss:$24 sps:$4 sm:$0xff]   ;;  %v5543_v46 = vld [vmem:[%s8734_s1 + $0x240] ss:$24 sps:$4 sm:$0xff]   ;;  %v213_v48 = vld [vmem:[%s6166_s10 + $0x8] sm:$0xff]  ;;  %vm3774_vm3 = vcmask 1044482  }
  0x1c   : > { %v5544_v47 = vld [vmem:[%s8734_s1 + $0x540] ss:$24 sps:$4 sm:$0xff]   ;;  %v5545_v49 = vld [vmem:[%s8734_s1 + $0x214] ss:$24 sps:$4 sm:$0xff]   ;;  %vm3824_vm4 = vcmask 1046532   ;;  %vm3874_vm5 = vcmask 1047558  }
  0x1d   : > { %2388 = vmatpush1.bf16.msra.mxu0 %v5501_v18  ;;  %v220_v50 = vld [vmem:[%s6166_s10 + $0x40] sm:$0xff]  ;;  %v6186_v51 = vld [vmem:[%s6166_s10 + $0x78] sm:$0xff]  ;;  %v6189_v52 = vld [vmem:[%s6166_s10 + $0xb0] sm:$0xff]  ;;  %vm3876_vm6 = vcmask 1040384   ;;  %vm4919_vm7 = vcmask 1041408   ;;  %vm4934_vm8 = vcmask 1043456  }
  0x1e   : > { %2479 = vmatpush1.bf16.msra.mxu1 %v5502_v19  ;;  %2389 = vmatprep.subr.bf16.mxu0 %v5503_v20  ;;  %v6191_v53 = vpack.c.bf16 %v220_v50, %v213_v48  ;;  %v3621_v54 = vrot.slane %v220_v50, 1  ;;  %v3622_v55 = vrot.slane %v6186_v51, 1  ;;  %v3678_v56 = vrot.slane %v6186_v51, 2  ;;  %v215_v57 = vld [vmem:[%s6166_s10 + $0x18] sm:$0xff]  ;;  %v222_v58 = vld [vmem:[%s6166_s10 + $0x50] sm:$0xff]  ;;  %v6198_v59 = vld [vmem:[%s6166_s10 + $0x88] sm:$0xff] }
  0x1f   : > { %2480 = vmatprep.subr.bf16.mxu1 %v5505_v21  ;;  %v5547_v60 = vld [vmem:[%s8734_s1 + $0x514] ss:$24 sps:$4 sm:$0xff]   ;;  %v3679_v61 = vrot.slane %v6189_v52, 2  ;;  %v6205_v62 = vld [vmem:[%s6166_s10 + $0xc0] sm:$0xff]  ;;  %v6207_v63 = vpack.c.bf16 %v222_v58, %v215_v57  ;;  %v3627_v0 = vrot.slane %v222_v58, 1  ;;  %v3628_v1 = vrot.slane %v6198_v59, 1 }
  0x20   : > { %8791 = vst [vmem:[#allocation2_spill] sm:$0xff] %v6191_v53  ;;  %v5549_v2 = vld [vmem:[%s8734_s1 + $0x210] ss:$24 sps:$4 sm:$0xff]   ;;  %2411 = vmatprep.mubr.bf16.mxu0 %v6191_v53  ;;  %v3623_v3 = vsel %vm3617_vm0, %v3621_v54, %v3622_v55  ;;  %v3661_v4 = vmax.f32 %v220_v50, %v3622_v55  ;;  %v3684_v5 = vrot.slane %v6198_v59, 2  ;;  %v3685_v6 = vrot.slane %v6205_v62, 2  ;;  %v6218_v7 = vld [vmem:[%s6166_s10] sm:$0xff] }
  0x21   : > { %2390 = vmatpush1.bf16.msra.mxu0 %v5507_v22  ;;  %8792 = vst [vmem:[#allocation3_spill] sm:$0xff] %v6207_v63  ;;  %v6221_v8 = vld [vmem:[%s6166_s10 + $0x38] sm:$0xff]  ;;  %v5550_v9 = vld [vmem:[%s8734_s1 + $0x510] ss:$24 sps:$4 sm:$0xff]   ;;  %v3654_v12 = vmax.f32 %v213_v48, %v3623_v3  ;;  %v3680_v13 = vsel %vm3674_vm1, %v3678_v56, %v3679_v61  ;;  %2502 = vmatprep.mubr.bf16.mxu1 %v6207_v63  ;;  %vm4942_vm9 = vcmask 1044480   ;;  %s5463_s12 = smul.u32 112, %s8904_s16 }
  0x22   : > { %2481 = vmatpush1.bf16.msra.mxu1 %v5508_v23  ;;  %2391 = vmatprep.subr.bf16.mxu0 %v5509_v24  ;;  %v5551_v10 = vld [vmem:[%s8734_s1 + $0x1e4] ss:$24 sps:$4 sm:$0xff]   ;;  %v3629_v14 = vsel %vm3617_vm0, %v3627_v0, %v3628_v1  ;;  %v3663_v15 = vmax.f32 %v222_v58, %v3628_v1  ;;  %v3718_v16 = vmax.f32 %v3661_v4, %v3679_v61  ;;  %v6237_v19 = vld [vmem:[%s6166_s10 + $0x70] sm:$0xff]  ;;  %v3618_v20 = vrot.slane %v6221_v8, 1  ;;  %v6241_v23 = vld [vmem:[%s6166_s10 + $0xa8] sm:$0xff]  ;;  %s5462_s5 = smul.u32 528, %s8904_s16 }
  0x23   : > { %2482 = vmatprep.subr.bf16.mxu1 %v5511_v25  ;;  %v5553_v11 = vld [vmem:[%s8734_s1 + $0x4e4] ss:$24 sps:$4 sm:$0xff]   ;;  %v3656_v17 = vmax.f32 %v215_v57, %v3629_v14  ;;  %v3686_v18 = vsel %vm3674_vm1, %v3684_v5, %v3685_v6  ;;  %v3711_v21 = vmax.f32 %v3654_v12, %v3680_v13  ;;  %v6245_v24 = vpack.c.bf16 %v6221_v8, %v6218_v7  ;;  %v5562_v54 = vld [vmem:[%s8734_s1 + $0x4b0] ss:$24 sps:$4 sm:$0xff]   ;;  %s6572_s21 = scalar_lea.vmem %s8737_s4, %s5463_s12 }
  0x24   : > { %v3720_v22 = vmax.f32 %v3663_v15, %v3685_v6  ;;  %v3619_v25 = vrot.slane %v6237_v19, 1  ;;  %v5563_v3 = vld [vmem:[%s8734_s1 + $0x184] ss:$24 sps:$4 sm:$0xff]   ;;  %v5567_v15 = vld [vmem:[%s8734_s1 + $0x180] ss:$24 sps:$4 sm:$0xff]   ;;  %s7962_s14 = scalar_lea.vmem %s8736_s3, %s5462_s5 }
  0x25   : > { %2392 = vmatpush1.bf16.msra.mxu0 %v5513_v26  ;;  %8793 = vst [vmem:[#allocation4_spill] sm:$0xff] %v6245_v24  ;;  %v5555_v26 = vld [vmem:[%s8734_s1 + $0x1e0] ss:$24 sps:$4 sm:$0xff]   ;;  %v5565_v4 = vld [vmem:[%s8734_s1 + $0x484] ss:$24 sps:$4 sm:$0xff]  }
  0x26   : > { %2483 = vmatpush1.bf16.msra.mxu1 %v5514_v27  ;;  %2393 = vmatprep.subr.bf16.mxu0 %v5515_v28  ;;  %v3886_v27 = vsel %vm3876_vm6, %v3718_v16, -inf  ;;  %v3713_v28 = vmax.f32 %v3656_v17, %v3686_v18  ;;  %v3904_v58 = vsel %vm3876_vm6, %v3720_v22, -inf  ;;  %v5568_v22 = vld [vmem:[%s8734_s1 + $0x480] ss:$24 sps:$4 sm:$0xff]  }
  0x27   : > { %2484 = vmatprep.subr.bf16.mxu1 %v5517_v29  ;;  %v3675_v29 = vrot.slane %v6237_v19, 2 }
  0x29   : > { %2394 = vmatpush1.bf16.msra.mxu0 %v5519_v30  ;;  %v3676_v30 = vrot.slane %v6241_v23, 2 }
  0x2a   : > { %2485 = vmatpush1.bf16.msra.mxu1 %v5520_v31  ;;  %2395 = vmatprep.subr.bf16.mxu0 %v5521_v32  ;;  %v5556_v31 = vld [vmem:[%s8734_s1 + $0x4e0] ss:$24 sps:$4 sm:$0xff]   ;;  %v3732_v32 = vsel %vm3724_vm2, %v3711_v21, -inf }
  0x2b   : > { %2486 = vmatprep.subr.bf16.mxu1 %v5523_v33  ;;  %v3782_v33 = vsel %vm3774_vm3, %v3711_v21, -inf }
  0x2d   : > { %2396 = vmatpush2.bf16.msra.mxu0 %v5525_v34  ;;  %v3832_v34 = vsel %vm3824_vm4, %v3711_v21, -inf }
  0x2e   : > { %2487 = vmatpush2.bf16.msra.mxu1 %v5526_v35  ;;  %2397 = vmatprep.subr.bf16.mxu0 %v5527_v36  ;;  %v3885_v35 = vsel %vm3874_vm5, %v3711_v21, -inf  ;;  %v5557_v36 = vld [vmem:[%s8734_s1 + $0x1b4] ss:$24 sps:$4 sm:$0xff]  }
  0x2f   : > { %2488 = vmatprep.subr.bf16.mxu1 %v5529_v37  ;;  %v3733_v37 = vrot.slane %v3732_v32, 4 }
  0x31   : > { %2398 = vmatpush2.bf16.msra.mxu0 %v5531_v38  ;;  %v3783_v38 = vrot.slane %v3782_v33, 4 }
  0x32   : > { %2489 = vmatpush2.bf16.msra.mxu1 %v5532_v39  ;;  %2399 = vmatprep.subr.bf16.mxu0 %v5533_v40  ;;  %v3833_v39 = vrot.slane %v3832_v34, 4  ;;  %v3887_v40 = vmax.f32 %v3885_v35, %v3886_v27 }
  0x33   : > { %2490 = vmatprep.subr.bf16.mxu1 %v5535_v41  ;;  %v5559_v41 = vld [vmem:[%s8734_s1 + $0x4b4] ss:$24 sps:$4 sm:$0xff]   ;;  %v3784_v48 = vmax.f32 %v3782_v33, %v3783_v38 }
  0x34   : > { %v3888_v50 = vrot.slane %v3887_v40, 4 }
  0x35   : > { %2400 = vmatpush2.bf16.msra.mxu0 %v5537_v42  ;;  %v3746_v42 = vsel %vm3724_vm2, %v3713_v28, -inf  ;;  %v3785_v61 = vrot.slane %v3784_v48, 2 }
  0x36   : > { %2491 = vmatpush2.bf16.msra.mxu1 %v5538_v43  ;;  %2401 = vmatprep.subr.bf16.mxu0 %v5539_v44  ;;  %v3796_v43 = vsel %vm3774_vm3, %v3713_v28, -inf  ;;  %v3846_v44 = vsel %vm3824_vm4, %v3713_v28, -inf  ;;  %v3747_v55 = vrot.slane %v3746_v42, 4  ;;  %v3889_v1 = vmax.f32 %v3887_v40, %v3888_v50 }
  0x37   : > { %2492 = vmatprep.subr.bf16.mxu1 %v5541_v45  ;;  %v3903_v45 = vsel %vm3874_vm5, %v3713_v28, -inf  ;;  %v3797_v56 = vrot.slane %v3796_v43, 4  ;;  %v3847_v57 = vrot.slane %v3846_v44, 4  ;;  %v3786_v12 = vmax.f32 %v3784_v48, %v3785_v61 }
  0x38   : > { %v3748_v5 = vmax.f32 %v3746_v42, %v3747_v55  ;;  %v3890_v14 = vrot.slane %v3889_v1, 2  ;;  %v3905_v21 = vmax.f32 %v3903_v45, %v3904_v58  ;;  %v3620_v50 = vsel %vm3617_vm0, %v3618_v20, %v3619_v25  ;;  %v5569_v55 = vld [vmem:[%s8734_s1 + $0x750] ss:$24 sps:$4 sm:$0xff]  }
  0x39   : > { %2402 = vmatpush2.bf16.msra.mxu0 %v5543_v46  ;;  %v5561_v46 = vld [vmem:[%s8734_s1 + $0x1b0] ss:$24 sps:$4 sm:$0xff]   ;;  %v3798_v6 = vmax.f32 %v3796_v43, %v3797_v56  ;;  %v3787_v27 = vrot.slane %v3786_v12, 1 }
  0x3a   : > { %2493 = vmatpush2.bf16.msra.mxu1 %v5544_v47  ;;  %2403 = vmatprep.subr.bf16.mxu0 %v5545_v49  ;;  %v3734_v47 = vmax.f32 %v3732_v32, %v3733_v37  ;;  %v3834_v49 = vmax.f32 %v3832_v34, %v3833_v39  ;;  %v3749_v16 = vrot.slane %v3748_v5, 2  ;;  %v3906_v35 = vrot.slane %v3905_v21, 4 }
  0x3b   : > { %2494 = vmatprep.subr.bf16.mxu1 %v5547_v60  ;;  %v3799_v17 = vrot.slane %v3798_v6, 2  ;;  %v3788_v38 = vmax.f32 %v3786_v12, %v3787_v27 }
  0x3c   : > { %v3735_v60 = vrot.slane %v3734_v47, 2  ;;  %v3835_v0 = vrot.slane %v3834_v49, 2  ;;  %v3750_v32 = vmax.f32 %v3748_v5, %v3749_v16  ;;  %v3907_v45 = vmax.f32 %v3905_v21, %v3906_v35 }
  0x3d   : > { %2404 = vmatpush2.bf16.msra.mxu0 %v5549_v2  ;;  %v6279_v2 = vld [vmem:[%s6166_s10 + $0x48] sm:$0xff]  ;;  %v3800_v33 = vmax.f32 %v3798_v6, %v3799_v17  ;;  %v3677_v5 = vsel %vm3674_vm1, %v3675_v29, %v3676_v30  ;;  %v5572_v29 = vld [vmem:[%s8734_s1 + $0x720] ss:$24 sps:$4 sm:$0xff]  }
  0x3e   : > { %2495 = vmatpush2.bf16.msra.mxu1 %v5550_v9  ;;  %2405 = vmatprep.subr.bf16.mxu0 %v5551_v10  ;;  %v3848_v9 = vmax.f32 %v3846_v44, %v3847_v57  ;;  %v3624_v10 = vrot.slane %v6279_v2, 1  ;;  %v3836_v13 = vmax.f32 %v3834_v49, %v3835_v0  ;;  %v3751_v42 = vrot.slane %v3750_v32, 1  ;;  %v5587_v17 = vld [vmem:[%s8734_s1 + $0xa20] ss:$24 sps:$4 sm:$0xff]  }
  0x3f   : > { %2496 = vmatprep.subr.bf16.mxu1 %v5553_v11  ;;  %v3736_v11 = vmax.f32 %v3734_v47, %v3735_v60  ;;  %v3801_v43 = vrot.slane %v3800_v33, 1  ;;  %v6304_v47 = vld [vmem:[%s6166_s10 + $0x80] sm:$0xff]  ;;  %v3908_v20 = vrot.slane %v3907_v45, 2  ;;  %v3653_v0 = vmax.f32 %v6218_v7, %v3620_v50 }
  0x40   : > { %v3849_v18 = vrot.slane %v3848_v9, 2  ;;  %v3837_v28 = vrot.slane %v3836_v13, 1  ;;  %v3752_v57 = vmax.f32 %v3750_v32, %v3751_v42  ;;  %v5574_v60 = vld [vmem:[%s8734_s1 + $0x724] ss:$24 sps:$4 sm:$0xff]   ;;  %v3681_v16 = vrot.slane %v6304_v47, 2 }
  0x41   : > { %2406 = vmatpush2.bf16.msra.mxu0 %v5555_v26  ;;  %v3737_v26 = vrot.slane %v3736_v11, 1  ;;  %v3802_v58 = vmax.f32 %v3800_v33, %v3801_v43  ;;  %v3909_v6 = vmax.f32 %v3907_v45, %v3908_v20  ;;  %v5580_v42 = vld [vmem:[%s8734_s1 + $0x6c4] ss:$24 sps:$4 sm:$0xff]  }
  0x42   : > { %2497 = vmatpush2.bf16.msra.mxu1 %v5556_v31  ;;  %2407 = vmatprep.subr.bf16.mxu0 %v5557_v36  ;;  %v3891_v31 = vmax.f32 %v3889_v1, %v3890_v14  ;;  %v3850_v34 = vmax.f32 %v3848_v9, %v3849_v18  ;;  %v5571_v36 = vld [vmem:[%s8734_s1 + $0x754] ss:$24 sps:$4 sm:$0xff]   ;;  %v3838_v39 = vmax.f32 %v3836_v13, %v3837_v28  ;;  %v6348_v13 = vld [vmem:[%s6166_s10 + $0xb8] sm:$0xff] }
  0x43   : > { %2498 = vmatprep.subr.bf16.mxu1 %v5559_v41  ;;  %v3738_v37 = vmax.f32 %v3736_v11, %v3737_v26  ;;  %v5583_v41 = vld [vmem:[%s8734_s1 + $0xa54] ss:$24 sps:$4 sm:$0xff]   ;;  %v3660_v1 = vmax.f32 %v6221_v8, %v3619_v25  ;;  %v5589_v25 = vld [vmem:[%s8734_s1 + $0xa24] ss:$24 sps:$4 sm:$0xff]   ;;  %v4915_v9 = vsel %vm3876_vm6, %v3752_v57, %v3802_v58  ;;  %v3710_v11 = vmax.f32 %v3653_v0, %v3677_v5 }
  0x44   : > { %v3892_v40 = vrot.slane %v3891_v31, 1  ;;  %v3851_v44 = vrot.slane %v3850_v34, 1  ;;  %v3910_v18 = vrot.slane %v3909_v6, 1  ;;  %v5601_v50 = vld [vmem:[%s8734_s1 + $0x9c4] ss:$24 sps:$4 sm:$0xff]  }
  0x45   : > { %2408 = vmatpush2.bf16.msra.mxu0 %v5561_v46  ;;  %v6301_v46 = vld [vmem:[%s6166_s10 + $0x10] sm:$0xff]  ;;  %v4913_v49 = vsel %vm3876_vm6, %v3738_v37, %v3788_v38  ;;  %v3717_v12 = vmax.f32 %v3660_v1, %v3676_v30  ;;  %v3682_v30 = vrot.slane %v6348_v13, 2  ;;  %v3725_v21 = vsel %vm3724_vm2, %v3710_v11, -inf }
  0x46   : > { %2499 = vmatpush2.bf16.msra.mxu1 %v5562_v54  ;;  %2409 = vmatprep.subr.bf16.mxu0 %v5563_v3  ;;  %v3893_v48 = vmax.f32 %v3891_v31, %v3892_v40  ;;  %v3625_v54 = vrot.slane %v6304_v47, 1  ;;  %v4921_v56 = vsel %vm4919_vm7, %v4913_v49, %v3838_v39  ;;  %v5581_v3 = vld [vmem:[%s8734_s1 + $0xa50] ss:$24 sps:$4 sm:$0xff]   ;;  %v6338_v7 = vpack.c.bf16 %v6279_v2, %v6301_v46 }
  0x47   : > { %2500 = vmatprep.subr.bf16.mxu1 %v5565_v4  ;;  %v3852_v4 = vmax.f32 %v3850_v34, %v3851_v44  ;;  %v3825_v26 = vsel %vm3824_vm4, %v3710_v11, -inf  ;;  %v3726_v27 = vrot.slane %v3725_v21, 4  ;;  %v3875_v32 = vsel %vm3874_vm5, %v3710_v11, -inf  ;;  %v5575_v37 = vld [vmem:[%s8734_s1 + $0x6f0] ss:$24 sps:$4 sm:$0xff]  }
  0x48   : > { %v6321_v61 = vsel %vm3724_vm2, %v4921_v56, %v3893_v48  ;;  %8794 = vst [vmem:[#allocation5_spill] sm:$0xff] %v6338_v7  ;;  %v3626_v8 = vsel %vm3617_vm0, %v3624_v10, %v3625_v54  ;;  %v5577_v10 = vld [vmem:[%s8734_s1 + $0x6f4] ss:$24 sps:$4 sm:$0xff]   ;;  %v3826_v31 = vrot.slane %v3825_v26, 4  ;;  %v3877_v34 = vsel %vm3876_vm6, %v3717_v12, -inf }
  0x49   : > { %2410 = vmatpush2.bf16.msra.mxu0 %v5567_v15  ;;  %v3655_v14 = vmax.f32 %v6301_v46, %v3626_v8  ;;  %v3662_v15 = vmax.f32 %v6279_v2, %v3625_v54  ;;  %v5595_v2 = vld [vmem:[%s8734_s1 + $0x9f4] ss:$24 sps:$4 sm:$0xff]   ;;  %v6372_v33 = vsel %vm4919_vm7, %v4915_v9, %v3852_v4  ;;  %v3683_v35 = vsel %vm3674_vm1, %v3681_v16, %v3682_v30  ;;  %v5578_v48 = vld [vmem:[%s8734_s1 + $0x6c0] ss:$24 sps:$4 sm:$0xff]   ;;  %v5593_v49 = vld [vmem:[%s8734_s1 + $0x9f0] ss:$24 sps:$4 sm:$0xff]  }
  0x4a   : > { %2501 = vmatpush2.bf16.msra.mxu1 %v5568_v22  ;;  %2561 = vmatprep.subr.bf16.mxu0 %v5571_v36  ;;  %v3775_v22 = vsel %vm3774_vm3, %v3710_v11, -inf  ;;  %v3727_v38 = vmax.f32 %v3725_v21, %v3726_v27  ;;  %v3827_v40 = vmax.f32 %v3825_v26, %v3826_v31  ;;  %v6382_v43 = vmax.f32 %v3909_v6, %v3910_v18  ;;  %v5586_v8 = vld [vmem:[%s8734_s1 + $0x694] ss:$24 sps:$4 sm:$0xff]  }
  0x4b   : > { %2652 = vmatprep.subr.bf16.mxu1 %v5583_v41  ;;  %v3776_v28 = vrot.slane %v3775_v22, 4  ;;  %v3719_v36 = vmax.f32 %v3662_v15, %v3682_v30  ;;  %v3878_v41 = vmax.f32 %v3875_v32, %v3877_v34  ;;  %v3712_v44 = vmax.f32 %v3655_v14, %v3683_v35  ;;  %v6416_v26 = vld [vmem:[%s6166_s10 + $0x130] sm:$0xff]  ;;  %v5592_v34 = vld [vmem:[%s8734_s1 + $0x664] ss:$24 sps:$4 sm:$0xff]  }
  0x4c   : > { %2412 = vmatmul.mubr.bf16.vlgmr.msra.gmra.mxu0 %v6245_v24  ;;  %v6387_v46 = vpack.c.bf16 %v6205_v62, %v6198_v59  ;;  %v3728_v54 = vrot.slane %v3727_v38, 2  ;;  %v3828_v56 = vrot.slane %v3827_v40, 2  ;;  %v5605_v35 = vld [vmem:[%s8734_s1 + $0x990] ss:$24 sps:$4 sm:$0xff]  }
  0x4d   : > { %2562 = vmatpush1.bf16.msra.mxu0 %v5569_v55  ;;  %2503 = vmatmul.mubr.bf16.vlgmr.msra.gmra.mxu1 %v6338_v7  ;;  %v3777_v39 = vmax.f32 %v3775_v22, %v3776_v28  ;;  %v3895_v45 = vsel %vm3876_vm6, %v3719_v36, -inf  ;;  %v3879_v57 = vrot.slane %v3878_v41, 4  ;;  %v3739_v58 = vsel %vm3724_vm2, %v3712_v44, -inf }
  0x4e   : > { %2563 = vmatprep.subr.bf16.mxu0 %v5574_v60  ;;  %2653 = vmatpush1.bf16.msra.mxu1 %v5581_v3  ;;  %8795 = vst [vmem:[#allocation6_spill] sm:$0xff] %v6387_v46  ;;  %v3789_v60 = vsel %vm3774_vm3, %v3712_v44, -inf  ;;  %v3839_v20 = vsel %vm3824_vm4, %v3712_v44, -inf  ;;  %v3894_v0 = vsel %vm3874_vm5, %v3712_v44, -inf  ;;  %v3729_v1 = vmax.f32 %v3727_v38, %v3728_v54 }
  0x4f   : > { %2654 = vmatprep.subr.bf16.mxu1 %v5589_v25  ;;  %v3778_v55 = vrot.slane %v3777_v39, 2  ;;  %2512 = vmatprep.mubr.bf16.mxu1 %v6387_v46  ;;  %v3829_v4 = vmax.f32 %v3827_v40, %v3828_v56  ;;  %v3880_v5 = vmax.f32 %v3878_v41, %v3879_v57  ;;  %v5599_v25 = vld [vmem:[%s8734_s1 + $0x9c0] ss:$24 sps:$4 sm:$0xff]   ;;  %v3740_v6 = vrot.slane %v3739_v58, 4  ;;  %v5598_v56 = vld [vmem:[%s8734_s1 + $0x634] ss:$24 sps:$4 sm:$0xff]  }
  0x50   : > { %v3790_v9 = vrot.slane %v3789_v60, 4  ;;  %v3840_v11 = vrot.slane %v3839_v20, 4  ;;  %v3896_v12 = vmax.f32 %v3894_v0, %v3895_v45  ;;  %v3730_v14 = vrot.slane %v3729_v1, 1  ;;  %v5613_v45 = vld [vmem:[%s8734_s1 + $0x964] ss:$24 sps:$4 sm:$0xff]   ;;  %v6450_v0 = vld [vmem:[%s6166_s10 + $0xf0] sm:$0xff] }
  0x51   : > { %2564 = vmatpush1.bf16.msra.mxu0 %v5572_v29  ;;  %v3779_v3 = vmax.f32 %v3777_v39, %v3778_v55  ;;  %v6410_v29 = vld [vmem:[%s6166_s10 + $0xf8] sm:$0xff]  ;;  %v3830_v16 = vrot.slane %v3829_v4, 1  ;;  %v3881_v30 = vrot.slane %v3880_v5, 2 }
  0x52   : > { %2565 = vmatprep.subr.bf16.mxu0 %v5577_v10  ;;  %2655 = vmatpush1.bf16.msra.mxu1 %v5587_v17  ;;  %v5607_v10 = vld [vmem:[%s8734_s1 + $0x994] ss:$24 sps:$4 sm:$0xff]   ;;  %v3741_v17 = vmax.f32 %v3739_v58, %v3740_v6  ;;  %v3791_v18 = vmax.f32 %v3789_v60, %v3790_v9  ;;  %v3841_v21 = vmax.f32 %v3839_v20, %v3840_v11  ;;  %v3897_v22 = vrot.slane %v3896_v12, 4  ;;  %v5590_v55 = vld [vmem:[%s8734_s1 + $0x660] ss:$24 sps:$4 sm:$0xff]  }
  0x53   : > { %2656 = vmatprep.subr.bf16.mxu1 %v5595_v2  ;;  %v3780_v15 = vrot.slane %v3779_v3, 1  ;;  %v5584_v2 = vld [vmem:[%s8734_s1 + $0x690] ss:$24 sps:$4 sm:$0xff]   ;;  %v3731_v27 = vmax.f32 %v3729_v1, %v3730_v14  ;;  %v3831_v31 = vmax.f32 %v3829_v4, %v3830_v16  ;;  %v3882_v32 = vmax.f32 %v3880_v5, %v3881_v30  ;;  %v5611_v1 = vld [vmem:[%s8734_s1 + $0x960] ss:$24 sps:$4 sm:$0xff]  }
  0x54   : > { %v3742_v36 = vrot.slane %v3741_v17, 2  ;;  %v3842_v38 = vrot.slane %v3841_v21, 2  ;;  %v3898_v39 = vmax.f32 %v3896_v12, %v3897_v22  ;;  %v6434_v44 = vpack.c.bf16 %v6416_v26, %v6410_v29 }
  0x55   : > { %2566 = vmatpush1.bf16.msra.mxu0 %v5575_v37  ;;  %v3781_v28 = vmax.f32 %v3779_v3, %v3780_v15  ;;  %v3792_v37 = vrot.slane %v3791_v18, 2  ;;  %v3883_v40 = vrot.slane %v3882_v32, 1  ;;  %v3955_v60 = vrot.slane %v6205_v62, 1 }
  0x56   : > { %2567 = vmatprep.subr.bf16.mxu0 %v5580_v42  ;;  %2657 = vmatpush1.bf16.msra.mxu1 %v5593_v49  ;;  %v6430_v42 = vpack.c.bf16 %v6348_v13, %v6304_v47  ;;  %v3743_v49 = vmax.f32 %v3741_v17, %v3742_v36  ;;  %v3843_v54 = vmax.f32 %v3841_v21, %v3842_v38  ;;  %v3899_v58 = vrot.slane %v3898_v39, 2  ;;  %v5596_v17 = vld [vmem:[%s8734_s1 + $0x630] ss:$24 sps:$4 sm:$0xff]   ;;  %v5625_v36 = vld [vmem:[%s8734_s1 + $0x904] ss:$24 sps:$4 sm:$0xff]  }
  0x57   : > { %2658 = vmatprep.subr.bf16.mxu1 %v5601_v50  ;;  %v4912_v41 = vsel %vm3876_vm6, %v3731_v27, %v3781_v28  ;;  %v3793_v50 = vmax.f32 %v3791_v18, %v3792_v37  ;;  %v3884_v57 = vmax.f32 %v3882_v32, %v3883_v40  ;;  %v3956_v20 = vrot.slane %v6410_v29, 1  ;;  %v5617_v28 = vld [vmem:[%s8734_s1 + $0x930] ss:$24 sps:$4 sm:$0xff]  }
  0x58   : > { %2513 = vmatmul.mubr.bf16.gmra.mxu1 %v6430_v42  ;;  %v3744_v3 = vrot.slane %v3743_v49, 1  ;;  %v3844_v5 = vrot.slane %v3843_v54, 1  ;;  %v3900_v9 = vmax.f32 %v3898_v39, %v3899_v58  ;;  %v6471_v14 = vsel %vm3724_vm2, %v6372_v33, %v6382_v43  ;;  %v5604_v33 = vld [vmem:[%s8734_s1 + $0x604] ss:$24 sps:$4 sm:$0xff]   ;;  %v5623_v58 = vld [vmem:[%s8734_s1 + $0x900] ss:$24 sps:$4 sm:$0xff]  }
  0x59   : > { %2568 = vmatpush1.bf16.msra.mxu0 %v5578_v48  ;;  %v4920_v48 = vsel %vm4919_vm7, %v4912_v41, %v3831_v31  ;;  %v3794_v4 = vrot.slane %v3793_v50, 1  ;;  %2522 = vmatprep.mubr.bf16.mxu1 %v6434_v44  ;;  %v3957_v11 = vsel %vm3617_vm0, %v3955_v60, %v3956_v20  ;;  %v3991_v12 = vmax.f32 %v6205_v62, %v3956_v20  ;;  %v5602_v41 = vld [vmem:[%s8734_s1 + $0x600] ss:$24 sps:$4 sm:$0xff]  }
  0x5a   : > { %2569 = vmatprep.subr.bf16.mxu0 %v5586_v8  ;;  %2659 = vmatpush1.bf16.msra.mxu1 %v5599_v25  ;;  %v4011_v8 = vrot.slane %v6410_v29, 2  ;;  %v6458_v25 = vld [vmem:[%s6166_s10 + $0x128] sm:$0xff]  ;;  %v6461_v6 = vsel %vm3724_vm2, %v4920_v48, %v3884_v57  ;;  %v3745_v15 = vmax.f32 %v3743_v49, %v3744_v3  ;;  %v3984_v30 = vmax.f32 %v6198_v59, %v3957_v11  ;;  %v5631_v3 = vld [vmem:[%s8734_s1 + $0x15c] ss:$24 sps:$4 sm:$0xff]  }
  0x5b   : > { %2660 = vmatprep.subr.bf16.mxu1 %v5607_v10  ;;  %v5619_v10 = vld [vmem:[%s8734_s1 + $0x934] ss:$24 sps:$4 sm:$0xff]   ;;  %v3795_v16 = vmax.f32 %v3793_v50, %v3794_v4  ;;  %v3845_v62 = vmax.f32 %v3843_v54, %v3844_v5  ;;  %v3901_v18 = vrot.slane %v3900_v9, 1  ;;  %v4012_v21 = vrot.slane %v6416_v26, 2  ;;  %v5608_v11 = vld [vmem:[%s8734_s1 + $0x8d0] ss:$24 sps:$4 sm:$0xff]  }
  0x5c   : > { %v6480_v22 = vpack.c.bf16 %v6458_v25, %v6450_v0  ;;  %v4277_v43 = vrot.slane %v6416_v26, 1  ;;  %v3953_v27 = vrot.slane %v6450_v0, 1  ;;  %v4009_v40 = vrot.slane %v6458_v25, 2 }
  0x5d   : > { %2570 = vmatpush1.bf16.msra.mxu0 %v5584_v2  ;;  %v4914_v59 = vsel %vm3876_vm6, %v3745_v15, %v3795_v16  ;;  %v3952_v2 = vrot.slane %v6348_v13, 1  ;;  %v3902_v31 = vmax.f32 %v3900_v9, %v3901_v18  ;;  %v4013_v32 = vsel %vm3674_vm1, %v4011_v8, %v4012_v21 }
  0x5e   : > { %2571 = vmatprep.subr.bf16.mxu0 %v5592_v34  ;;  %2661 = vmatpush1.bf16.msra.mxu1 %v5605_v35  ;;  %v4047_v34 = vmax.f32 %v3991_v12, %v4012_v21  ;;  %v4008_v35 = vrot.slane %v6450_v0, 2  ;;  %v4040_v37 = vmax.f32 %v3984_v30, %v4013_v32  ;;  %v3990_v39 = vmax.f32 %v6348_v13, %v3953_v27  ;;  %v5610_v13 = vld [vmem:[%s8734_s1 + $0x8d4] ss:$24 sps:$4 sm:$0xff]   ;;  %v5616_v30 = vld [vmem:[%s8734_s1 + $0x8a4] ss:$24 sps:$4 sm:$0xff]  }
  0x5f   : > { %2662 = vmatprep.subr.bf16.mxu1 %v5613_v45  ;;  %v3954_v38 = vsel %vm3617_vm0, %v3952_v2, %v3953_v27  ;;  %v4922_v45 = vsel %vm4919_vm7, %v4914_v59, %v3845_v62  ;;  %v6529_v16 = vpack.c.bf16 %v6189_v52, %v6186_v51  ;;  %v5614_v32 = vld [vmem:[%s8734_s1 + $0x8a0] ss:$24 sps:$4 sm:$0xff]  }
  0x60   : > { %v4177_v48 = vsel %vm3876_vm6, %v4047_v34, -inf  ;;  %v4233_v49 = vsel %vm3724_vm2, %v4047_v34, -inf  ;;  %2523 = vmatmul.mubr.bf16.gmra.mxu1 %v6480_v22  ;;  %v3983_v50 = vmax.f32 %v6304_v47, %v3954_v38  ;;  %v4072_v54 = vsel %vm3774_vm3, %v4040_v37, -inf  ;;  %v5622_v38 = vld [vmem:[%s8734_s1 + $0x874] ss:$24 sps:$4 sm:$0xff]  }
  0x61   : > { %2572 = vmatpush1.bf16.msra.mxu0 %v5590_v55  ;;  %v4121_v55 = vsel %vm3824_vm4, %v4040_v37, -inf  ;;  %v4234_v57 = vrot.slane %v4233_v49, 4  ;;  %v4073_v60 = vrot.slane %v4072_v54, 4  ;;  %v6522_v4 = vsel %vm3724_vm2, %v4922_v45, %v3902_v31  ;;  %8796 = vst [vmem:[#allocation7_spill] sm:$0xff] %v6529_v16  ;;  %2421 = vmatprep.mubr.bf16.mxu0 %v6529_v16 }
  0x62   : > { %2573 = vmatprep.subr.bf16.mxu0 %v5598_v56  ;;  %2663 = vmatpush1.bf16.msra.mxu1 %v5611_v1  ;;  %v4176_v56 = vsel %vm3874_vm5, %v4040_v37, -inf  ;;  %v4122_v20 = vrot.slane %v4121_v55, 4  ;;  %v4010_v1 = vsel %vm3674_vm1, %v4008_v35, %v4009_v40  ;;  %v4046_v9 = vmax.f32 %v3990_v39, %v4009_v40 }
  0x63   : > { %2664 = vmatprep.subr.bf16.mxu1 %v5619_v10  ;;  %v4178_v47 = vmax.f32 %v4176_v56, %v4177_v48  ;;  %v4235_v5 = vmax.f32 %v4233_v49, %v4234_v57  ;;  %v4039_v8 = vmax.f32 %v3983_v50, %v4010_v1  ;;  %v4074_v12 = vmax.f32 %v4072_v54, %v4073_v60  ;;  %v6551_v60 = vld [vmem:[%s6166_s10 + $0x1a0] sm:$0xff] }
  0x64   : > { %v4123_v10 = vmax.f32 %v4121_v55, %v4122_v20  ;;  %v4226_v31 = vsel %vm3724_vm2, %v4046_v9, -inf }
  0x65   : > { %2574 = vmatpush1.bf16.msra.mxu0 %v5596_v17  ;;  %v4179_v15 = vrot.slane %v4178_v47, 4  ;;  %v4236_v17 = vrot.slane %v4235_v5, 2  ;;  %v4065_v62 = vsel %vm3774_vm3, %v4039_v8, -inf  ;;  %v4114_v18 = vsel %vm3824_vm4, %v4039_v8, -inf }
  0x66   : > { %2575 = vmatprep.subr.bf16.mxu0 %v5604_v33  ;;  %2665 = vmatpush1.bf16.msra.mxu1 %v5617_v28  ;;  %v4167_v21 = vsel %vm3874_vm5, %v4039_v8, -inf  ;;  %v4075_v33 = vrot.slane %v4074_v12, 2  ;;  %v4124_v59 = vrot.slane %v4123_v10, 2  ;;  %v4066_v27 = vrot.slane %v4065_v62, 4 }
  0x67   : > { %2666 = vmatprep.subr.bf16.mxu1 %v5625_v36  ;;  %v4180_v2 = vmax.f32 %v4178_v47, %v4179_v15  ;;  %v4237_v51 = vmax.f32 %v4235_v5, %v4236_v17  ;;  %v4115_v52 = vrot.slane %v4114_v18, 4  ;;  %v4168_v28 = vsel %vm3876_vm6, %v4046_v9, -inf  ;;  %v5620_v5 = vld [vmem:[%s8734_s1 + $0x870] ss:$24 sps:$4 sm:$0xff]  }
  0x68   : > { %v4076_v34 = vmax.f32 %v4074_v12, %v4075_v33  ;;  %v4125_v35 = vmax.f32 %v4123_v10, %v4124_v59  ;;  %v4067_v37 = vmax.f32 %v4065_v62, %v4066_v27  ;;  %v4227_v45 = vrot.slane %v4226_v31, 4  ;;  %v5628_v10 = vld [vmem:[%s8734_s1 + $0x844] ss:$24 sps:$4 sm:$0xff]  }
  0x69   : > { %2576 = vmatpush1.bf16.msra.mxu0 %v5602_v41  ;;  %v4181_v36 = vrot.slane %v4180_v2, 2  ;;  %v4238_v39 = vrot.slane %v4237_v51, 1  ;;  %v4116_v40 = vmax.f32 %v4114_v18, %v4115_v52  ;;  %v4169_v41 = vmax.f32 %v4167_v21, %v4168_v28 }
  0x6a   : > { %2577 = vmatprep.subr.bf16.mxu0 %v5610_v13  ;;  %2667 = vmatpush1.bf16.msra.mxu1 %v5623_v58  ;;  %v4077_v48 = vrot.slane %v4076_v34, 1  ;;  %v4126_v49 = vrot.slane %v4125_v35, 1  ;;  %v4068_v13 = vrot.slane %v4067_v37, 2  ;;  %v4228_v57 = vmax.f32 %v4226_v31, %v4227_v45  ;;  %v6548_v58 = vld [vmem:[%s6166_s10 + $0x168] sm:$0xff] }
  0x6b   : > { %2743 = vmatprep.subr.bf16.mxu1 %v5631_v3  ;;  %v4182_v50 = vmax.f32 %v4180_v2, %v4181_v36  ;;  %v4239_v54 = vmax.f32 %v4237_v51, %v4238_v39  ;;  %v4117_v55 = vrot.slane %v4116_v40, 2  ;;  %v4170_v56 = vrot.slane %v4169_v41, 4  ;;  %v5626_v51 = vld [vmem:[%s8734_s1 + $0x840] ss:$24 sps:$4 sm:$0xff]  }
  0x6c   : > { %v4078_v20 = vmax.f32 %v4076_v34, %v4077_v48  ;;  %v4127_v47 = vmax.f32 %v4125_v35, %v4126_v49  ;;  %v4069_v3 = vmax.f32 %v4067_v37, %v4068_v13  ;;  %v6558_v12 = vpack.c.bf16 %v6241_v23, %v6237_v19  ;;  %v6588_v34 = vld [vmem:[%s6166_s10 + $0x198] sm:$0xff]  ;;  %v5634_v35 = vld [vmem:[%s8734_s1 + $0x814] ss:$24 sps:$4 sm:$0xff]  }
  0x6d   : > { %2578 = vmatpush2.bf16.msra.mxu0 %v5608_v11  ;;  %v4183_v1 = vrot.slane %v4182_v50, 1  ;;  %v4118_v8 = vmax.f32 %v4116_v40, %v4117_v55  ;;  %v4171_v9 = vmax.f32 %v4169_v41, %v4170_v56  ;;  %v4229_v11 = vrot.slane %v4228_v57, 2  ;;  %v5640_v56 = vld [vmem:[%s8734_s1 + $0x7e4] ss:$24 sps:$4 sm:$0xff]  }
  0x6e   : > { %2579 = vmatprep.subr.bf16.mxu0 %v5616_v30  ;;  %v4938_v30 = vsel %vm4934_vm8, %v6471_v14, %v4078_v20  ;;  %v4070_v17 = vrot.slane %v4069_v3, 1  ;;  %v6567_v62 = vpack.c.bf16 %v6551_v60, %v6548_v58  ;;  %2422 = vmatmul.mubr.bf16.gmra.mxu0 %v6558_v12  ;;  %v6577_v14 = vld [vmem:[%s6166_s10 + $0x160] sm:$0xff]  ;;  %v4278_v2 = vrot.slane %v6548_v58, 1 }
  0x6f   : > { %v4184_v15 = vmax.f32 %v4182_v50, %v4183_v1  ;;  %v4946_v19 = vsel %vm4942_vm9, %v4938_v30, %v4127_v47  ;;  %v4119_v23 = vrot.slane %v4118_v8, 1  ;;  %v4172_v18 = vrot.slane %v4171_v9, 2 }
  0x70   : > { %v4230_v21 = vmax.f32 %v4228_v57, %v4229_v11  ;;  %v4071_v59 = vmax.f32 %v4069_v3, %v4070_v17  ;;  %2532 = vmatprep.mubr.bf16.mxu1 %v6567_v62  ;;  %v4333_v27 = vrot.slane %v6548_v58, 2  ;;  %v4279_v37 = vsel %vm3617_vm0, %v4277_v43, %v4278_v2  ;;  %v6627_v17 = vld [vmem:[%s6166_s10 + $0xe8] sm:$0xff] }
  0x71   : > { %2580 = vmatpush2.bf16.msra.mxu0 %v5614_v32  ;;  %v4953_v33 = vsel %vm3674_vm1, %v4946_v19, %v4184_v15  ;;  %v4120_v28 = vmax.f32 %v4118_v8, %v4119_v23  ;;  %v4173_v31 = vmax.f32 %v4171_v9, %v4172_v18  ;;  %v4334_v39 = vrot.slane %v6551_v60, 2  ;;  %v6630_v19 = vld [vmem:[%s6166_s10 + $0x120] sm:$0xff] }
  0x72   : > { %2581 = vmatprep.subr.bf16.mxu0 %v5622_v38  ;;  %v4960_v52 = vsel %vm3617_vm0, %v4953_v33, %v4239_v54  ;;  %v4231_v32 = vrot.slane %v4230_v21, 1  ;;  %v4937_v36 = vsel %vm4934_vm8, %v6522_v4, %v4071_v59  ;;  %v4313_v38 = vmax.f32 %v6416_v26, %v4278_v2  ;;  %v5632_v26 = vld [vmem:[%s8734_s1 + $0x810] ss:$24 sps:$4 sm:$0xff]   ;;  %v5638_v23 = vld [vmem:[%s8734_s1 + $0x7e0] ss:$24 sps:$4 sm:$0xff]  }
  0x73   : > { %5016 = vst [vmem:[%s6572_s21 + $0x18] sm:$0xff] %v4960_v52  ;;  %v4174_v40 = vrot.slane %v4173_v31, 1  ;;  %v4274_v45 = vrot.slane %v6458_v25, 1  ;;  %v4306_v48 = vmax.f32 %v6410_v29, %v4279_v37  ;;  %v4945_v49 = vsel %vm4942_vm9, %v4937_v36, %v4120_v28  ;;  %v5646_v2 = vld [vmem:[%s8734_s1 + $0x7b4] ss:$24 sps:$4 sm:$0xff]  }
  0x74   : > { %v4232_v41 = vmax.f32 %v4230_v21, %v4231_v32  ;;  %v4335_v50 = vsel %vm3674_vm1, %v4333_v27, %v4334_v39  ;;  %v4369_v13 = vmax.f32 %v4313_v38, %v4334_v39  ;;  %v6607_v4 = vpack.c.bf16 %v6588_v34, %v6577_v14 }
  0x75   : > { %2582 = vmatpush2.bf16.msra.mxu0 %v5620_v5  ;;  %v4175_v43 = vmax.f32 %v4173_v31, %v4174_v40  ;;  %v4362_v54 = vmax.f32 %v4306_v48, %v4335_v50  ;;  %v4275_v55 = vrot.slane %v6577_v14, 1  ;;  %v4330_v29 = vrot.slane %v6577_v14, 2  ;;  %v5644_v40 = vld [vmem:[%s8734_s1 + $0x7b0] ss:$24 sps:$4 sm:$0xff]  }
  0x76   : > { %2583 = vmatprep.subr.bf16.mxu0 %v5628_v10  ;;  %v4450_v57 = vsel %vm3876_vm6, %v4369_v13, -inf  ;;  %v4506_v20 = vsel %vm3724_vm2, %v4369_v13, -inf  ;;  %v4555_v47 = vsel %vm3774_vm3, %v4369_v13, -inf  ;;  %2533 = vmatmul.mubr.bf16.gmra.mxu1 %v6607_v4  ;;  %v4331_v1 = vrot.slane %v6588_v34, 2 }
  0x77   : > { %v4952_v3 = vsel %vm3674_vm1, %v4945_v49, %v4175_v43  ;;  %v4394_v5 = vsel %vm3824_vm4, %v4362_v54, -inf  ;;  %v4449_v8 = vsel %vm3874_vm5, %v4362_v54, -inf  ;;  %v4507_v9 = vrot.slane %v4506_v20, 4  ;;  %v5652_v49 = vld [vmem:[%s8734_s1 + $0x784] ss:$24 sps:$4 sm:$0xff]  }
  0x78   : > { %v4959_v11 = vsel %vm3617_vm0, %v4952_v3, %v4232_v41  ;;  %v4395_v10 = vrot.slane %v4394_v5, 4  ;;  %v4451_v15 = vmax.f32 %v4449_v8, %v4450_v57  ;;  %v4556_v30 = vrot.slane %v4555_v47, 4  ;;  %v5650_v54 = vld [vmem:[%s8734_s1 + $0x780] ss:$24 sps:$4 sm:$0xff]  }
  0x79   : > { %2584 = vmatpush2.bf16.msra.mxu0 %v5626_v51  ;;  %5015 = vst [vmem:[%s6572_s21 + $0x10] sm:$0xff] %v4959_v11  ;;  %v4508_v18 = vmax.f32 %v4506_v20, %v4507_v9  ;;  %v4276_v21 = vsel %vm3617_vm0, %v4274_v45, %v4275_v55  ;;  %v4312_v33 = vmax.f32 %v6458_v25, %v4275_v55  ;;  %v4599_v32 = vrot.slane %v6551_v60, 1  ;;  %v5658_v20 = vld [vmem:[%s8734_s1 + $0x45c] ss:$24 sps:$4 sm:$0xff]  }
  0x7a   : > { %2585 = vmatprep.subr.bf16.mxu0 %v5634_v35  ;;  %v4332_v59 = vsel %vm3674_vm1, %v4330_v29, %v4331_v1  ;;  %v4396_v27 = vmax.f32 %v4394_v5, %v4395_v10  ;;  %v4452_v51 = vrot.slane %v4451_v15, 4  ;;  %v4557_v52 = vmax.f32 %v4555_v47, %v4556_v30 }
  0x7b   : > { %v4305_v28 = vmax.f32 %v6450_v0, %v4276_v21  ;;  %v4509_v31 = vrot.slane %v4508_v18, 2  ;;  %v4368_v35 = vmax.f32 %v4312_v33, %v4331_v1  ;;  %v6646_v36 = vpack.c.bf16 %v6630_v19, %v6627_v17 }
  0x7c   : > { %v4397_v25 = vrot.slane %v4396_v27, 2  ;;  %v4453_v37 = vmax.f32 %v4451_v15, %v4452_v51  ;;  %v4558_v38 = vrot.slane %v4557_v52, 2 }
  0x7d   : > { %2586 = vmatpush2.bf16.msra.mxu0 %v5632_v26  ;;  %v4361_v39 = vmax.f32 %v4305_v28, %v4332_v59  ;;  %v4510_v41 = vmax.f32 %v4508_v18, %v4509_v31  ;;  %v4441_v0 = vsel %vm3876_vm6, %v4368_v35, -inf  ;;  %v4499_v45 = vsel %vm3724_vm2, %v4368_v35, -inf  ;;  %2431 = vmatprep.mubr.bf16.mxu0 %v6646_v36 }
  0x7e   : > { %2587 = vmatprep.subr.bf16.mxu0 %v5640_v56  ;;  %v4548_v48 = vsel %vm3774_vm3, %v4368_v35, -inf  ;;  %v4398_v50 = vmax.f32 %v4396_v27, %v4397_v25  ;;  %v4454_v13 = vrot.slane %v4453_v37, 2  ;;  %v4559_v26 = vmax.f32 %v4557_v52, %v4558_v38 }
  0x7f   : > { %v4387_v43 = vsel %vm3824_vm4, %v4361_v39, -inf  ;;  %v4511_v55 = vrot.slane %v4510_v41, 1  ;;  %v4440_v56 = vsel %vm3874_vm5, %v4361_v39, -inf  ;;  %v4500_v57 = vrot.slane %v4499_v45, 4  ;;  %v6671_v39 = vld [vmem:[%s6166_s10 + $0xe0] sm:$0xff] }
  0x80   : > { %v4388_v29 = vrot.slane %v4387_v43, 4  ;;  %v4399_v47 = vrot.slane %v4398_v50, 1  ;;  %v4455_v1 = vmax.f32 %v4453_v37, %v4454_v13  ;;  %v4560_v3 = vrot.slane %v4559_v26, 1 }
  0x81   : > { %2588 = vmatpush2.bf16.msra.mxu0 %v5638_v23  ;;  %v4442_v5 = vmax.f32 %v4440_v56, %v4441_v0  ;;  %v4512_v8 = vmax.f32 %v4510_v41, %v4511_v55  ;;  %v4501_v11 = vmax.f32 %v4499_v45, %v4500_v57  ;;  %v4549_v10 = vrot.slane %v4548_v48, 4  ;;  %v5978_v55 = vld [vmem:[%s6166_s10 + $0x78] sm:$0xff] }
  0x82   : > { %2589 = vmatprep.subr.bf16.mxu0 %v5646_v2  ;;  %v4389_v9 = vmax.f32 %v4387_v43, %v4388_v29  ;;  %v4400_v15 = vmax.f32 %v4398_v50, %v4399_v47  ;;  %v4456_v30 = vrot.slane %v4455_v1, 1  ;;  %v4561_v23 = vmax.f32 %v4559_v26, %v4560_v3  ;;  %v5977_v2 = vld [vmem:[%s6166_s10 + $0xb0] sm:$0xff] }
  0x83   : > { %v4443_v18 = vrot.slane %v4442_v5, 4  ;;  %v4502_v33 = vrot.slane %v4501_v11, 2  ;;  %v4550_v59 = vmax.f32 %v4548_v48, %v4549_v10  ;;  %v3949_v27 = vrot.slane %v5977_v2, 1 }
  0x84   : > { %v4390_v21 = vrot.slane %v4389_v9, 2  ;;  %v4457_v51 = vmax.f32 %v4455_v1, %v4456_v30  ;;  %v3950_v28 = vrot.slane %v6627_v17, 1  ;;  %v4005_v31 = vrot.slane %v6627_v17, 2  ;;  %v5979_v30 = vld [vmem:[%s6166_s10 + $0xa8] sm:$0xff] }
  0x85   : > { %2590 = vmatpush2.bf16.msra.mxu0 %v5644_v40  ;;  %v4444_v52 = vmax.f32 %v4442_v5, %v4443_v18  ;;  %v4503_v25 = vmax.f32 %v4501_v11, %v4502_v33  ;;  %v4551_v37 = vrot.slane %v4550_v59, 2  ;;  %v4006_v38 = vrot.slane %v6630_v19, 2  ;;  %v6674_v40 = vld [vmem:[%s6166_s10 + $0x118] sm:$0xff] }
  0x86   : > { %2591 = vmatprep.subr.bf16.mxu0 %v5652_v49  ;;  %v4391_v35 = vmax.f32 %v4389_v9, %v4390_v21  ;;  %v4967_v41 = vsel %vm3876_vm6, %v4400_v15, %v4457_v51  ;;  %v3951_v45 = vsel %vm3617_vm0, %v3949_v27, %v3950_v28  ;;  %v3989_v48 = vmax.f32 %v5977_v2, %v3950_v28 }
  0x87   : > { %v4445_v0 = vrot.slane %v4444_v52, 2  ;;  %v4974_v49 = vsel %vm4919_vm7, %v4967_v41, %v4512_v8  ;;  %v4504_v13 = vrot.slane %v4503_v25, 1  ;;  %v4552_v26 = vmax.f32 %v4550_v59, %v4551_v37 }
  0x88   : > { %v4392_v50 = vrot.slane %v4391_v35, 1  ;;  %v6680_v43 = vsel %vm3724_vm2, %v4974_v49, %v4561_v23  ;;  %v3982_v29 = vmax.f32 %v5978_v55, %v3951_v45  ;;  %v4007_v56 = vsel %vm3674_vm1, %v4005_v31, %v4006_v38  ;;  %v6702_v45 = vld [vmem:[%s6166_s10 + $0x1d8] sm:$0xff] }
  0x89   : > { %2592 = vmatpush2.bf16.msra.mxu0 %v5650_v54  ;;  %v4446_v54 = vmax.f32 %v4444_v52, %v4445_v0  ;;  %v4596_v47 = vrot.slane %v6588_v34, 1  ;;  %v4045_v1 = vmax.f32 %v3989_v48, %v4006_v38  ;;  %v4505_v5 = vmax.f32 %v4503_v25, %v4504_v13 }
  0x8a   : > { %2834 = vmatprep.subr.bf16.mxu0 %v5658_v20  ;;  %v4393_v57 = vmax.f32 %v4391_v35, %v4392_v50  ;;  %v4553_v20 = vrot.slane %v4552_v26, 1  ;;  %v4038_v8 = vmax.f32 %v3982_v29, %v4007_v56  ;;  %v6687_v9 = vpack.c.bf16 %v6674_v40, %v6671_v39  ;;  %v5980_v56 = vld [vmem:[%s6166_s10 + $0x70] sm:$0xff] }
  0x8b   : > { %v4447_v3 = vrot.slane %v4446_v54, 1  ;;  %v4159_v10 = vsel %vm3876_vm6, %v4045_v1, -inf  ;;  %v4219_v15 = vsel %vm3724_vm2, %v4045_v1, -inf  ;;  %v3946_v23 = vrot.slane %v5979_v30, 1 }
  0x8c   : > { %v4554_v11 = vmax.f32 %v4552_v26, %v4553_v20  ;;  %v4058_v21 = vsel %vm3774_vm3, %v4038_v8, -inf  ;;  %v4107_v33 = vsel %vm3824_vm4, %v4038_v8, -inf  ;;  %v4158_v59 = vsel %vm3874_vm5, %v4038_v8, -inf  ;;  %2432 = vmatmul.mubr.bf16.gmra.mxu0 %v6687_v9  ;;  %v6709_v26 = vld [vmem:[%s6166_s10 + $0x210] sm:$0xff] }
  0x8d   : > { %v4448_v18 = vmax.f32 %v4446_v54, %v4447_v3  ;;  %v4059_v2 = vrot.slane %v4058_v21, 4  ;;  %v4108_v27 = vrot.slane %v4107_v33, 4  ;;  %v4160_v51 = vmax.f32 %v4158_v59, %v4159_v10 }
  0x8e   : > { %v4220_v52 = vrot.slane %v4219_v15, 4  ;;  %v3947_v31 = vrot.slane %v6671_v39, 1  ;;  %v4002_v35 = vrot.slane %v6671_v39, 2  ;;  %v4003_v25 = vrot.slane %v6674_v40, 2 }
  0x8f   : > { %v4966_v28 = vsel %vm3876_vm6, %v4393_v57, %v4448_v18  ;;  %v4060_v38 = vmax.f32 %v4058_v21, %v4059_v2  ;;  %v4109_v41 = vmax.f32 %v4107_v33, %v4108_v27  ;;  %v4161_v0 = vrot.slane %v4160_v51, 4 }
  0x90   : > { %v4973_v37 = vsel %vm4919_vm7, %v4966_v28, %v4505_v5  ;;  %v4221_v49 = vmax.f32 %v4219_v15, %v4220_v52  ;;  %v3948_v50 = vsel %vm3617_vm0, %v3946_v23, %v3947_v31  ;;  %v3988_v13 = vmax.f32 %v5979_v30, %v3947_v31 }
  0x91   : > { %v6705_v48 = vsel %vm3724_vm2, %v4973_v37, %v4554_v11  ;;  %v4061_v54 = vrot.slane %v4060_v38, 2  ;;  %v4110_v55 = vrot.slane %v4109_v41, 2  ;;  %v4162_v29 = vmax.f32 %v4160_v51, %v4161_v0 }
  0x92   : > { %v3981_v57 = vmax.f32 %v5980_v56, %v3948_v50  ;;  %v4222_v20 = vrot.slane %v4221_v49, 2  ;;  %v4271_v1 = vrot.slane %v6630_v19, 1  ;;  %v4004_v3 = vsel %vm3674_vm1, %v4002_v35, %v4003_v25 }
  0x93   : > { %v4044_v5 = vmax.f32 %v3988_v13, %v4003_v25  ;;  %v4062_v8 = vmax.f32 %v4060_v38, %v4061_v54  ;;  %v4111_v11 = vmax.f32 %v4109_v41, %v4110_v55  ;;  %v4163_v10 = vrot.slane %v4162_v29, 2  ;;  %v270_v13 = vld [vmem:[%s6166_s10 + $0x1d0] sm:$0xff]  ;;  %v6726_v54 = vld [vmem:[%s6166_s10 + $0x208] sm:$0xff] }
  0x94   : > { %v4037_v15 = vmax.f32 %v3981_v57, %v4004_v3  ;;  %v4223_v18 = vmax.f32 %v4221_v49, %v4222_v20  ;;  %v6718_v21 = vpack.c.bf16 %v6709_v26, %v6702_v45  ;;  %v4600_v57 = vrot.slane %v6702_v45, 1 }
  0x95   : > { %v4150_v30 = vsel %vm3876_vm6, %v4044_v5, -inf  ;;  %v4212_v23 = vsel %vm3724_vm2, %v4044_v5, -inf  ;;  %v4063_v33 = vrot.slane %v4062_v8, 1  ;;  %v4112_v59 = vrot.slane %v4111_v11, 1 }
  0x96   : > { %v4164_v2 = vmax.f32 %v4162_v29, %v4163_v10  ;;  %v4051_v27 = vsel %vm3774_vm3, %v4037_v15, -inf  ;;  %v4224_v51 = vrot.slane %v4223_v18, 1  ;;  %v4100_v28 = vsel %vm3824_vm4, %v4037_v15, -inf  ;;  %2542 = vmatprep.mubr.bf16.mxu1 %v6718_v21 }
  0x97   : > { %v4052_v52 = vrot.slane %v4051_v27, 4  ;;  %v4149_v31 = vsel %vm3874_vm5, %v4037_v15, -inf  ;;  %v4064_v35 = vmax.f32 %v4062_v8, %v4063_v33  ;;  %v4113_v25 = vmax.f32 %v4111_v11, %v4112_v59 }
  0x98   : > { %v4165_v37 = vrot.slane %v4164_v2, 1  ;;  %v4101_v38 = vrot.slane %v4100_v28, 4  ;;  %v4225_v41 = vmax.f32 %v4223_v18, %v4224_v51  ;;  %v4151_v49 = vmax.f32 %v4149_v31, %v4150_v30 }
  0x99   : > { %v4053_v0 = vmax.f32 %v4051_v27, %v4052_v52  ;;  %v4213_v50 = vrot.slane %v4212_v23, 4  ;;  %v4936_v29 = vsel %vm4934_vm8, %v6321_v61, %v4064_v35  ;;  %v4268_v15 = vrot.slane %v6674_v40, 1  ;;  %v6738_v61 = vld [vmem:[%s6166_s10 + $0x158] sm:$0xff] }
  0x9a   : > { %v4166_v55 = vmax.f32 %v4164_v2, %v4165_v37  ;;  %v4102_v56 = vmax.f32 %v4100_v28, %v4101_v38  ;;  %v4944_v20 = vsel %vm4942_vm9, %v4936_v29, %v4113_v25  ;;  %v4152_v5 = vrot.slane %v4151_v49, 4  ;;  %v6742_v2 = vld [vmem:[%s6166_s10 + $0x190] sm:$0xff] }
  0x9b   : > { %v4054_v3 = vrot.slane %v4053_v0, 2  ;;  %v4214_v8 = vmax.f32 %v4212_v23, %v4213_v50  ;;  %v4601_v18 = vsel %vm3617_vm0, %v4599_v32, %v4600_v57  ;;  %v4656_v51 = vrot.slane %v6709_v26, 2 }
  0x9c   : > { %v4951_v11 = vsel %vm3674_vm1, %v4944_v20, %v4166_v55  ;;  %v4103_v10 = vrot.slane %v4102_v56, 2  ;;  %v4153_v45 = vmax.f32 %v4151_v49, %v4152_v5  ;;  %v4628_v27 = vmax.f32 %v6548_v58, %v4601_v18  ;;  %v6765_v55 = vld [vmem:[%s6166_s10 + $0x188] sm:$0xff] }
  0x9d   : > { %v4958_v30 = vsel %vm3617_vm0, %v4951_v11, %v4225_v41  ;;  %v4055_v33 = vmax.f32 %v4053_v0, %v4054_v3  ;;  %v4215_v59 = vrot.slane %v4214_v8, 2  ;;  %v6748_v52 = vpack.c.bf16 %v6726_v54, %v270_v13 }
  0x9e   : > { %5014 = vst [vmem:[%s6572_s21 + $0x8] sm:$0xff] %v4958_v30  ;;  %v4104_v23 = vmax.f32 %v4102_v56, %v4103_v10  ;;  %v4154_v28 = vrot.slane %v4153_v45, 2  ;;  %v4597_v35 = vrot.slane %v270_v13, 1  ;;  %v4691_v37 = vmax.f32 %v4628_v27, %v4656_v51  ;;  %v6762_v13 = vld [vmem:[%s6166_s10 + $0x150] sm:$0xff] }
  0x9f   : > { %v4056_v32 = vrot.slane %v4055_v33, 1  ;;  %v4216_v31 = vmax.f32 %v4214_v8, %v4215_v59  ;;  %2543 = vmatmul.mubr.bf16.gmra.mxu1 %v6748_v52  ;;  %v8738_v38 = vrot.slane %v6726_v54, 2  ;;  %v6756_v58 = vpack.c.bf16 %v6742_v2, %v6738_v61 }
  0xa0   : > { %v4105_v25 = vrot.slane %v4104_v23, 1  ;;  %v4155_v0 = vmax.f32 %v4153_v45, %v4154_v28  ;;  %v4598_v50 = vsel %vm3617_vm0, %v4596_v47, %v4597_v35  ;;  %v6768_v56 = vmax.f32 %v6551_v60, %v4600_v57 }
  0xa1   : > { %v4057_v41 = vmax.f32 %v4055_v33, %v4056_v32  ;;  %v4217_v49 = vrot.slane %v4216_v31, 1  ;;  %v6771_v20 = vsel %vm3874_vm5, %v4691_v37, -inf  ;;  %v4627_v3 = vmax.f32 %v6577_v14, %v4598_v50  ;;  %2441 = vmatprep.mubr.bf16.mxu0 %v6756_v58  ;;  %v6817_v50 = vld [vmem:[%s6166_s10 + $0x240] sm:$0x1] }
  0xa2   : > { %v4106_v29 = vmax.f32 %v4104_v23, %v4105_v25  ;;  %v4156_v5 = vrot.slane %v4155_v0, 1  ;;  %v4272_v11 = vrot.slane %v6738_v61, 1  ;;  %v4327_v57 = vrot.slane %v6738_v61, 2  ;;  %v6844_v23 = vld [vmem:[%s6166_s10 + $0x200] sm:$0xff] }
  0xa3   : > { %v4218_v8 = vmax.f32 %v4216_v31, %v4217_v49  ;;  %v4935_v47 = vsel %vm4934_vm8, %v6461_v6, %v4057_v41  ;;  %v4690_v60 = vmax.f32 %v4627_v3, %v8738_v38  ;;  %v4328_v18 = vrot.slane %v6742_v2, 2 }
  0xa4   : > { %v4943_v10 = vsel %vm4942_vm9, %v4935_v47, %v4106_v29  ;;  %v4157_v14 = vmax.f32 %v4155_v0, %v4156_v5  ;;  %v6784_v30 = vmax.f32 %v6588_v34, %v4597_v35  ;;  %v4273_v6 = vsel %vm3617_vm0, %v4271_v1, %v4272_v11 }
  0xa5   : > { %v4311_v33 = vmax.f32 %v6630_v19, %v4272_v11  ;;  %v4304_v45 = vmax.f32 %v6627_v17, %v4273_v6  ;;  %v4329_v59 = vsel %vm3674_vm1, %v4327_v57, %v4328_v18  ;;  %v6795_v27 = vpack.c.bf16 %v6765_v55, %v6762_v13  ;;  %v6803_v19 = vld [vmem:[%s6166_s10 + $0x248] sm:$0x1] }
  0xa6   : > { %v4950_v34 = vsel %vm3674_vm1, %v4943_v10, %v4157_v14  ;;  %v6799_v32 = vsel %vm3874_vm5, %v4690_v60, -inf  ;;  %v4269_v28 = vrot.slane %v6762_v13, 1  ;;  %v4324_v35 = vrot.slane %v6762_v13, 2 }
  0xa7   : > { %v4367_v1 = vmax.f32 %v4311_v33, %v4328_v18  ;;  %v4957_v17 = vsel %vm3617_vm0, %v4950_v34, %v4218_v8  ;;  %v4360_v31 = vmax.f32 %v4304_v45, %v4329_v59  ;;  %2442 = vmatmul.mubr.bf16.gmra.mxu0 %v6795_v27  ;;  %v4325_v25 = vrot.slane %v6765_v55, 2 }
  0xa8   : > { %5013 = vst [vmem:[%s6572_s21] sm:$0xff] %v4957_v17  ;;  %v4270_v49 = vsel %vm3617_vm0, %v4268_v15, %v4269_v28  ;;  %v4310_v60 = vmax.f32 %v6674_v40, %v4269_v28  ;;  %v6826_v15 = vpack.c.bf16 %v6803_v19, %v6803_v19  ;;  %v6832_v40 = vpack.c.bf16 %v6817_v50, %v6817_v50 }
  0xa9   : > { %v4432_v37 = vsel %vm3876_vm6, %v4367_v1, -inf  ;;  %v4492_v41 = vsel %vm3724_vm2, %v4367_v1, -inf  ;;  %v4541_v0 = vsel %vm3774_vm3, %v4367_v1, -inf  ;;  %v4380_v29 = vsel %vm3824_vm4, %v4360_v31, -inf }
  0xaa   : > { %v4431_v3 = vsel %vm3874_vm5, %v4360_v31, -inf  ;;  %v4493_v5 = vrot.slane %v4492_v41, 4  ;;  %v4542_v8 = vrot.slane %v4541_v0, 4  ;;  %v4381_v47 = vrot.slane %v4380_v29, 4  ;;  %2552 = vmatprep.mubr.bf16.mxu1 %v6826_v15  ;;  %8797 = vst [vmem:[#allocation8_spill] sm:$0xff] %v6832_v40 }
  0xab   : > { %v4433_v11 = vmax.f32 %v4431_v3, %v4432_v37  ;;  %v4303_v10 = vmax.f32 %v6671_v39, %v4270_v49  ;;  %v4326_v14 = vsel %vm3674_vm1, %v4324_v35, %v4325_v25  ;;  %v4366_v59 = vmax.f32 %v4310_v60, %v4325_v25  ;;  %2553 = vmatmul.mubr.bf16.gmra.mxu1 %v6832_v40 }
  0xac   : > { %v4494_v57 = vmax.f32 %v4492_v41, %v4493_v5  ;;  %v4543_v18 = vmax.f32 %v4541_v0, %v4542_v8  ;;  %v4382_v6 = vmax.f32 %v4380_v29, %v4381_v47  ;;  %v4666_v39 = vrot.slane %v6803_v19, 2 }
  0xad   : > { %v4434_v33 = vrot.slane %v4433_v11, 4  ;;  %v4359_v45 = vmax.f32 %v4303_v10, %v4326_v14  ;;  %v4423_v25 = vsel %vm3876_vm6, %v4366_v59, -inf  ;;  %v4485_v3 = vsel %vm3724_vm2, %v4366_v59, -inf }
  0xae   : > { %v4495_v34 = vrot.slane %v4494_v57, 2  ;;  %v4544_v1 = vrot.slane %v4543_v18, 2  ;;  %v4383_v28 = vrot.slane %v4382_v6, 2 }
  0xaf   : > { %v4435_v17 = vmax.f32 %v4433_v11, %v4434_v33  ;;  %v4373_v31 = vsel %vm3824_vm4, %v4359_v45, -inf  ;;  %v4422_v35 = vsel %vm3874_vm5, %v4359_v45, -inf  ;;  %v4486_v11 = vrot.slane %v4485_v3, 4 }
  0xb0   : > { %v4496_v37 = vmax.f32 %v4494_v57, %v4495_v34  ;;  %v4545_v41 = vmax.f32 %v4543_v18, %v4544_v1  ;;  %v4374_v0 = vrot.slane %v4373_v31, 4  ;;  %v4384_v49 = vmax.f32 %v4382_v6, %v4383_v28 }
  0xb1   : > { %v4436_v29 = vrot.slane %v4435_v17, 2  ;;  %v4424_v19 = vmax.f32 %v4422_v35, %v4423_v25  ;;  %v4534_v18 = vsel %vm3774_vm3, %v4366_v59, -inf  ;;  %v4487_v34 = vmax.f32 %v4485_v3, %v4486_v11  ;;  %v6841_v25 = vld [vmem:[%s6166_s10 + $0x1c8] sm:$0xff] }
  0xb2   : > { %v4497_v5 = vrot.slane %v4496_v37, 1  ;;  %v4546_v8 = vrot.slane %v4545_v41, 1  ;;  %v4375_v47 = vmax.f32 %v4373_v31, %v4374_v0  ;;  %v4385_v10 = vrot.slane %v4384_v49, 1 }
  0xb3   : > { %v4437_v60 = vmax.f32 %v4435_v17, %v4436_v29  ;;  %v4425_v57 = vrot.slane %v4424_v19, 4  ;;  %v4535_v35 = vrot.slane %v4534_v18, 4  ;;  %v4488_v31 = vrot.slane %v4487_v34, 2 }
  0xb4   : > { %v4498_v14 = vmax.f32 %v4496_v37, %v4497_v5  ;;  %v4547_v33 = vmax.f32 %v4545_v41, %v4546_v8  ;;  %v4376_v45 = vrot.slane %v4375_v47, 2  ;;  %v4386_v6 = vmax.f32 %v4384_v49, %v4385_v10 }
  0xb5   : > { %v4438_v1 = vrot.slane %v4437_v60, 1  ;;  %v4426_v28 = vmax.f32 %v4424_v19, %v4425_v57  ;;  %v4667_v17 = vsel %vm3674_vm1, %v4656_v51, %v4666_v39  ;;  %v4664_v59 = vrot.slane %v6817_v50, 2 }
  0xb6   : > { %v4377_v38 = vmax.f32 %v4375_v47, %v4376_v45  ;;  %v4536_v0 = vmax.f32 %v4534_v18, %v4535_v35  ;;  %v4698_v49 = vmax.f32 %v6768_v56, %v4667_v17  ;;  %v4489_v19 = vmax.f32 %v4487_v34, %v4488_v31 }
  0xb7   : > { %v4439_v37 = vmax.f32 %v4437_v60, %v4438_v1  ;;  %v4427_v41 = vrot.slane %v4426_v28, 2  ;;  %v8798_v3 = vrot.slane %v6726_v54, 2  ;;  %v6856_v8 = vpack.c.bf16 %v6844_v23, %v6841_v25 }
  0xb8   : > { %v4378_v29 = vrot.slane %v4377_v38, 1  ;;  %v4537_v39 = vrot.slane %v4536_v0, 2  ;;  %v4730_v50 = vsel %vm3876_vm6, %v4698_v49, -inf  ;;  %v4490_v56 = vrot.slane %v4489_v19, 1 }
  0xb9   : > { %v4665_v5 = vsel %vm3674_vm1, %v8798_v3, %v4664_v59  ;;  %v4965_v26 = vsel %vm3876_vm6, %v4386_v6, %v4439_v37  ;;  %v4428_v51 = vmax.f32 %v4426_v28, %v4427_v41  ;;  %v4731_v10 = vmax.f32 %v6771_v20, %v4730_v50  ;;  %2451 = vmatprep.mubr.bf16.mxu0 %v6856_v8 }
  0xba   : > { %v4972_v47 = vsel %vm4919_vm7, %v4965_v26, %v4498_v14  ;;  %v4379_v11 = vmax.f32 %v4377_v38, %v4378_v29  ;;  %v4538_v57 = vmax.f32 %v4536_v0, %v4537_v39  ;;  %v4786_v18 = vsel %vm3724_vm2, %v4698_v49, -inf }
  0xbb   : > { %v6864_v54 = vsel %vm3724_vm2, %v4972_v47, %v4547_v33  ;;  %v4429_v60 = vrot.slane %v4428_v51, 1  ;;  %v4491_v45 = vmax.f32 %v4489_v19, %v4490_v56  ;;  %v4732_v34 = vrot.slane %v4731_v10, 4 }
  0xbc   : > { %v4787_v6 = vrot.slane %v4786_v18, 4  ;;  %v4835_v1 = vsel %vm3774_vm3, %v4698_v49, -inf  ;;  %v4539_v14 = vrot.slane %v4538_v57, 1  ;;  %v4884_v35 = vsel %vm3824_vm4, %v4698_v49, -inf }
  0xbd   : > { %v4430_v28 = vmax.f32 %v4428_v51, %v4429_v60  ;;  %v4836_v38 = vrot.slane %v4835_v1, 4  ;;  %v4733_v20 = vmax.f32 %v4731_v10, %v4732_v34  ;;  %v4885_v17 = vrot.slane %v4884_v35, 4 }
  0xbe   : > { %v4788_v31 = vmax.f32 %v4786_v18, %v4787_v6  ;;  %v4697_v33 = vmax.f32 %v6784_v30, %v4665_v5  ;;  %v4540_v59 = vmax.f32 %v4538_v57, %v4539_v14  ;;  %v4594_v0 = vrot.slane %v6841_v25, 1 }
  0xbf   : > { %v4964_v37 = vsel %vm3876_vm6, %v4379_v11, %v4430_v28  ;;  %v4837_v41 = vmax.f32 %v4835_v1, %v4836_v38  ;;  %v4734_v19 = vrot.slane %v4733_v20, 2  ;;  %v4886_v26 = vmax.f32 %v4884_v35, %v4885_v17 }
  0xc0   : > { %v4971_v29 = vsel %vm4919_vm7, %v4964_v37, %v4491_v45  ;;  %v4789_v3 = vrot.slane %v4788_v31, 2  ;;  %v4721_v39 = vsel %vm3876_vm6, %v4697_v33, -inf  ;;  %v4779_v50 = vsel %vm3724_vm2, %v4697_v33, -inf }
  0xc1   : > { %v6874_v51 = vsel %vm3724_vm2, %v4971_v29, %v4540_v59  ;;  %v4838_v49 = vrot.slane %v4837_v41, 2  ;;  %v4735_v30 = vmax.f32 %v4733_v20, %v4734_v19  ;;  %v4887_v47 = vrot.slane %v4886_v26, 2 }
  0xc2   : > { %v4790_v5 = vmax.f32 %v4788_v31, %v4789_v3  ;;  %v4722_v11 = vmax.f32 %v6799_v32, %v4721_v39  ;;  %v4780_v10 = vrot.slane %v4779_v50, 4  ;;  %v4828_v60 = vsel %vm3774_vm3, %v4697_v33, -inf }
  0xc3   : > { %v4839_v56 = vmax.f32 %v4837_v41, %v4838_v49  ;;  %v4877_v57 = vsel %vm3824_vm4, %v4697_v33, -inf  ;;  %v4736_v18 = vrot.slane %v4735_v30, 1  ;;  %v4888_v34 = vmax.f32 %v4886_v26, %v4887_v47  ;;  %v268_v49 = vld [vmem:[%s6166_s10 + $0x1c0] sm:$0xff]  ;;  %v6891_v47 = vld [vmem:[%s6166_s10 + $0x1f8] sm:$0xff] }
  0xc4   : > { %v4791_v45 = vrot.slane %v4790_v5, 1  ;;  %v4723_v6 = vrot.slane %v4722_v11, 4  ;;  %v4781_v28 = vmax.f32 %v4779_v50, %v4780_v10  ;;  %v4829_v14 = vrot.slane %v4828_v60, 4 }
  0xc5   : > { %v4840_v1 = vrot.slane %v4839_v56, 1  ;;  %v4878_v38 = vrot.slane %v4877_v57, 4  ;;  %v4737_v35 = vmax.f32 %v4735_v30, %v4736_v18  ;;  %v4889_v31 = vrot.slane %v4888_v34, 1 }
  0xc6   : > { %v4792_v20 = vmax.f32 %v4790_v5, %v4791_v45  ;;  %v4724_v32 = vmax.f32 %v4722_v11, %v4723_v6  ;;  %v4782_v59 = vrot.slane %v4781_v28, 2  ;;  %v4830_v37 = vmax.f32 %v4828_v60, %v4829_v14 }
  0xc7   : > { %v4841_v17 = vmax.f32 %v4839_v56, %v4840_v1  ;;  %v4879_v41 = vmax.f32 %v4877_v57, %v4878_v38  ;;  %v4890_v29 = vmax.f32 %v4888_v34, %v4889_v31  ;;  %v4988_v33 = vsel %vm4934_vm8, %v6680_v43, %v4737_v35  ;;  %v6907_v31 = vld [vmem:[%s6166_s10 + $0x30] sm:$0xff] }
  0xc8   : > { %v4725_v19 = vrot.slane %v4724_v32, 2  ;;  %v8799_v3 = vrot.slane %v6742_v2, 1  ;;  %v4995_v39 = vsel %vm4942_vm9, %v4988_v33, %v4792_v20  ;;  %v4783_v50 = vmax.f32 %v4781_v28, %v4782_v59  ;;  %v5629_v20 = vld [vmem:[%s8734_s1 + $0x158] ss:$24 sps:$4 sm:$0xff]  }
  0xc9   : > { %v4831_v30 = vrot.slane %v4830_v37, 2  ;;  %v4880_v5 = vrot.slane %v4879_v41, 2  ;;  %v4590_v11 = vrot.slane %v6765_v55, 1  ;;  %v5002_v43 = vsel %vm3674_vm1, %v4995_v39, %v4841_v17 }
  0xca   : > { %v4595_v26 = vsel %vm3617_vm0, %v8799_v3, %v4594_v0  ;;  %v4726_v56 = vmax.f32 %v4724_v32, %v4725_v19  ;;  %v5009_v60 = vsel %vm3617_vm0, %v5002_v43, %v4890_v29  ;;  %v4784_v57 = vrot.slane %v4783_v50, 1  ;;  %v6910_v32 = vld [vmem:[%s6166_s10 + $0x68] sm:$0xff]  ;;  %v282_v29 = vld [vmem:[%s6166_s10 + $0x230] sm:$0x1] }
  0xcb   : > { %v4626_v10 = vmax.f32 %v6738_v61, %v4595_v26  ;;  %v4832_v18 = vmax.f32 %v4830_v37, %v4831_v30  ;;  %v4881_v45 = vmax.f32 %v4879_v41, %v4880_v5  ;;  %5023 = vst [vmem:[%s6572_s21 + $0x50] sm:$0xff] %v5009_v60  ;;  %v4654_v6 = vrot.slane %v6844_v23, 2  ;;  %v283_v41 = vld [vmem:[%s6166_s10 + $0x238] sm:$0x1]  ;;  %v6921_v26 = vld [vmem:[%s6166_s10 + $0x28] sm:$0xff] }
  0xcc   : > { %v4727_v34 = vrot.slane %v4726_v56, 1  ;;  %v6900_v1 = vpack.c.bf16 %v6891_v47, %v268_v49  ;;  %v4591_v28 = vrot.slane %v268_v49, 1  ;;  %v4785_v14 = vmax.f32 %v4783_v50, %v4784_v57  ;;  %v6924_v49 = vld [vmem:[%s6166_s10 + $0x60] sm:$0xff]  ;;  %v6953_v60 = vld [vmem:[%s6166_s10 + $0x58] sm:$0xff] }
  0xcd   : > { %v4833_v38 = vrot.slane %v4832_v18, 1  ;;  %v4882_v61 = vrot.slane %v4881_v45, 1  ;;  %v4653_v35 = vrot.slane %v6891_v47, 2  ;;  %v4633_v17 = vmax.f32 %v6742_v2, %v4594_v0 }
  0xce   : > { %v4728_v23 = vmax.f32 %v4726_v56, %v4727_v34  ;;  %v4689_v59 = vmax.f32 %v4626_v10, %v4654_v6  ;;  %2452 = vmatmul.mubr.bf16.gmra.mxu0 %v6900_v1  ;;  %v4592_v37 = vsel %vm3617_vm0, %v4590_v11, %v4591_v28  ;;  %v4632_v0 = vmax.f32 %v6765_v55, %v4591_v28  ;;  %v6950_v10 = vld [vmem:[%s6166_s10 + $0x20] sm:$0xff]  ;;  %v6963_v28 = vld [vmem:[%s6166_s10 + $0x98] sm:$0xff] }
  0xcf   : > { %v4834_v33 = vmax.f32 %v4832_v18, %v4833_v38  ;;  %v4883_v19 = vmax.f32 %v4881_v45, %v4882_v61  ;;  %v4625_v3 = vmax.f32 %v6762_v13, %v4592_v37  ;;  %v8739_v39 = vmov 0   ;;  %v5637_v13 = vld [vmem:[%s8734_s1 + $0x12c] ss:$24 sps:$4 sm:$0xff]   ;;  %v5635_v34 = vld [vmem:[%s8734_s1 + $0x128] ss:$24 sps:$4 sm:$0xff]  }
  0xd0   : > { %v4987_v25 = vsel %vm4934_vm8, %v6705_v48, %v4728_v23  ;;  %v4711_v2 = vsel %vm3874_vm5, %v4689_v59, -inf  ;;  %2684 = vmatprep.mubr.bf16.mxu1 %v8739_v39  ;;  %v6933_v50 = vpack.c.bf16 %v6910_v32, %v6907_v31  ;;  %v6939_v5 = vpack.c.bf16 %v283_v41, %v283_v41  ;;  %v6972_v23 = vld [vmem:[%s6166_s10 + $0xd0] sm:$0xff] }
  0xd1   : > { %v4994_v30 = vsel %vm4942_vm9, %v4987_v25, %v4785_v14  ;;  %v4688_v48 = vmax.f32 %v4625_v3, %v4653_v35  ;;  %v4662_v47 = vrot.slane %v283_v41, 2  ;;  %v6943_v11 = vpack.c.bf16 %v282_v29, %v282_v29  ;;  %v5647_v41 = vld [vmem:[%s8734_s1 + $0xc8] ss:$24 sps:$4 sm:$0xff]  }
  0xd2   : > { %8800 = vst [vmem:[#allocation9_spill] sm:$0xff] %v6933_v50  ;;  %v5001_v55 = vsel %vm3674_vm1, %v4994_v30, %v4834_v33  ;;  %2685 = vmatmul.mubr.bf16.vlgmr.msra.gmra.mxu1 %v6933_v50  ;;  %v4660_v43 = vrot.slane %v282_v29, 2  ;;  %v6947_v56 = vpack.c.bf16 %v6924_v49, %v6921_v26  ;;  %2461 = vmatprep.mubr.bf16.mxu0 %v6939_v5  ;;  %v5656_v50 = vld [vmem:[%s8734_s1 + $0x458] ss:$24 sps:$4 sm:$0xff]  }
  0xd3   : > { %8801 = vst [vmem:[#allocation10_spill] sm:$0xff] %v6943_v11  ;;  %v5008_v57 = vsel %vm3617_vm0, %v5001_v55, %v4883_v19  ;;  %v4702_v18 = vsel %vm3874_vm5, %v4688_v48, -inf  ;;  %2744 = vmatpush1.bf16.msra.mxu1 %v5629_v20  ;;  %v4663_v45 = vsel %vm3674_vm1, %v4654_v6, %v4662_v47  ;;  %v5643_v20 = vld [vmem:[%s8734_s1 + $0xfc] ss:$24 sps:$4 sm:$0xff]   ;;  %2694 = vmatprep.mubr.bf16.mxu1 %v8739_v39  ;;  %v5641_v48 = vld [vmem:[%s8734_s1 + $0xf8] ss:$24 sps:$4 sm:$0xff]  }
  0xd4   : > { %8802 = vst [vmem:[#allocation11_spill] sm:$0xff] %v6947_v56  ;;  %5022 = vst [vmem:[%s6572_s21 + $0x48] sm:$0xff] %v5008_v57  ;;  %v4696_v38 = vmax.f32 %v4633_v17, %v4663_v45  ;;  %v4661_v61 = vsel %vm3674_vm1, %v4653_v35, %v4660_v43  ;;  %2745 = vmatprep.subr.bf16.mxu1 %v5637_v13  ;;  %v6980_v17 = vpack.c.bf16 %v6953_v60, %v6950_v10 }
  0xd5   : > { %v4695_v37 = vmax.f32 %v4632_v0, %v4661_v61 }
  0xd6   : > { %8803 = vst [vmem:[#allocation12_spill] sm:$0xff] %v6980_v17  ;;  %v4712_v29 = vsel %vm3876_vm6, %v4696_v38, -inf  ;;  %v4772_v33 = vsel %vm3724_vm2, %v4696_v38, -inf  ;;  %v4821_v19 = vsel %vm3774_vm3, %v4696_v38, -inf  ;;  %v4870_v3 = vsel %vm3824_vm4, %v4696_v38, -inf  ;;  %2462 = vmatmul.mubr.bf16.gmra.mxu0 %v6943_v11 }
  0xd7   : > { %v4713_v25 = vmax.f32 %v4711_v2, %v4712_v29  ;;  %v4773_v0 = vrot.slane %v4772_v33, 4  ;;  %v4822_v13 = vrot.slane %v4821_v19, 4  ;;  %v4871_v30 = vrot.slane %v4870_v3, 4  ;;  %2746 = vmatpush1.bf16.msra.mxu1 %v5635_v34  ;;  %2593 = vmatprep.mubr.bf16.mxu0 %v6947_v56  ;;  %v5649_v2 = vld [vmem:[%s8734_s1 + $0xcc] ss:$24 sps:$4 sm:$0xff]  }
  0xd8   : > { %v4703_v47 = vsel %vm3876_vm6, %v4695_v37, -inf  ;;  %v4765_v55 = vsel %vm3724_vm2, %v4695_v37, -inf  ;;  %v4814_v43 = vsel %vm3774_vm3, %v4695_v37, -inf  ;;  %v4863_v57 = vsel %vm3824_vm4, %v4695_v37, -inf  ;;  %2747 = vmatprep.subr.bf16.mxu1 %v5643_v20 }
  0xd9   : > { %v4714_v45 = vrot.slane %v4713_v25, 4  ;;  %v4774_v34 = vmax.f32 %v4772_v33, %v4773_v0  ;;  %v4823_v38 = vmax.f32 %v4821_v19, %v4822_v13  ;;  %v4872_v61 = vmax.f32 %v4870_v3, %v4871_v30  ;;  %v5655_v0 = vld [vmem:[%s8734_s1 + $0x9c] ss:$24 sps:$4 sm:$0xff]  }
  0xda   : > { %v4704_v29 = vmax.f32 %v4702_v18, %v4703_v47  ;;  %v4766_v39 = vrot.slane %v4765_v55, 4  ;;  %v4815_v35 = vrot.slane %v4814_v43, 4  ;;  %v4864_v59 = vrot.slane %v4863_v57, 4 }
  0xdb   : > { %v4715_v14 = vmax.f32 %v4713_v25, %v4714_v45  ;;  %v4775_v6 = vrot.slane %v4774_v34, 2  ;;  %v4824_v37 = vrot.slane %v4823_v38, 2  ;;  %v4873_v20 = vrot.slane %v4872_v61, 2  ;;  %2748 = vmatpush1.bf16.msra.mxu1 %v5641_v48  ;;  %v5664_v25 = vld [vmem:[%s8734_s1 + $0x42c] ss:$24 sps:$4 sm:$0xff]  }
  0xdc   : > { %v4705_v33 = vrot.slane %v4704_v29, 4  ;;  %v4767_v19 = vmax.f32 %v4765_v55, %v4766_v39  ;;  %v4816_v3 = vmax.f32 %v4814_v43, %v4815_v35  ;;  %v4865_v18 = vmax.f32 %v4863_v57, %v4864_v59  ;;  %2749 = vmatprep.subr.bf16.mxu1 %v5649_v2  ;;  %v5653_v43 = vld [vmem:[%s8734_s1 + $0x98] ss:$24 sps:$4 sm:$0xff]  }
  0xdd   : > { %v4716_v13 = vrot.slane %v4715_v14, 2  ;;  %v4776_v30 = vmax.f32 %v4774_v34, %v4775_v6  ;;  %v4825_v48 = vmax.f32 %v4823_v38, %v4824_v37  ;;  %v4874_v47 = vmax.f32 %v4872_v61, %v4873_v20  ;;  %v5661_v38 = vld [vmem:[%s8734_s1 + $0x6c] ss:$24 sps:$4 sm:$0xff]  }
  0xde   : > { %v4706_v45 = vmax.f32 %v4704_v29, %v4705_v33  ;;  %v4768_v56 = vrot.slane %v4767_v19, 2  ;;  %v4817_v11 = vrot.slane %v4816_v3, 2  ;;  %v4866_v40 = vrot.slane %v4865_v18, 2  ;;  %2594 = vmatmul.mubr.bf16.vlgmr.msra.gmra.mxu0 %v6980_v17 }
  0xdf   : > { %v4717_v39 = vmax.f32 %v4715_v14, %v4716_v13  ;;  %v4777_v59 = vrot.slane %v4776_v30, 1  ;;  %v4826_v35 = vrot.slane %v4825_v48, 1  ;;  %v4875_v55 = vrot.slane %v4874_v47, 1  ;;  %2750 = vmatpush1.bf16.msra.mxu1 %v5647_v41  ;;  %2835 = vmatpush1.bf16.msra.mxu0 %v5656_v50  ;;  %v5662_v14 = vld [vmem:[%s8734_s1 + $0x428] ss:$24 sps:$4 sm:$0xff]  }
  0xe0   : > { %v4707_v57 = vrot.slane %v4706_v45, 2  ;;  %v4769_v6 = vmax.f32 %v4767_v19, %v4768_v56  ;;  %v4818_v2 = vmax.f32 %v4816_v3, %v4817_v11  ;;  %v4867_v34 = vmax.f32 %v4865_v18, %v4866_v40  ;;  %2751 = vmatprep.subr.bf16.mxu1 %v5655_v0  ;;  %2836 = vmatprep.subr.bf16.mxu0 %v5664_v25  ;;  %v5670_v40 = vld [vmem:[%s8734_s1 + $0x3fc] ss:$24 sps:$4 sm:$0xff]  }
  0xe1   : > { %v4718_v41 = vrot.slane %v4717_v39, 1  ;;  %v4778_v61 = vmax.f32 %v4776_v30, %v4777_v59  ;;  %v4827_v29 = vmax.f32 %v4825_v48, %v4826_v35  ;;  %v4876_v50 = vmax.f32 %v4874_v47, %v4875_v55  ;;  %v5659_v47 = vld [vmem:[%s8734_s1 + $0x68] ss:$24 sps:$4 sm:$0xff]  }
  0xe2   : > { %v4708_v11 = vmax.f32 %v4706_v45, %v4707_v57  ;;  %v4770_v56 = vrot.slane %v4769_v6, 1  ;;  %v4819_v37 = vrot.slane %v4818_v2, 1  ;;  %v4868_v20 = vrot.slane %v4867_v34, 1  ;;  %v7041_v45 = vld [vmem:[%s6166_s10 + $0x90] sm:$0xff] }
  0xe3   : > { %v4719_v33 = vmax.f32 %v4717_v39, %v4718_v41  ;;  %v8804_v19 = vrot.slane %v6963_v28, 1  ;;  %v8805_v3 = vrot.slane %v6924_v49, 1  ;;  %v8807_v13 = vrot.slane %v6972_v23, 2  ;;  %2752 = vmatpush1.bf16.msra.mxu1 %v5653_v43  ;;  %v7044_v39 = vld [vmem:[%s6166_s10 + $0xc8] sm:$0xff]  ;;  %2837 = vmatpush1.bf16.msra.mxu0 %v5662_v14 }
  0xe4   : > { %v8808_v30 = vrot.slane %v6963_v28, 2  ;;  %v4709_v59 = vrot.slane %v4708_v11, 1  ;;  %v4771_v35 = vmax.f32 %v4769_v6, %v4770_v56  ;;  %v4820_v55 = vmax.f32 %v4818_v2, %v4819_v37  ;;  %2753 = vmatprep.subr.bf16.mxu1 %v5661_v38  ;;  %v5668_v6 = vld [vmem:[%s8734_s1 + $0x3f8] ss:$24 sps:$4 sm:$0xff]   ;;  %2838 = vmatprep.subr.bf16.mxu0 %v5670_v40  ;;  %v5676_v38 = vld [vmem:[%s8734_s1 + $0x3cc] ss:$24 sps:$4 sm:$0xff]  }
  0xe5   : > { %v3635_v18 = vsel %vm3617_vm0, %v8805_v3, %v8804_v19  ;;  %v8806_v0 = vmov %v8804_v19  ;;  %v4869_v57 = vmax.f32 %v4867_v34, %v4868_v20  ;;  %v4986_v43 = vsel %vm4934_vm8, %v6864_v54, %v4719_v33 }
  0xe6   : > { %v3665_v25 = vmax.f32 %v6924_v49, %v8806_v0  ;;  %v3692_v48 = vsel %vm3674_vm1, %v8808_v30, %v8807_v13  ;;  %v5667_v49 = vld [vmem:[%s8734_s1 + $0x3c] ss:$24 sps:$4 sm:$0xff]   ;;  %v3658_v41 = vmax.f32 %v6921_v26, %v3635_v18  ;;  %v8809_v19 = vmov %v8807_v13 }
  0xe7   : > { %v7056_v0 = vpack.c.bf16 %v6972_v23, %v6963_v28  ;;  %v4993_v2 = vsel %vm4942_vm9, %v4986_v43, %v4778_v61  ;;  %v4710_v34 = vmax.f32 %v4708_v11, %v4709_v59  ;;  %v7064_v54 = vpack.c.bf16 %v7044_v39, %v7041_v45  ;;  %2754 = vmatpush1.bf16.msra.mxu1 %v5659_v47  ;;  %v5665_v61 = vld [vmem:[%s8734_s1 + $0x38] ss:$24 sps:$4 sm:$0xff]   ;;  %v5674_v47 = vld [vmem:[%s8734_s1 + $0x3c8] ss:$24 sps:$4 sm:$0xff]  }
  0xe8   : > { %v3722_v3 = vmax.f32 %v3665_v25, %v8809_v19  ;;  %v3631_v26 = vrot.slane %v7041_v45, 1  ;;  %v5000_v14 = vsel %vm3674_vm1, %v4993_v2, %v4827_v29  ;;  %v3715_v56 = vmax.f32 %v3658_v41, %v3692_v48  ;;  %2755 = vmatprep.subr.bf16.mxu1 %v5667_v49  ;;  %v5673_v25 = vld [vmem:[%s8734_s1 + $0xc] ss:$24 sps:$4 sm:$0xff]   ;;  %2839 = vmatpush1.bf16.msra.mxu0 %v5668_v6  ;;  %v5682_v19 = vld [vmem:[%s8734_s1 + $0x39c] ss:$24 sps:$4 sm:$0xff]  }
  0xe9   : > { %8810 = vst [vmem:[#allocation13_spill] sm:$0xff] %v7056_v0  ;;  %8811 = vst [vmem:[#allocation14_spill] sm:$0xff] %v7064_v54  ;;  %2603 = vmatprep.mubr.bf16.mxu0 %v7056_v0  ;;  %v3687_v40 = vrot.slane %v7041_v45, 2  ;;  %v5007_v11 = vsel %vm3617_vm0, %v5000_v14, %v4876_v50  ;;  %v4985_v20 = vsel %vm4934_vm8, %v6874_v51, %v4710_v34  ;;  %v8812_v29 = vrot.slane %v6953_v60, 1  ;;  %v7094_v48 = vld [vmem:[%s6166_s10 + $0xa0] sm:$0xff] }
  0xea   : > { %v3922_v37 = vsel %vm3876_vm6, %v3722_v3, -inf  ;;  %2604 = vmatmul.mubr.bf16.gmra.mxu0 %v7064_v54  ;;  %v3688_v18 = vrot.slane %v7044_v39, 2  ;;  %5021 = vst [vmem:[%s6572_s21 + $0x40] sm:$0xff] %v5007_v11  ;;  %v4992_v50 = vsel %vm4942_vm9, %v4985_v20, %v4771_v35  ;;  %v3760_v13 = vsel %vm3724_vm2, %v3715_v56, -inf  ;;  %v7101_v35 = vld [vmem:[%s6166_s10 + $0xd8] sm:$0xff]  ;;  %2840 = vmatprep.subr.bf16.mxu0 %v5676_v38 }
  0xeb   : > { %v3632_v33 = vsel %vm3617_vm0, %v8812_v29, %v3631_v26  ;;  %v3810_v51 = vsel %vm3774_vm3, %v3715_v56, -inf  ;;  %v3860_v30 = vsel %vm3824_vm4, %v3715_v56, -inf  ;;  %v4999_v59 = vsel %vm3674_vm1, %v4992_v50, %v4820_v55  ;;  %2756 = vmatpush1.bf16.msra.mxu1 %v5665_v61  ;;  %v5671_v38 = vld [vmem:[%s8734_s1 + $0x8] ss:$24 sps:$4 sm:$0xff]  }
  0xec   : > { %v3761_v49 = vrot.slane %v3760_v13, 4  ;;  %v3811_v43 = vrot.slane %v3810_v51, 4  ;;  %v3861_v41 = vrot.slane %v3860_v30, 4  ;;  %v5006_v3 = vsel %vm3617_vm0, %v4999_v59, %v4869_v57  ;;  %2757 = vmatprep.subr.bf16.mxu1 %v5673_v25  ;;  %2841 = vmatpush1.bf16.msra.mxu0 %v5674_v47  ;;  %v5680_v25 = vld [vmem:[%s8734_s1 + $0x398] ss:$24 sps:$4 sm:$0xff]  }
  0xed   : > { %v3921_v6 = vsel %vm3874_vm5, %v3715_v56, -inf  ;;  %v3657_v2 = vmax.f32 %v6950_v10, %v3632_v33  ;;  %v3664_v34 = vmax.f32 %v6953_v60, %v3631_v26  ;;  %5020 = vst [vmem:[%s6572_s21 + $0x38] sm:$0xff] %v5006_v3  ;;  %v3636_v29 = vrot.slane %v6910_v32, 1  ;;  %v5679_v60 = vld [vmem:[%s8734_s1 + $0x2dc] ss:$24 sps:$4 sm:$0xff]   ;;  %2842 = vmatprep.subr.bf16.mxu0 %v5682_v19 }
  0xee   : > { %v3762_v55 = vmax.f32 %v3760_v13, %v3761_v49  ;;  %v3812_v14 = vmax.f32 %v3810_v51, %v3811_v43  ;;  %v3862_v11 = vmax.f32 %v3860_v30, %v3861_v41  ;;  %v3923_v20 = vmax.f32 %v3921_v6, %v3922_v37  ;;  %v5688_v51 = vld [vmem:[%s8734_s1 + $0x36c] ss:$24 sps:$4 sm:$0xff]   ;;  %v5677_v43 = vld [vmem:[%s8734_s1 + $0x2d8] ss:$24 sps:$4 sm:$0xff]  }
  0xef   : > { %v3689_v57 = vsel %vm3674_vm1, %v3687_v40, %v3688_v18  ;;  %v3721_v56 = vmax.f32 %v3664_v34, %v3688_v18  ;;  %v7118_v10 = vpack.c.bf16 %v7101_v35, %v7094_v48  ;;  %v3637_v50 = vrot.slane %v7094_v48, 1  ;;  %2758 = vmatpush1.bf16.msra.mxu1 %v5671_v38  ;;  %v5685_v34 = vld [vmem:[%s8734_s1 + $0x2ac] ss:$24 sps:$4 sm:$0xff]   ;;  %v5686_v38 = vld [vmem:[%s8734_s1 + $0x368] ss:$24 sps:$4 sm:$0xff]  }
  0xf0   : > { %v3763_v26 = vrot.slane %v3762_v55, 2  ;;  %v3813_v37 = vrot.slane %v3812_v14, 2  ;;  %v3863_v61 = vrot.slane %v3862_v11, 2  ;;  %v3924_v33 = vrot.slane %v3923_v20, 4  ;;  %2759 = vmatprep.subr.bf16.mxu1 %v5679_v60  ;;  %2843 = vmatpush1.bf16.msra.mxu0 %v5680_v25  ;;  %v5694_v60 = vld [vmem:[%s8734_s1 + $0x33c] ss:$24 sps:$4 sm:$0xff]  }
  0xf1   : > { %8813 = vst [vmem:[#allocation15_spill] sm:$0xff] %v7118_v10  ;;  %v3714_v40 = vmax.f32 %v3657_v2, %v3689_v57  ;;  %v3913_v18 = vsel %vm3876_vm6, %v3721_v56, -inf  ;;  %2695 = vmatmul.mubr.bf16.gmra.mxu1 %v7118_v10  ;;  %v8814_v2 = vmov 0   ;;  %2844 = vmatprep.subr.bf16.mxu0 %v5688_v51  ;;  %v5683_v25 = vld [vmem:[%s8734_s1 + $0x2a8] ss:$24 sps:$4 sm:$0xff]  }
  0xf2   : > { %v3764_v30 = vmax.f32 %v3762_v55, %v3763_v26  ;;  %v3814_v47 = vmax.f32 %v3812_v14, %v3813_v37  ;;  %v3864_v59 = vmax.f32 %v3862_v11, %v3863_v61  ;;  %v3925_v49 = vmax.f32 %v3923_v20, %v3924_v33  ;;  %2704 = vmatprep.mubr.bf16.mxu1 %v8814_v2 }
  0xf3   : > { %v3753_v41 = vsel %vm3724_vm2, %v3714_v40, -inf  ;;  %v3803_v19 = vsel %vm3774_vm3, %v3714_v40, -inf  ;;  %v3853_v3 = vsel %vm3824_vm4, %v3714_v40, -inf  ;;  %v3912_v6 = vsel %vm3874_vm5, %v3714_v40, -inf  ;;  %2760 = vmatpush2.bf16.msra.mxu1 %v5677_v43 }
  0xf4   : > { %v3765_v55 = vrot.slane %v3764_v30, 1  ;;  %v3815_v14 = vrot.slane %v3814_v47, 1  ;;  %v3865_v11 = vrot.slane %v3864_v59, 1  ;;  %v3926_v20 = vrot.slane %v3925_v49, 2  ;;  %2761 = vmatprep.subr.bf16.mxu1 %v5685_v34  ;;  %2845 = vmatpush1.bf16.msra.mxu0 %v5686_v38  ;;  %v7172_v38 = vld [vmem:[%s6166_s10 + $0x108] sm:$0xff] }
  0xf5   : > { %v3754_v57 = vrot.slane %v3753_v41, 4  ;;  %v3804_v56 = vrot.slane %v3803_v19, 4  ;;  %v3854_v26 = vrot.slane %v3853_v3, 4  ;;  %v3914_v37 = vmax.f32 %v3912_v6, %v3913_v18  ;;  %v5691_v18 = vld [vmem:[%s8734_s1 + $0x27c] ss:$24 sps:$4 sm:$0xff]   ;;  %2846 = vmatprep.subr.bf16.mxu0 %v5694_v60 }
  0xf6   : > { %v3766_v61 = vmax.f32 %v3764_v30, %v3765_v55  ;;  %v3816_v33 = vmax.f32 %v3814_v47, %v3815_v14  ;;  %v3866_v40 = vmax.f32 %v3864_v59, %v3865_v11  ;;  %v3927_v13 = vmax.f32 %v3925_v49, %v3926_v20  ;;  %v5692_v49 = vld [vmem:[%s8734_s1 + $0x338] ss:$24 sps:$4 sm:$0xff]  }
  0xf7   : > { %v3755_v54 = vmax.f32 %v3753_v41, %v3754_v57  ;;  %v3805_v0 = vmax.f32 %v3803_v19, %v3804_v56  ;;  %v3855_v17 = vmax.f32 %v3853_v3, %v3854_v26  ;;  %v3915_v10 = vrot.slane %v3914_v37, 4  ;;  %v5700_v3 = vld [vmem:[%s8734_s1 + $0x30c] ss:$24 sps:$4 sm:$0xff]   ;;  %2762 = vmatpush2.bf16.msra.mxu1 %v5683_v25 }
  0xf8   : > { %v3928_v51 = vrot.slane %v3927_v13, 1  ;;  %v4917_v30 = vsel %vm3876_vm6, %v3766_v61, %v3816_v33  ;;  %v3638_v47 = vsel %vm3617_vm0, %v3636_v29, %v3637_v50  ;;  %v3666_v59 = vmax.f32 %v6910_v32, %v3637_v50  ;;  %v5689_v50 = vld [vmem:[%s8734_s1 + $0x278] ss:$24 sps:$4 sm:$0xff]   ;;  %v7175_v57 = vld [vmem:[%s6166_s10 + $0x140] sm:$0xff]  ;;  %2763 = vmatprep.subr.bf16.mxu1 %v5691_v18  ;;  %2847 = vmatpush1.bf16.msra.mxu0 %v5692_v49  ;;  %v5706_v33 = vld [vmem:[%s8734_s1 + $0x5dc] ss:$24 sps:$4 sm:$0xff]  }
  0xf9   : > { %v3756_v43 = vrot.slane %v3755_v54, 2  ;;  %v3806_v41 = vrot.slane %v3805_v0, 2  ;;  %v3856_v19 = vrot.slane %v3855_v17, 2  ;;  %v3916_v34 = vmax.f32 %v3914_v37, %v3915_v10  ;;  %2848 = vmatprep.subr.bf16.mxu0 %v5700_v3 }
  0xfa   : > { %v3929_v6 = vmax.f32 %v3927_v13, %v3928_v51  ;;  %v3659_v29 = vmax.f32 %v6907_v31, %v3638_v47  ;;  %v3694_v32 = vrot.slane %v7101_v35, 2  ;;  %v4925_v55 = vsel %vm4919_vm7, %v4917_v30, %v3866_v40  ;;  %v5697_v31 = vld [vmem:[%s8734_s1 + $0x24c] ss:$24 sps:$4 sm:$0xff]   ;;  %v5695_v30 = vld [vmem:[%s8734_s1 + $0x248] ss:$24 sps:$4 sm:$0xff]  }
  0xfb   : > { %v3757_v14 = vmax.f32 %v3755_v54, %v3756_v43  ;;  %v3807_v11 = vmax.f32 %v3805_v0, %v3806_v41  ;;  %v3857_v20 = vmax.f32 %v3855_v17, %v3856_v19  ;;  %v3917_v10 = vrot.slane %v3916_v34, 2  ;;  %v5698_v17 = vld [vmem:[%s8734_s1 + $0x308] ss:$24 sps:$4 sm:$0xff]   ;;  %2764 = vmatpush2.bf16.msra.mxu1 %v5689_v50  ;;  %v5703_v41 = vld [vmem:[%s8734_s1 + $0x21c] ss:$24 sps:$4 sm:$0xff]  }
  0xfc   : > { %v3958_v13 = vrot.slane %v7044_v39, 1  ;;  %v8815_v56 = vrot.slane %v7094_v48, 2  ;;  %v3723_v37 = vmax.f32 %v3666_v59, %v3694_v32  ;;  %v7192_v40 = vsel %vm3724_vm2, %v4925_v55, %v3929_v6  ;;  %2765 = vmatprep.subr.bf16.mxu1 %v5697_v31  ;;  %2849 = vmatpush1.bf16.msra.mxu0 %v5698_v17 }
  0xfd   : > { %v3758_v0 = vrot.slane %v3757_v14, 1  ;;  %v3808_v54 = vrot.slane %v3807_v11, 1  ;;  %v3858_v25 = vrot.slane %v3857_v20, 1  ;;  %v3918_v18 = vmax.f32 %v3916_v34, %v3917_v10  ;;  %2850 = vmatprep.subr.bf16.mxu0 %v5706_v33 }
  0xfe   : > { %v3695_v26 = vsel %vm3674_vm1, %v8815_v56, %v3694_v32  ;;  %v7196_v51 = vpack.c.bf16 %v7175_v57, %v7172_v38  ;;  %v3931_v43 = vsel %vm3876_vm6, %v3723_v37, -inf  ;;  %v5701_v37 = vld [vmem:[%s8734_s1 + $0x218] ss:$24 sps:$4 sm:$0xff]  }
  0xff   : > { %v3716_v60 = vmax.f32 %v3659_v29, %v3695_v26  ;;  %v3759_v47 = vmax.f32 %v3757_v14, %v3758_v0  ;;  %v3809_v59 = vmax.f32 %v3807_v11, %v3808_v54  ;;  %v3919_v19 = vrot.slane %v3918_v18, 1  ;;  %v5704_v29 = vld [vmem:[%s8734_s1 + $0x5d8] ss:$24 sps:$4 sm:$0xff]   ;;  %v5712_v11 = vld [vmem:[%s8734_s1 + $0x5ac] ss:$24 sps:$4 sm:$0xff]   ;;  %2766 = vmatpush2.bf16.msra.mxu1 %v5695_v30 }
 0x100   : > { %8816 = vst [vmem:[#allocation16_spill] sm:$0xff] %v7196_v51  ;;  %2613 = vmatprep.mubr.bf16.mxu0 %v7196_v51  ;;  %v3961_v14 = vrot.slane %v6972_v23, 1  ;;  %v3859_v31 = vmax.f32 %v3857_v20, %v3858_v25  ;;  %v3962_v54 = vrot.slane %v7172_v38, 1  ;;  %2767 = vmatprep.subr.bf16.mxu1 %v5703_v41  ;;  %v5709_v20 = vld [vmem:[%s8734_s1 + $0x1ec] ss:$24 sps:$4 sm:$0xff]  }
 0x101   : > { %v3767_v49 = vsel %vm3724_vm2, %v3716_v60, -inf  ;;  %v3817_v6 = vsel %vm3774_vm3, %v3716_v60, -inf  ;;  %v3867_v34 = vsel %vm3824_vm4, %v3716_v60, -inf  ;;  %v3930_v55 = vsel %vm3874_vm5, %v3716_v60, -inf  ;;  %2851 = vmatpush2.bf16.msra.mxu0 %v5704_v29 }
 0x102   : > { %v3768_v3 = vrot.slane %v3767_v49, 4  ;;  %v3818_v32 = vrot.slane %v3817_v6, 4  ;;  %v3868_v50 = vrot.slane %v3867_v34, 4  ;;  %v4916_v10 = vsel %vm3876_vm6, %v3759_v47, %v3809_v59  ;;  %v5710_v59 = vld [vmem:[%s8734_s1 + $0x5a8] ss:$24 sps:$4 sm:$0xff]   ;;  %2852 = vmatprep.subr.bf16.mxu0 %v5712_v11 }
 0x103   : > { %v3932_v26 = vmax.f32 %v3930_v55, %v3931_v43  ;;  %v4017_v60 = vrot.slane %v7172_v38, 2  ;;  %v7226_v33 = vmax.f32 %v3918_v18, %v3919_v19  ;;  %v4018_v47 = vrot.slane %v7175_v57, 2  ;;  %v5718_v18 = vld [vmem:[%s8734_s1 + $0x57c] ss:$24 sps:$4 sm:$0xff]   ;;  %2768 = vmatpush2.bf16.msra.mxu1 %v5701_v37 }
 0x104   : > { %v3769_v56 = vmax.f32 %v3767_v49, %v3768_v3  ;;  %v3819_v17 = vmax.f32 %v3817_v6, %v3818_v32  ;;  %v3869_v0 = vmax.f32 %v3867_v34, %v3868_v50  ;;  %v3963_v3 = vsel %vm3617_vm0, %v3961_v14, %v3962_v54  ;;  %v7235_v6 = vld [vmem:[%s6166_s10 + $0x100] sm:$0xff]  ;;  %v7238_v34 = vld [vmem:[%s6166_s10 + $0x138] sm:$0xff]  ;;  %2769 = vmatprep.subr.bf16.mxu1 %v5709_v20 }
 0x105   : > { %v3933_v30 = vrot.slane %v3932_v26, 4  ;;  %v3993_v41 = vmax.f32 %v6972_v23, %v3962_v54  ;;  %v3986_v32 = vmax.f32 %v6963_v28, %v3963_v3  ;;  %v4019_v50 = vsel %vm3674_vm1, %v4017_v60, %v4018_v47  ;;  %v5707_v23 = vld [vmem:[%s8734_s1 + $0x1e8] ss:$24 sps:$4 sm:$0xff]   ;;  %2853 = vmatpush2.bf16.msra.mxu0 %v5710_v59  ;;  %v5724_v20 = vld [vmem:[%s8734_s1 + $0x54c] ss:$24 sps:$4 sm:$0xff]  }
 0x106   : > { %v3770_v25 = vrot.slane %v3769_v56, 2  ;;  %v3820_v49 = vrot.slane %v3819_v17, 2  ;;  %v3870_v43 = vrot.slane %v3869_v0, 2  ;;  %v7249_v55 = vsel %vm4919_vm7, %v4916_v10, %v3859_v31  ;;  %v5716_v31 = vld [vmem:[%s8734_s1 + $0x578] ss:$24 sps:$4 sm:$0xff]   ;;  %2854 = vmatprep.subr.bf16.mxu0 %v5718_v18 }
 0x107   : > { %v3934_v29 = vmax.f32 %v3932_v26, %v3933_v30  ;;  %v4049_v54 = vmax.f32 %v3993_v41, %v4018_v47  ;;  %v7256_v37 = vpack.c.bf16 %v7238_v34, %v7235_v6  ;;  %2770 = vmatpush2.bf16.msra.mxu1 %v5707_v23  ;;  %v3959_v23 = vrot.slane %v7235_v6, 1 }
 0x108   : > { %v3771_v19 = vmax.f32 %v3769_v56, %v3770_v25  ;;  %v3821_v14 = vmax.f32 %v3819_v17, %v3820_v49  ;;  %v3871_v11 = vmax.f32 %v3869_v0, %v3870_v43  ;;  %v5715_v56 = vld [vmem:[%s8734_s1 + $0x1bc] ss:$24 sps:$4 sm:$0xff]   ;;  %v4042_v25 = vmax.f32 %v3986_v32, %v4019_v50  ;;  %v5713_v43 = vld [vmem:[%s8734_s1 + $0x1b8] ss:$24 sps:$4 sm:$0xff]  }
 0x109   : > { %v3935_v28 = vrot.slane %v3934_v29, 2  ;;  %8817 = vst [vmem:[#allocation17_spill] sm:$0xff] %v7256_v37  ;;  %v4195_v0 = vsel %vm3876_vm6, %v4049_v54, -inf  ;;  %v4247_v60 = vsel %vm3724_vm2, %v4049_v54, -inf  ;;  %2614 = vmatmul.mubr.bf16.gmra.mxu0 %v7256_v37  ;;  %2771 = vmatprep.subr.bf16.mxu1 %v5715_v56  ;;  %v7289_v37 = vld [vmem:[%s6166_s10 + $0x110] sm:$0xff] }
 0x10a   : > { %v3772_v26 = vrot.slane %v3771_v19, 1  ;;  %v3822_v10 = vrot.slane %v3821_v14, 1  ;;  %v3872_v17 = vrot.slane %v3871_v11, 1  ;;  %v4086_v49 = vsel %vm3774_vm3, %v4042_v25, -inf  ;;  %2855 = vmatpush2.bf16.msra.mxu0 %v5716_v31 }
 0x10b   : > { %v3936_v47 = vmax.f32 %v3934_v29, %v3935_v28  ;;  %v4135_v59 = vsel %vm3824_vm4, %v4042_v25, -inf  ;;  %v4087_v18 = vrot.slane %v4086_v49, 4  ;;  %v4194_v50 = vsel %vm3874_vm5, %v4042_v25, -inf  ;;  %2856 = vmatprep.subr.bf16.mxu0 %v5724_v20  ;;  %2772 = vmatpush2.bf16.msra.mxu1 %v5713_v43 }
 0x10c   : > { %v3773_v30 = vmax.f32 %v3771_v19, %v3772_v26  ;;  %v3823_v3 = vmax.f32 %v3821_v14, %v3822_v10  ;;  %v3873_v41 = vmax.f32 %v3871_v11, %v3872_v17  ;;  %v4136_v32 = vrot.slane %v4135_v59, 4  ;;  %v5721_v19 = vld [vmem:[%s8734_s1 + $0x18c] ss:$24 sps:$4 sm:$0xff]   ;;  %v5722_v14 = vld [vmem:[%s8734_s1 + $0x548] ss:$24 sps:$4 sm:$0xff]  }
 0x10d   : > { %v3937_v29 = vrot.slane %v3936_v47, 1  ;;  %v4248_v54 = vrot.slane %v4247_v60, 4  ;;  %v4088_v26 = vmax.f32 %v4086_v49, %v4087_v18  ;;  %v4196_v28 = vmax.f32 %v4194_v50, %v4195_v0  ;;  %v5730_v10 = vld [vmem:[%s8734_s1 + $0x51c] ss:$24 sps:$4 sm:$0xff]   ;;  %v5719_v0 = vld [vmem:[%s8734_s1 + $0x188] ss:$24 sps:$4 sm:$0xff]   ;;  %2773 = vmatprep.subr.bf16.mxu1 %v5721_v19 }
 0x10e   : > { %v4918_v11 = vsel %vm3876_vm6, %v3773_v30, %v3823_v3  ;;  %v4137_v56 = vmax.f32 %v4135_v59, %v4136_v32  ;;  %v3960_v31 = vsel %vm3617_vm0, %v3958_v13, %v3959_v23  ;;  %v3992_v3 = vmax.f32 %v7044_v39, %v3959_v23  ;;  %2857 = vmatpush2.bf16.msra.mxu0 %v5722_v14  ;;  %v5736_v14 = vld [vmem:[%s8734_s1 + $0x4ec] ss:$24 sps:$4 sm:$0xff]  }
 0x10f   : > { %v3938_v25 = vmax.f32 %v3936_v47, %v3937_v29  ;;  %v4926_v17 = vsel %vm4919_vm7, %v4918_v11, %v3873_v41  ;;  %v4249_v61 = vmax.f32 %v4247_v60, %v4248_v54  ;;  %v4089_v20 = vrot.slane %v4088_v26, 2  ;;  %v7296_v47 = vld [vmem:[%s6166_s10 + $0x148] sm:$0xff]  ;;  %v5727_v60 = vld [vmem:[%s8734_s1 + $0x75c] ss:$24 sps:$4 sm:$0xff]   ;;  %2858 = vmatprep.subr.bf16.mxu0 %v5730_v10  ;;  %2774 = vmatpush2.bf16.msra.mxu1 %v5719_v0 }
 0x110   : > { %v4138_v30 = vrot.slane %v4137_v56, 2  ;;  %v4197_v49 = vrot.slane %v4196_v28, 4  ;;  %v3985_v59 = vmax.f32 %v7041_v45, %v3960_v31  ;;  %v4014_v41 = vrot.slane %v7235_v6, 2  ;;  %v5728_v45 = vld [vmem:[%s8734_s1 + $0x518] ss:$24 sps:$4 sm:$0xff]   ;;  %2925 = vmatprep.subr.bf16.mxu1 %v5727_v60 }
 0x111   : > { %v7302_v13 = vsel %vm3724_vm2, %v4926_v17, %v3938_v25  ;;  %v4250_v43 = vrot.slane %v4249_v61, 2  ;;  %v4090_v18 = vmax.f32 %v4088_v26, %v4089_v20  ;;  %v4015_v29 = vrot.slane %v7238_v34, 2  ;;  %v5734_v17 = vld [vmem:[%s8734_s1 + $0x4e8] ss:$24 sps:$4 sm:$0xff]  }
 0x112   : > { %v4139_v32 = vmax.f32 %v4137_v56, %v4138_v30  ;;  %v4198_v19 = vmax.f32 %v4196_v28, %v4197_v49  ;;  %v7313_v50 = vsel %vm3724_vm2, %v7249_v55, %v7226_v33  ;;  %v7317_v39 = vpack.c.bf16 %v7296_v47, %v7289_v37  ;;  %2859 = vmatpush2.bf16.msra.mxu0 %v5728_v45  ;;  %v5742_v49 = vld [vmem:[%s8734_s1 + $0x4bc] ss:$24 sps:$4 sm:$0xff]  }
 0x113   : > { %v4251_v54 = vmax.f32 %v4249_v61, %v4250_v43  ;;  %v3965_v23 = vrot.slane %v7289_v37, 1  ;;  %v4091_v11 = vrot.slane %v4090_v18, 1  ;;  %v4016_v28 = vsel %vm3674_vm1, %v4014_v41, %v4015_v29  ;;  %2860 = vmatprep.subr.bf16.mxu0 %v5736_v14  ;;  %v5740_v14 = vld [vmem:[%s8734_s1 + $0x4b8] ss:$24 sps:$4 sm:$0xff]  }
 0x114   : > { %8818 = vst [vmem:[#allocation18_spill] sm:$0xff] %v7317_v39  ;;  %v4140_v26 = vrot.slane %v4139_v32, 1  ;;  %v4199_v56 = vrot.slane %v4198_v19, 2  ;;  %v4041_v55 = vmax.f32 %v3985_v59, %v4016_v28  ;;  %v4048_v61 = vmax.f32 %v3992_v3, %v4015_v29  ;;  %2705 = vmatmul.mubr.bf16.gmra.mxu1 %v7317_v39  ;;  %v5748_v28 = vld [vmem:[%s8734_s1 + $0x48c] ss:$24 sps:$4 sm:$0xff]  }
 0x115   : > { %v4252_v33 = vrot.slane %v4251_v54, 1  ;;  %v8819_v10 = vrot.slane %v7101_v35, 1  ;;  %v4092_v31 = vmax.f32 %v4090_v18, %v4091_v11  ;;  %2714 = vmatprep.mubr.bf16.mxu1 %v8814_v2 }
 0x116   : > { %v4141_v0 = vmax.f32 %v4139_v32, %v4140_v26  ;;  %v4200_v20 = vmax.f32 %v4198_v19, %v4199_v56  ;;  %v4079_v60 = vsel %vm3774_vm3, %v4041_v55, -inf  ;;  %v4128_v43 = vsel %vm3824_vm4, %v4041_v55, -inf  ;;  %2861 = vmatpush2.bf16.msra.mxu0 %v5734_v17 }
 0x117   : > { %v3966_v25 = vsel %vm3617_vm0, %v8819_v10, %v3965_v23  ;;  %v4253_v59 = vmax.f32 %v4251_v54, %v4252_v33  ;;  %v4185_v3 = vsel %vm3874_vm5, %v4041_v55, -inf  ;;  %v4940_v45 = vsel %vm4934_vm8, %v7192_v40, %v4092_v31  ;;  %2862 = vmatprep.subr.bf16.mxu0 %v5742_v49  ;;  %v7356_v31 = vld [vmem:[%s6166_s10 + $0x178] sm:$0xff] }
 0x118   : > { %v3987_v30 = vmax.f32 %v7094_v48, %v3966_v25  ;;  %v4201_v41 = vrot.slane %v4200_v20, 1  ;;  %v4080_v18 = vrot.slane %v4079_v60, 4  ;;  %v4129_v48 = vrot.slane %v4128_v43, 4 }
 0x119   : > { %v4948_v32 = vsel %vm4942_vm9, %v4940_v45, %v4141_v0  ;;  %v4186_v19 = vsel %vm3876_vm6, %v4048_v61, -inf  ;;  %v4240_v29 = vsel %vm3724_vm2, %v4048_v61, -inf  ;;  %v3994_v54 = vmax.f32 %v7101_v35, %v3965_v23  ;;  %v7359_v0 = vld [vmem:[%s6166_s10 + $0x1b0] sm:$0xff] }
 0x11a   : > { %v4202_v11 = vmax.f32 %v4200_v20, %v4201_v41  ;;  %v4081_v26 = vmax.f32 %v4079_v60, %v4080_v18  ;;  %v4130_v40 = vmax.f32 %v4128_v43, %v4129_v48  ;;  %v4187_v56 = vmax.f32 %v4185_v3, %v4186_v19  ;;  %2863 = vmatpush2.bf16.msra.mxu0 %v5740_v14  ;;  %v5746_v3 = vld [vmem:[%s8734_s1 + $0x488] ss:$24 sps:$4 sm:$0xff]  }
 0x11b   : > { %v4283_v33 = vrot.slane %v7175_v57, 1  ;;  %v4241_v35 = vrot.slane %v4240_v29, 4  ;;  %v4020_v23 = vrot.slane %v7289_v37, 2  ;;  %v4021_v55 = vrot.slane %v7296_v47, 2  ;;  %2864 = vmatprep.subr.bf16.mxu0 %v5748_v28 }
 0x11c   : > { %v4955_v61 = vsel %vm3674_vm1, %v4948_v32, %v4202_v11  ;;  %v4082_v10 = vrot.slane %v4081_v26, 2  ;;  %v4131_v25 = vrot.slane %v4130_v40, 2  ;;  %v4188_v17 = vrot.slane %v4187_v56, 4  ;;  %v5754_v32 = vld [vmem:[%s8734_s1 + $0xa5c] ss:$24 sps:$4 sm:$0xff]  }
 0x11d   : > { %v4962_v20 = vsel %vm3617_vm0, %v4955_v61, %v4253_v59  ;;  %v4242_v49 = vmax.f32 %v4240_v29, %v4241_v35  ;;  %v4022_v60 = vsel %vm3674_vm1, %v4020_v23, %v4021_v55  ;;  %v4050_v43 = vmax.f32 %v3994_v54, %v4021_v55 }
 0x11e   : > { %5018 = vst [vmem:[%s6572_s21 + $0x28] sm:$0xff] %v4962_v20  ;;  %v4083_v41 = vmax.f32 %v4081_v26, %v4082_v10  ;;  %v4132_v45 = vmax.f32 %v4130_v40, %v4131_v25  ;;  %v4189_v18 = vmax.f32 %v4187_v56, %v4188_v17  ;;  %v4043_v48 = vmax.f32 %v3987_v30, %v4022_v60 }
 0x11f   : > { %v4243_v59 = vrot.slane %v4242_v49, 2  ;;  %v4204_v19 = vsel %vm3876_vm6, %v4050_v43, -inf  ;;  %v4254_v29 = vsel %vm3724_vm2, %v4050_v43, -inf  ;;  %v7374_v54 = vpack.c.bf16 %v7359_v0, %v7356_v31  ;;  %2865 = vmatpush2.bf16.msra.mxu0 %v5746_v3 }
 0x120   : > { %v4084_v14 = vrot.slane %v4083_v41, 1  ;;  %v4133_v11 = vrot.slane %v4132_v45, 1  ;;  %v4190_v26 = vrot.slane %v4189_v18, 2  ;;  %v4093_v40 = vsel %vm3774_vm3, %v4043_v48, -inf  ;;  %3016 = vmatprep.subr.bf16.mxu0 %v5754_v32 }
 0x121   : > { %8820 = vst [vmem:[#allocation19_spill] sm:$0xff] %v7374_v54  ;;  %v4244_v30 = vmax.f32 %v4242_v49, %v4243_v59  ;;  %v4094_v56 = vrot.slane %v4093_v40, 4  ;;  %v4142_v28 = vsel %vm3824_vm4, %v4043_v48, -inf  ;;  %v4203_v35 = vsel %vm3874_vm5, %v4043_v48, -inf  ;;  %2623 = vmatprep.mubr.bf16.mxu0 %v7374_v54 }
 0x122   : > { %v4085_v23 = vmax.f32 %v4083_v41, %v4084_v14  ;;  %v4134_v55 = vmax.f32 %v4132_v45, %v4133_v11  ;;  %v4191_v61 = vmax.f32 %v4189_v18, %v4190_v26  ;;  %v4143_v10 = vrot.slane %v4142_v28, 4 }
 0x123   : > { %v4245_v25 = vrot.slane %v4244_v30, 1  ;;  %v4095_v17 = vmax.f32 %v4093_v40, %v4094_v56  ;;  %v4205_v20 = vmax.f32 %v4203_v35, %v4204_v19  ;;  %v4255_v60 = vrot.slane %v4254_v29, 4  ;;  %v7388_v56 = vld [vmem:[%s6166_s10 + $0x170] sm:$0xff] }
 0x124   : > { %v4192_v43 = vrot.slane %v4191_v61, 1  ;;  %v4939_v49 = vsel %vm4934_vm8, %v7313_v50, %v4085_v23  ;;  %v4144_v59 = vmax.f32 %v4142_v28, %v4143_v10  ;;  %v4284_v48 = vrot.slane %v7356_v31, 1  ;;  %v7391_v28 = vld [vmem:[%s6166_s10 + $0x1a8] sm:$0xff] }
 0x125   : > { %v4246_v54 = vmax.f32 %v4244_v30, %v4245_v25  ;;  %v4947_v3 = vsel %vm4942_vm9, %v4939_v49, %v4134_v55  ;;  %v4096_v41 = vrot.slane %v4095_v17, 2  ;;  %v4206_v45 = vrot.slane %v4205_v20, 4 }
 0x126   : > { %v4193_v18 = vmax.f32 %v4191_v61, %v4192_v43  ;;  %v4145_v32 = vrot.slane %v4144_v59, 2  ;;  %v4256_v14 = vmax.f32 %v4254_v29, %v4255_v60  ;;  %v4285_v19 = vsel %vm3617_vm0, %v4283_v33, %v4284_v48 }
 0x127   : > { %v4097_v11 = vmax.f32 %v4095_v17, %v4096_v41  ;;  %v4207_v26 = vmax.f32 %v4205_v20, %v4206_v45  ;;  %v4308_v40 = vmax.f32 %v7172_v38, %v4285_v19  ;;  %v4315_v50 = vmax.f32 %v7175_v57, %v4284_v48 }
 0x128   : > { %v4954_v30 = vsel %vm3674_vm1, %v4947_v3, %v4193_v18  ;;  %v4146_v35 = vmax.f32 %v4144_v59, %v4145_v32  ;;  %v4257_v23 = vrot.slane %v4256_v14, 2  ;;  %v4339_v55 = vrot.slane %v7356_v31, 2 }
 0x129   : > { %v4961_v29 = vsel %vm3617_vm0, %v4954_v30, %v4246_v54  ;;  %v4098_v33 = vrot.slane %v4097_v11, 1  ;;  %v4208_v61 = vrot.slane %v4207_v26, 2  ;;  %v4340_v10 = vrot.slane %v7359_v0, 2 }
 0x12a   : > { %v4280_v38 = vrot.slane %v7238_v34, 1  ;;  %5017 = vst [vmem:[%s6572_s21 + $0x20] sm:$0xff] %v4961_v29  ;;  %v4147_v57 = vrot.slane %v4146_v35, 1  ;;  %v4258_v25 = vmax.f32 %v4256_v14, %v4257_v23  ;;  %v7401_v17 = vpack.c.bf16 %v7391_v28, %v7388_v56 }
 0x12b   : > { %v4099_v20 = vmax.f32 %v4097_v11, %v4098_v33  ;;  %v4209_v60 = vmax.f32 %v4207_v26, %v4208_v61  ;;  %v4341_v43 = vsel %vm3674_vm1, %v4339_v55, %v4340_v10  ;;  %v4371_v49 = vmax.f32 %v4315_v50, %v4340_v10  ;;  %v7417_v33 = vpop.f32.mrf.mxu1 }
 0x12c   : > { %8821 = vst [vmem:[#allocation20_spill] sm:$0xff] %v7401_v17  ;;  %v4148_v59 = vmax.f32 %v4146_v35, %v4147_v57  ;;  %v4259_v54 = vrot.slane %v4258_v25, 1  ;;  %v4364_v48 = vmax.f32 %v4308_v40, %v4341_v43  ;;  %2624 = vmatmul.mubr.bf16.gmra.mxu0 %v7401_v17  ;;  %v4281_v3 = vrot.slane %v7388_v56, 1  ;;  %8822 = vst [vmem:[#allocation21_spill] sm:$0xff] %v7417_v33 }
 0x12d   : > { %v4210_v41 = vrot.slane %v4209_v60, 1  ;;  %v4941_v45 = vsel %vm4934_vm8, %v7302_v13, %v4099_v20  ;;  %v4468_v18 = vsel %vm3876_vm6, %v4371_v49, -inf  ;;  %v4520_v32 = vsel %vm3724_vm2, %v4371_v49, -inf  ;;  %v7421_v20 = vld [vmem:[%s6166_s10 + $0x180] sm:$0xff] }
 0x12e   : > { %v4260_v14 = vmax.f32 %v4258_v25, %v4259_v54  ;;  %v4949_v19 = vsel %vm4942_vm9, %v4941_v45, %v4148_v59  ;;  %v4408_v11 = vsel %vm3824_vm4, %v4364_v48, -inf  ;;  %v4467_v26 = vsel %vm3874_vm5, %v4364_v48, -inf }
 0x12f   : > { %v4211_v40 = vmax.f32 %v4209_v60, %v4210_v41  ;;  %v4409_v50 = vrot.slane %v4408_v11, 4  ;;  %v4469_v30 = vmax.f32 %v4467_v26, %v4468_v18  ;;  %v4521_v35 = vrot.slane %v4520_v32, 4  ;;  %v7424_v60 = vld [vmem:[%s6166_s10 + $0x1b8] sm:$0xff] }
 0x130   : > { %v4569_v23 = vsel %vm3774_vm3, %v4371_v49, -inf  ;;  %v4282_v13 = vsel %vm3617_vm0, %v4280_v38, %v4281_v3  ;;  %v4314_v55 = vmax.f32 %v7238_v34, %v4281_v3  ;;  %v4336_v29 = vrot.slane %v7388_v56, 2 }
 0x131   : > { %v4956_v61 = vsel %vm3674_vm1, %v4949_v19, %v4211_v40  ;;  %v4410_v10 = vmax.f32 %v4408_v11, %v4409_v50  ;;  %v4470_v57 = vrot.slane %v4469_v30, 4  ;;  %v4522_v25 = vmax.f32 %v4520_v32, %v4521_v35 }
 0x132   : > { %v4963_v43 = vsel %vm3617_vm0, %v4956_v61, %v4260_v14  ;;  %v4570_v49 = vrot.slane %v4569_v23, 4  ;;  %v4307_v38 = vmax.f32 %v7235_v6, %v4282_v13  ;;  %v4337_v34 = vrot.slane %v7391_v28, 2  ;;  %v7436_v14 = vpop.f32.mrf.mxu1 }
 0x133   : > { %v4286_v59 = vrot.slane %v7296_v47, 1  ;;  %5019 = vst [vmem:[%s6572_s21 + $0x30] sm:$0xff] %v4963_v43  ;;  %v4411_v54 = vrot.slane %v4410_v10, 2  ;;  %v4471_v48 = vmax.f32 %v4469_v30, %v4470_v57  ;;  %v4523_v3 = vrot.slane %v4522_v25, 2  ;;  %8824 = vst [vmem:[#allocation23_spill] sm:$0xff] %v7436_v14 }
 0x134   : > { %v4571_v41 = vmax.f32 %v4569_v23, %v4570_v49  ;;  %v4338_v45 = vsel %vm3674_vm1, %v4336_v29, %v4337_v34  ;;  %v4370_v18 = vmax.f32 %v4314_v55, %v4337_v34  ;;  %v7434_v32 = vpack.c.bf16 %v7424_v60, %v7421_v20  ;;  %v7445_v43 = vpop.f32.mrf.mxu1 }
 0x135   : > { %v4412_v19 = vmax.f32 %v4410_v10, %v4411_v54  ;;  %v4472_v6 = vrot.slane %v4471_v48, 2  ;;  %v4524_v11 = vmax.f32 %v4522_v25, %v4523_v3  ;;  %v4363_v26 = vmax.f32 %v4307_v38, %v4338_v45  ;;  %8825 = vst [vmem:[#allocation24_spill] sm:$0xff] %v7445_v43 }
 0x136   : > { %8823 = vst [vmem:[#allocation22_spill] sm:$0xff] %v7434_v32  ;;  %v4572_v40 = vrot.slane %v4571_v41, 2  ;;  %v4459_v50 = vsel %vm3876_vm6, %v4370_v18, -inf  ;;  %v4513_v30 = vsel %vm3724_vm2, %v4370_v18, -inf  ;;  %v4562_v35 = vsel %vm3774_vm3, %v4370_v18, -inf  ;;  %2715 = vmatmul.mubr.bf16.gmra.mxu1 %v7434_v32 }
 0x137   : > { %v4413_v23 = vrot.slane %v4412_v19, 1  ;;  %v4473_v13 = vmax.f32 %v4471_v48, %v4472_v6  ;;  %v4525_v55 = vrot.slane %v4524_v11, 1  ;;  %v4401_v29 = vsel %vm3824_vm4, %v4363_v26, -inf  ;;  %2724 = vmatprep.mubr.bf16.mxu1 %v8814_v2 }
 0x138   : > { %v4573_v61 = vmax.f32 %v4571_v41, %v4572_v40  ;;  %v4402_v10 = vrot.slane %v4401_v29, 4  ;;  %v4458_v57 = vsel %vm3874_vm5, %v4363_v26, -inf  ;;  %v4514_v25 = vrot.slane %v4513_v30, 4 }
 0x139   : > { %v4414_v49 = vmax.f32 %v4412_v19, %v4413_v23  ;;  %v4474_v38 = vrot.slane %v4473_v13, 1  ;;  %v4526_v34 = vmax.f32 %v4524_v11, %v4525_v55  ;;  %v4460_v54 = vmax.f32 %v4458_v57, %v4459_v50  ;;  %v7449_v19 = vpop.f32.mrf.mxu1  ;;  %v7456_v57 = vld [vmem:[%s6166_s10 + $0x1e8] sm:$0xff] }
 0x13a   : > { %v4574_v3 = vrot.slane %v4573_v61, 1  ;;  %v4403_v45 = vmax.f32 %v4401_v29, %v4402_v10  ;;  %v4515_v18 = vmax.f32 %v4513_v30, %v4514_v25  ;;  %v4563_v48 = vrot.slane %v4562_v35, 4  ;;  %8826 = vst [vmem:[#allocation25_spill] sm:$0xff] %v7449_v19 }
 0x13b   : > { %v4475_v6 = vmax.f32 %v4473_v13, %v4474_v38  ;;  %v4461_v17 = vrot.slane %v4460_v54, 4  ;;  %v4287_v51 = vrot.slane %v7421_v20, 1  ;;  %v4342_v41 = vrot.slane %v7421_v20, 2  ;;  %v7461_v25 = vpop.f32.mrf.mxu1 }
 0x13c   : > { %v4575_v26 = vmax.f32 %v4573_v61, %v4574_v3  ;;  %v4404_v40 = vrot.slane %v4403_v45, 2  ;;  %v4516_v32 = vrot.slane %v4515_v18, 2  ;;  %v4564_v43 = vmax.f32 %v4562_v35, %v4563_v48  ;;  %v7459_v61 = vld [vmem:[%s6166_s10 + $0x220] sm:$0xff]  ;;  %8827 = vst [vmem:[#allocation26_spill] sm:$0xff] %v7461_v25 }
 0x13d   : > { %v4969_v11 = vsel %vm3876_vm6, %v4414_v49, %v4475_v6  ;;  %v4462_v50 = vmax.f32 %v4460_v54, %v4461_v17  ;;  %v4288_v30 = vsel %vm3617_vm0, %v4286_v59, %v4287_v51  ;;  %v4316_v23 = vmax.f32 %v7296_v47, %v4287_v51 }
 0x13e   : > { %v4976_v13 = vsel %vm4919_vm7, %v4969_v11, %v4526_v34  ;;  %v4405_v55 = vmax.f32 %v4403_v45, %v4404_v40  ;;  %v4517_v29 = vmax.f32 %v4515_v18, %v4516_v32  ;;  %v4565_v10 = vrot.slane %v4564_v43, 2  ;;  %v7474_v18 = vpop.f32.mrf.mxu0 }
 0x13f   : > { %v7464_v35 = vsel %vm3724_vm2, %v4976_v13, %v4575_v26  ;;  %v4463_v49 = vrot.slane %v4462_v50, 2  ;;  %v4309_v17 = vmax.f32 %v7289_v37, %v4288_v30  ;;  %v4343_v59 = vrot.slane %v7424_v60, 2  ;;  %v7476_v37 = vpop.f32.mrf.mxu1  ;;  %v272_v30 = vld [vmem:[%s6166_s10 + $0x1e0] sm:$0xff] }
 0x140   : > { %v4605_v51 = vrot.slane %v7359_v0, 1  ;;  %v4406_v47 = vrot.slane %v4405_v55, 1  ;;  %v4518_v38 = vrot.slane %v4517_v29, 1  ;;  %v4566_v32 = vmax.f32 %v4564_v43, %v4565_v10  ;;  %8829 = vst [vmem:[#allocation28_spill] sm:$0xff] %v7476_v37 }
 0x141   : > { %v4464_v34 = vmax.f32 %v4462_v50, %v4463_v49  ;;  %v4344_v54 = vsel %vm3674_vm1, %v4342_v41, %v4343_v59  ;;  %v4372_v3 = vmax.f32 %v4316_v23, %v4343_v59  ;;  %v7472_v45 = vpack.c.bf16 %v7459_v61, %v7456_v57  ;;  %v7484_v23 = vld [vmem:[%s6166_s10 + $0x218] sm:$0xff] }
 0x142   : > { %v4407_v48 = vmax.f32 %v4405_v55, %v4406_v47  ;;  %v4519_v6 = vmax.f32 %v4517_v29, %v4518_v38  ;;  %v4567_v26 = vrot.slane %v4566_v32, 1  ;;  %v4365_v40 = vmax.f32 %v4309_v17, %v4344_v54  ;;  %v7488_v38 = vpop.f32.mrf.mxu0  ;;  %v7490_v54 = vpop.f32.mrf.mxu1 }
 0x143   : > { %8828 = vst [vmem:[#allocation27_spill] sm:$0xff] %v7472_v45  ;;  %v4465_v11 = vrot.slane %v4464_v34, 1  ;;  %v4477_v43 = vsel %vm3876_vm6, %v4372_v3, -inf  ;;  %v4527_v50 = vsel %vm3724_vm2, %v4372_v3, -inf  ;;  %v4576_v41 = vsel %vm3774_vm3, %v4372_v3, -inf  ;;  %2633 = vmatprep.mubr.bf16.mxu0 %v7472_v45  ;;  %8830 = vst [vmem:[#allocation29_spill] sm:$0xff] %v7488_v38 }
 0x144   : > { %v4568_v13 = vmax.f32 %v4566_v32, %v4567_v26  ;;  %v4415_v10 = vsel %vm3824_vm4, %v4365_v40, -inf  ;;  %v4476_v55 = vsel %vm3874_vm5, %v4365_v40, -inf  ;;  %v4528_v29 = vrot.slane %v4527_v50, 4  ;;  %8831 = vst [vmem:[#allocation30_spill] sm:$0xff] %v7490_v54 }
 0x145   : > { %v4466_v49 = vmax.f32 %v4464_v34, %v4465_v11  ;;  %v4416_v17 = vrot.slane %v4415_v10, 4  ;;  %v4478_v59 = vmax.f32 %v4476_v55, %v4477_v43  ;;  %v4577_v47 = vrot.slane %v4576_v41, 4  ;;  %v7497_v11 = vpop.f32.mrf.mxu1 }
 0x146   : > { %v4529_v3 = vmax.f32 %v4527_v50, %v4528_v29  ;;  %v4606_v45 = vrot.slane %v7456_v57, 1  ;;  %v7494_v32 = vpack.c.bf16 %v7484_v23, %v272_v30  ;;  %8833 = vst [vmem:[#allocation32_spill] sm:$0xff] %v7497_v11  ;;  %v4602_v43 = vrot.slane %v7391_v28, 1  ;;  %v274_v57 = vld [vmem:[%s6166_s10 + $0x1f0] sm:$0xff]  ;;  %v7505_v50 = vld [vmem:[%s6166_s10 + $0x228] sm:$0xff] }
 0x147   : > { %v4968_v26 = vsel %vm3876_vm6, %v4407_v48, %v4466_v49  ;;  %v4417_v40 = vmax.f32 %v4415_v10, %v4416_v17  ;;  %v4479_v37 = vrot.slane %v4478_v59, 4  ;;  %v4578_v34 = vmax.f32 %v4576_v41, %v4577_v47  ;;  %v7510_v49 = vpop.f32.mrf.mxu0  ;;  %v7512_v17 = vpop.f32.mrf.mxu1 }
 0x148   : > { %8832 = vst [vmem:[#allocation31_spill] sm:$0xff] %v7494_v32  ;;  %v4975_v55 = vsel %vm4919_vm7, %v4968_v26, %v4519_v6  ;;  %v4530_v25 = vrot.slane %v4529_v3, 2  ;;  %v4607_v54 = vsel %vm3617_vm0, %v4605_v51, %v4606_v45  ;;  %2634 = vmatmul.mubr.bf16.gmra.mxu0 %v7494_v32  ;;  %8834 = vst [vmem:[#allocation33_spill] sm:$0xff] %v7510_v49  ;;  %v4658_v51 = vrot.slane %v7459_v61, 2 }
 0x149   : > { %v7508_v29 = vsel %vm3724_vm2, %v4975_v55, %v4568_v13  ;;  %v4418_v48 = vrot.slane %v4417_v40, 2  ;;  %v4480_v10 = vmax.f32 %v4478_v59, %v4479_v37  ;;  %v4579_v41 = vrot.slane %v4578_v34, 2  ;;  %v7519_v55 = vpop.f32.mrf.mxu1 }
 0x14a   : > { %v4531_v47 = vmax.f32 %v4529_v3, %v4530_v25  ;;  %v4630_v6 = vmax.f32 %v7356_v31, %v4607_v54  ;;  %v4603_v26 = vrot.slane %v272_v30, 1  ;;  %v7517_v13 = vpack.c.bf16 %v7505_v50, %v274_v57 }
 0x14b   : > { %v4419_v32 = vmax.f32 %v4417_v40, %v4418_v48  ;;  %v4481_v11 = vrot.slane %v4480_v10, 2  ;;  %v4580_v19 = vmax.f32 %v4578_v34, %v4579_v41  ;;  %v4608_v59 = vrot.slane %v7424_v60, 1  ;;  %v287_v40 = vld [vmem:[%s6166_s10 + $0x258] sm:$0x1]  ;;  %v7527_v34 = vpop.f32.mrf.mxu0  ;;  %v7529_v48 = vpop.f32.mrf.mxu1 }
 0x14c   : > { %8835 = vst [vmem:[#allocation34_spill] sm:$0xff] %v7517_v13  ;;  %v4532_v37 = vrot.slane %v4531_v47, 1  ;;  %v4604_v25 = vsel %vm3617_vm0, %v4602_v43, %v4603_v26  ;;  %v4657_v31 = vrot.slane %v7484_v23, 2  ;;  %2725 = vmatmul.mubr.bf16.gmra.mxu1 %v7517_v13  ;;  %8836 = vst [vmem:[#allocation35_spill] sm:$0xff] %v7527_v34  ;;  %v4637_v41 = vmax.f32 %v7359_v0, %v4606_v45  ;;  %v286_v23 = vld [vmem:[%s6166_s10 + $0x250] sm:$0x1] }
 0x14d   : > { %v4420_v54 = vrot.slane %v4419_v32, 1  ;;  %v4482_v61 = vmax.f32 %v4480_v10, %v4481_v11  ;;  %v4581_v3 = vrot.slane %v4580_v19, 1  ;;  %v4629_v30 = vmax.f32 %v7388_v56, %v4604_v25  ;;  %2734 = vmatprep.mubr.bf16.mxu1 %v8814_v2  ;;  %v288_v25 = vld [vmem:[%s6166_s10 + $0x260] sm:$0x1]  ;;  %v7537_v13 = vpop.f32.mrf.mxu0  ;;  %v7539_v34 = vpop.f32.mrf.mxu1 }
 0x14e   : > { %v4693_v14 = vmax.f32 %v4630_v6, %v4658_v51  ;;  %v4636_v43 = vmax.f32 %v7391_v28, %v4603_v26  ;;  %v4609_v49 = vrot.slane %v274_v57, 1  ;;  %v4533_v33 = vmax.f32 %v4531_v47, %v4532_v37  ;;  %8837 = vst [vmem:[#allocation36_spill] sm:$0xff] %v7539_v34 }
 0x14f   : > { %v4421_v11 = vmax.f32 %v4419_v32, %v4420_v54  ;;  %v4483_v10 = vrot.slane %v4482_v61, 1  ;;  %v4659_v56 = vrot.slane %v7505_v50, 2  ;;  %v4692_v38 = vmax.f32 %v4629_v30, %v4657_v31 }
 0x150   : > { %v4610_v0 = vsel %vm3617_vm0, %v4608_v59, %v4609_v49  ;;  %v7542_v45 = vpack.c.bf16 %v287_v40, %v287_v40  ;;  %v4670_v28 = vrot.slane %v287_v40, 2  ;;  %v4582_v6 = vmax.f32 %v4580_v19, %v4581_v3  ;;  %v7557_v19 = vpop.f32.mrf.mxu1 }
 0x151   : > { %v4484_v57 = vmax.f32 %v4482_v61, %v4483_v10  ;;  %v4631_v26 = vmax.f32 %v7421_v20, %v4610_v0  ;;  %v7545_v32 = vpack.c.bf16 %v286_v23, %v286_v23  ;;  %v4668_v47 = vrot.slane %v286_v23, 2  ;;  %v7555_v20 = vpop.f32.mrf.mxu0 }
 0x152   : > { %8838 = vst [vmem:[#allocation37_spill] sm:$0xff] %v7542_v45  ;;  %2643 = vmatprep.mubr.bf16.mxu0 %v7542_v45  ;;  %v4671_v50 = vsel %vm3674_vm1, %v4658_v51, %v4670_v28  ;;  %v7549_v37 = vpack.c.bf16 %v288_v25, %v288_v25  ;;  %v4672_v54 = vrot.slane %v288_v25, 2  ;;  %v4747_v59 = vsel %vm3874_vm5, %v4693_v14, -inf }
 0x153   : > { %8839 = vst [vmem:[#allocation38_spill] sm:$0xff] %v7545_v32  ;;  %v4970_v30 = vsel %vm3876_vm6, %v4421_v11, %v4484_v57  ;;  %v4638_v40 = vmax.f32 %v7424_v60, %v4609_v49  ;;  %v4700_v61 = vmax.f32 %v4637_v41, %v4671_v50  ;;  %2644 = vmatmul.mubr.bf16.gmra.mxu0 %v7545_v32  ;;  %v4738_v51 = vsel %vm3874_vm5, %v4692_v38, -inf }
 0x154   : > { %8840 = vst [vmem:[#allocation39_spill] sm:$0xff] %v7549_v37  ;;  %v4977_v3 = vsel %vm4919_vm7, %v4970_v30, %v4533_v33  ;;  %v4694_v23 = vmax.f32 %v4631_v26, %v4659_v56  ;;  %v4669_v10 = vsel %vm3674_vm1, %v4657_v31, %v4668_v47  ;;  %2866 = vmatprep.mubr.bf16.mxu0 %v6207_v63  ;;  %v7575_v26 = vpop.f32.mrf.mxu1  ;;  %v5752_v30 = vld [vmem:[%s8734_s1 + $0xa58] ss:$24 sps:$4 sm:$0xff]   ;;  %v5758_v63 = vld [vmem:[%s8734_s1 + $0xa28] ss:$24 sps:$4 sm:$0xff]  }
 0x155   : > { %v7564_v14 = vsel %vm3724_vm2, %v4977_v3, %v4582_v6  ;;  %v4748_v60 = vsel %vm3876_vm6, %v4700_v61, -inf  ;;  %v4800_v49 = vsel %vm3724_vm2, %v4700_v61, -inf  ;;  %2735 = vmatmul.mubr.bf16.gmra.mxu1 %v7549_v37  ;;  %v4673_v41 = vsel %vm3674_vm1, %v4659_v56, %v4672_v54  ;;  %v7573_v6 = vpop.f32.mrf.mxu0 }
 0x156   : > { %v4749_v11 = vmax.f32 %v4747_v59, %v4748_v60  ;;  %v4801_v33 = vrot.slane %v4800_v49, 4  ;;  %v4849_v38 = vsel %vm3774_vm3, %v4700_v61, -inf  ;;  %v4898_v25 = vsel %vm3824_vm4, %v4700_v61, -inf  ;;  %2775 = vmatprep.mubr.bf16.mxu1 %v6191_v53 }
 0x157   : > { %v4850_v31 = vrot.slane %v4849_v38, 4  ;;  %v4899_v0 = vrot.slane %v4898_v25, 4  ;;  %v4699_v28 = vmax.f32 %v4636_v43, %v4669_v10  ;;  %v7578_v50 = vsel %vm3874_vm5, %v4694_v23, -inf  ;;  %v5760_v10 = vld [vmem:[%s8734_s1 + $0xa2c] ss:$24 sps:$4 sm:$0xff]  }
 0x158   : > { %v4750_v56 = vrot.slane %v4749_v11, 4  ;;  %v4802_v47 = vmax.f32 %v4800_v49, %v4801_v33  ;;  %v7580_v54 = vmax.f32 %v4638_v40, %v4673_v41  ;;  %v5725_v40 = vld [vmem:[%s8734_s1 + $0x758] ss:$24 sps:$4 sm:$0xff]  }
 0x159   : > { %v4851_v59 = vmax.f32 %v4849_v38, %v4850_v31  ;;  %v4900_v61 = vmax.f32 %v4898_v25, %v4899_v0  ;;  %v4739_v43 = vsel %vm3876_vm6, %v4699_v28, -inf  ;;  %v4793_v3 = vsel %vm3724_vm2, %v4699_v28, -inf  ;;  %v5733_v31 = vld [vmem:[%s8734_s1 + $0x72c] ss:$24 sps:$4 sm:$0xff]  }
 0x15a   : > { %v4751_v23 = vmax.f32 %v4749_v11, %v4750_v56  ;;  %v4803_v60 = vrot.slane %v4802_v47, 2  ;;  %v4740_v57 = vmax.f32 %v4738_v51, %v4739_v43  ;;  %v4794_v49 = vrot.slane %v4793_v3, 4  ;;  %v7599_v11 = vpop.f32.mrf.mxu0  ;;  %v7601_v51 = vpop.f32.mrf.mxu1 }
 0x15b   : > { %v4852_v41 = vrot.slane %v4851_v59, 2  ;;  %v4901_v33 = vrot.slane %v4900_v61, 2  ;;  %v4842_v38 = vsel %vm3774_vm3, %v4699_v28, -inf  ;;  %v4891_v25 = vsel %vm3824_vm4, %v4699_v28, -inf  ;;  %2867 = vmatmul.mubr.bf16.vlgmr.msra.gmra.mxu0 %v6338_v7 }
 0x15c   : > { %v4752_v0 = vrot.slane %v4751_v23, 2  ;;  %v4804_v56 = vmax.f32 %v4802_v47, %v4803_v60  ;;  %v4741_v43 = vrot.slane %v4740_v57, 4  ;;  %v4795_v34 = vmax.f32 %v4793_v3, %v4794_v49  ;;  %3017 = vmatpush1.bf16.msra.mxu0 %v5752_v30  ;;  %2876 = vmatprep.mubr.bf16.mxu0 %v6387_v46  ;;  %v5769_v47 = vld [vmem:[%s8734_s1 + $0x9fc] ss:$24 sps:$4 sm:$0xff]   ;;  %v5731_v46 = vld [vmem:[%s8734_s1 + $0x728] ss:$24 sps:$4 sm:$0xff]  }
 0x15d   : > { %v4853_v28 = vmax.f32 %v4851_v59, %v4852_v41  ;;  %v4902_v32 = vmax.f32 %v4900_v61, %v4901_v33  ;;  %v4843_v45 = vrot.slane %v4842_v38, 4  ;;  %v4892_v53 = vrot.slane %v4891_v25, 4  ;;  %2776 = vmatmul.mubr.bf16.vlgmr.msra.gmra.mxu1 %v6245_v24  ;;  %3018 = vmatprep.subr.bf16.mxu0 %v5760_v10  ;;  %v5739_v10 = vld [vmem:[%s8734_s1 + $0x6fc] ss:$24 sps:$4 sm:$0xff]  }
 0x15e   : > { %v4753_v60 = vmax.f32 %v4751_v23, %v4752_v0  ;;  %v4805_v3 = vrot.slane %v4804_v56, 1  ;;  %v4742_v30 = vmax.f32 %v4740_v57, %v4741_v43  ;;  %v4796_v49 = vrot.slane %v4795_v34, 2  ;;  %2926 = vmatpush1.bf16.msra.mxu1 %v5725_v40  ;;  %2785 = vmatprep.mubr.bf16.mxu1 %v6529_v16  ;;  %v7618_v23 = vpop.f32.mrf.mxu0  ;;  %v7620_v57 = vpop.f32.mrf.mxu1  ;;  %v5767_v16 = vld [vmem:[%s8734_s1 + $0x9f8] ss:$24 sps:$4 sm:$0xff]  }
 0x15f   : > { %v4854_v59 = vrot.slane %v4853_v28, 1  ;;  %v4903_v61 = vrot.slane %v4902_v32, 1  ;;  %v4844_v41 = vmax.f32 %v4842_v38, %v4843_v45  ;;  %v4893_v33 = vmax.f32 %v4891_v25, %v4892_v53  ;;  %2927 = vmatprep.subr.bf16.mxu1 %v5733_v31  ;;  %8841 = vst [vmem:[#allocation40_spill] sm:$0xff] %v7620_v57  ;;  %v5775_v31 = vld [vmem:[%s8734_s1 + $0x9cc] ss:$24 sps:$4 sm:$0xff]  }
 0x160   : > { %v4754_v40 = vrot.slane %v4753_v60, 1  ;;  %v4806_v0 = vmax.f32 %v4804_v56, %v4805_v3  ;;  %v4743_v43 = vrot.slane %v4742_v30, 2  ;;  %v4797_v7 = vmax.f32 %v4795_v34, %v4796_v49  ;;  %3019 = vmatpush1.bf16.msra.mxu0 %v5758_v63  ;;  %v5737_v63 = vld [vmem:[%s8734_s1 + $0x6f8] ss:$24 sps:$4 sm:$0xff]   ;;  %v7640_v3 = vpop.f32.mrf.mxu0 }
 0x161   : > { %v4855_v45 = vmax.f32 %v4853_v28, %v4854_v59  ;;  %v4904_v53 = vmax.f32 %v4902_v32, %v4903_v61  ;;  %v4845_v38 = vrot.slane %v4844_v41, 2  ;;  %v4894_v25 = vrot.slane %v4893_v33, 2  ;;  %3020 = vmatprep.subr.bf16.mxu0 %v5769_v47  ;;  %v5773_v61 = vld [vmem:[%s8734_s1 + $0x9c8] ss:$24 sps:$4 sm:$0xff]  }
 0x162   : > { %v4755_v24 = vmax.f32 %v4753_v60, %v4754_v40  ;;  %v4744_v57 = vmax.f32 %v4742_v30, %v4743_v43  ;;  %v4798_v37 = vrot.slane %v4797_v7, 1  ;;  %v4757_v34 = vsel %vm3876_vm6, %v7580_v54, -inf  ;;  %2928 = vmatpush1.bf16.msra.mxu1 %v5731_v46  ;;  %v5745_v60 = vld [vmem:[%s8734_s1 + $0x6cc] ss:$24 sps:$4 sm:$0xff]   ;;  %v7642_v46 = vpop.f32.mrf.mxu1 }
 0x163   : > { %v4846_v56 = vmax.f32 %v4844_v41, %v4845_v38  ;;  %v4895_v32 = vmax.f32 %v4893_v33, %v4894_v25  ;;  %v4758_v28 = vmax.f32 %v7578_v50, %v4757_v34  ;;  %v4807_v47 = vsel %vm3724_vm2, %v7580_v54, -inf  ;;  %2929 = vmatprep.subr.bf16.mxu1 %v5739_v10  ;;  %2877 = vmatmul.mubr.bf16.gmra.mxu0 %v6430_v42 }
 0x164   : > { %v4990_v30 = vsel %vm4934_vm8, %v7464_v35, %v4755_v24  ;;  %v4745_v49 = vrot.slane %v4744_v57, 1  ;;  %v4799_v59 = vmax.f32 %v4797_v7, %v4798_v37  ;;  %v4808_v50 = vrot.slane %v4807_v47, 4  ;;  %3021 = vmatpush1.bf16.msra.mxu0 %v5767_v16  ;;  %2886 = vmatprep.mubr.bf16.mxu0 %v6434_v44  ;;  %v5784_v24 = vld [vmem:[%s8734_s1 + $0x99c] ss:$24 sps:$4 sm:$0xff]   ;;  %v7668_v34 = vpop.f32.mrf.mxu1 }
 0x165   : > { %v4997_v41 = vsel %vm4942_vm9, %v4990_v30, %v4806_v0  ;;  %v4847_v33 = vrot.slane %v4846_v56, 1  ;;  %v4896_v10 = vrot.slane %v4895_v32, 1  ;;  %v4759_v40 = vrot.slane %v4758_v28, 4  ;;  %2786 = vmatmul.mubr.bf16.gmra.mxu1 %v6558_v12  ;;  %3022 = vmatprep.subr.bf16.mxu0 %v5775_v31  ;;  %v5743_v0 = vld [vmem:[%s8734_s1 + $0x6c8] ss:$24 sps:$4 sm:$0xff]  }
 0x166   : > { %v5004_v7 = vsel %vm3674_vm1, %v4997_v41, %v4855_v45  ;;  %v4746_v16 = vmax.f32 %v4744_v57, %v4745_v49  ;;  %v4809_v35 = vmax.f32 %v4807_v47, %v4808_v50  ;;  %v4856_v37 = vsel %vm3774_vm3, %v7580_v54, -inf  ;;  %2930 = vmatpush1.bf16.msra.mxu1 %v5737_v63  ;;  %2795 = vmatprep.mubr.bf16.mxu1 %v6646_v36  ;;  %v5751_v57 = vld [vmem:[%s8734_s1 + $0x69c] ss:$24 sps:$4 sm:$0xff]   ;;  %v7666_v45 = vpop.f32.mrf.mxu0 }
 0x167   : > { %v5011_v43 = vsel %vm3617_vm0, %v5004_v7, %v4904_v53  ;;  %v4848_v38 = vmax.f32 %v4846_v56, %v4847_v33  ;;  %v4897_v25 = vmax.f32 %v4895_v32, %v4896_v10  ;;  %v4760_v31 = vmax.f32 %v4758_v28, %v4759_v40  ;;  %2931 = vmatprep.subr.bf16.mxu1 %v5745_v60  ;;  %v5782_v56 = vld [vmem:[%s8734_s1 + $0x998] ss:$24 sps:$4 sm:$0xff]   ;;  %v5757_v10 = vld [vmem:[%s8734_s1 + $0x66c] ss:$24 sps:$4 sm:$0xff]  }
 0x168   : > { %5025 = vst [vmem:[%s6572_s21 + $0x60] sm:$0xff] %v5011_v43  ;;  %v4989_v63 = vsel %vm4934_vm8, %v7508_v29, %v4746_v16  ;;  %v4810_v47 = vrot.slane %v4809_v35, 2  ;;  %v4857_v30 = vrot.slane %v4856_v37, 4  ;;  %v4905_v53 = vsel %vm3824_vm4, %v7580_v54, -inf  ;;  %3023 = vmatpush1.bf16.msra.mxu0 %v5773_v61  ;;  %v5790_v29 = vld [vmem:[%s8734_s1 + $0x96c] ss:$24 sps:$4 sm:$0xff]   ;;  %v7694_v7 = vpop.f32.mrf.mxu0  ;;  %v7696_v16 = vpop.f32.mrf.mxu1 }
 0x169   : > { %v4996_v32 = vsel %vm4942_vm9, %v4989_v63, %v4799_v59  ;;  %v4761_v28 = vrot.slane %v4760_v31, 2  ;;  %v4906_v60 = vrot.slane %v4905_v53, 4  ;;  %3024 = vmatprep.subr.bf16.mxu0 %v5784_v24  ;;  %v5749_v54 = vld [vmem:[%s8734_s1 + $0x698] ss:$24 sps:$4 sm:$0xff]   ;;  %v8842_v40 = vlaneseq  ;;  %v5755_v63 = vld [vmem:[%s8734_s1 + $0x668] ss:$24 sps:$4 sm:$0xff]  }
 0x16a   : > { %v5003_v49 = vsel %vm3674_vm1, %v4996_v32, %v4848_v38  ;;  %v4811_v50 = vmax.f32 %v4809_v35, %v4810_v47  ;;  %v4858_v41 = vmax.f32 %v4856_v37, %v4857_v30  ;;  %2932 = vmatpush1.bf16.msra.mxu1 %v5743_v0  ;;  %v5788_v0 = vld [vmem:[%s8734_s1 + $0x968] ss:$24 sps:$4 sm:$0xff]   ;;  %v2443_v32 = vpop.f32.mrf.mxu0 }
 0x16b   : > { %v5010_v61 = vsel %vm3617_vm0, %v5003_v49, %v4897_v25  ;;  %v4762_v59 = vmax.f32 %v4760_v31, %v4761_v28  ;;  %v4907_v33 = vmax.f32 %v4905_v53, %v4906_v60  ;;  %2933 = vmatprep.subr.bf16.mxu1 %v5751_v57  ;;  %2887 = vmatmul.mubr.bf16.gmra.mxu0 %v6480_v22  ;;  %v7692_v24 = vshrl.u32 %v8842_v40, 7  ;;  %v5799_v25 = vld [vmem:[%s8734_s1 + $0x93c] ss:$24 sps:$4 sm:$0xff]   ;;  %v7715_v28 = vpop.f32.mrf.mxu1  ;;  %v667_v49 = vld [vmem:[%s8735_s2] sm:$0x3f] }
 0x16c   : > { %5024 = vst [vmem:[%s6572_s21 + $0x58] sm:$0xff] %v5010_v61  ;;  %v4812_v35 = vrot.slane %v4811_v50, 1  ;;  %v4859_v37 = vrot.slane %v4858_v41, 2  ;;  %2896 = vmatprep.mubr.bf16.mxu0 %v6567_v62  ;;  %3025 = vmatpush1.bf16.msra.mxu0 %v5782_v56  ;;  %v5763_v53 = vld [vmem:[%s8734_s1 + $0x63c] ss:$24 sps:$4 sm:$0xff]  }
 0x16d   : > { %8843 = vst [vmem:[#allocation41_spill] sm:$0xff] %v7692_v24  ;;  %v4763_v43 = vrot.slane %v4762_v59, 1  ;;  %v4908_v38 = vrot.slane %v4907_v33, 2  ;;  %2796 = vmatmul.mubr.bf16.gmra.mxu1 %v6687_v9  ;;  %3026 = vmatprep.subr.bf16.mxu0 %v5790_v29  ;;  %v671_v56 = vsub.s32 0, %v7692_v24  ;;  %v5797_v29 = vld [vmem:[%s8734_s1 + $0x938] ss:$24 sps:$4 sm:$0xff]  }
 0x16e   : > { %v4813_v31 = vmax.f32 %v4811_v50, %v4812_v35  ;;  %v4860_v57 = vmax.f32 %v4858_v41, %v4859_v37  ;;  %2934 = vmatpush1.bf16.msra.mxu1 %v5749_v54  ;;  %2805 = vmatprep.mubr.bf16.mxu1 %v6756_v58  ;;  %v675_v50 = vsub.s32 1, %v7692_v24  ;;  %v5805_v61 = vld [vmem:[%s8734_s1 + $0x90c] ss:$24 sps:$4 sm:$0xff]   ;;  %v2445_v37 = vpop.f32.mrf.mxu0 }
 0x16f   : > { %v4764_v47 = vmax.f32 %v4762_v59, %v4763_v43  ;;  %v4909_v30 = vmax.f32 %v4907_v33, %v4908_v38  ;;  %2935 = vmatprep.subr.bf16.mxu1 %v5757_v10  ;;  %v5761_v10 = vld [vmem:[%s8734_s1 + $0x638] ss:$24 sps:$4 sm:$0xff]   ;;  %v5766_v35 = vld [vmem:[%s8734_s1 + $0x60c] ss:$24 sps:$4 sm:$0xff]   ;;  %v5803_v38 = vld [vmem:[%s8734_s1 + $0x908] ss:$24 sps:$4 sm:$0xff]  }
 0x170   : > { %v4861_v60 = vrot.slane %v4860_v57, 1  ;;  %3027 = vmatpush1.bf16.msra.mxu0 %v5788_v0  ;;  %v7739_v0 = vpop.f32.mrf.mxu1  ;;  %v8858_v24 = vld [vmem:[#allocation22_spill] sm:$0xff] }
 0x171   : > { %v4910_v41 = vrot.slane %v4909_v30, 1  ;;  %v4991_v54 = vsel %vm4934_vm8, %v7564_v14, %v4764_v47  ;;  %3028 = vmatprep.subr.bf16.mxu0 %v5799_v25  ;;  %v7737_v14 = vrot.slane %v667_v49, %v671_v56  ;;  %v7746_v25 = vrot.slane %v667_v49, %v675_v50  ;;  %v2447_v50 = vpop.f32.mrf.mxu0 }
 0x172   : > { %v4862_v59 = vmax.f32 %v4860_v57, %v4861_v60  ;;  %v4998_v33 = vsel %vm4942_vm9, %v4991_v54, %v4813_v31  ;;  %2936 = vmatpush1.bf16.msra.mxu1 %v5755_v63  ;;  %v5811_v57 = vld [vmem:[%s8734_s1 + $0x164] ss:$24 sps:$4 sm:$0xff]   ;;  %v7755_v47 = vpop.f32.mrf.mxu1 }
 0x173   : > { %v4911_v40 = vmax.f32 %v4909_v30, %v4910_v41  ;;  %2937 = vmatprep.subr.bf16.mxu1 %v5763_v53  ;;  %2897 = vmatmul.mubr.bf16.gmra.mxu0 %v6607_v4  ;;  %v2434_v63 = vadd.f32 %v7618_v23, %v7737_v14  ;;  %v5764_v30 = vld [vmem:[%s8734_s1 + $0x608] ss:$24 sps:$4 sm:$0xff]   ;;  %v2436_v53 = vadd.f32 %v7640_v3, %v7746_v25  ;;  %v5772_v23 = vld [vmem:[%s8734_s1 + $0x8dc] ss:$24 sps:$4 sm:$0xff]  }
 0x174   : > { %v5005_v43 = vsel %vm3674_vm1, %v4998_v33, %v4862_v59  ;;  %2906 = vmatprep.mubr.bf16.mxu0 %v6718_v21  ;;  %3029 = vmatpush1.bf16.msra.mxu0 %v5797_v29  ;;  %v2438_v56 = vadd.f32 %v7666_v45, %v7737_v14  ;;  %v2444_v29 = vadd.f32 %v2443_v32, %v7737_v14  ;;  %v2558_v41 = vpop.f32.mrf.mxu1  ;;  %v5770_v59 = vld [vmem:[%s8734_s1 + $0x8d8] ss:$24 sps:$4 sm:$0xff]   ;;  %v5787_v33 = vld [vmem:[%s8734_s1 + $0x84c] ss:$24 sps:$4 sm:$0xff]  }
 0x175   : > { %v5012_v31 = vsel %vm3617_vm0, %v5005_v43, %v4911_v40  ;;  %2806 = vmatmul.mubr.bf16.gmra.mxu1 %v6795_v27  ;;  %3030 = vmatprep.subr.bf16.mxu0 %v5805_v61  ;;  %v7770_v60 = vadd.f32 %v7512_v17, %v2434_v63  ;;  %v2446_v49 = vadd.f32 %v2445_v37, %v7746_v25  ;;  %v8845_v40 = vld [vmem:[#allocation10_spill] sm:$0xff]  ;;  %v8846_v37 = vld [vmem:[#allocation11_spill] sm:$0xff]  ;;  %v5793_v43 = vld [vmem:[%s8734_s1 + $0x81c] ss:$24 sps:$4 sm:$0xff]  }
 0x176   : > { %5026 = vst [vmem:[%s6572_s21 + $0x68] sm:$0xff] %v5012_v31  ;;  %2938 = vmatpush1.bf16.msra.mxu1 %v5761_v10  ;;  %2815 = vmatprep.mubr.bf16.mxu1 %v6856_v8  ;;  %v7775_v3 = vadd.f32 %v7519_v55, %v2436_v53  ;;  %v7778_v45 = vadd.f32 %v7529_v48, %v2438_v56  ;;  %v2559_v32 = vpop.f32.mrf.mxu1  ;;  %v5778_v48 = vld [vmem:[%s8734_s1 + $0x8ac] ss:$24 sps:$4 sm:$0xff]   ;;  %v8844_v10 = vld [vmem:[#allocation8_spill] sm:$0xff] }
 0x177   : > { %2939 = vmatprep.subr.bf16.mxu1 %v5766_v35  ;;  %v2448_v54 = vadd.f32 %v2447_v50, %v7737_v14  ;;  %v7782_v61 = vadd.f32 %v7557_v19, %v2444_v29  ;;  %v7785_v17 = vadd.f32 %v7575_v26, %v2446_v49  ;;  %v5776_v19 = vld [vmem:[%s8734_s1 + $0x8a8] ss:$24 sps:$4 sm:$0xff]   ;;  %v5781_v26 = vld [vmem:[%s8734_s1 + $0x87c] ss:$24 sps:$4 sm:$0xff]   ;;  %v5796_v63 = vld [vmem:[%s8734_s1 + $0x7ec] ss:$24 sps:$4 sm:$0xff]  }
 0x178   : > { %3031 = vmatpush1.bf16.msra.mxu0 %v5803_v38  ;;  %v5785_v35 = vld [vmem:[%s8734_s1 + $0x848] ss:$24 sps:$4 sm:$0xff]   ;;  %v5817_v31 = vld [vmem:[%s8734_s1 + $0x134] ss:$24 sps:$4 sm:$0xff]   ;;  %v5823_v56 = vld [vmem:[%s8734_s1 + $0x104] ss:$24 sps:$4 sm:$0xff]  }
 0x179   : > { %3107 = vmatprep.subr.bf16.mxu0 %v5811_v57  ;;  %v7791_v55 = vadd.f32 %v7601_v51, %v2448_v54  ;;  %v5779_v51 = vld [vmem:[%s8734_s1 + $0x878] ss:$24 sps:$4 sm:$0xff]   ;;  %v5794_v29 = vld [vmem:[%s8734_s1 + $0x7e8] ss:$24 sps:$4 sm:$0xff]   ;;  %v5802_v49 = vld [vmem:[%s8734_s1 + $0x7bc] ss:$24 sps:$4 sm:$0xff]  }
 0x17a   : > { %2940 = vmatpush1.bf16.msra.mxu1 %v5764_v30  ;;  %v5809_v38 = vld [vmem:[%s8734_s1 + $0x160] ss:$24 sps:$4 sm:$0xff]   ;;  %v5815_v53 = vld [vmem:[%s8734_s1 + $0x130] ss:$24 sps:$4 sm:$0xff]   ;;  %v5829_v41 = vld [vmem:[%s8734_s1 + $0xd4] ss:$24 sps:$4 sm:$0xff]  }
 0x17b   : > { %2941 = vmatprep.subr.bf16.mxu1 %v5772_v23  ;;  %2907 = vmatmul.mubr.bf16.gmra.mxu0 %v6748_v52  ;;  %v5791_v57 = vld [vmem:[%s8734_s1 + $0x818] ss:$24 sps:$4 sm:$0xff]   ;;  %v7842_v23 = vpop.f32.mrf.mxu0 }
 0x17c   : > { %2916 = vmatprep.mubr.bf16.mxu0 %v6826_v15  ;;  %v8847_v30 = vld [vmem:[#allocation9_spill] sm:$0xff] }
 0x17d   : > { %2816 = vmatmul.mubr.bf16.gmra.mxu1 %v6900_v1  ;;  %v5821_v50 = vld [vmem:[%s8734_s1 + $0x100] ss:$24 sps:$4 sm:$0xff]  }
 0x17e   : > { %2942 = vmatpush2.bf16.msra.mxu1 %v5770_v59  ;;  %2825 = vmatprep.mubr.bf16.mxu1 %v6939_v5  ;;  %v5800_v32 = vld [vmem:[%s8734_s1 + $0x7b8] ss:$24 sps:$4 sm:$0xff]  }
 0x17f   : > { %2943 = vmatprep.subr.bf16.mxu1 %v5778_v48  ;;  %v5808_v48 = vld [vmem:[%s8734_s1 + $0x78c] ss:$24 sps:$4 sm:$0xff]  }
 0x182   : > { %2944 = vmatpush2.bf16.msra.mxu1 %v5776_v19  ;;  %v8848_v19 = vld [vmem:[#allocation15_spill] sm:$0xff] }
 0x183   : > { %2945 = vmatprep.subr.bf16.mxu1 %v5781_v26  ;;  %2917 = vmatmul.mubr.bf16.gmra.mxu0 %v8844_v10 }
 0x184   : > { %3048 = vmatprep.mubr.bf16.mxu0 %v8814_v2 }
 0x185   : > { %2826 = vmatmul.mubr.bf16.gmra.mxu1 %v8845_v40 }
 0x186   : > { %2946 = vmatpush2.bf16.msra.mxu1 %v5779_v51  ;;  %2957 = vmatprep.mubr.bf16.mxu1 %v8846_v37  ;;  %v5827_v51 = vld [vmem:[%s8734_s1 + $0xd0] ss:$24 sps:$4 sm:$0xff]  }
 0x187   : > { %2947 = vmatprep.subr.bf16.mxu1 %v5787_v33 }
 0x18a   : > { %2948 = vmatpush2.bf16.msra.mxu1 %v5785_v35 }
 0x18b   : > { %2949 = vmatprep.subr.bf16.mxu1 %v5793_v43  ;;  %3049 = vmatmul.mubr.bf16.vlgmr.msra.gmra.mxu0 %v8847_v30  ;;  %v5835_v43 = vld [vmem:[%s8734_s1 + $0xa4] ss:$24 sps:$4 sm:$0xff]  }
 0x18c   : > { %3108 = vmatpush1.bf16.msra.mxu0 %v5809_v38  ;;  %3058 = vmatprep.mubr.bf16.mxu0 %v8814_v2 }
 0x18d   : > { %3109 = vmatprep.subr.bf16.mxu0 %v5817_v31  ;;  %v5806_v31 = vld [vmem:[%s8734_s1 + $0x788] ss:$24 sps:$4 sm:$0xff]  }
 0x18e   : > { %2950 = vmatpush2.bf16.msra.mxu1 %v5791_v57  ;;  %v2453_v54 = vpop.f32.mrf.mxu0 }
 0x18f   : > { %2951 = vmatprep.subr.bf16.mxu1 %v5796_v63  ;;  %v2454_v59 = vadd.f32 %v2453_v54, %v7737_v14  ;;  %v5820_v54 = vld [vmem:[%s8734_s1 + $0x434] ss:$24 sps:$4 sm:$0xff]  }
 0x190   : > { %3110 = vmatpush1.bf16.msra.mxu0 %v5815_v53  ;;  %v2455_v26 = vpop.f32.mrf.mxu0 }
 0x191   : > { %3111 = vmatprep.subr.bf16.mxu0 %v5823_v56  ;;  %v2456_v33 = vadd.f32 %v2455_v26, %v7746_v25  ;;  %v7870_v35 = vadd.f32 %v7642_v46, %v2454_v59  ;;  %v5814_v46 = vld [vmem:[%s8734_s1 + $0x464] ss:$24 sps:$4 sm:$0xff]   ;;  %v5833_v56 = vld [vmem:[%s8734_s1 + $0xa0] ss:$24 sps:$4 sm:$0xff]   ;;  %v5839_v59 = vld [vmem:[%s8734_s1 + $0x70] ss:$24 sps:$4 sm:$0xff]  }
 0x192   : > { %2952 = vmatpush2.bf16.msra.mxu1 %v5794_v29  ;;  %v2457_v38 = vpop.f32.mrf.mxu0 }
 0x193   : > { %2953 = vmatprep.subr.bf16.mxu1 %v5802_v49  ;;  %3059 = vmatmul.mubr.bf16.gmra.mxu0 %v8848_v19  ;;  %v2458_v57 = vadd.f32 %v2457_v38, %v7737_v14  ;;  %v7880_v63 = vadd.f32 %v7668_v34, %v2456_v33  ;;  %v5841_v34 = vld [vmem:[%s8734_s1 + $0x74] ss:$24 sps:$4 sm:$0xff]   ;;  %v5847_v33 = vld [vmem:[%s8734_s1 + $0x44] ss:$24 sps:$4 sm:$0xff]   ;;  %v5818_v38 = vld [vmem:[%s8734_s1 + $0x430] ss:$24 sps:$4 sm:$0xff]  }
 0x194   : > { %3112 = vmatpush1.bf16.msra.mxu0 %v5821_v50  ;;  %3068 = vmatprep.mubr.bf16.mxu0 %v8814_v2  ;;  %v7885_v53 = vpop.f32.mrf.mxu0  ;;  %v5812_v50 = vld [vmem:[%s8734_s1 + $0x460] ss:$24 sps:$4 sm:$0xff]   ;;  %v5851_v19 = vld [vmem:[%s8734_s1 + $0x10] ss:$24 sps:$4 sm:$0xff]  }
 0x195   : > { %3113 = vmatprep.subr.bf16.mxu0 %v5829_v41  ;;  %v7891_v29 = vadd.f32 %v7696_v16, %v2458_v57 }
 0x196   : > { %2954 = vmatpush2.bf16.msra.mxu1 %v5800_v32  ;;  %v2463_v49 = vpop.f32.mrf.mxu0  ;;  %v2414_v32 = vadd.f32 %v7474_v18, %v7737_v14 }
 0x197   : > { %2955 = vmatprep.subr.bf16.mxu1 %v5808_v48  ;;  %v2464_v41 = vadd.f32 %v2463_v49, %v7737_v14  ;;  %v8854_v49 = vld [vmem:[#allocation21_spill] sm:$0xff] }
 0x198   : > { %3114 = vmatpush1.bf16.msra.mxu0 %v5827_v51  ;;  %v2465_v16 = vpop.f32.mrf.mxu0  ;;  %v8850_v51 = vld [vmem:[#allocation12_spill] sm:$0xff] }
 0x199   : > { %3115 = vmatprep.subr.bf16.mxu0 %v5835_v43  ;;  %v7911_v48 = vadd.f32 %v7739_v0, %v2464_v41  ;;  %v2466_v26 = vadd.f32 %v2465_v16, %v7746_v25  ;;  %v2686_v43 = vpop.f32.mrf.mxu1  ;;  %v8852_v0 = vld [vmem:[#allocation29_spill] sm:$0xff] }
 0x19a   : > { %2956 = vmatpush2.bf16.msra.mxu1 %v5806_v31  ;;  %v2467_v18 = vpop.f32.mrf.mxu0  ;;  %v8851_v31 = vld [vmem:[#allocation13_spill] sm:$0xff]  ;;  %v2416_v57 = vadd.f32 %v8852_v0, %v7746_v25  ;;  %v8856_v0 = vld [vmem:[#allocation23_spill] sm:$0xff] }
 0x19b   : > { %3198 = vmatprep.subr.bf16.mxu1 %v5814_v46  ;;  %3069 = vmatmul.mubr.bf16.gmra.mxu0 %v7317_v39  ;;  %8849 = vst [vmem:[#allocation8_spill] sm:$0xff] %v7911_v48  ;;  %v7925_v46 = vadd.f32 %v7755_v47, %v2466_v26  ;;  %v8855_v41 = vld [vmem:[#allocation33_spill] sm:$0xff]  ;;  %v5853_v47 = vld [vmem:[%s8734_s1 + $0x14] ss:$24 sps:$4 sm:$0xff]  }
 0x19c   : > { %3116 = vmatpush1.bf16.msra.mxu0 %v5833_v56  ;;  %3078 = vmatprep.mubr.bf16.mxu0 %v8814_v2  ;;  %v5826_v56 = vld [vmem:[%s8734_s1 + $0x404] ss:$24 sps:$4 sm:$0xff]   ;;  %v2418_v16 = vadd.f32 %v8855_v41, %v7737_v14  ;;  %v5845_v18 = vld [vmem:[%s8734_s1 + $0x40] ss:$24 sps:$4 sm:$0xff]  }
 0x19d   : > { %2958 = vmatmul.mubr.bf16.vlgmr.msra.gmra.mxu1 %v8850_v51  ;;  %3117 = vmatprep.subr.bf16.mxu0 %v5841_v34  ;;  %8853 = vst [vmem:[#allocation10_spill] sm:$0xff] %v7925_v46  ;;  %v2468_v34 = vpop.f32.mrf.mxu0  ;;  %v8859_v46 = vld [vmem:[#allocation24_spill] sm:$0xff] }
 0x19e   : > { %3199 = vmatpush1.bf16.msra.mxu1 %v5812_v50  ;;  %2967 = vmatprep.mubr.bf16.mxu1 %v8851_v31  ;;  %v2505_v50 = vadd.f32 %v8854_v49, %v2414_v32  ;;  %v5824_v32 = vld [vmem:[%s8734_s1 + $0x400] ss:$24 sps:$4 sm:$0xff]   ;;  %v2507_v34 = vadd.f32 %v8856_v0, %v2416_v57 }
 0x19f   : > { %3200 = vmatprep.subr.bf16.mxu1 %v5820_v54  ;;  %v2688_v54 = vpop.f32.mrf.mxu1  ;;  %v2595_v26 = vpop.f32.mrf.mxu0 }
 0x1a0   : > { %3118 = vmatpush1.bf16.msra.mxu0 %v5839_v59  ;;  %v8857_v59 = vld [vmem:[#allocation35_spill] sm:$0xff]  ;;  %v2596_v41 = vadd.f32 %v2595_v26, %v2505_v50  ;;  %v8860_v50 = vld [vmem:[#allocation14_spill] sm:$0xff] }
 0x1a1   : > { %3119 = vmatprep.subr.bf16.mxu0 %v5847_v33  ;;  %v2420_v49 = vadd.f32 %v8857_v59, %v7746_v25  ;;  %v5832_v33 = vld [vmem:[%s8734_s1 + $0x3d4] ss:$24 sps:$4 sm:$0xff]   ;;  %v2597_v39 = vpop.f32.mrf.mxu0 }
 0x1a2   : > { %3201 = vmatpush1.bf16.msra.mxu1 %v5818_v38  ;;  %v2509_v38 = vadd.f32 %v8859_v46, %v2418_v16  ;;  %v2687_v57 = vadd.f32 %v2686_v43, %v2596_v41  ;;  %v2598_v0 = vadd.f32 %v2597_v39, %v2507_v34  ;;  %v2690_v46 = vpop.f32.mrf.mxu1  ;;  %v5830_v39 = vld [vmem:[%s8734_s1 + $0x3d0] ss:$24 sps:$4 sm:$0xff]   ;;  %v5838_v41 = vld [vmem:[%s8734_s1 + $0x3a4] ss:$24 sps:$4 sm:$0xff]  }
 0x1a3   : > { %3202 = vmatprep.subr.bf16.mxu1 %v5826_v56  ;;  %3079 = vmatmul.mubr.bf16.gmra.mxu0 %v8858_v24  ;;  %v5859_v56 = vld [vmem:[%s8734_s1 + $0x2e4] ss:$24 sps:$4 sm:$0xff]   ;;  %v2599_v16 = vpop.f32.mrf.mxu0  ;;  %v8861_v43 = vld [vmem:[#allocation16_spill] sm:$0xff] }
 0x1a4   : > { %3120 = vmatpush1.bf16.msra.mxu0 %v5845_v18  ;;  %3088 = vmatprep.mubr.bf16.mxu0 %v8814_v2  ;;  %v8862_v18 = vld [vmem:[#allocation25_spill] sm:$0xff]  ;;  %v3471_v26 = vmax.f32 %v2687_v57, 0.0  ;;  %v2689_v34 = vadd.f32 %v2688_v54, %v2598_v0  ;;  %v2600_v59 = vadd.f32 %v2599_v16, %v2509_v38  ;;  %v2424_v54 = vadd.f32 %v7537_v13, %v7737_v14  ;;  %v8863_v13 = vld [vmem:[#allocation34_spill] sm:$0xff] }
 0x1a5   : > { %2968 = vmatmul.mubr.bf16.gmra.mxu1 %v8860_v50  ;;  %3121 = vmatprep.subr.bf16.mxu0 %v5853_v47  ;;  %v2511_v47 = vadd.f32 %v8862_v18, %v2420_v49  ;;  %v2601_v24 = vpop.f32.mrf.mxu0  ;;  %v5865_v49 = vld [vmem:[%s8734_s1 + $0x2b4] ss:$24 sps:$4 sm:$0xff]   ;;  %v2426_v0 = vadd.f32 %v7555_v20, %v7746_v25  ;;  %v8865_v16 = vld [vmem:[#allocation26_spill] sm:$0xff] }
 0x1a6   : > { %3203 = vmatpush1.bf16.msra.mxu1 %v5824_v32  ;;  %2977 = vmatprep.mubr.bf16.mxu1 %v8861_v43  ;;  %v5857_v32 = vld [vmem:[%s8734_s1 + $0x2e0] ss:$24 sps:$4 sm:$0xff]   ;;  %3537 = vst [vmem:[%s7962_s14] sm:$0xff] %v3471_v26  ;;  %v3472_v48 = vmax.f32 %v2689_v34, 0.0  ;;  %v2691_v43 = vadd.f32 %v2690_v46, %v2600_v59  ;;  %v5863_v46 = vld [vmem:[%s8734_s1 + $0x2b0] ss:$24 sps:$4 sm:$0xff]  }
 0x1a7   : > { %3204 = vmatprep.subr.bf16.mxu1 %v5832_v33  ;;  %v2602_v50 = vadd.f32 %v2601_v24, %v2511_v47  ;;  %v2692_v33 = vpop.f32.mrf.mxu1  ;;  %v5844_v24 = vld [vmem:[%s8734_s1 + $0x374] ss:$24 sps:$4 sm:$0xff]   ;;  %v5871_v20 = vld [vmem:[%s8734_s1 + $0x284] ss:$24 sps:$4 sm:$0xff]   ;;  %v5842_v47 = vld [vmem:[%s8734_s1 + $0x370] ss:$24 sps:$4 sm:$0xff]  }
 0x1a8   : > { %3122 = vmatpush1.bf16.msra.mxu0 %v5851_v19  ;;  %v5836_v19 = vld [vmem:[%s8734_s1 + $0x3a0] ss:$24 sps:$4 sm:$0xff]   ;;  %3538 = vst [vmem:[%s7962_s14 + $0x8] sm:$0xff] %v3472_v48  ;;  %v3477_v38 = vmax.f32 %v2691_v43, 0.0  ;;  %v2428_v43 = vadd.f32 %v7573_v6, %v7737_v14  ;;  %v8866_v26 = vld [vmem:[#allocation19_spill] sm:$0xff]  ;;  %v8867_v59 = vld [vmem:[#allocation28_spill] sm:$0xff]  ;;  %v2430_v14 = vadd.f32 %v7599_v11, %v7746_v25 }
 0x1a9   : > { %3123 = vmatprep.subr.bf16.mxu0 %v5859_v56  ;;  %v2693_v57 = vadd.f32 %v2692_v33, %v2602_v50  ;;  %v8864_v50 = vld [vmem:[#allocation17_spill] sm:$0xff]  ;;  %v2517_v6 = vadd.f32 %v8867_v59, %v2426_v0  ;;  %v5856_v0 = vld [vmem:[%s8734_s1 + $0x314] ss:$24 sps:$4 sm:$0xff]  }
 0x1aa   : > { %3205 = vmatpush1.bf16.msra.mxu1 %v5830_v39  ;;  %v2605_v56 = vpop.f32.mrf.mxu0  ;;  %3543 = vst [vmem:[%s7962_s14 + $0x30] sm:$0xff] %v3477_v38  ;;  %v2515_v39 = vadd.f32 %v8865_v16, %v2424_v54  ;;  %v5850_v34 = vld [vmem:[%s8734_s1 + $0x344] ss:$24 sps:$4 sm:$0xff]   ;;  %v5869_v54 = vld [vmem:[%s8734_s1 + $0x280] ss:$24 sps:$4 sm:$0xff]  }
 0x1ab   : > { %3206 = vmatprep.subr.bf16.mxu1 %v5838_v41  ;;  %3089 = vmatmul.mubr.bf16.gmra.mxu0 %v8863_v13  ;;  %v3478_v48 = vmax.f32 %v2693_v57, 0.0  ;;  %v5848_v11 = vld [vmem:[%s8734_s1 + $0x340] ss:$24 sps:$4 sm:$0xff]  }
 0x1ac   : > { %3124 = vmatpush2.bf16.msra.mxu0 %v5857_v32  ;;  %3098 = vmatprep.mubr.bf16.mxu0 %v8814_v2  ;;  %v2607_v18 = vpop.f32.mrf.mxu0  ;;  %v2606_v41 = vadd.f32 %v2605_v56, %v2515_v39  ;;  %v8869_v56 = vld [vmem:[#allocation39_spill] sm:$0xff] }
 0x1ad   : > { %2978 = vmatmul.mubr.bf16.gmra.mxu1 %v8864_v50  ;;  %3125 = vmatprep.subr.bf16.mxu0 %v5865_v49  ;;  %3544 = vst [vmem:[%s7962_s14 + $0x38] sm:$0xff] %v3478_v48  ;;  %v8868_v49 = vld [vmem:[#allocation30_spill] sm:$0xff]  ;;  %v2608_v38 = vadd.f32 %v2607_v18, %v2517_v6 }
 0x1ae   : > { %3207 = vmatpush1.bf16.msra.mxu1 %v5836_v19  ;;  %2987 = vmatprep.mubr.bf16.mxu1 %v8866_v26  ;;  %v2609_v32 = vpop.f32.mrf.mxu0  ;;  %v2519_v33 = vadd.f32 %v8868_v49, %v2428_v43  ;;  %v5877_v19 = vld [vmem:[%s8734_s1 + $0x254] ss:$24 sps:$4 sm:$0xff]   ;;  %v5875_v43 = vld [vmem:[%s8734_s1 + $0x250] ss:$24 sps:$4 sm:$0xff]   ;;  %v5862_v49 = vld [vmem:[%s8734_s1 + $0x5e4] ss:$24 sps:$4 sm:$0xff]  }
 0x1af   : > { %3208 = vmatprep.subr.bf16.mxu1 %v5844_v24 }
 0x1b0   : > { %3126 = vmatpush2.bf16.msra.mxu0 %v5863_v46  ;;  %v2611_v24 = vpop.f32.mrf.mxu0  ;;  %v8870_v46 = vld [vmem:[#allocation32_spill] sm:$0xff]  ;;  %v2610_v39 = vadd.f32 %v2609_v32, %v2519_v33  ;;  %v8873_v32 = vld [vmem:[#allocation27_spill] sm:$0xff] }
 0x1b1   : > { %3127 = vmatprep.subr.bf16.mxu0 %v5871_v20  ;;  %v2696_v57 = vpop.f32.mrf.mxu1  ;;  %v2521_v48 = vadd.f32 %v8870_v46, %v2430_v14  ;;  %v8871_v20 = vld [vmem:[#allocation2_spill] sm:$0xff] }
 0x1b2   : > { %3209 = vmatpush1.bf16.msra.mxu1 %v5842_v47  ;;  %v2697_v16 = vadd.f32 %v2696_v57, %v2606_v41  ;;  %v8872_v47 = vld [vmem:[#allocation20_spill] sm:$0xff]  ;;  %v5860_v46 = vld [vmem:[%s8734_s1 + $0x5e0] ss:$24 sps:$4 sm:$0xff]  }
 0x1b3   : > { %3210 = vmatprep.subr.bf16.mxu1 %v5850_v34  ;;  %3099 = vmatmul.mubr.bf16.gmra.mxu0 %v8869_v56  ;;  %v2698_v18 = vpop.f32.mrf.mxu1  ;;  %v5883_v34 = vld [vmem:[%s8734_s1 + $0x224] ss:$24 sps:$4 sm:$0xff]   ;;  %v2612_v14 = vadd.f32 %v2611_v24, %v2521_v48  ;;  %v5854_v41 = vld [vmem:[%s8734_s1 + $0x310] ss:$24 sps:$4 sm:$0xff]   ;;  %v5889_v57 = vld [vmem:[%s8734_s1 + $0x1f4] ss:$24 sps:$4 sm:$0xff]  }
 0x1b4   : > { %3128 = vmatpush2.bf16.msra.mxu0 %v5869_v54  ;;  %3139 = vmatprep.mubr.bf16.mxu0 %v8871_v20  ;;  %v3483_v59 = vmax.f32 %v2697_v16, 0.0  ;;  %v2699_v6 = vadd.f32 %v2698_v18, %v2608_v38  ;;  %v5881_v38 = vld [vmem:[%s8734_s1 + $0x220] ss:$24 sps:$4 sm:$0xff]   ;;  %v5868_v48 = vld [vmem:[%s8734_s1 + $0x5b4] ss:$24 sps:$4 sm:$0xff]  }
 0x1b5   : > { %2988 = vmatmul.mubr.bf16.gmra.mxu1 %v8872_v47  ;;  %3129 = vmatprep.subr.bf16.mxu0 %v5877_v19  ;;  %v2700_v54 = vpop.f32.mrf.mxu1  ;;  %v5895_v20 = vld [vmem:[%s8734_s1 + $0x1c4] ss:$24 sps:$4 sm:$0xff]   ;;  %v5866_v18 = vld [vmem:[%s8734_s1 + $0x5b0] ss:$24 sps:$4 sm:$0xff]  }
 0x1b6   : > { %3211 = vmatpush1.bf16.msra.mxu1 %v5848_v11  ;;  %2997 = vmatprep.mubr.bf16.mxu1 %v8873_v32  ;;  %3549 = vst [vmem:[%s7962_s14 + $0x60] sm:$0xff] %v3483_v59  ;;  %v3484_v33 = vmax.f32 %v2699_v6, 0.0  ;;  %v2701_v19 = vadd.f32 %v2700_v54, %v2610_v39  ;;  %v5887_v39 = vld [vmem:[%s8734_s1 + $0x1f0] ss:$24 sps:$4 sm:$0xff]   ;;  %v5874_v59 = vld [vmem:[%s8734_s1 + $0x584] ss:$24 sps:$4 sm:$0xff]  }
 0x1b7   : > { %3212 = vmatprep.subr.bf16.mxu1 %v5856_v0  ;;  %v2702_v11 = vpop.f32.mrf.mxu1  ;;  %v5893_v6 = vld [vmem:[%s8734_s1 + $0x1c0] ss:$24 sps:$4 sm:$0xff]   ;;  %v5880_v54 = vld [vmem:[%s8734_s1 + $0x554] ss:$24 sps:$4 sm:$0xff]  }
 0x1b8   : > { %3130 = vmatpush2.bf16.msra.mxu0 %v5875_v43  ;;  %3550 = vst [vmem:[%s7962_s14 + $0x68] sm:$0xff] %v3484_v33  ;;  %v3489_v24 = vmax.f32 %v2701_v19, 0.0  ;;  %v2703_v0 = vadd.f32 %v2702_v11, %v2612_v14  ;;  %v8874_v43 = vld [vmem:[#allocation31_spill] sm:$0xff]  ;;  %v8876_v33 = vld [vmem:[#allocation38_spill] sm:$0xff] }
 0x1b9   : > { %3131 = vmatprep.subr.bf16.mxu0 %v5883_v34  ;;  %v8875_v34 = vld [vmem:[#allocation37_spill] sm:$0xff]  ;;  %v5901_v14 = vld [vmem:[%s8734_s1 + $0x194] ss:$24 sps:$4 sm:$0xff]  }
 0x1ba   : > { %3213 = vmatpush1.bf16.msra.mxu1 %v5854_v41  ;;  %3555 = vst [vmem:[%s7962_s14 + $0x90] sm:$0xff] %v3489_v24  ;;  %v3490_v16 = vmax.f32 %v2703_v0, 0.0  ;;  %v5872_v41 = vld [vmem:[%s8734_s1 + $0x580] ss:$24 sps:$4 sm:$0xff]   ;;  %v5907_v19 = vld [vmem:[%s8734_s1 + $0x764] ss:$24 sps:$4 sm:$0xff]  }
 0x1bb   : > { %3214 = vmatprep.subr.bf16.mxu1 %v5862_v49  ;;  %v5899_v49 = vld [vmem:[%s8734_s1 + $0x190] ss:$24 sps:$4 sm:$0xff]   ;;  %v5905_v24 = vld [vmem:[%s8734_s1 + $0x760] ss:$24 sps:$4 sm:$0xff]   ;;  %v5910_v0 = vld [vmem:[%s8734_s1 + $0x734] ss:$24 sps:$4 sm:$0xff]  }
 0x1bc   : > { %3132 = vmatpush2.bf16.msra.mxu0 %v5881_v38  ;;  %3556 = vst [vmem:[%s7962_s14 + $0x98] sm:$0xff] %v3490_v16  ;;  %v5878_v38 = vld [vmem:[%s8734_s1 + $0x550] ss:$24 sps:$4 sm:$0xff]  }
 0x1bd   : > { %2998 = vmatmul.mubr.bf16.gmra.mxu1 %v8874_v43  ;;  %3133 = vmatprep.subr.bf16.mxu0 %v5889_v57  ;;  %v8877_v11 = vld [vmem:[#allocation3_spill] sm:$0xff]  ;;  %v5886_v57 = vld [vmem:[%s8734_s1 + $0x524] ss:$24 sps:$4 sm:$0xff]   ;;  %v8878_v16 = vld [vmem:[#allocation4_spill] sm:$0xff] }
 0x1be   : > { %3215 = vmatpush2.bf16.msra.mxu1 %v5860_v46  ;;  %3007 = vmatprep.mubr.bf16.mxu1 %v8875_v34  ;;  %v5884_v46 = vld [vmem:[%s8734_s1 + $0x520] ss:$24 sps:$4 sm:$0xff]  }
 0x1bf   : > { %3216 = vmatprep.subr.bf16.mxu1 %v5868_v48  ;;  %v5892_v48 = vld [vmem:[%s8734_s1 + $0x4f4] ss:$24 sps:$4 sm:$0xff]  }
 0x1c0   : > { %3134 = vmatpush2.bf16.msra.mxu0 %v5887_v39 }
 0x1c1   : > { %3135 = vmatprep.subr.bf16.mxu0 %v5895_v20  ;;  %v5908_v20 = vld [vmem:[%s8734_s1 + $0x730] ss:$24 sps:$4 sm:$0xff]  }
 0x1c2   : > { %3217 = vmatpush2.bf16.msra.mxu1 %v5866_v18  ;;  %v8879_v18 = vld [vmem:[#allocation7_spill] sm:$0xff] }
 0x1c3   : > { %3218 = vmatprep.subr.bf16.mxu1 %v5874_v59  ;;  %v5913_v59 = vld [vmem:[%s8734_s1 + $0x704] ss:$24 sps:$4 sm:$0xff]  }
 0x1c4   : > { %3136 = vmatpush2.bf16.msra.mxu0 %v5893_v6 }
 0x1c5   : > { %3008 = vmatmul.mubr.bf16.gmra.mxu1 %v8876_v33  ;;  %3137 = vmatprep.subr.bf16.mxu0 %v5901_v14  ;;  %v5890_v14 = vld [vmem:[%s8734_s1 + $0x4f0] ss:$24 sps:$4 sm:$0xff]  }
 0x1c6   : > { %3219 = vmatpush2.bf16.msra.mxu1 %v5872_v41  ;;  %3230 = vmatprep.mubr.bf16.mxu1 %v8877_v11  ;;  %v5898_v41 = vld [vmem:[%s8734_s1 + $0x4c4] ss:$24 sps:$4 sm:$0xff]   ;;  %v5896_v11 = vld [vmem:[%s8734_s1 + $0x4c0] ss:$24 sps:$4 sm:$0xff]  }
 0x1c7   : > { %3220 = vmatprep.subr.bf16.mxu1 %v5880_v54  ;;  %v5911_v54 = vld [vmem:[%s8734_s1 + $0x700] ss:$24 sps:$4 sm:$0xff]  }
 0x1c8   : > { %3138 = vmatpush2.bf16.msra.mxu0 %v5899_v49  ;;  %v5916_v49 = vld [vmem:[%s8734_s1 + $0x6d4] ss:$24 sps:$4 sm:$0xff]  }
 0x1c9   : > { %3289 = vmatprep.subr.bf16.mxu0 %v5907_v19  ;;  %v2615_v39 = vpop.f32.mrf.mxu0 }
 0x1ca   : > { %3221 = vmatpush2.bf16.msra.mxu1 %v5878_v38  ;;  %v2440_v38 = vadd.f32 %v7694_v7, %v7746_v25 }
 0x1cb   : > { %3222 = vmatprep.subr.bf16.mxu1 %v5886_v57  ;;  %3140 = vmatmul.mubr.bf16.vlgmr.msra.gmra.mxu0 %v8878_v16  ;;  %v2617_v6 = vpop.f32.mrf.mxu0  ;;  %v2616_v57 = vadd.f32 %v2615_v39, %v7770_v60  ;;  %v5919_v60 = vld [vmem:[%s8734_s1 + $0x6a4] ss:$24 sps:$4 sm:$0xff]   ;;  %v8880_v16 = vld [vmem:[#allocation36_spill] sm:$0xff] }
 0x1cc   : > { %3290 = vmatpush1.bf16.msra.mxu0 %v5905_v24  ;;  %3149 = vmatprep.mubr.bf16.mxu0 %v8879_v18  ;;  %v5904_v24 = vld [vmem:[%s8734_s1 + $0x494] ss:$24 sps:$4 sm:$0xff]   ;;  %v2618_v7 = vadd.f32 %v2617_v6, %v7775_v3  ;;  %v2531_v39 = vadd.f32 %v8880_v16, %v2440_v38  ;;  %v5922_v3 = vld [vmem:[%s8734_s1 + $0xa64] ss:$24 sps:$4 sm:$0xff]  }
 0x1cd   : > { %3291 = vmatprep.subr.bf16.mxu0 %v5910_v0  ;;  %v2619_v19 = vpop.f32.mrf.mxu0  ;;  %v5914_v0 = vld [vmem:[%s8734_s1 + $0x6d0] ss:$24 sps:$4 sm:$0xff]   ;;  %v5937_v16 = vld [vmem:[%s8734_s1 + $0xa04] ss:$24 sps:$4 sm:$0xff]  }
 0x1ce   : > { %3223 = vmatpush2.bf16.msra.mxu1 %v5884_v46 }
 0x1cf   : > { %3224 = vmatprep.subr.bf16.mxu1 %v5892_v48  ;;  %v2621_v48 = vpop.f32.mrf.mxu0 }
 0x1d0   : > { %3292 = vmatpush1.bf16.msra.mxu0 %v5908_v20 }
 0x1d1   : > { %3293 = vmatprep.subr.bf16.mxu0 %v5913_v59  ;;  %v5917_v59 = vld [vmem:[%s8734_s1 + $0x6a0] ss:$24 sps:$4 sm:$0xff]  }
 0x1d2   : > { %3225 = vmatpush2.bf16.msra.mxu1 %v5890_v14 }
 0x1d3   : > { %3226 = vmatprep.subr.bf16.mxu1 %v5898_v41  ;;  %3150 = vmatmul.mubr.bf16.gmra.mxu0 %v6558_v12  ;;  %v5902_v12 = vld [vmem:[%s8734_s1 + $0x490] ss:$24 sps:$4 sm:$0xff]   ;;  %v2622_v41 = vadd.f32 %v2621_v48, %v2531_v39  ;;  %v5926_v39 = vld [vmem:[%s8734_s1 + $0x640] ss:$24 sps:$4 sm:$0xff]  }
 0x1d4   : > { %3294 = vmatpush1.bf16.msra.mxu0 %v5911_v54  ;;  %3159 = vmatprep.mubr.bf16.mxu0 %v6646_v36  ;;  %v2706_v46 = vpop.f32.mrf.mxu1  ;;  %v2620_v36 = vadd.f32 %v2619_v19, %v7778_v45  ;;  %v5925_v45 = vld [vmem:[%s8734_s1 + $0x674] ss:$24 sps:$4 sm:$0xff]   ;;  %v5929_v48 = vld [vmem:[%s8734_s1 + $0xa30] ss:$24 sps:$4 sm:$0xff]  }
 0x1d5   : > { %3295 = vmatprep.subr.bf16.mxu0 %v5916_v49  ;;  %v2707_v20 = vadd.f32 %v2706_v46, %v2616_v57  ;;  %v5920_v49 = vld [vmem:[%s8734_s1 + $0xa60] ss:$24 sps:$4 sm:$0xff]   ;;  %v5928_v46 = vld [vmem:[%s8734_s1 + $0x644] ss:$24 sps:$4 sm:$0xff]  }
 0x1d6   : > { %3227 = vmatpush2.bf16.msra.mxu1 %v5896_v11  ;;  %v2708_v18 = vpop.f32.mrf.mxu1  ;;  %v5931_v11 = vld [vmem:[%s8734_s1 + $0xa34] ss:$24 sps:$4 sm:$0xff]  }
 0x1d7   : > { %3228 = vmatprep.subr.bf16.mxu1 %v5904_v24  ;;  %v3495_v6 = vmax.f32 %v2707_v20, 0.0  ;;  %v2709_v14 = vadd.f32 %v2708_v18, %v2618_v7  ;;  %v5923_v24 = vld [vmem:[%s8734_s1 + $0x670] ss:$24 sps:$4 sm:$0xff]   ;;  %v5935_v20 = vld [vmem:[%s8734_s1 + $0xa00] ss:$24 sps:$4 sm:$0xff]  }
 0x1d8   : > { %3296 = vmatpush1.bf16.msra.mxu0 %v5914_v0  ;;  %v2710_v54 = vpop.f32.mrf.mxu1  ;;  %v5940_v18 = vld [vmem:[%s8734_s1 + $0x8e4] ss:$24 sps:$4 sm:$0xff]  }
 0x1d9   : > { %3297 = vmatprep.subr.bf16.mxu0 %v5919_v60  ;;  %3561 = vst [vmem:[%s7962_s14 + $0xc0] sm:$0xff] %v3495_v6  ;;  %v3496_v19 = vmax.f32 %v2709_v14, 0.0  ;;  %v2711_v38 = vadd.f32 %v2710_v54, %v2620_v36  ;;  %v8881_v60 = vld [vmem:[#allocation5_spill] sm:$0xff]  ;;  %v5946_v36 = vld [vmem:[%s8734_s1 + $0x9d4] ss:$24 sps:$4 sm:$0xff]  }
 0x1da   : > { %3229 = vmatpush2.bf16.msra.mxu1 %v5902_v12  ;;  %v2712_v57 = vpop.f32.mrf.mxu1  ;;  %v5934_v12 = vld [vmem:[%s8734_s1 + $0x614] ss:$24 sps:$4 sm:$0xff]   ;;  %v5941_v14 = vld [vmem:[%s8734_s1 + $0x8b0] ss:$24 sps:$4 sm:$0xff]  }
 0x1db   : > { %3380 = vmatprep.subr.bf16.mxu1 %v5922_v3  ;;  %3160 = vmatmul.mubr.bf16.gmra.mxu0 %v6687_v9  ;;  %3562 = vst [vmem:[%s7962_s14 + $0xc8] sm:$0xff] %v3496_v19  ;;  %v3501_v0 = vmax.f32 %v2711_v38, 0.0  ;;  %v2713_v7 = vadd.f32 %v2712_v57, %v2622_v41  ;;  %v8882_v9 = vld [vmem:[#allocation6_spill] sm:$0xff]  ;;  %v5932_v3 = vld [vmem:[%s8734_s1 + $0x610] ss:$24 sps:$4 sm:$0xff]   ;;  %v2450_v38 = vadd.f32 %v7842_v23, %v7746_v25 }
 0x1dc   : > { %3298 = vmatpush1.bf16.msra.mxu0 %v5917_v59  ;;  %3169 = vmatprep.mubr.bf16.mxu0 %v6756_v58  ;;  %v5952_v59 = vld [vmem:[%s8734_s1 + $0x9a4] ss:$24 sps:$4 sm:$0xff]   ;;  %v5961_v6 = vld [vmem:[%s8734_s1 + $0x974] ss:$24 sps:$4 sm:$0xff]   ;;  %v5959_v54 = vld [vmem:[%s8734_s1 + $0x970] ss:$24 sps:$4 sm:$0xff]  }
 0x1dd   : > { %3231 = vmatmul.mubr.bf16.vlgmr.msra.gmra.mxu1 %v8881_v60  ;;  %3299 = vmatprep.subr.bf16.mxu0 %v5925_v45  ;;  %3567 = vst [vmem:[%s7962_s14 + $0xf0] sm:$0xff] %v3501_v0  ;;  %v3502_v58 = vmax.f32 %v2713_v7, 0.0  ;;  %v5949_v45 = vld [vmem:[%s8734_s1 + $0x884] ss:$24 sps:$4 sm:$0xff]   ;;  %v5965_v19 = vld [vmem:[%s8734_s1 + $0x940] ss:$24 sps:$4 sm:$0xff]  }
 0x1de   : > { %3381 = vmatpush1.bf16.msra.mxu1 %v5920_v49  ;;  %3240 = vmatprep.mubr.bf16.mxu1 %v8882_v9  ;;  %v5973_v57 = vld [vmem:[%s8734_s1 + $0x914] ss:$24 sps:$4 sm:$0xff]   ;;  %v5971_v7 = vld [vmem:[%s8734_s1 + $0x910] ss:$24 sps:$4 sm:$0xff]  }
 0x1df   : > { %3382 = vmatprep.subr.bf16.mxu1 %v5931_v11  ;;  %3568 = vst [vmem:[%s7962_s14 + $0xf8] sm:$0xff] %v3502_v58 }
 0x1e0   : > { %3300 = vmatpush1.bf16.msra.mxu0 %v5923_v24  ;;  %v5953_v24 = vld [vmem:[%s8734_s1 + $0x850] ss:$24 sps:$4 sm:$0xff]  }
 0x1e1   : > { %3301 = vmatprep.subr.bf16.mxu0 %v5928_v46 }
 0x1e2   : > { %3383 = vmatpush1.bf16.msra.mxu1 %v5929_v48 }
 0x1e3   : > { %3384 = vmatprep.subr.bf16.mxu1 %v5937_v16  ;;  %3170 = vmatmul.mubr.bf16.gmra.mxu0 %v6795_v27  ;;  %v5944_v27 = vld [vmem:[%s8734_s1 + $0x9d0] ss:$24 sps:$4 sm:$0xff]   ;;  %v5964_v16 = vld [vmem:[%s8734_s1 + $0x7f4] ss:$24 sps:$4 sm:$0xff]  }
 0x1e4   : > { %3302 = vmatpush1.bf16.msra.mxu0 %v5926_v39  ;;  %3179 = vmatprep.mubr.bf16.mxu0 %v6856_v8  ;;  %v5950_v8 = vld [vmem:[%s8734_s1 + $0x9a0] ss:$24 sps:$4 sm:$0xff]  }
 0x1e5   : > { %3241 = vmatmul.mubr.bf16.gmra.mxu1 %v6430_v42  ;;  %3303 = vmatprep.subr.bf16.mxu0 %v5934_v12  ;;  %v5938_v42 = vld [vmem:[%s8734_s1 + $0x8e0] ss:$24 sps:$4 sm:$0xff]  }
 0x1e6   : > { %3250 = vmatprep.mubr.bf16.mxu1 %v6434_v44  ;;  %3385 = vmatpush1.bf16.msra.mxu1 %v5935_v20  ;;  %v5943_v44 = vld [vmem:[%s8734_s1 + $0x8b4] ss:$24 sps:$4 sm:$0xff]  }
 0x1e7   : > { %3386 = vmatprep.subr.bf16.mxu1 %v5946_v36  ;;  %v5962_v36 = vld [vmem:[%s8734_s1 + $0x7f0] ss:$24 sps:$4 sm:$0xff]  }
 0x1e8   : > { %3304 = vmatpush1.bf16.msra.mxu0 %v5932_v3 }
 0x1e9   : > { %3305 = vmatprep.subr.bf16.mxu0 %v5940_v18 }
 0x1ea   : > { %3387 = vmatpush1.bf16.msra.mxu1 %v5944_v27  ;;  %v5970_v27 = vld [vmem:[%s8734_s1 + $0x7c4] ss:$24 sps:$4 sm:$0xff]  }
 0x1eb   : > { %3388 = vmatprep.subr.bf16.mxu1 %v5952_v59  ;;  %3180 = vmatmul.mubr.bf16.gmra.mxu0 %v6900_v1 }
 0x1ec   : > { %3306 = vmatpush2.bf16.msra.mxu0 %v5938_v42  ;;  %v2625_v41 = vpop.f32.mrf.mxu0  ;;  %3189 = vmatprep.mubr.bf16.mxu0 %v6939_v5  ;;  %v5967_v5 = vld [vmem:[%s8734_s1 + $0x944] ss:$24 sps:$4 sm:$0xff]   ;;  %v5968_v42 = vld [vmem:[%s8734_s1 + $0x7c0] ss:$24 sps:$4 sm:$0xff]  }
 0x1ed   : > { %3251 = vmatmul.mubr.bf16.gmra.mxu1 %v6480_v22  ;;  %3307 = vmatprep.subr.bf16.mxu0 %v5943_v44  ;;  %v5947_v22 = vld [vmem:[%s8734_s1 + $0x880] ss:$24 sps:$4 sm:$0xff]   ;;  %v2626_v11 = vadd.f32 %v2625_v41, %v7782_v61  ;;  %v5958_v61 = vld [vmem:[%s8734_s1 + $0x824] ss:$24 sps:$4 sm:$0xff]   ;;  %v5974_v44 = vld [vmem:[%s8734_s1 + $0x790] ss:$24 sps:$4 sm:$0xff]  }
 0x1ee   : > { %3260 = vmatprep.mubr.bf16.mxu1 %v6567_v62  ;;  %v2627_v1 = vpop.f32.mrf.mxu0  ;;  %3389 = vmatpush1.bf16.msra.mxu1 %v5950_v8  ;;  %v5955_v62 = vld [vmem:[%s8734_s1 + $0x854] ss:$24 sps:$4 sm:$0xff]   ;;  %v2460_v8 = vadd.f32 %v7885_v53, %v7746_v25 }
 0x1ef   : > { %3390 = vmatprep.subr.bf16.mxu1 %v5961_v6  ;;  %v2628_v23 = vadd.f32 %v2627_v1, %v7785_v17 }
 0x1f0   : > { %3308 = vmatpush2.bf16.msra.mxu0 %v5941_v14  ;;  %v2629_v49 = vpop.f32.mrf.mxu0  ;;  %v2551_v1 = vadd.f32 %v7715_v28, %v2460_v8 }
 0x1f1   : > { %3309 = vmatprep.subr.bf16.mxu0 %v5949_v45  ;;  %v2630_v17 = vadd.f32 %v2629_v49, %v7791_v55 }
 0x1f2   : > { %3391 = vmatpush1.bf16.msra.mxu1 %v5959_v54  ;;  %v2631_v0 = vpop.f32.mrf.mxu0 }
 0x1f3   : > { %3190 = vmatmul.mubr.bf16.gmra.mxu0 %v8845_v40  ;;  %3392 = vmatprep.subr.bf16.mxu1 %v5967_v5 }
 0x1f4   : > { %3310 = vmatpush2.bf16.msra.mxu0 %v5947_v22  ;;  %3321 = vmatprep.mubr.bf16.mxu0 %v8846_v37  ;;  %v8883_v37 = vld [vmem:[#allocation40_spill] sm:$0xff] }
 0x1f5   : > { %3261 = vmatmul.mubr.bf16.gmra.mxu1 %v6607_v4  ;;  %3311 = vmatprep.subr.bf16.mxu0 %v5955_v62  ;;  %v2541_v60 = vadd.f32 %v8883_v37, %v2450_v38 }
 0x1f6   : > { %v2716_v40 = vpop.f32.mrf.mxu1  ;;  %3270 = vmatprep.mubr.bf16.mxu1 %v6718_v21  ;;  %3393 = vmatpush1.bf16.msra.mxu1 %v5965_v19  ;;  %v5956_v21 = vld [vmem:[%s8734_s1 + $0x820] ss:$24 sps:$4 sm:$0xff]  }
 0x1f7   : > { %v2717_v4 = vadd.f32 %v2716_v40, %v2626_v11  ;;  %3394 = vmatprep.subr.bf16.mxu1 %v5973_v57  ;;  %v2632_v58 = vadd.f32 %v2631_v0, %v2541_v60  ;;  %v8884_v19 = vld [vmem:[#allocation14_spill] sm:$0xff]  ;;  %v8886_v57 = vld [vmem:[#allocation16_spill] sm:$0xff] }
 0x1f8   : > { %v2718_v46 = vpop.f32.mrf.mxu1  ;;  %3312 = vmatpush2.bf16.msra.mxu0 %v5953_v24  ;;  %v8888_v0 = vld [vmem:[#allocation10_spill] sm:$0xff] }
 0x1f9   : > { %v3507_v9 = vmax.f32 %v2717_v4, 0.0  ;;  %v2719_v48 = vadd.f32 %v2718_v46, %v2628_v23  ;;  %3313 = vmatprep.subr.bf16.mxu0 %v5958_v61  ;;  %v8887_v61 = vld [vmem:[#allocation15_spill] sm:$0xff] }
 0x1fa   : > { %v2720_v39 = vpop.f32.mrf.mxu1  ;;  %3395 = vmatpush1.bf16.msra.mxu1 %v5971_v7 }
 0x1fb   : > { %3573 = vst [vmem:[%s7962_s14 + $0x120] sm:$0xff] %v3507_v9  ;;  %v3508_v55 = vmax.f32 %v2719_v48, 0.0  ;;  %v2721_v12 = vadd.f32 %v2720_v39, %v2630_v17 }
 0x1fc   : > { %v2722_v20 = vpop.f32.mrf.mxu1  ;;  %3314 = vmatpush2.bf16.msra.mxu0 %v5956_v21 }
 0x1fd   : > { %3574 = vst [vmem:[%s7962_s14 + $0x128] sm:$0xff] %v3508_v55  ;;  %3271 = vmatmul.mubr.bf16.gmra.mxu1 %v6748_v52  ;;  %v3513_v3 = vmax.f32 %v2721_v12, 0.0  ;;  %v2723_v18 = vadd.f32 %v2722_v20, %v2632_v58  ;;  %3315 = vmatprep.subr.bf16.mxu0 %v5964_v16  ;;  %v5976_v52 = vld [vmem:[%s8734_s1 + $0x794] ss:$24 sps:$4 sm:$0xff]   ;;  %v8889_v55 = vld [vmem:[#allocation18_spill] sm:$0xff] }
 0x1fe   : > { %3280 = vmatprep.mubr.bf16.mxu1 %v6826_v15 }
 0x1ff   : > { %3579 = vst [vmem:[%s7962_s14 + $0x150] sm:$0xff] %v3513_v3  ;;  %v3514_v59 = vmax.f32 %v2723_v18, 0.0 }
 0x200   : > { %3316 = vmatpush2.bf16.msra.mxu0 %v5962_v36 }
 0x201   : > { %3580 = vst [vmem:[%s7962_s14 + $0x158] sm:$0xff] %v3514_v59  ;;  %3317 = vmatprep.subr.bf16.mxu0 %v5970_v27  ;;  %v8890_v27 = vld [vmem:[#allocation22_spill] sm:$0xff] }
 0x204   : > { %3318 = vmatpush2.bf16.msra.mxu0 %v5968_v42 }
 0x205   : > { %3281 = vmatmul.mubr.bf16.gmra.mxu1 %v8844_v10  ;;  %3319 = vmatprep.subr.bf16.mxu0 %v5976_v52 }
 0x206   : > { %3412 = vmatprep.mubr.bf16.mxu1 %v8814_v2 }
 0x208   : > { %v2635_v15 = vpop.f32.mrf.mxu0  ;;  %3320 = vmatpush2.bf16.msra.mxu0 %v5974_v44 }
 0x209   : > { %v2636_v6 = vadd.f32 %v2635_v15, %v7870_v35 }
 0x20a   : > { %v2637_v14 = vpop.f32.mrf.mxu0 }
 0x20b   : > { %3322 = vmatmul.mubr.bf16.vlgmr.msra.gmra.mxu0 %v8850_v51  ;;  %v2638_v41 = vadd.f32 %v2637_v14, %v7880_v63 }
 0x20c   : > { %v2639_v45 = vpop.f32.mrf.mxu0  ;;  %3331 = vmatprep.mubr.bf16.mxu0 %v8851_v31  ;;  %v2726_v10 = vpop.f32.mrf.mxu1 }
 0x20d   : > { %3413 = vmatmul.mubr.bf16.vlgmr.msra.gmra.mxu1 %v8847_v30  ;;  %v2727_v54 = vadd.f32 %v2726_v10, %v2636_v6  ;;  %v2640_v25 = vadd.f32 %v2639_v45, %v7891_v29  ;;  %v8885_v29 = vld [vmem:[#allocation8_spill] sm:$0xff] }
 0x20e   : > { %v2641_v53 = vpop.f32.mrf.mxu0  ;;  %3422 = vmatprep.mubr.bf16.mxu1 %v8814_v2  ;;  %v2728_v35 = vpop.f32.mrf.mxu1 }
 0x20f   : > { %v3519_v51 = vmax.f32 %v2727_v54, 0.0  ;;  %v2729_v5 = vadd.f32 %v2728_v35, %v2638_v41  ;;  %v2642_v22 = vadd.f32 %v2641_v53, %v2551_v1 }
 0x210   : > { %v2730_v63 = vpop.f32.mrf.mxu1 }
 0x211   : > { %3585 = vst [vmem:[%s7962_s14 + $0x180] sm:$0xff] %v3519_v51  ;;  %v3520_v31 = vmax.f32 %v2729_v5, 0.0  ;;  %v2731_v62 = vadd.f32 %v2730_v63, %v2640_v25 }
 0x212   : > { %v2732_v30 = vpop.f32.mrf.mxu1 }
 0x213   : > { %v2645_v49 = vpop.f32.mrf.mxu0  ;;  %3332 = vmatmul.mubr.bf16.gmra.mxu0 %v8884_v19  ;;  %3586 = vst [vmem:[%s7962_s14 + $0x188] sm:$0xff] %v3520_v31  ;;  %v3525_v28 = vmax.f32 %v2731_v62, 0.0  ;;  %v2733_v11 = vadd.f32 %v2732_v30, %v2642_v22 }
 0x214   : > { %v2646_v38 = vadd.f32 %v2645_v49, %v8885_v29  ;;  %3341 = vmatprep.mubr.bf16.mxu0 %v8886_v57 }
 0x215   : > { %v2647_v24 = vpop.f32.mrf.mxu0  ;;  %v2736_v23 = vpop.f32.mrf.mxu1  ;;  %3423 = vmatmul.mubr.bf16.gmra.mxu1 %v8887_v61  ;;  %3591 = vst [vmem:[%s7962_s14 + $0x1b0] sm:$0xff] %v3525_v28  ;;  %v3526_v40 = vmax.f32 %v2733_v11, 0.0 }
 0x216   : > { %v2648_v7 = vadd.f32 %v2647_v24, %v8888_v0  ;;  %v2737_v37 = vadd.f32 %v2736_v23, %v2646_v38  ;;  %3432 = vmatprep.mubr.bf16.mxu1 %v8814_v2  ;;  %v8895_v0 = vld [vmem:[#allocation41_spill] sm:$0xff] }
 0x217   : > { %v2738_v60 = vpop.f32.mrf.mxu1  ;;  %v2649_v4 = vpop.f32.mrf.mxu0  ;;  %3592 = vst [vmem:[%s7962_s14 + $0x1b8] sm:$0xff] %v3526_v40 }
 0x218   : > { %v3531_v17 = vmax.f32 %v2737_v37, 0.0  ;;  %v2739_v46 = vadd.f32 %v2738_v60, %v2648_v7  ;;  %v679_v7 = vsub.s32 2, %v8895_v0  ;;  %v683_v60 = vsub.s32 3, %v8895_v0 }
 0x219   : > { %v2740_v21 = vpop.f32.mrf.mxu1  ;;  %v2650_v9 = vpop.f32.mrf.mxu0 }
 0x21a   : > { %3597 = vst [vmem:[%s7962_s14 + $0x1e0] sm:$0x1] %v3531_v17  ;;  %v3532_v48 = vmax.f32 %v2739_v46, 0.0  ;;  %v8435_v17 = vld [vmem:[%s8735_s2] sm:$0x3f] }
 0x21b   : > { %v2741_v58 = vpop.f32.mrf.mxu1  ;;  %3342 = vmatmul.mubr.bf16.gmra.mxu0 %v8864_v50  ;;  %v8328_v16 = vpop.f32.mrf.mxu0  ;;  %8896 = vst [vmem:[#allocation29_spill] sm:$0xff] %v8435_v17  ;;  %v8438_v46 = vrot.slane %v8435_v17, %v679_v7  ;;  %v8441_v9 = vrot.slane %v8435_v17, %v683_v60 }
 0x21c   : > { %3598 = vst [vmem:[%s7962_s14 + $0x1e8] sm:$0x1] %v3532_v48  ;;  %3351 = vmatprep.mubr.bf16.mxu0 %v8866_v26 }
 0x21d   : > { %v8332_v39 = vpop.f32.mrf.mxu1  ;;  %3433 = vmatmul.mubr.bf16.gmra.mxu1 %v8889_v55  ;;  %v8335_v12 = vpop.f32.mrf.mxu0 }
 0x21e   : > { %3442 = vmatprep.mubr.bf16.mxu1 %v8814_v2  ;;  %v2778_v58 = vadd.f32 %v8332_v39, %v8438_v46 }
 0x21f   : > { %v8338_v20 = vpop.f32.mrf.mxu1  ;;  %v8340_v36 = vpop.f32.mrf.mxu0 }
 0x221   : > { %v8342_v3 = vpop.f32.mrf.mxu1  ;;  %v8344_v50 = vpop.f32.mrf.mxu0 }
 0x223   : > { %v8346_v18 = vpop.f32.mrf.mxu1  ;;  %3352 = vmatmul.mubr.bf16.gmra.mxu0 %v8872_v47  ;;  %v8349_v26 = vpop.f32.mrf.mxu0 }
 0x224   : > { %3361 = vmatprep.mubr.bf16.mxu0 %v8873_v32  ;;  %v2784_v39 = vadd.f32 %v8346_v18, %v8441_v9 }
 0x225   : > { %3443 = vmatmul.mubr.bf16.gmra.mxu1 %v8890_v27  ;;  %v8353_v59 = vpop.f32.mrf.mxu1  ;;  %v8355_v42 = vpop.f32.mrf.mxu0  ;;  %v2780_v27 = vadd.f32 %v8338_v20, %v8441_v9 }
 0x226   : > { %3452 = vmatprep.mubr.bf16.mxu1 %v8814_v2 }
 0x227   : > { %v8358_v52 = vpop.f32.mrf.mxu1  ;;  %v8360_v44 = vpop.f32.mrf.mxu0  ;;  %v2871_v60 = vadd.f32 %v8335_v12, %v2780_v27 }
 0x228   : > { %v2790_v12 = vadd.f32 %v8358_v52, %v8441_v9 }
 0x229   : > { %v8362_v15 = vpop.f32.mrf.mxu1  ;;  %v8364_v8 = vpop.f32.mrf.mxu0 }
 0x22b   : > { %v8366_v47 = vpop.f32.mrf.mxu1  ;;  %3362 = vmatmul.mubr.bf16.gmra.mxu0 %v8874_v43  ;;  %v8369_v32 = vpop.f32.mrf.mxu0 }
 0x22c   : > { %3371 = vmatprep.mubr.bf16.mxu0 %v8875_v34  ;;  %v2794_v52 = vadd.f32 %v8366_v47, %v8441_v9 }
 0x22d   : > { %3453 = vmatmul.mubr.bf16.gmra.mxu1 %v8863_v13  ;;  %v8373_v6 = vpop.f32.mrf.mxu1  ;;  %v8375_v14 = vpop.f32.mrf.mxu0 }
 0x22e   : > { %3462 = vmatprep.mubr.bf16.mxu1 %v8814_v2 }
 0x22f   : > { %v8378_v41 = vpop.f32.mrf.mxu1  ;;  %v8380_v45 = vpop.f32.mrf.mxu0 }
 0x231   : > { %v8382_v10 = vpop.f32.mrf.mxu1  ;;  %v8384_v1 = vpop.f32.mrf.mxu0 }
 0x233   : > { %v8386_v43 = vpop.f32.mrf.mxu1  ;;  %3372 = vmatmul.mubr.bf16.gmra.mxu0 %v8876_v33  ;;  %v8389_v34 = vpop.f32.mrf.mxu0 }
 0x235   : > { %3463 = vmatmul.mubr.bf16.gmra.mxu1 %v8869_v56  ;;  %v8392_v13 = vpop.f32.mrf.mxu1  ;;  %v8394_v54 = vpop.f32.mrf.mxu0 }
 0x237   : > { %v8396_v2 = vpop.f32.mrf.mxu1  ;;  %v8398_v25 = vpop.f32.mrf.mxu0 }
 0x239   : > { %v8400_v53 = vpop.f32.mrf.mxu1  ;;  %v8402_v35 = vpop.f32.mrf.mxu0 }
 0x23b   : > { %v8404_v51 = vpop.f32.mrf.mxu1  ;;  %v8406_v5 = vpop.f32.mrf.mxu0 }
 0x23d   : > { %v8408_v33 = vpop.f32.mrf.mxu1  ;;  %v8410_v22 = vpop.f32.mrf.mxu0 }
 0x23f   : > { %v8412_v56 = vpop.f32.mrf.mxu1  ;;  %v8414_v63 = vpop.f32.mrf.mxu0 }
 0x241   : > { %v8416_v31 = vpop.f32.mrf.mxu1  ;;  %v8418_v62 = vpop.f32.mrf.mxu0 }
 0x242   : > { %8891 = vst [vmem:[#allocation11_spill] sm:$0xff] %v8418_v62 }
 0x243   : > { %v8420_v49 = vpop.f32.mrf.mxu1  ;;  %v8422_v30 = vpop.f32.mrf.mxu0 }
 0x244   : > { %8892 = vst [vmem:[#allocation9_spill] sm:$0xff] %v8422_v30 }
 0x245   : > { %v8424_v19 = vpop.f32.mrf.mxu1  ;;  %v8426_v28 = vpop.f32.mrf.mxu0 }
 0x246   : > { %8893 = vst [vmem:[#allocation12_spill] sm:$0xff] %v8426_v28 }
 0x247   : > { %v8428_v29 = vpop.f32.mrf.mxu1  ;;  %v2922_v38 = vpop.f32.mrf.mxu0 }
 0x248   : > { %8894 = vst [vmem:[#allocation13_spill] sm:$0xff] %v8428_v29 }
 0x249   : > { %v2831_v11 = vpop.f32.mrf.mxu1  ;;  %v2923_v57 = vpop.f32.mrf.mxu0 }
 0x24a   : > { %v2782_v11 = vadd.f32 %v8342_v3, %v8438_v46  ;;  %v2869_v57 = vadd.f32 %v8328_v16, %v2778_v58  ;;  %v2788_v3 = vadd.f32 %v8353_v59, %v8438_v46  ;;  %v2875_v58 = vadd.f32 %v8344_v50, %v2784_v39 }
 0x24b   : > { %v2832_v24 = vpop.f32.mrf.mxu1  ;;  %v3050_v23 = vpop.f32.mrf.mxu0 }
 0x24c   : > { %v2873_v20 = vadd.f32 %v8340_v36, %v2782_v11  ;;  %v2792_v36 = vadd.f32 %v8362_v15, %v8438_v46  ;;  %v2879_v59 = vadd.f32 %v8349_v26, %v2788_v3 }
 0x24d   : > { %v3052_v61 = vpop.f32.mrf.mxu0 }
 0x24e   : > { %v2883_v26 = vadd.f32 %v8360_v44, %v2792_v36 }
 0x24f   : > { %v3054_v40 = vpop.f32.mrf.mxu0 }
 0x251   : > { %v3056_v37 = vpop.f32.mrf.mxu0 }
 0x253   : > { %v3060_v4 = vpop.f32.mrf.mxu0 }
 0x255   : > { %v3062_v21 = vpop.f32.mrf.mxu0 }
 0x257   : > { %v8443_v48 = vpop.f32.mrf.mxu0 }
 0x259   : > { %v8447_v55 = vpop.f32.mrf.mxu0 }
 0x25b   : > { %v8451_v38 = vpop.f32.mrf.mxu0 }
 0x25d   : > { %v2959_v24 = vpop.f32.mrf.mxu1  ;;  %v8456_v7 = vpop.f32.mrf.mxu0 }
 0x25e   : > { %v2960_v17 = vadd.f32 %v2959_v24, %v2869_v57 }
 0x25f   : > { %v2961_v0 = vpop.f32.mrf.mxu1  ;;  %v8461_v28 = vpop.f32.mrf.mxu0 }
 0x260   : > { %v3051_v30 = vadd.f32 %v3050_v23, %v2960_v17  ;;  %v2962_v16 = vadd.f32 %v2961_v0, %v2871_v60 }
 0x261   : > { %v2963_v29 = vpop.f32.mrf.mxu1  ;;  %v8467_v62 = vpop.f32.mrf.mxu0 }
 0x262   : > { %v3473_v18 = vmax.f32 %v3051_v30, 0.0  ;;  %v3053_v27 = vadd.f32 %v3052_v61, %v2962_v16  ;;  %v2964_v57 = vadd.f32 %v2963_v29, %v2873_v20  ;;  %v2881_v29 = vadd.f32 %v8355_v42, %v2790_v12 }
 0x263   : > { %v2965_v11 = vpop.f32.mrf.mxu1  ;;  %v8473_v24 = vpop.f32.mrf.mxu0  ;;  %v2885_v42 = vadd.f32 %v8364_v8, %v2794_v52 }
 0x264   : > { %3539 = vst [vmem:[%s7962_s14 + $0x10] sm:$0xff] %v3473_v18  ;;  %v3474_v50 = vmax.f32 %v3053_v27, 0.0  ;;  %v3055_v23 = vadd.f32 %v3054_v40, %v2964_v57  ;;  %v2966_v0 = vadd.f32 %v2965_v11, %v2875_v58  ;;  %v2798_v40 = vadd.f32 %v8373_v6, %v8438_v46 }
 0x265   : > { %v2969_v17 = vpop.f32.mrf.mxu1  ;;  %v8479_v30 = vpop.f32.mrf.mxu0  ;;  %v2802_v6 = vadd.f32 %v8382_v10, %v8438_v46 }
 0x266   : > { %3540 = vst [vmem:[%s7962_s14 + $0x18] sm:$0xff] %v3474_v50  ;;  %v3479_v15 = vmax.f32 %v3055_v23, 0.0  ;;  %v3057_v61 = vadd.f32 %v3056_v37, %v2966_v0  ;;  %v2970_v60 = vadd.f32 %v2969_v17, %v2879_v59  ;;  %v2800_v37 = vadd.f32 %v8378_v41, %v8441_v9 }
 0x267   : > { %v2971_v39 = vpop.f32.mrf.mxu1  ;;  %v8484_v20 = vpop.f32.mrf.mxu0  ;;  %v2804_v41 = vadd.f32 %v8386_v43, %v8441_v9  ;;  %v2893_v52 = vadd.f32 %v8380_v45, %v2802_v6  ;;  %v2810_v45 = vadd.f32 %v8396_v2, %v8441_v9 }
 0x268   : > { %3545 = vst [vmem:[%s7962_s14 + $0x40] sm:$0xff] %v3479_v15  ;;  %v3480_v47 = vmax.f32 %v3057_v61, 0.0  ;;  %v2972_v3 = vadd.f32 %v2971_v39, %v2881_v29  ;;  %v3061_v16 = vadd.f32 %v3060_v4, %v2970_v60  ;;  %v2889_v4 = vadd.f32 %v8369_v32, %v2798_v40 }
 0x269   : > { %v2973_v58 = vpop.f32.mrf.mxu1  ;;  %v8490_v12 = vpop.f32.mrf.mxu0  ;;  %v2895_v61 = vadd.f32 %v8384_v1, %v2804_v41  ;;  %v2812_v40 = vadd.f32 %v8400_v53, %v8438_v46 }
 0x26a   : > { %3546 = vst [vmem:[%s7962_s14 + $0x48] sm:$0xff] %v3480_v47  ;;  %v3485_v44 = vmax.f32 %v3061_v16, 0.0  ;;  %v2974_v18 = vadd.f32 %v2973_v58, %v2883_v26  ;;  %v3063_v27 = vadd.f32 %v3062_v21, %v2972_v3  ;;  %v2891_v21 = vadd.f32 %v8375_v14, %v2800_v37 }
 0x26b   : > { %v2975_v57 = vpop.f32.mrf.mxu1  ;;  %v8497_v36 = vpop.f32.mrf.mxu0 }
 0x26c   : > { %3551 = vst [vmem:[%s7962_s14 + $0x70] sm:$0xff] %v3485_v44  ;;  %v3486_v8 = vmax.f32 %v3063_v27, 0.0  ;;  %v2976_v11 = vadd.f32 %v2975_v57, %v2885_v42  ;;  %v3065_v59 = vadd.f32 %v8443_v48, %v2974_v18  ;;  %v2808_v48 = vadd.f32 %v8392_v13, %v8438_v46 }
 0x26d   : > { %v2979_v50 = vpop.f32.mrf.mxu1  ;;  %v8504_v23 = vpop.f32.mrf.mxu0  ;;  %v2814_v42 = vadd.f32 %v8404_v51, %v8441_v9  ;;  %v2903_v18 = vadd.f32 %v8398_v25, %v2812_v40 }
 0x26e   : > { %3552 = vst [vmem:[%s7962_s14 + $0x78] sm:$0xff] %v3486_v8  ;;  %v3491_v10 = vmax.f32 %v3065_v59, 0.0  ;;  %v2980_v0 = vadd.f32 %v2979_v50, %v2889_v4  ;;  %v3067_v32 = vadd.f32 %v8447_v55, %v2976_v11  ;;  %v2899_v1 = vadd.f32 %v8389_v34, %v2808_v48 }
 0x26f   : > { %v2981_v17 = vpop.f32.mrf.mxu1  ;;  %v8510_v29 = vpop.f32.mrf.mxu0  ;;  %v2828_v48 = vadd.f32 %v8424_v19, %v8438_v46  ;;  %v8899_v19 = vld [vmem:[#allocation9_spill] sm:$0xff] }
 0x270   : > { %3557 = vst [vmem:[%s7962_s14 + $0xa0] sm:$0xff] %v3491_v10  ;;  %v3492_v43 = vmax.f32 %v3067_v32, 0.0  ;;  %v2982_v15 = vadd.f32 %v2981_v17, %v2891_v21  ;;  %v3071_v14 = vadd.f32 %v8451_v38, %v2980_v0 }
 0x271   : > { %v2983_v60 = vpop.f32.mrf.mxu1  ;;  %v8517_v26 = vpop.f32.mrf.mxu0 }
 0x272   : > { %3558 = vst [vmem:[%s7962_s14 + $0xa8] sm:$0xff] %v3492_v43  ;;  %v3497_v55 = vmax.f32 %v3071_v14, 0.0  ;;  %v2984_v39 = vadd.f32 %v2983_v60, %v2893_v52  ;;  %v3073_v13 = vadd.f32 %v8456_v7, %v2982_v15  ;;  %v2901_v7 = vadd.f32 %v8394_v54, %v2810_v45  ;;  %v8897_v15 = vld [vmem:[#allocation11_spill] sm:$0xff] }
 0x273   : > { %v2985_v47 = vpop.f32.mrf.mxu1  ;;  %v8525_v3 = vpop.f32.mrf.mxu0  ;;  %v2905_v54 = vadd.f32 %v8402_v35, %v2814_v42 }
 0x274   : > { %3563 = vst [vmem:[%s7962_s14 + $0xd0] sm:$0xff] %v3497_v55  ;;  %v3498_v38 = vmax.f32 %v3073_v13, 0.0  ;;  %v2986_v16 = vadd.f32 %v2985_v47, %v2895_v61  ;;  %v3075_v2 = vadd.f32 %v8461_v28, %v2984_v39  ;;  %v2818_v28 = vadd.f32 %v8408_v33, %v8438_v46  ;;  %v8898_v61 = vld [vmem:[#allocation13_spill] sm:$0xff]  ;;  %v8900_v47 = vld [vmem:[#allocation12_spill] sm:$0xff] }
 0x275   : > { %v2989_v58 = vpop.f32.mrf.mxu1  ;;  %v8532_v37 = vpop.f32.mrf.mxu0  ;;  %v2822_v33 = vadd.f32 %v8416_v31, %v8438_v46  ;;  %v2830_v60 = vadd.f32 %v8898_v61, %v8441_v9  ;;  %v2919_v46 = vadd.f32 %v8899_v19, %v2828_v48 }
 0x276   : > { %3564 = vst [vmem:[%s7962_s14 + $0xd8] sm:$0xff] %v3498_v38  ;;  %v3503_v53 = vmax.f32 %v3075_v2, 0.0  ;;  %v2990_v44 = vadd.f32 %v2989_v58, %v2899_v1  ;;  %v3077_v34 = vadd.f32 %v8467_v62, %v2986_v16  ;;  %v2820_v62 = vadd.f32 %v8412_v56, %v8441_v9 }
 0x277   : > { %v2991_v27 = vpop.f32.mrf.mxu1  ;;  %v3104_v6 = vpop.f32.mrf.mxu0  ;;  %v2824_v56 = vadd.f32 %v8420_v49, %v8441_v9  ;;  %v2913_v17 = vadd.f32 %v8414_v63, %v2822_v33  ;;  %v2921_v1 = vadd.f32 %v8900_v47, %v2830_v60 }
 0x278   : > { %3569 = vst [vmem:[%s7962_s14 + $0x100] sm:$0xff] %v3503_v53  ;;  %v3504_v51 = vmax.f32 %v3077_v34, 0.0  ;;  %v2992_v57 = vadd.f32 %v2991_v27, %v2901_v7  ;;  %v3081_v4 = vadd.f32 %v8473_v24, %v2990_v44  ;;  %v2909_v24 = vadd.f32 %v8406_v5, %v2818_v28 }
 0x279   : > { %v2993_v8 = vpop.f32.mrf.mxu1  ;;  %v3105_v11 = vpop.f32.mrf.mxu0  ;;  %v2911_v32 = vadd.f32 %v8410_v22, %v2820_v62  ;;  %v2915_v22 = vadd.f32 %v8897_v15, %v2824_v56 }
 0x27a   : > { %3570 = vst [vmem:[%s7962_s14 + $0x108] sm:$0xff] %v3504_v51  ;;  %v3509_v25 = vmax.f32 %v3081_v4, 0.0  ;;  %v2994_v59 = vadd.f32 %v2993_v8, %v2903_v18  ;;  %v3083_v41 = vadd.f32 %v8479_v30, %v2992_v57 }
 0x27b   : > { %v2995_v50 = vpop.f32.mrf.mxu1 }
 0x27c   : > { %3575 = vst [vmem:[%s7962_s14 + $0x130] sm:$0xff] %v3509_v25  ;;  %v3510_v35 = vmax.f32 %v3083_v41, 0.0  ;;  %v2996_v21 = vadd.f32 %v2995_v50, %v2905_v54  ;;  %v3085_v10 = vadd.f32 %v8484_v20, %v2994_v59 }
 0x27d   : > { %v2999_v0 = vpop.f32.mrf.mxu1 }
 0x27e   : > { %3576 = vst [vmem:[%s7962_s14 + $0x138] sm:$0xff] %v3510_v35  ;;  %v3515_v30 = vmax.f32 %v3085_v10, 0.0  ;;  %v3000_v52 = vadd.f32 %v2999_v0, %v2909_v24  ;;  %v3087_v31 = vadd.f32 %v8490_v12, %v2996_v21 }
 0x27f   : > { %v3001_v5 = vpop.f32.mrf.mxu1 }
 0x280   : > { %3581 = vst [vmem:[%s7962_s14 + $0x160] sm:$0xff] %v3515_v30  ;;  %v3516_v20 = vmax.f32 %v3087_v31, 0.0  ;;  %v3002_v43 = vadd.f32 %v3001_v5, %v2911_v32  ;;  %v3091_v49 = vadd.f32 %v8497_v36, %v3000_v52 }
 0x281   : > { %v3003_v14 = vpop.f32.mrf.mxu1 }
 0x282   : > { %3582 = vst [vmem:[%s7962_s14 + $0x168] sm:$0xff] %v3516_v20  ;;  %v3521_v12 = vmax.f32 %v3091_v49, 0.0  ;;  %v3004_v63 = vadd.f32 %v3003_v14, %v2913_v17  ;;  %v3093_v45 = vadd.f32 %v8504_v23, %v3002_v43 }
 0x283   : > { %v3005_v55 = vpop.f32.mrf.mxu1 }
 0x284   : > { %3587 = vst [vmem:[%s7962_s14 + $0x190] sm:$0xff] %v3521_v12  ;;  %v3522_v39 = vmax.f32 %v3093_v45, 0.0  ;;  %v3006_v36 = vadd.f32 %v3005_v55, %v2915_v22  ;;  %v3095_v13 = vadd.f32 %v8510_v29, %v3004_v63  ;;  %v8901_v63 = vld [vmem:[#allocation41_spill] sm:$0xff] }
 0x285   : > { %v3009_v40 = vpop.f32.mrf.mxu1  ;;  %v687_v45 = vsub.s32 4, %v8901_v63  ;;  %v691_v19 = vsub.s32 5, %v8901_v63 }
 0x286   : > { %3588 = vst [vmem:[%s7962_s14 + $0x198] sm:$0xff] %v3522_v39  ;;  %v3527_v9 = vmax.f32 %v3095_v13, 0.0  ;;  %v3010_v38 = vadd.f32 %v3009_v40, %v2919_v46  ;;  %v3097_v16 = vadd.f32 %v8517_v26, %v3006_v36  ;;  %v8902_v39 = vld [vmem:[#allocation29_spill] sm:$0xff] }
 0x287   : > { %v3011_v23 = vpop.f32.mrf.mxu1  ;;  %v8642_v36 = vrot.slane %v8902_v39, %v687_v45  ;;  %v8647_v40 = vrot.slane %v8902_v39, %v691_v19 }
 0x288   : > { %3593 = vst [vmem:[%s7962_s14 + $0x1c0] sm:$0xff] %v3527_v9  ;;  %v3528_v2 = vmax.f32 %v3097_v16, 0.0  ;;  %v3012_v42 = vadd.f32 %v3011_v23, %v2921_v1  ;;  %v3101_v58 = vadd.f32 %v8525_v3, %v3010_v38 }
 0x289   : > { %v3013_v7 = vpop.f32.mrf.mxu1 }
 0x28a   : > { %3594 = vst [vmem:[%s7962_s14 + $0x1c8] sm:$0xff] %v3528_v2  ;;  %v3533_v53 = vmax.f32 %v3101_v58, 0.0  ;;  %v3103_v29 = vadd.f32 %v8532_v37, %v3012_v42 }
 0x28b   : > { %v3014_v44 = vpop.f32.mrf.mxu1  ;;  %v3141_v34 = vpop.f32.mrf.mxu0 }
 0x28c   : > { %3599 = vst [vmem:[%s7962_s14 + $0x1f0] sm:$0x1] %v3533_v53  ;;  %v3534_v18 = vmax.f32 %v3103_v29, 0.0  ;;  %v3142_v1 = vadd.f32 %v3141_v34, %v8642_v36 }
 0x28d   : > { %v3143_v27 = vpop.f32.mrf.mxu0 }
 0x28e   : > { %3600 = vst [vmem:[%s7962_s14 + $0x1f8] sm:$0x1] %v3534_v18  ;;  %v3144_v38 = vadd.f32 %v3143_v27, %v8647_v40 }
 0x28f   : > { %v3145_v6 = vpop.f32.mrf.mxu0 }
 0x290   : > { %v3146_v2 = vadd.f32 %v3145_v6, %v8642_v36 }
 0x291   : > { %v3147_v28 = vpop.f32.mrf.mxu0 }
 0x292   : > { %v3148_v53 = vadd.f32 %v3147_v28, %v8647_v40 }
 0x293   : > { %v3151_v26 = vpop.f32.mrf.mxu0 }
 0x294   : > { %v3152_v34 = vadd.f32 %v3151_v26, %v8642_v36 }
 0x295   : > { %v3153_v51 = vpop.f32.mrf.mxu0 }
 0x296   : > { %v3154_v27 = vadd.f32 %v3153_v51, %v8647_v40 }
 0x297   : > { %v8579_v57 = vpop.f32.mrf.mxu0 }
 0x298   : > { %v3156_v28 = vadd.f32 %v8579_v57, %v8642_v36 }
 0x299   : > { %v8581_v4 = vpop.f32.mrf.mxu0 }
 0x29a   : > { %v3158_v51 = vadd.f32 %v8581_v4, %v8647_v40 }
 0x29b   : > { %v8583_v3 = vpop.f32.mrf.mxu0 }
 0x29d   : > { %v3232_v54 = vpop.f32.mrf.mxu1  ;;  %v8585_v8 = vpop.f32.mrf.mxu0 }
 0x29e   : > { %v3233_v23 = vadd.f32 %v3232_v54, %v3142_v1 }
 0x29f   : > { %v3234_v37 = vpop.f32.mrf.mxu1  ;;  %v8587_v11 = vpop.f32.mrf.mxu0 }
 0x2a0   : > { %v3235_v7 = vadd.f32 %v3234_v37, %v3144_v38 }
 0x2a1   : > { %v3236_v62 = vpop.f32.mrf.mxu1  ;;  %v8589_v25 = vpop.f32.mrf.mxu0 }
 0x2a3   : > { %v3238_v59 = vpop.f32.mrf.mxu1  ;;  %v8591_v41 = vpop.f32.mrf.mxu0 }
 0x2a4   : > { %v3239_v19 = vadd.f32 %v3238_v59, %v3148_v53 }
 0x2a5   : > { %v3242_v33 = vpop.f32.mrf.mxu1  ;;  %v8593_v50 = vpop.f32.mrf.mxu0 }
 0x2a7   : > { %v8595_v24 = vpop.f32.mrf.mxu1  ;;  %v8597_v35 = vpop.f32.mrf.mxu0 }
 0x2a9   : > { %v8599_v21 = vpop.f32.mrf.mxu1  ;;  %v8601_v10 = vpop.f32.mrf.mxu0 }
 0x2ab   : > { %v8603_v56 = vpop.f32.mrf.mxu1  ;;  %v8605_v0 = vpop.f32.mrf.mxu0 }
 0x2ad   : > { %v8607_v32 = vpop.f32.mrf.mxu1  ;;  %v8609_v30 = vpop.f32.mrf.mxu0 }
 0x2af   : > { %v8611_v52 = vpop.f32.mrf.mxu1  ;;  %v8613_v31 = vpop.f32.mrf.mxu0 }
 0x2b1   : > { %v8615_v17 = vpop.f32.mrf.mxu1  ;;  %v8617_v5 = vpop.f32.mrf.mxu0 }
 0x2b3   : > { %v8619_v48 = vpop.f32.mrf.mxu1  ;;  %v8621_v20 = vpop.f32.mrf.mxu0 }
 0x2b5   : > { %v8623_v43 = vpop.f32.mrf.mxu1  ;;  %v8625_v49 = vpop.f32.mrf.mxu0 }
 0x2b7   : > { %v8627_v15 = vpop.f32.mrf.mxu1  ;;  %v3195_v22 = vpop.f32.mrf.mxu0 }
 0x2b8   : > { %v3237_v22 = vadd.f32 %v3236_v62, %v3146_v2 }
 0x2b9   : > { %v8629_v14 = vpop.f32.mrf.mxu1  ;;  %v3196_v61 = vpop.f32.mrf.mxu0 }
 0x2bb   : > { %v8631_v60 = vpop.f32.mrf.mxu1 }
 0x2bd   : > { %v8633_v12 = vpop.f32.mrf.mxu1 }
 0x2bf   : > { %v8636_v55 = vpop.f32.mrf.mxu1 }
 0x2c1   : > { %v8639_v46 = vpop.f32.mrf.mxu1 }
 0x2c3   : > { %v8644_v13 = vpop.f32.mrf.mxu1 }
 0x2c5   : > { %v8649_v47 = vpop.f32.mrf.mxu1 }
 0x2c7   : > { %v8652_v9 = vpop.f32.mrf.mxu1 }
 0x2c9   : > { %v3286_v16 = vpop.f32.mrf.mxu1 }
 0x2ca   : > { %v3243_v16 = vadd.f32 %v3242_v33, %v3152_v34  ;;  %v3162_v33 = vadd.f32 %v8583_v3, %v8642_v36 }
 0x2cb   : > { %v3287_v42 = vpop.f32.mrf.mxu1  ;;  %v3323_v58 = vpop.f32.mrf.mxu0 }
 0x2cc   : > { %v3324_v29 = vadd.f32 %v3323_v58, %v3233_v23  ;;  %v3245_v42 = vadd.f32 %v8595_v24, %v3154_v27  ;;  %v3164_v24 = vadd.f32 %v8585_v8, %v8647_v40 }
 0x2cd   : > { %v3414_v44 = vpop.f32.mrf.mxu1  ;;  %v3325_v18 = vpop.f32.mrf.mxu0 }
 0x2ce   : > { %v3415_v61 = vadd.f32 %v3414_v44, %v3324_v29  ;;  %v3326_v63 = vadd.f32 %v3325_v18, %v3235_v7  ;;  %v3247_v44 = vadd.f32 %v8599_v21, %v3156_v28  ;;  %v3166_v21 = vadd.f32 %v8587_v11, %v8642_v36 }
 0x2cf   : > { %v3416_v45 = vpop.f32.mrf.mxu1  ;;  %v3327_v54 = vpop.f32.mrf.mxu0 }
 0x2d0   : > { %v3475_v6 = vmax.f32 %v3415_v61, 0.0  ;;  %v3417_v39 = vadd.f32 %v3416_v45, %v3326_v63  ;;  %v3328_v37 = vadd.f32 %v3327_v54, %v3237_v22  ;;  %v3249_v63 = vadd.f32 %v8603_v56, %v3158_v51 }
 0x2d1   : > { %v3418_v1 = vpop.f32.mrf.mxu1  ;;  %v3329_v38 = vpop.f32.mrf.mxu0  ;;  %v3168_v56 = vadd.f32 %v8589_v25, %v8647_v40  ;;  %v3257_v51 = vadd.f32 %v8615_v17, %v3166_v21  ;;  %v3176_v17 = vadd.f32 %v8597_v35, %v8642_v36 }
 0x2d2   : > { %3541 = vst [vmem:[%s7962_s14 + $0x20] sm:$0xff] %v3475_v6  ;;  %v3476_v26 = vmax.f32 %v3417_v39, 0.0  ;;  %v3419_v62 = vadd.f32 %v3418_v1, %v3328_v37  ;;  %v3330_v23 = vadd.f32 %v3329_v38, %v3239_v19  ;;  %v3253_v6 = vadd.f32 %v8607_v32, %v3162_v33 }
 0x2d3   : > { %v3420_v2 = vpop.f32.mrf.mxu1  ;;  %v3333_v59 = vpop.f32.mrf.mxu0  ;;  %v3255_v38 = vadd.f32 %v8611_v52, %v3164_v24  ;;  %v3172_v32 = vadd.f32 %v8591_v41, %v8642_v36  ;;  %v3174_v52 = vadd.f32 %v8593_v50, %v8647_v40 }
 0x2d4   : > { %3542 = vst [vmem:[%s7962_s14 + $0x28] sm:$0xff] %v3476_v26  ;;  %v3481_v58 = vmax.f32 %v3419_v62, 0.0  ;;  %v3421_v7 = vadd.f32 %v3420_v2, %v3330_v23  ;;  %v3334_v57 = vadd.f32 %v3333_v59, %v3243_v16 }
 0x2d5   : > { %v3424_v53 = vpop.f32.mrf.mxu1  ;;  %v3335_v29 = vpop.f32.mrf.mxu0 }
 0x2d6   : > { %3547 = vst [vmem:[%s7962_s14 + $0x50] sm:$0xff] %v3481_v58  ;;  %v3482_v18 = vmax.f32 %v3421_v7, 0.0  ;;  %v3425_v4 = vadd.f32 %v3424_v53, %v3334_v57  ;;  %v3336_v22 = vadd.f32 %v3335_v29, %v3245_v42  ;;  %v3259_v7 = vadd.f32 %v8619_v48, %v3168_v56 }
 0x2d7   : > { %v3426_v34 = vpop.f32.mrf.mxu1  ;;  %v3337_v61 = vpop.f32.mrf.mxu0  ;;  %v3178_v48 = vadd.f32 %v8601_v10, %v8647_v40 }
 0x2d8   : > { %3548 = vst [vmem:[%s7962_s14 + $0x58] sm:$0xff] %v3482_v18  ;;  %v3487_v27 = vmax.f32 %v3425_v4, 0.0  ;;  %v3427_v3 = vadd.f32 %v3426_v34, %v3336_v22  ;;  %v3338_v45 = vadd.f32 %v3337_v61, %v3247_v44  ;;  %v3263_v44 = vadd.f32 %v8623_v43, %v3172_v32 }
 0x2d9   : > { %v3428_v54 = vpop.f32.mrf.mxu1  ;;  %v3339_v19 = vpop.f32.mrf.mxu0  ;;  %v3265_v34 = vadd.f32 %v8627_v15, %v3174_v52  ;;  %v3182_v43 = vadd.f32 %v8605_v0, %v8642_v36  ;;  %v3184_v15 = vadd.f32 %v8609_v30, %v8647_v40 }
 0x2da   : > { %3553 = vst [vmem:[%s7962_s14 + $0x80] sm:$0xff] %v3487_v27  ;;  %v3488_v39 = vmax.f32 %v3427_v3, 0.0  ;;  %v3429_v8 = vadd.f32 %v3428_v54, %v3338_v45  ;;  %v3340_v37 = vadd.f32 %v3339_v19, %v3249_v63  ;;  %v3267_v45 = vadd.f32 %v8629_v14, %v3176_v17 }
 0x2db   : > { %v3430_v28 = vpop.f32.mrf.mxu1  ;;  %v3343_v1 = vpop.f32.mrf.mxu0  ;;  %v3186_v14 = vadd.f32 %v8613_v31, %v8642_v36  ;;  %v3275_v32 = vadd.f32 %v8636_v55, %v3184_v15  ;;  %v3194_v55 = vadd.f32 %v8625_v49, %v8647_v40 }
 0x2dc   : > { %3554 = vst [vmem:[%s7962_s14 + $0x88] sm:$0xff] %v3488_v39  ;;  %v3493_v16 = vmax.f32 %v3429_v8, 0.0  ;;  %v3431_v11 = vadd.f32 %v3430_v28, %v3340_v37  ;;  %v3344_v26 = vadd.f32 %v3343_v1, %v3253_v6  ;;  %v3269_v39 = vadd.f32 %v8631_v60, %v3178_v48 }
 0x2dd   : > { %v3434_v62 = vpop.f32.mrf.mxu1  ;;  %v3345_v23 = vpop.f32.mrf.mxu0  ;;  %v3273_v1 = vadd.f32 %v8633_v12, %v3182_v43  ;;  %v3188_v60 = vadd.f32 %v8617_v5, %v8647_v40  ;;  %v3192_v12 = vadd.f32 %v8621_v20, %v8642_v36 }
 0x2de   : > { %3559 = vst [vmem:[%s7962_s14 + $0xb0] sm:$0xff] %v3493_v16  ;;  %v3494_v2 = vmax.f32 %v3431_v11, 0.0  ;;  %v3435_v25 = vadd.f32 %v3434_v62, %v3344_v26  ;;  %v3346_v59 = vadd.f32 %v3345_v23, %v3255_v38 }
 0x2df   : > { %v3436_v42 = vpop.f32.mrf.mxu1  ;;  %v3347_v58 = vpop.f32.mrf.mxu0 }
 0x2e0   : > { %3560 = vst [vmem:[%s7962_s14 + $0xb8] sm:$0xff] %v3494_v2  ;;  %v3499_v57 = vmax.f32 %v3435_v25, 0.0  ;;  %v3437_v41 = vadd.f32 %v3436_v42, %v3346_v59  ;;  %v3348_v33 = vadd.f32 %v3347_v58, %v3257_v51  ;;  %v3277_v25 = vadd.f32 %v8639_v46, %v3186_v14 }
 0x2e1   : > { %v3438_v53 = vpop.f32.mrf.mxu1  ;;  %v3349_v29 = vpop.f32.mrf.mxu0 }
 0x2e2   : > { %3565 = vst [vmem:[%s7962_s14 + $0xe0] sm:$0xff] %v3499_v57  ;;  %v3500_v18 = vmax.f32 %v3437_v41, 0.0  ;;  %v3439_v50 = vadd.f32 %v3438_v53, %v3348_v33  ;;  %v3350_v4 = vadd.f32 %v3349_v29, %v3259_v7  ;;  %v3279_v7 = vadd.f32 %v8644_v13, %v3188_v60 }
 0x2e3   : > { %v3440_v22 = vpop.f32.mrf.mxu1  ;;  %v3353_v24 = vpop.f32.mrf.mxu0  ;;  %v3283_v33 = vadd.f32 %v8649_v47, %v3192_v12 }
 0x2e4   : > { %3566 = vst [vmem:[%s7962_s14 + $0xe8] sm:$0xff] %v3500_v18  ;;  %v3505_v61 = vmax.f32 %v3439_v50, 0.0  ;;  %v3441_v35 = vadd.f32 %v3440_v22, %v3350_v4  ;;  %v3354_v63 = vadd.f32 %v3353_v24, %v3263_v44  ;;  %v3285_v44 = vadd.f32 %v8652_v9, %v3194_v55 }
 0x2e5   : > { %v3444_v27 = vpop.f32.mrf.mxu1  ;;  %v3355_v3 = vpop.f32.mrf.mxu0 }
 0x2e6   : > { %3571 = vst [vmem:[%s7962_s14 + $0x110] sm:$0xff] %v3505_v61  ;;  %v3506_v21 = vmax.f32 %v3441_v35, 0.0  ;;  %v3445_v10 = vadd.f32 %v3444_v27, %v3354_v63  ;;  %v3356_v54 = vadd.f32 %v3355_v3, %v3265_v34 }
 0x2e7   : > { %v3446_v19 = vpop.f32.mrf.mxu1  ;;  %v3357_v6 = vpop.f32.mrf.mxu0 }
 0x2e8   : > { %3572 = vst [vmem:[%s7962_s14 + $0x118] sm:$0xff] %v3506_v21  ;;  %v3511_v8 = vmax.f32 %v3445_v10, 0.0  ;;  %v3447_v0 = vadd.f32 %v3446_v19, %v3356_v54  ;;  %v3358_v37 = vadd.f32 %v3357_v6, %v3267_v45 }
 0x2e9   : > { %v3448_v56 = vpop.f32.mrf.mxu1  ;;  %v3359_v28 = vpop.f32.mrf.mxu0 }
 0x2ea   : > { %3577 = vst [vmem:[%s7962_s14 + $0x140] sm:$0xff] %v3511_v8  ;;  %v3512_v38 = vmax.f32 %v3447_v0, 0.0  ;;  %v3449_v30 = vadd.f32 %v3448_v56, %v3358_v37  ;;  %v3360_v16 = vadd.f32 %v3359_v28, %v3269_v39 }
 0x2eb   : > { %v3450_v11 = vpop.f32.mrf.mxu1  ;;  %v3363_v26 = vpop.f32.mrf.mxu0 }
 0x2ec   : > { %3578 = vst [vmem:[%s7962_s14 + $0x148] sm:$0xff] %v3512_v38  ;;  %v3517_v62 = vmax.f32 %v3449_v30, 0.0  ;;  %v3451_v31 = vadd.f32 %v3450_v11, %v3360_v16  ;;  %v3364_v23 = vadd.f32 %v3363_v26, %v3273_v1 }
 0x2ed   : > { %v3454_v51 = vpop.f32.mrf.mxu1  ;;  %v3365_v2 = vpop.f32.mrf.mxu0 }
 0x2ee   : > { %3583 = vst [vmem:[%s7962_s14 + $0x170] sm:$0xff] %v3517_v62  ;;  %v3518_v59 = vmax.f32 %v3451_v31, 0.0  ;;  %v3455_v5 = vadd.f32 %v3454_v51, %v3364_v23  ;;  %v3366_v52 = vadd.f32 %v3365_v2, %v3275_v32 }
 0x2ef   : > { %v3456_v42 = vpop.f32.mrf.mxu1  ;;  %v3367_v58 = vpop.f32.mrf.mxu0 }
 0x2f0   : > { %3584 = vst [vmem:[%s7962_s14 + $0x178] sm:$0xff] %v3518_v59  ;;  %v3523_v57 = vmax.f32 %v3455_v5, 0.0  ;;  %v3457_v20 = vadd.f32 %v3456_v42, %v3366_v52  ;;  %v3368_v36 = vadd.f32 %v3367_v58, %v3277_v25 }
 0x2f1   : > { %v3458_v41 = vpop.f32.mrf.mxu1  ;;  %v3369_v46 = vpop.f32.mrf.mxu0 }
 0x2f2   : > { %3589 = vst [vmem:[%s7962_s14 + $0x1a0] sm:$0xff] %v3523_v57  ;;  %v3524_v17 = vmax.f32 %v3457_v20, 0.0  ;;  %v3459_v53 = vadd.f32 %v3458_v41, %v3368_v36  ;;  %v3370_v29 = vadd.f32 %v3369_v46, %v3279_v7 }
 0x2f3   : > { %v3460_v49 = vpop.f32.mrf.mxu1  ;;  %v3373_v40 = vpop.f32.mrf.mxu0 }
 0x2f4   : > { %3590 = vst [vmem:[%s7962_s14 + $0x1a8] sm:$0xff] %v3524_v17  ;;  %v3529_v13 = vmax.f32 %v3459_v53, 0.0  ;;  %v3461_v18 = vadd.f32 %v3460_v49, %v3370_v29  ;;  %v3374_v50 = vadd.f32 %v3373_v40, %v3283_v33 }
 0x2f5   : > { %v3464_v4 = vpop.f32.mrf.mxu1  ;;  %v3375_v48 = vpop.f32.mrf.mxu0 }
 0x2f6   : > { %3595 = vst [vmem:[%s7962_s14 + $0x1d0] sm:$0xff] %v3529_v13  ;;  %v3530_v22 = vmax.f32 %v3461_v18, 0.0  ;;  %v3465_v47 = vadd.f32 %v3464_v4, %v3374_v50  ;;  %v3376_v24 = vadd.f32 %v3375_v48, %v3285_v44 }
 0x2f7   : > { %v3466_v34 = vpop.f32.mrf.mxu1  ;;  %v3377_v61 = vpop.f32.mrf.mxu0 }
 0x2f8   : > { %3596 = vst [vmem:[%s7962_s14 + $0x1d8] sm:$0xff] %v3530_v22  ;;  %v3535_v35 = vmax.f32 %v3465_v47, 0.0  ;;  %v3467_v63 = vadd.f32 %v3466_v34, %v3376_v24 }
 0x2f9   : > { %v3468_v43 = vpop.f32.mrf.mxu1  ;;  %v3378_v27 = vpop.f32.mrf.mxu0 }
 0x2fa   : > { %3601 = vst [vmem:[%s7962_s14 + $0x200] sm:$0x1] %v3535_v35  ;;  %v3536_v9 = vmax.f32 %v3467_v63, 0.0 }
 0x2fb   : > { %v3469_v3 = vpop.f32.mrf.mxu1 }
 0x2fc   : > { %3602 = vst [vmem:[%s7962_s14 + $0x208] sm:$0x1] %v3536_v9 }
 0x2fd PF: > { %s15_s15 = sadd.s32 1, %s5988_s15  }
 0x2fe   : > { %p12_p4 = scmp.ge.s32.totalorder %s15_s15, 4  }
 0x300   :  { %14 = sbr.rel (!%p12_p4) target bundleno = 1 (0x1), region = 74 }

// kernel: mixed_7a_pallas.4
= control target key start
LH: loop header
LB: loop body
LE: loop exit
PB: predicated region body
PF: predicated region fallthrough
CT: control target
= control target key end

     0   :  { %s4501_s12 = smov 0   ;;  %s5814_s0 = inlined_call_operand.vmem [shape: bf16[2,81,2304], index: 0, kind: input, shape index: {}]   ;;  %s5815_s1 = inlined_call_operand.vmem [shape: bf16[2304,256], index: 1, kind: input, shape index: {}]   ;;  %s5816_s2 = inlined_call_operand.vmem [shape: f32[1,256], index: 2, kind: input, shape index: {}]   ;;  %s5817_s3 = inlined_call_operand.vmem [shape: f32[2,81,256], index: 3, kind: output, shape index: {}]  }
   0x1 LB: > { %s3441_s13 = sadd.s32 4294967295, %s4479_s12   ;;  %p3445_p0 = scmp.ge.s32.totalorder %s4479_s12, 1  ;;  %s4479_s12 = sphi %s4501_s12, %s13_s12  }
   0x2   : > { %p137_p1 = scmp.lt.s32.totalorder %s4479_s12, 3 }
   0x4   : > { %p138_p2 = pnand %p3445_p0, %p137_p1 }
   0x6   : > { %141 = sbr.rel (%p138_p2) target bundleno = 552 (0x228), region = 32 }
   0xb   : > { %v3888_v0 = vld [vmem:[%s5815_s1 + $0x74] ss:$8 sps:$4 sm:$0xff]   ;;  %v3892_v2 = vld [vmem:[%s5815_s1 + $0x70] ss:$8 sps:$4 sm:$0xff]   ;;  %v3894_v4 = vld [vmem:[%s5815_s1 + $0x64] ss:$8 sps:$4 sm:$0xff]  }
   0xc   : > { %v3890_v1 = vld [vmem:[%s5815_s1 + $0x174] ss:$8 sps:$4 sm:$0xff]   ;;  %2523 = vmatprep.subr.bf16.mxu0 %v3888_v0  ;;  %v3893_v3 = vld [vmem:[%s5815_s1 + $0x170] ss:$8 sps:$4 sm:$0xff]   ;;  %v3896_v5 = vld [vmem:[%s5815_s1 + $0x164] ss:$8 sps:$4 sm:$0xff]  }
   0xd   : > { %2614 = vmatprep.subr.bf16.mxu1 %v3890_v1  ;;  %2524 = vmatpush1.bf16.msra.mxu0 %v3892_v2  ;;  %v3898_v6 = vld [vmem:[%s5815_s1 + $0x60] ss:$8 sps:$4 sm:$0xff]   ;;  %v3900_v8 = vld [vmem:[%s5815_s1 + $0x54] ss:$8 sps:$4 sm:$0xff]   ;;  %v3904_v10 = vld [vmem:[%s5815_s1 + $0x50] ss:$8 sps:$4 sm:$0xff]  }
   0xe   : > { %2615 = vmatpush1.bf16.msra.mxu1 %v3893_v3  ;;  %2525 = vmatprep.subr.bf16.mxu0 %v3894_v4  ;;  %v3899_v7 = vld [vmem:[%s5815_s1 + $0x160] ss:$8 sps:$4 sm:$0xff]   ;;  %v3902_v9 = vld [vmem:[%s5815_s1 + $0x154] ss:$8 sps:$4 sm:$0xff]   ;;  %v3905_v11 = vld [vmem:[%s5815_s1 + $0x150] ss:$8 sps:$4 sm:$0xff]  }
   0xf   : > { %2616 = vmatprep.subr.bf16.mxu1 %v3896_v5  ;;  %v3906_v12 = vld [vmem:[%s5815_s1 + $0x44] ss:$8 sps:$4 sm:$0xff]   ;;  %v3910_v14 = vld [vmem:[%s5815_s1 + $0x40] ss:$8 sps:$4 sm:$0xff]   ;;  %v3912_v16 = vld [vmem:[%s5815_s1 + $0x34] ss:$8 sps:$4 sm:$0xff]  }
  0x10   : > { %v3908_v13 = vld [vmem:[%s5815_s1 + $0x144] ss:$8 sps:$4 sm:$0xff]   ;;  %v3911_v15 = vld [vmem:[%s5815_s1 + $0x140] ss:$8 sps:$4 sm:$0xff]   ;;  %v3914_v17 = vld [vmem:[%s5815_s1 + $0x134] ss:$8 sps:$4 sm:$0xff]  }
  0x11   : > { %2526 = vmatpush1.bf16.msra.mxu0 %v3898_v6  ;;  %v3916_v18 = vld [vmem:[%s5815_s1 + $0x30] ss:$8 sps:$4 sm:$0xff]   ;;  %v3918_v20 = vld [vmem:[%s5815_s1 + $0x24] ss:$8 sps:$4 sm:$0xff]   ;;  %v3922_v22 = vld [vmem:[%s5815_s1 + $0x20] ss:$8 sps:$4 sm:$0xff]  }
  0x12   : > { %2617 = vmatpush1.bf16.msra.mxu1 %v3899_v7  ;;  %2527 = vmatprep.subr.bf16.mxu0 %v3900_v8  ;;  %v3917_v19 = vld [vmem:[%s5815_s1 + $0x130] ss:$8 sps:$4 sm:$0xff]   ;;  %v3920_v21 = vld [vmem:[%s5815_s1 + $0x124] ss:$8 sps:$4 sm:$0xff]   ;;  %v3923_v23 = vld [vmem:[%s5815_s1 + $0x120] ss:$8 sps:$4 sm:$0xff]  }
  0x13   : > { %2618 = vmatprep.subr.bf16.mxu1 %v3902_v9  ;;  %v3924_v24 = vld [vmem:[%s5815_s1 + $0x14] ss:$8 sps:$4 sm:$0xff]   ;;  %v3928_v26 = vld [vmem:[%s5815_s1 + $0x10] ss:$8 sps:$4 sm:$0xff]   ;;  %v3930_v28 = vld [vmem:[%s5815_s1 + $0x4] ss:$8 sps:$4 sm:$0xff]  }
  0x14   : > { %v3926_v25 = vld [vmem:[%s5815_s1 + $0x114] ss:$8 sps:$4 sm:$0xff]   ;;  %v3929_v27 = vld [vmem:[%s5815_s1 + $0x110] ss:$8 sps:$4 sm:$0xff]   ;;  %v3932_v29 = vld [vmem:[%s5815_s1 + $0x104] ss:$8 sps:$4 sm:$0xff]  }
  0x15   : > { %2528 = vmatpush1.bf16.msra.mxu0 %v3904_v10  ;;  %v3934_v30 = vld [vmem:[%s5815_s1] ss:$8 sps:$4 sm:$0xff]   ;;  %v3936_v32 = vld [vmem:[%s5815_s1 + $0xf4] ss:$8 sps:$4 sm:$0xff]   ;;  %p161_p3 = scmp.lt.s32.totalorder %s3441_s13, 1 }
  0x16   : > { %2619 = vmatpush1.bf16.msra.mxu1 %v3905_v11  ;;  %2529 = vmatprep.subr.bf16.mxu0 %v3906_v12  ;;  %v3935_v31 = vld [vmem:[%s5815_s1 + $0x100] ss:$8 sps:$4 sm:$0xff]   ;;  %v3938_v33 = vld [vmem:[%s5815_s1 + $0x1f4] ss:$8 sps:$4 sm:$0xff]   ;;  %v3940_v34 = vld [vmem:[%s5815_s1 + $0xf0] ss:$8 sps:$4 sm:$0xff]  }
  0x17   : > { %2620 = vmatprep.subr.bf16.mxu1 %v3908_v13  ;;  %v3941_v35 = vld [vmem:[%s5815_s1 + $0x1f0] ss:$8 sps:$4 sm:$0xff]   ;;  %v3942_v36 = vld [vmem:[%s5815_s1 + $0xe4] ss:$8 sps:$4 sm:$0xff]   ;;  %s5847_s13 = smov (!%p161_p3, %s3441_s13), 1 }
  0x18   : > { %v3944_v37 = vld [vmem:[%s5815_s1 + $0x1e4] ss:$8 sps:$4 sm:$0xff]   ;;  %v3946_v38 = vld [vmem:[%s5815_s1 + $0xe0] ss:$8 sps:$4 sm:$0xff]   ;;  %v3948_v40 = vld [vmem:[%s5815_s1 + $0xd4] ss:$8 sps:$4 sm:$0xff]  }
  0x19   : > { %2530 = vmatpush1.bf16.msra.mxu0 %v3910_v14  ;;  %v3947_v39 = vld [vmem:[%s5815_s1 + $0x1e0] ss:$8 sps:$4 sm:$0xff]   ;;  %s3878_s21 = smul.u32 792, %s5847_s13  ;;  %v3950_v41 = vld [vmem:[%s5815_s1 + $0x1d4] ss:$8 sps:$4 sm:$0xff]  }
  0x1a   : > { %2621 = vmatpush1.bf16.msra.mxu1 %v3911_v15  ;;  %2531 = vmatprep.subr.bf16.mxu0 %v3912_v16  ;;  %v3952_v42 = vld [vmem:[%s5815_s1 + $0xd0] ss:$8 sps:$4 sm:$0xff]   ;;  %v3954_v44 = vld [vmem:[%s5815_s1 + $0xc4] ss:$8 sps:$4 sm:$0xff]   ;;  %v3958_v46 = vld [vmem:[%s5815_s1 + $0xc0] ss:$8 sps:$4 sm:$0xff]  }
  0x1b   : > { %2622 = vmatprep.subr.bf16.mxu1 %v3914_v17  ;;  %v3953_v43 = vld [vmem:[%s5815_s1 + $0x1d0] ss:$8 sps:$4 sm:$0xff]   ;;  %s4654_s5 = scalar_lea.vmem %s5814_s0, %s3878_s21  ;;  %v3956_v45 = vld [vmem:[%s5815_s1 + $0x1c4] ss:$8 sps:$4 sm:$0xff]   ;;  %v3959_v47 = vld [vmem:[%s5815_s1 + $0x1c0] ss:$8 sps:$4 sm:$0xff]  }
  0x1c   : > { %v3960_v48 = vld [vmem:[%s5815_s1 + $0xb4] ss:$8 sps:$4 sm:$0xff]   ;;  %v3986_v49 = vld [vmem:[%s4654_s5 + $0x4] ss:$72 sps:$4 sm:$0xff]   ;;  %v3964_v52 = vld [vmem:[%s5815_s1 + $0xb0] ss:$8 sps:$4 sm:$0xff]  }
  0x1d   : > { %2532 = vmatpush1.bf16.msra.mxu0 %v3916_v18  ;;  %v3962_v50 = vld [vmem:[%s5815_s1 + $0x1b4] ss:$8 sps:$4 sm:$0xff]   ;;  %2555 = vmatprep.mubr.bf16.mxu0 %v3986_v49  ;;  %v3965_v53 = vld [vmem:[%s5815_s1 + $0x1b0] ss:$8 sps:$4 sm:$0xff]   ;;  %v3966_v54 = vld [vmem:[%s5815_s1 + $0xa4] ss:$8 sps:$4 sm:$0xff]  }
  0x1e   : > { %2623 = vmatpush1.bf16.msra.mxu1 %v3917_v19  ;;  %2533 = vmatprep.subr.bf16.mxu0 %v3918_v20  ;;  %v3989_v51 = vld [vmem:[%s4654_s5 + $0xc] ss:$72 sps:$4 sm:$0xff]   ;;  %v3970_v56 = vld [vmem:[%s5815_s1 + $0xa0] ss:$8 sps:$4 sm:$0xff]   ;;  %v3976_v60 = vld [vmem:[%s5815_s1 + $0x90] ss:$8 sps:$4 sm:$0xff]  }
  0x1f   : > { %2624 = vmatprep.subr.bf16.mxu1 %v3920_v21  ;;  %2646 = vmatprep.mubr.bf16.mxu1 %v3989_v51  ;;  %v3968_v55 = vld [vmem:[%s5815_s1 + $0x1a4] ss:$8 sps:$4 sm:$0xff]   ;;  %v3971_v57 = vld [vmem:[%s5815_s1 + $0x1a0] ss:$8 sps:$4 sm:$0xff]   ;;  %v3972_v58 = vld [vmem:[%s5815_s1 + $0x94] ss:$8 sps:$4 sm:$0xff]  }
  0x20   : > { %v3974_v59 = vld [vmem:[%s5815_s1 + $0x194] ss:$8 sps:$4 sm:$0xff]   ;;  %v3977_v61 = vld [vmem:[%s5815_s1 + $0x190] ss:$8 sps:$4 sm:$0xff]   ;;  %v3978_v62 = vld [vmem:[%s5815_s1 + $0x84] ss:$8 sps:$4 sm:$0xff]  }
  0x21   : > { %2534 = vmatpush1.bf16.msra.mxu0 %v3922_v22  ;;  %v3980_v63 = vld [vmem:[%s5815_s1 + $0x184] ss:$8 sps:$4 sm:$0xff]   ;;  %v3982_v0 = vld [vmem:[%s5815_s1 + $0x80] ss:$8 sps:$4 sm:$0xff]   ;;  %v3992_v2 = vld [vmem:[%s5815_s1 + $0x274] ss:$8 sps:$4 sm:$0xff]  }
  0x22   : > { %2625 = vmatpush1.bf16.msra.mxu1 %v3923_v23  ;;  %2535 = vmatprep.subr.bf16.mxu0 %v3924_v24  ;;  %v3983_v1 = vld [vmem:[%s5815_s1 + $0x180] ss:$8 sps:$4 sm:$0xff]   ;;  %v3995_v3 = vld [vmem:[%s5815_s1 + $0x374] ss:$8 sps:$4 sm:$0xff]   ;;  %v3990_v6 = vld [vmem:[%s5815_s1 + $0x270] ss:$8 sps:$4 sm:$0xff]  }
  0x23   : > { %2626 = vmatprep.subr.bf16.mxu1 %v3926_v25  ;;  %v3984_v4 = vld [vmem:[%s4654_s5] ss:$72 sps:$4 sm:$0xff]   ;;  %v3993_v7 = vld [vmem:[%s5815_s1 + $0x370] ss:$8 sps:$4 sm:$0xff]   ;;  %v3998_v8 = vld [vmem:[%s5815_s1 + $0x264] ss:$8 sps:$4 sm:$0xff]  }
  0x24   : > { %v3987_v5 = vld [vmem:[%s4654_s5 + $0x8] ss:$72 sps:$4 sm:$0xff]   ;;  %v4001_v9 = vld [vmem:[%s5815_s1 + $0x364] ss:$8 sps:$4 sm:$0xff]   ;;  %v4020_v10 = vld [vmem:[%s4654_s5 + $0x94] ss:$72 sps:$4 sm:$0xff]  }
  0x25   : > { %2536 = vmatpush1.bf16.msra.mxu0 %v3928_v26  ;;  %v4023_v11 = vld [vmem:[%s4654_s5 + $0x9c] ss:$72 sps:$4 sm:$0xff]   ;;  %v3996_v12 = vld [vmem:[%s5815_s1 + $0x260] ss:$8 sps:$4 sm:$0xff]   ;;  %v4002_v16 = vld [vmem:[%s5815_s1 + $0x250] ss:$8 sps:$4 sm:$0xff]  }
  0x26   : > { %2627 = vmatpush1.bf16.msra.mxu1 %v3929_v27  ;;  %2537 = vmatprep.subr.bf16.mxu0 %v3930_v28  ;;  %v3999_v13 = vld [vmem:[%s5815_s1 + $0x360] ss:$8 sps:$4 sm:$0xff]   ;;  %v4004_v14 = vld [vmem:[%s5815_s1 + $0x254] ss:$8 sps:$4 sm:$0xff]   ;;  %v4005_v17 = vld [vmem:[%s5815_s1 + $0x350] ss:$8 sps:$4 sm:$0xff]  }
  0x27   : > { %2628 = vmatprep.subr.bf16.mxu1 %v3932_v29  ;;  %v4007_v15 = vld [vmem:[%s5815_s1 + $0x354] ss:$8 sps:$4 sm:$0xff]   ;;  %v4022_v18 = vld [vmem:[%s4654_s5 + $0x90] ss:$72 sps:$4 sm:$0xff]   ;;  %v4010_v20 = vld [vmem:[%s5815_s1 + $0x244] ss:$8 sps:$4 sm:$0xff]  }
  0x28   : > { %v4031_v19 = vld [vmem:[%s4654_s5 + $0x98] ss:$72 sps:$4 sm:$0xff]   ;;  %v4013_v21 = vld [vmem:[%s5815_s1 + $0x344] ss:$8 sps:$4 sm:$0xff]   ;;  %v4016_v26 = vld [vmem:[%s5815_s1 + $0x234] ss:$8 sps:$4 sm:$0xff]  }
  0x29   : > { %2538 = vmatpush1.bf16.msra.mxu0 %v3934_v30  ;;  %v4038_v22 = vld [vmem:[%s4654_s5 + $0x124] ss:$72 sps:$4 sm:$0xff]   ;;  %v4008_v24 = vld [vmem:[%s5815_s1 + $0x240] ss:$8 sps:$4 sm:$0xff]   ;;  %v4019_v27 = vld [vmem:[%s5815_s1 + $0x334] ss:$8 sps:$4 sm:$0xff]  }
  0x2a   : > { %2629 = vmatpush1.bf16.msra.mxu1 %v3935_v31  ;;  %2539 = vmatprep.subr.bf16.mxu0 %v3936_v32  ;;  %v4041_v23 = vld [vmem:[%s4654_s5 + $0x12c] ss:$72 sps:$4 sm:$0xff]   ;;  %v4011_v25 = vld [vmem:[%s5815_s1 + $0x340] ss:$8 sps:$4 sm:$0xff]   ;;  %v4014_v28 = vld [vmem:[%s5815_s1 + $0x230] ss:$8 sps:$4 sm:$0xff]  }
  0x2b   : > { %2630 = vmatprep.subr.bf16.mxu1 %v3938_v33  ;;  %v4017_v29 = vld [vmem:[%s5815_s1 + $0x330] ss:$8 sps:$4 sm:$0xff]   ;;  %v4040_v30 = vld [vmem:[%s4654_s5 + $0x120] ss:$72 sps:$4 sm:$0xff]   ;;  %v4027_v32 = vld [vmem:[%s5815_s1 + $0x224] ss:$8 sps:$4 sm:$0xff]  }
  0x2c   : > { %v4049_v31 = vld [vmem:[%s4654_s5 + $0x128] ss:$72 sps:$4 sm:$0xff]   ;;  %v4030_v33 = vld [vmem:[%s5815_s1 + $0x324] ss:$8 sps:$4 sm:$0xff]   ;;  %v4055_v51 = vld [vmem:[%s5815_s1 + $0x3f4] ss:$8 sps:$4 sm:$0xff]  }
  0x2d   : > { %2540 = vmatpush2.bf16.msra.mxu0 %v3940_v34  ;;  %v4056_v34 = vld [vmem:[%s4654_s5 + $0x1b4] ss:$72 sps:$4 sm:$0xff]   ;;  %v4046_v49 = vld [vmem:[%s5815_s1 + $0x300] ss:$8 sps:$4 sm:$0xff]  }
  0x2e   : > { %2631 = vmatpush2.bf16.msra.mxu1 %v3941_v35  ;;  %2541 = vmatprep.subr.bf16.mxu0 %v3942_v36  ;;  %v4059_v35 = vld [vmem:[%s4654_s5 + $0x1bc] ss:$72 sps:$4 sm:$0xff]   ;;  %v4025_v36 = vld [vmem:[%s5815_s1 + $0x220] ss:$8 sps:$4 sm:$0xff]  }
  0x2f   : > { %2632 = vmatprep.subr.bf16.mxu1 %v3944_v37  ;;  %v4028_v37 = vld [vmem:[%s5815_s1 + $0x320] ss:$8 sps:$4 sm:$0xff]  }
  0x31   : > { %2542 = vmatpush2.bf16.msra.mxu0 %v3946_v38  ;;  %v4034_v38 = vld [vmem:[%s5815_s1 + $0x214] ss:$8 sps:$4 sm:$0xff]  }
  0x32   : > { %2633 = vmatpush2.bf16.msra.mxu1 %v3947_v39  ;;  %2543 = vmatprep.subr.bf16.mxu0 %v3948_v40  ;;  %v4037_v39 = vld [vmem:[%s5815_s1 + $0x314] ss:$8 sps:$4 sm:$0xff]   ;;  %v4032_v40 = vld [vmem:[%s5815_s1 + $0x210] ss:$8 sps:$4 sm:$0xff]  }
  0x33   : > { %2634 = vmatprep.subr.bf16.mxu1 %v3950_v41  ;;  %v4035_v41 = vld [vmem:[%s5815_s1 + $0x310] ss:$8 sps:$4 sm:$0xff]  }
  0x35   : > { %2544 = vmatpush2.bf16.msra.mxu0 %v3952_v42  ;;  %v4058_v42 = vld [vmem:[%s4654_s5 + $0x1b0] ss:$72 sps:$4 sm:$0xff]  }
  0x36   : > { %2635 = vmatpush2.bf16.msra.mxu1 %v3953_v43  ;;  %2545 = vmatprep.subr.bf16.mxu0 %v3954_v44  ;;  %v4067_v43 = vld [vmem:[%s4654_s5 + $0x1b8] ss:$72 sps:$4 sm:$0xff]   ;;  %v4045_v44 = vld [vmem:[%s5815_s1 + $0x204] ss:$8 sps:$4 sm:$0xff]  }
  0x37   : > { %2636 = vmatprep.subr.bf16.mxu1 %v3956_v45  ;;  %v4048_v45 = vld [vmem:[%s5815_s1 + $0x304] ss:$8 sps:$4 sm:$0xff]  }
  0x39   : > { %2546 = vmatpush2.bf16.msra.mxu0 %v3958_v46  ;;  %v4043_v46 = vld [vmem:[%s5815_s1 + $0x200] ss:$8 sps:$4 sm:$0xff]  }
  0x3a   : > { %2637 = vmatpush2.bf16.msra.mxu1 %v3959_v47  ;;  %2547 = vmatprep.subr.bf16.mxu0 %v3960_v48  ;;  %v4074_v47 = vld [vmem:[%s4654_s5 + $0x244] ss:$72 sps:$4 sm:$0xff]  }
  0x3b   : > { %2638 = vmatprep.subr.bf16.mxu1 %v3962_v50  ;;  %v4077_v48 = vld [vmem:[%s4654_s5 + $0x24c] ss:$72 sps:$4 sm:$0xff]  }
  0x3c   : > { %v4052_v50 = vld [vmem:[%s5815_s1 + $0x2f4] ss:$8 sps:$4 sm:$0xff]  }
  0x3d   : > { %2548 = vmatpush2.bf16.msra.mxu0 %v3964_v52  ;;  %v4076_v52 = vld [vmem:[%s4654_s5 + $0x240] ss:$72 sps:$4 sm:$0xff]  }
  0x3e   : > { %2639 = vmatpush2.bf16.msra.mxu1 %v3965_v53  ;;  %2549 = vmatprep.subr.bf16.mxu0 %v3966_v54  ;;  %v4085_v53 = vld [vmem:[%s4654_s5 + $0x248] ss:$72 sps:$4 sm:$0xff]  }
  0x3f   : > { %2640 = vmatprep.subr.bf16.mxu1 %v3968_v55  ;;  %v261_v54 = vld [vmem:[%s4654_s5 + $0x2d0] sm:$0x11]  ;;  %v262_v55 = vld [vmem:[%s4654_s5 + $0x2d8] sm:$0x11] }
  0x41   : > { %2550 = vmatpush2.bf16.msra.mxu0 %v3970_v56  ;;  %v4050_v56 = vld [vmem:[%s5815_s1 + $0x2f0] ss:$8 sps:$4 sm:$0xff]  }
  0x42   : > { %2641 = vmatpush2.bf16.msra.mxu1 %v3971_v57  ;;  %2551 = vmatprep.subr.bf16.mxu0 %v3972_v58  ;;  %v4053_v57 = vld [vmem:[%s5815_s1 + $0x3f0] ss:$8 sps:$4 sm:$0xff]   ;;  %v4063_v58 = vld [vmem:[%s5815_s1 + $0x2e4] ss:$8 sps:$4 sm:$0xff]  }
  0x43   : > { %2642 = vmatprep.subr.bf16.mxu1 %v3974_v59  ;;  %v4066_v59 = vld [vmem:[%s5815_s1 + $0x3e4] ss:$8 sps:$4 sm:$0xff]  }
  0x45   : > { %2552 = vmatpush2.bf16.msra.mxu0 %v3976_v60  ;;  %v3539_v60 = vcombine.high %v261_v54, %v261_v54 }
  0x46   : > { %2643 = vmatpush2.bf16.msra.mxu1 %v3977_v61  ;;  %2553 = vmatprep.subr.bf16.mxu0 %v3978_v62  ;;  %v3541_v61 = vcombine.high %v262_v55, %v262_v55  ;;  %v4061_v62 = vld [vmem:[%s5815_s1 + $0x2e0] ss:$8 sps:$4 sm:$0xff]  }
  0x47   : > { %2644 = vmatprep.subr.bf16.mxu1 %v3980_v63  ;;  %v4064_v63 = vld [vmem:[%s5815_s1 + $0x3e0] ss:$8 sps:$4 sm:$0xff]  }
  0x49   : > { %2554 = vmatpush2.bf16.msra.mxu0 %v3982_v0  ;;  %v4070_v0 = vld [vmem:[%s5815_s1 + $0x2d4] ss:$8 sps:$4 sm:$0xff]  }
  0x4a   : > { %2645 = vmatpush2.bf16.msra.mxu1 %v3983_v1  ;;  %2705 = vmatprep.subr.bf16.mxu0 %v3992_v2  ;;  %v4073_v1 = vld [vmem:[%s5815_s1 + $0x3d4] ss:$8 sps:$4 sm:$0xff]   ;;  %v4068_v2 = vld [vmem:[%s5815_s1 + $0x2d0] ss:$8 sps:$4 sm:$0xff]  }
  0x4b   : > { %2796 = vmatprep.subr.bf16.mxu1 %v3995_v3  ;;  %v3538_v3 = vcombine.low %v261_v54, %v261_v54  ;;  %v4152_v54 = vld [vmem:[%s4654_s5 + $0x130] ss:$72 sps:$4 sm:$0xff]  }
  0x4c   : > { %2556 = vmatmul.mubr.bf16.vlgmr.msra.gmra.mxu0 %v3984_v4  ;;  %v3540_v4 = vcombine.low %v262_v55, %v262_v55  ;;  %v4153_v55 = vld [vmem:[%s5815_s1 + $0x430] ss:$8 sps:$4 sm:$0xff]  }
  0x4d   : > { %2647 = vmatmul.mubr.bf16.vlgmr.msra.gmra.mxu1 %v3987_v5  ;;  %2706 = vmatpush1.bf16.msra.mxu0 %v3990_v6  ;;  %v4071_v5 = vld [vmem:[%s5815_s1 + $0x3d0] ss:$8 sps:$4 sm:$0xff]   ;;  %v4081_v6 = vld [vmem:[%s5815_s1 + $0x2c4] ss:$8 sps:$4 sm:$0xff]  }
  0x4e   : > { %2797 = vmatpush1.bf16.msra.mxu1 %v3993_v7  ;;  %2707 = vmatprep.subr.bf16.mxu0 %v3998_v8  ;;  %v4084_v7 = vld [vmem:[%s5815_s1 + $0x3c4] ss:$8 sps:$4 sm:$0xff]   ;;  %v4116_v8 = vld [vmem:[%s4654_s5 + $0x14] ss:$72 sps:$4 sm:$0xff]  }
  0x4f   : > { %2798 = vmatprep.subr.bf16.mxu1 %v4001_v9  ;;  %2565 = vmatprep.mubr.bf16.mxu0 %v4020_v10  ;;  %v4119_v9 = vld [vmem:[%s4654_s5 + $0x1c] ss:$72 sps:$4 sm:$0xff]   ;;  %v4079_v10 = vld [vmem:[%s5815_s1 + $0x2c0] ss:$8 sps:$4 sm:$0xff]  }
  0x50   : > { %2656 = vmatprep.mubr.bf16.mxu1 %v4023_v11  ;;  %v4082_v11 = vld [vmem:[%s5815_s1 + $0x3c0] ss:$8 sps:$4 sm:$0xff]  }
  0x51   : > { %2708 = vmatpush1.bf16.msra.mxu0 %v3996_v12  ;;  %v4088_v12 = vld [vmem:[%s5815_s1 + $0x2b4] ss:$8 sps:$4 sm:$0xff]  }
  0x52   : > { %2799 = vmatpush1.bf16.msra.mxu1 %v3999_v13  ;;  %2709 = vmatprep.subr.bf16.mxu0 %v4004_v14  ;;  %v4091_v13 = vld [vmem:[%s5815_s1 + $0x3b4] ss:$8 sps:$4 sm:$0xff]   ;;  %v4086_v14 = vld [vmem:[%s5815_s1 + $0x2b0] ss:$8 sps:$4 sm:$0xff]  }
  0x53   : > { %2800 = vmatprep.subr.bf16.mxu1 %v4007_v15  ;;  %v4089_v15 = vld [vmem:[%s5815_s1 + $0x3b0] ss:$8 sps:$4 sm:$0xff]  }
  0x54   : > { %2566 = vmatmul.mubr.bf16.gmra.mxu0 %v4022_v18  ;;  %v4094_v18 = vld [vmem:[%s5815_s1 + $0x2a0] ss:$8 sps:$4 sm:$0xff]  }
  0x55   : > { %2657 = vmatmul.mubr.bf16.gmra.mxu1 %v4031_v19  ;;  %2710 = vmatpush1.bf16.msra.mxu0 %v4002_v16  ;;  %v4096_v16 = vld [vmem:[%s5815_s1 + $0x2a4] ss:$8 sps:$4 sm:$0xff]   ;;  %v4097_v19 = vld [vmem:[%s5815_s1 + $0x3a0] ss:$8 sps:$4 sm:$0xff]  }
  0x56   : > { %2801 = vmatpush1.bf16.msra.mxu1 %v4005_v17  ;;  %2711 = vmatprep.subr.bf16.mxu0 %v4010_v20  ;;  %v4099_v17 = vld [vmem:[%s5815_s1 + $0x3a4] ss:$8 sps:$4 sm:$0xff]   ;;  %v4104_v20 = vld [vmem:[%s5815_s1 + $0x294] ss:$8 sps:$4 sm:$0xff]  }
  0x57   : > { %2802 = vmatprep.subr.bf16.mxu1 %v4013_v21  ;;  %2575 = vmatprep.mubr.bf16.mxu0 %v4038_v22  ;;  %v4107_v21 = vld [vmem:[%s5815_s1 + $0x394] ss:$8 sps:$4 sm:$0xff]   ;;  %v4102_v22 = vld [vmem:[%s5815_s1 + $0x290] ss:$8 sps:$4 sm:$0xff]  }
  0x58   : > { %2666 = vmatprep.mubr.bf16.mxu1 %v4041_v23  ;;  %v4105_v23 = vld [vmem:[%s5815_s1 + $0x390] ss:$8 sps:$4 sm:$0xff]  }
  0x59   : > { %2712 = vmatpush1.bf16.msra.mxu0 %v4008_v24  ;;  %v4110_v24 = vld [vmem:[%s5815_s1 + $0x284] ss:$8 sps:$4 sm:$0xff]  }
  0x5a   : > { %2803 = vmatpush1.bf16.msra.mxu1 %v4011_v25  ;;  %2713 = vmatprep.subr.bf16.mxu0 %v4016_v26  ;;  %v4113_v25 = vld [vmem:[%s5815_s1 + $0x384] ss:$8 sps:$4 sm:$0xff]   ;;  %v4108_v26 = vld [vmem:[%s5815_s1 + $0x280] ss:$8 sps:$4 sm:$0xff]  }
  0x5b   : > { %2804 = vmatprep.subr.bf16.mxu1 %v4019_v27  ;;  %v4111_v27 = vld [vmem:[%s5815_s1 + $0x380] ss:$8 sps:$4 sm:$0xff]  }
  0x5c   : > { %2576 = vmatmul.mubr.bf16.gmra.mxu0 %v4040_v30  ;;  %v4125_v30 = vld [vmem:[%s5815_s1 + $0x574] ss:$8 sps:$4 sm:$0xff]  }
  0x5d   : > { %2667 = vmatmul.mubr.bf16.gmra.mxu1 %v4049_v31  ;;  %2714 = vmatpush1.bf16.msra.mxu0 %v4014_v28  ;;  %v4114_v28 = vld [vmem:[%s4654_s5 + $0x10] ss:$72 sps:$4 sm:$0xff]  }
  0x5e   : > { %2805 = vmatpush1.bf16.msra.mxu1 %v4017_v29  ;;  %2715 = vmatprep.subr.bf16.mxu0 %v4027_v32  ;;  %v4122_v29 = vld [vmem:[%s5815_s1 + $0x474] ss:$8 sps:$4 sm:$0xff]   ;;  %v4117_v31 = vld [vmem:[%s4654_s5 + $0x18] ss:$72 sps:$4 sm:$0xff]  }
  0x5f   : > { %2806 = vmatprep.subr.bf16.mxu1 %v4030_v33  ;;  %2585 = vmatprep.mubr.bf16.mxu0 %v4056_v34  ;;  %v4120_v32 = vld [vmem:[%s5815_s1 + $0x470] ss:$8 sps:$4 sm:$0xff]   ;;  %v4128_v34 = vld [vmem:[%s5815_s1 + $0x464] ss:$8 sps:$4 sm:$0xff]  }
  0x60   : > { %2676 = vmatprep.mubr.bf16.mxu1 %v4059_v35  ;;  %v4123_v33 = vld [vmem:[%s5815_s1 + $0x570] ss:$8 sps:$4 sm:$0xff]   ;;  %v4131_v35 = vld [vmem:[%s5815_s1 + $0x564] ss:$8 sps:$4 sm:$0xff]  }
  0x61   : > { %2716 = vmatpush1.bf16.msra.mxu0 %v4025_v36  ;;  %v4132_v36 = vld [vmem:[%s4654_s5 + $0xa4] ss:$72 sps:$4 sm:$0xff]  }
  0x62   : > { %2807 = vmatpush1.bf16.msra.mxu1 %v4028_v37  ;;  %2717 = vmatprep.subr.bf16.mxu0 %v4034_v38  ;;  %v4141_v37 = vld [vmem:[%s4654_s5 + $0xac] ss:$72 sps:$4 sm:$0xff]   ;;  %v4126_v38 = vld [vmem:[%s5815_s1 + $0x460] ss:$8 sps:$4 sm:$0xff]  }
  0x63   : > { %2808 = vmatprep.subr.bf16.mxu1 %v4037_v39  ;;  %v4129_v39 = vld [vmem:[%s5815_s1 + $0x560] ss:$8 sps:$4 sm:$0xff]  }
  0x64   : > { %2586 = vmatmul.mubr.bf16.gmra.mxu0 %v4058_v42  ;;  %v4140_v42 = vld [vmem:[%s5815_s1 + $0x554] ss:$8 sps:$4 sm:$0xff]  }
  0x65   : > { %2677 = vmatmul.mubr.bf16.gmra.mxu1 %v4067_v43  ;;  %2718 = vmatpush1.bf16.msra.mxu0 %v4032_v40  ;;  %v4134_v40 = vld [vmem:[%s4654_s5 + $0xa0] ss:$72 sps:$4 sm:$0xff]   ;;  %v4135_v43 = vld [vmem:[%s5815_s1 + $0x450] ss:$8 sps:$4 sm:$0xff]  }
  0x66   : > { %2809 = vmatpush1.bf16.msra.mxu1 %v4035_v41  ;;  %2719 = vmatprep.subr.bf16.mxu0 %v4045_v44  ;;  %v4137_v41 = vld [vmem:[%s5815_s1 + $0x454] ss:$8 sps:$4 sm:$0xff]   ;;  %v4143_v44 = vld [vmem:[%s4654_s5 + $0xa8] ss:$72 sps:$4 sm:$0xff]  }
  0x67   : > { %2810 = vmatprep.subr.bf16.mxu1 %v4048_v45  ;;  %2595 = vmatprep.mubr.bf16.mxu0 %v4074_v47  ;;  %v4138_v45 = vld [vmem:[%s5815_s1 + $0x550] ss:$8 sps:$4 sm:$0xff]   ;;  %v4149_v47 = vld [vmem:[%s5815_s1 + $0x544] ss:$8 sps:$4 sm:$0xff]  }
  0x68   : > { %2686 = vmatprep.mubr.bf16.mxu1 %v4077_v48  ;;  %v4150_v48 = vld [vmem:[%s4654_s5 + $0x134] ss:$72 sps:$4 sm:$0xff]  }
  0x69   : > { %2720 = vmatpush1.bf16.msra.mxu0 %v4043_v46  ;;  %v4146_v46 = vld [vmem:[%s5815_s1 + $0x444] ss:$8 sps:$4 sm:$0xff]  }
  0x6a   : > { %2811 = vmatpush1.bf16.msra.mxu1 %v4046_v49  ;;  %2721 = vmatprep.subr.bf16.mxu0 %v4052_v50  ;;  %v4159_v49 = vld [vmem:[%s4654_s5 + $0x13c] ss:$72 sps:$4 sm:$0xff]   ;;  %v4144_v50 = vld [vmem:[%s5815_s1 + $0x440] ss:$8 sps:$4 sm:$0xff]  }
  0x6b   : > { %2812 = vmatprep.subr.bf16.mxu1 %v4055_v51  ;;  %v4147_v51 = vld [vmem:[%s5815_s1 + $0x540] ss:$8 sps:$4 sm:$0xff]  }
  0x6c   : > { %2596 = vmatmul.mubr.bf16.gmra.mxu0 %v4076_v52  ;;  %v4155_v52 = vld [vmem:[%s5815_s1 + $0x434] ss:$8 sps:$4 sm:$0xff]  }
  0x6d   : > { %2687 = vmatmul.mubr.bf16.gmra.mxu1 %v4085_v53  ;;  %2722 = vmatpush2.bf16.msra.mxu0 %v4050_v56  ;;  %v4158_v53 = vld [vmem:[%s5815_s1 + $0x534] ss:$8 sps:$4 sm:$0xff]   ;;  %v4156_v56 = vld [vmem:[%s5815_s1 + $0x530] ss:$8 sps:$4 sm:$0xff]  }
  0x6e   : > { %2813 = vmatpush2.bf16.msra.mxu1 %v4053_v57  ;;  %2723 = vmatprep.subr.bf16.mxu0 %v4063_v58  ;;  %v4161_v57 = vld [vmem:[%s4654_s5 + $0x138] ss:$72 sps:$4 sm:$0xff]   ;;  %v4164_v58 = vld [vmem:[%s5815_s1 + $0x424] ss:$8 sps:$4 sm:$0xff]  }
  0x6f   : > { %2814 = vmatprep.subr.bf16.mxu1 %v4066_v59  ;;  %2605 = vmatprep.mubr.bf16.mxu0 %v3539_v60  ;;  %v4167_v59 = vld [vmem:[%s5815_s1 + $0x524] ss:$8 sps:$4 sm:$0xff]  }
  0x70   : > { %2696 = vmatprep.mubr.bf16.mxu1 %v3541_v61  ;;  %v4168_v60 = vld [vmem:[%s4654_s5 + $0x1c4] ss:$72 sps:$4 sm:$0xff]  }
  0x71   : > { %2724 = vmatpush2.bf16.msra.mxu0 %v4061_v62  ;;  %v4177_v61 = vld [vmem:[%s4654_s5 + $0x1cc] ss:$72 sps:$4 sm:$0xff]   ;;  %v4162_v62 = vld [vmem:[%s5815_s1 + $0x420] ss:$8 sps:$4 sm:$0xff]  }
  0x72   : > { %2815 = vmatpush2.bf16.msra.mxu1 %v4064_v63  ;;  %2725 = vmatprep.subr.bf16.mxu0 %v4070_v0  ;;  %v4165_v63 = vld [vmem:[%s5815_s1 + $0x520] ss:$8 sps:$4 sm:$0xff]   ;;  %v4173_v0 = vld [vmem:[%s5815_s1 + $0x414] ss:$8 sps:$4 sm:$0xff]  }
  0x73   : > { %2816 = vmatprep.subr.bf16.mxu1 %v4073_v1  ;;  %v4176_v1 = vld [vmem:[%s5815_s1 + $0x514] ss:$8 sps:$4 sm:$0xff]  }
  0x74   : > { %2606 = vmatmul.mubr.bf16.gmra.mxu0 %v3538_v3  ;;  %v4171_v3 = vld [vmem:[%s5815_s1 + $0x410] ss:$8 sps:$4 sm:$0xff]  }
  0x75   : > { %2697 = vmatmul.mubr.bf16.gmra.mxu1 %v3540_v4  ;;  %2726 = vmatpush2.bf16.msra.mxu0 %v4068_v2  ;;  %v4170_v2 = vld [vmem:[%s4654_s5 + $0x1c0] ss:$72 sps:$4 sm:$0xff]   ;;  %v4174_v4 = vld [vmem:[%s5815_s1 + $0x510] ss:$8 sps:$4 sm:$0xff]  }
  0x76   : > { %2817 = vmatpush2.bf16.msra.mxu1 %v4071_v5  ;;  %2727 = vmatprep.subr.bf16.mxu0 %v4081_v6  ;;  %v4179_v5 = vld [vmem:[%s4654_s5 + $0x1c8] ss:$72 sps:$4 sm:$0xff]   ;;  %v4182_v6 = vld [vmem:[%s5815_s1 + $0x404] ss:$8 sps:$4 sm:$0xff]  }
  0x77   : > { %2818 = vmatprep.subr.bf16.mxu1 %v4084_v7  ;;  %2737 = vmatprep.mubr.bf16.mxu0 %v4116_v8  ;;  %v4185_v7 = vld [vmem:[%s5815_s1 + $0x504] ss:$8 sps:$4 sm:$0xff]   ;;  %v4186_v8 = vld [vmem:[%s4654_s5 + $0x254] ss:$72 sps:$4 sm:$0xff]  }
  0x78   : > { %2828 = vmatprep.mubr.bf16.mxu1 %v4119_v9  ;;  %v4195_v9 = vld [vmem:[%s4654_s5 + $0x25c] ss:$72 sps:$4 sm:$0xff]  }
  0x79   : > { %2728 = vmatpush2.bf16.msra.mxu0 %v4079_v10  ;;  %v4180_v10 = vld [vmem:[%s5815_s1 + $0x400] ss:$8 sps:$4 sm:$0xff]  }
  0x7a   : > { %2819 = vmatpush2.bf16.msra.mxu1 %v4082_v11  ;;  %2729 = vmatprep.subr.bf16.mxu0 %v4088_v12  ;;  %v4183_v11 = vld [vmem:[%s5815_s1 + $0x500] ss:$8 sps:$4 sm:$0xff]   ;;  %v4191_v12 = vld [vmem:[%s5815_s1 + $0x4f4] ss:$8 sps:$4 sm:$0xff]  }
  0x7b   : > { %2820 = vmatprep.subr.bf16.mxu1 %v4091_v13  ;;  %v4188_v13 = vld [vmem:[%s4654_s5 + $0x250] ss:$72 sps:$4 sm:$0xff]  }
  0x7d   : > { %2730 = vmatpush2.bf16.msra.mxu0 %v4086_v14  ;;  %v4194_v14 = vld [vmem:[%s5815_s1 + $0x5f4] ss:$8 sps:$4 sm:$0xff]  }
  0x7e   : > { %2821 = vmatpush2.bf16.msra.mxu1 %v4089_v15  ;;  %2731 = vmatprep.subr.bf16.mxu0 %v4096_v16  ;;  %v4189_v15 = vld [vmem:[%s5815_s1 + $0x4f0] ss:$8 sps:$4 sm:$0xff]  }
  0x7f   : > { %2822 = vmatprep.subr.bf16.mxu1 %v4099_v17  ;;  %v4192_v16 = vld [vmem:[%s5815_s1 + $0x5f0] ss:$8 sps:$4 sm:$0xff]  }
  0x80   : > { %v4197_v17 = vld [vmem:[%s4654_s5 + $0x258] ss:$72 sps:$4 sm:$0xff]  }
  0x81   : > { %2732 = vmatpush2.bf16.msra.mxu0 %v4094_v18  ;;  %v263_v18 = vld [vmem:[%s4654_s5 + $0x2e0] sm:$0x11] }
  0x82   : > { %2823 = vmatpush2.bf16.msra.mxu1 %v4097_v19  ;;  %2733 = vmatprep.subr.bf16.mxu0 %v4104_v20  ;;  %v264_v19 = vld [vmem:[%s4654_s5 + $0x2e8] sm:$0x11] }
  0x83   : > { %2824 = vmatprep.subr.bf16.mxu1 %v4107_v21  ;;  %v4200_v20 = vld [vmem:[%s5815_s1 + $0x4e4] ss:$8 sps:$4 sm:$0xff]  }
  0x84   : > { %v4203_v21 = vld [vmem:[%s5815_s1 + $0x5e4] ss:$8 sps:$4 sm:$0xff]  }
  0x85   : > { %2734 = vmatpush2.bf16.msra.mxu0 %v4102_v22  ;;  %v3543_v22 = vcombine.high %v263_v18, %v263_v18 }
  0x86   : > { %2825 = vmatpush2.bf16.msra.mxu1 %v4105_v23  ;;  %2735 = vmatprep.subr.bf16.mxu0 %v4110_v24  ;;  %v3545_v23 = vcombine.high %v264_v19, %v264_v19  ;;  %v4198_v24 = vld [vmem:[%s5815_s1 + $0x4e0] ss:$8 sps:$4 sm:$0xff]  }
  0x87   : > { %2826 = vmatprep.subr.bf16.mxu1 %v4113_v25  ;;  %v4201_v25 = vld [vmem:[%s5815_s1 + $0x5e0] ss:$8 sps:$4 sm:$0xff]  }
  0x89   : > { %2736 = vmatpush2.bf16.msra.mxu0 %v4108_v26  ;;  %v4208_v26 = vld [vmem:[%s5815_s1 + $0x4d4] ss:$8 sps:$4 sm:$0xff]  }
  0x8a   : > { %2827 = vmatpush2.bf16.msra.mxu1 %v4111_v27  ;;  %2887 = vmatprep.subr.bf16.mxu0 %v4122_v29  ;;  %v4211_v27 = vld [vmem:[%s5815_s1 + $0x5d4] ss:$8 sps:$4 sm:$0xff]   ;;  %v4206_v29 = vld [vmem:[%s5815_s1 + $0x4d0] ss:$8 sps:$4 sm:$0xff]  }
  0x8b   : > { %2978 = vmatprep.subr.bf16.mxu1 %v4125_v30  ;;  %v4209_v30 = vld [vmem:[%s5815_s1 + $0x5d0] ss:$8 sps:$4 sm:$0xff]  }
  0x8c   : > { %2738 = vmatmul.mubr.bf16.vlgmr.msra.gmra.mxu0 %v4114_v28  ;;  %v3542_v28 = vcombine.low %v263_v18, %v263_v18  ;;  %v4291_v18 = vld [vmem:[%s4654_s5 + $0x148] ss:$72 sps:$4 sm:$0xff]  }
  0x8d   : > { %2829 = vmatmul.mubr.bf16.vlgmr.msra.gmra.mxu1 %v4117_v31  ;;  %2888 = vmatpush1.bf16.msra.mxu0 %v4120_v32  ;;  %v3544_v31 = vcombine.low %v264_v19, %v264_v19  ;;  %v4216_v32 = vld [vmem:[%s5815_s1 + $0x4c4] ss:$8 sps:$4 sm:$0xff]   ;;  %v4286_v19 = vld [vmem:[%s5815_s1 + $0x730] ss:$8 sps:$4 sm:$0xff]  }
  0x8e   : > { %2979 = vmatpush1.bf16.msra.mxu1 %v4123_v33  ;;  %2889 = vmatprep.subr.bf16.mxu0 %v4128_v34  ;;  %v4219_v33 = vld [vmem:[%s5815_s1 + $0x5c4] ss:$8 sps:$4 sm:$0xff]  }
  0x8f   : > { %2980 = vmatprep.subr.bf16.mxu1 %v4131_v35  ;;  %2747 = vmatprep.mubr.bf16.mxu0 %v4132_v36  ;;  %v4246_v34 = vld [vmem:[%s4654_s5 + $0x24] ss:$72 sps:$4 sm:$0xff]   ;;  %v4214_v36 = vld [vmem:[%s5815_s1 + $0x4c0] ss:$8 sps:$4 sm:$0xff]  }
  0x90   : > { %2838 = vmatprep.mubr.bf16.mxu1 %v4141_v37  ;;  %v4249_v35 = vld [vmem:[%s4654_s5 + $0x2c] ss:$72 sps:$4 sm:$0xff]   ;;  %v4217_v37 = vld [vmem:[%s5815_s1 + $0x5c0] ss:$8 sps:$4 sm:$0xff]  }
  0x91   : > { %2890 = vmatpush1.bf16.msra.mxu0 %v4126_v38  ;;  %v4222_v38 = vld [vmem:[%s5815_s1 + $0x4b4] ss:$8 sps:$4 sm:$0xff]  }
  0x92   : > { %2981 = vmatpush1.bf16.msra.mxu1 %v4129_v39  ;;  %2891 = vmatprep.subr.bf16.mxu0 %v4137_v41  ;;  %v4225_v39 = vld [vmem:[%s5815_s1 + $0x5b4] ss:$8 sps:$4 sm:$0xff]   ;;  %v4223_v41 = vld [vmem:[%s5815_s1 + $0x5b0] ss:$8 sps:$4 sm:$0xff]  }
  0x93   : > { %2982 = vmatprep.subr.bf16.mxu1 %v4140_v42  ;;  %v4228_v42 = vld [vmem:[%s5815_s1 + $0x4a4] ss:$8 sps:$4 sm:$0xff]  }
  0x94   : > { %2748 = vmatmul.mubr.bf16.gmra.mxu0 %v4134_v40  ;;  %v4220_v40 = vld [vmem:[%s5815_s1 + $0x4b0] ss:$8 sps:$4 sm:$0xff]  }
  0x95   : > { %2839 = vmatmul.mubr.bf16.gmra.mxu1 %v4143_v44  ;;  %2892 = vmatpush1.bf16.msra.mxu0 %v4135_v43  ;;  %v4231_v43 = vld [vmem:[%s5815_s1 + $0x5a4] ss:$8 sps:$4 sm:$0xff]   ;;  %v4226_v44 = vld [vmem:[%s5815_s1 + $0x4a0] ss:$8 sps:$4 sm:$0xff]  }
  0x96   : > { %2983 = vmatpush1.bf16.msra.mxu1 %v4138_v45  ;;  %2893 = vmatprep.subr.bf16.mxu0 %v4146_v46  ;;  %v4229_v45 = vld [vmem:[%s5815_s1 + $0x5a0] ss:$8 sps:$4 sm:$0xff]   ;;  %v4234_v46 = vld [vmem:[%s5815_s1 + $0x494] ss:$8 sps:$4 sm:$0xff]  }
  0x97   : > { %2984 = vmatprep.subr.bf16.mxu1 %v4149_v47  ;;  %2757 = vmatprep.mubr.bf16.mxu0 %v4150_v48  ;;  %v4237_v47 = vld [vmem:[%s5815_s1 + $0x594] ss:$8 sps:$4 sm:$0xff]   ;;  %v4232_v48 = vld [vmem:[%s5815_s1 + $0x490] ss:$8 sps:$4 sm:$0xff]  }
  0x98   : > { %2848 = vmatprep.mubr.bf16.mxu1 %v4159_v49  ;;  %v4235_v49 = vld [vmem:[%s5815_s1 + $0x590] ss:$8 sps:$4 sm:$0xff]  }
  0x99   : > { %2894 = vmatpush1.bf16.msra.mxu0 %v4144_v50  ;;  %v4240_v50 = vld [vmem:[%s5815_s1 + $0x484] ss:$8 sps:$4 sm:$0xff]  }
  0x9a   : > { %2985 = vmatpush1.bf16.msra.mxu1 %v4147_v51  ;;  %2895 = vmatprep.subr.bf16.mxu0 %v4155_v52  ;;  %v4243_v51 = vld [vmem:[%s5815_s1 + $0x584] ss:$8 sps:$4 sm:$0xff]   ;;  %v4238_v52 = vld [vmem:[%s5815_s1 + $0x480] ss:$8 sps:$4 sm:$0xff]  }
  0x9b   : > { %2986 = vmatprep.subr.bf16.mxu1 %v4158_v53  ;;  %v4241_v53 = vld [vmem:[%s5815_s1 + $0x580] ss:$8 sps:$4 sm:$0xff]  }
  0x9c   : > { %2758 = vmatmul.mubr.bf16.gmra.mxu0 %v4152_v54  ;;  %v4252_v54 = vld [vmem:[%s5815_s1 + $0x674] ss:$8 sps:$4 sm:$0xff]  }
  0x9d   : > { %2849 = vmatmul.mubr.bf16.gmra.mxu1 %v4161_v57  ;;  %2896 = vmatpush1.bf16.msra.mxu0 %v4153_v55  ;;  %v4255_v55 = vld [vmem:[%s5815_s1 + $0x774] ss:$8 sps:$4 sm:$0xff]   ;;  %v4247_v57 = vld [vmem:[%s4654_s5 + $0x28] ss:$72 sps:$4 sm:$0xff]  }
  0x9e   : > { %2987 = vmatpush1.bf16.msra.mxu1 %v4156_v56  ;;  %2897 = vmatprep.subr.bf16.mxu0 %v4164_v58  ;;  %v4244_v56 = vld [vmem:[%s4654_s5 + $0x20] ss:$72 sps:$4 sm:$0xff]   ;;  %v4250_v58 = vld [vmem:[%s5815_s1 + $0x670] ss:$8 sps:$4 sm:$0xff]  }
  0x9f   : > { %2988 = vmatprep.subr.bf16.mxu1 %v4167_v59  ;;  %2767 = vmatprep.mubr.bf16.mxu0 %v4168_v60  ;;  %v4253_v59 = vld [vmem:[%s5815_s1 + $0x770] ss:$8 sps:$4 sm:$0xff]   ;;  %v4258_v60 = vld [vmem:[%s5815_s1 + $0x664] ss:$8 sps:$4 sm:$0xff]  }
  0xa0   : > { %2858 = vmatprep.mubr.bf16.mxu1 %v4177_v61  ;;  %v4261_v61 = vld [vmem:[%s5815_s1 + $0x764] ss:$8 sps:$4 sm:$0xff]  }
  0xa1   : > { %2898 = vmatpush1.bf16.msra.mxu0 %v4162_v62  ;;  %v4262_v62 = vld [vmem:[%s4654_s5 + $0xb4] ss:$72 sps:$4 sm:$0xff]  }
  0xa2   : > { %2989 = vmatpush1.bf16.msra.mxu1 %v4165_v63  ;;  %2899 = vmatprep.subr.bf16.mxu0 %v4173_v0  ;;  %v4271_v63 = vld [vmem:[%s4654_s5 + $0xbc] ss:$72 sps:$4 sm:$0xff]   ;;  %v4256_v0 = vld [vmem:[%s5815_s1 + $0x660] ss:$8 sps:$4 sm:$0xff]  }
  0xa3   : > { %2990 = vmatprep.subr.bf16.mxu1 %v4176_v1  ;;  %v4259_v1 = vld [vmem:[%s5815_s1 + $0x760] ss:$8 sps:$4 sm:$0xff]  }
  0xa4   : > { %2768 = vmatmul.mubr.bf16.gmra.mxu0 %v4170_v2  ;;  %v4267_v2 = vld [vmem:[%s5815_s1 + $0x654] ss:$8 sps:$4 sm:$0xff]  }
  0xa5   : > { %2859 = vmatmul.mubr.bf16.gmra.mxu1 %v4179_v5  ;;  %2900 = vmatpush1.bf16.msra.mxu0 %v4171_v3  ;;  %v4270_v3 = vld [vmem:[%s5815_s1 + $0x754] ss:$8 sps:$4 sm:$0xff]   ;;  %v4265_v5 = vld [vmem:[%s5815_s1 + $0x650] ss:$8 sps:$4 sm:$0xff]  }
  0xa6   : > { %2991 = vmatpush1.bf16.msra.mxu1 %v4174_v4  ;;  %2901 = vmatprep.subr.bf16.mxu0 %v4182_v6  ;;  %v4264_v4 = vld [vmem:[%s4654_s5 + $0xb0] ss:$72 sps:$4 sm:$0xff]  }
  0xa7   : > { %2992 = vmatprep.subr.bf16.mxu1 %v4185_v7  ;;  %2777 = vmatprep.mubr.bf16.mxu0 %v4186_v8  ;;  %v4273_v6 = vld [vmem:[%s4654_s5 + $0xb8] ss:$72 sps:$4 sm:$0xff]   ;;  %v4276_v8 = vld [vmem:[%s5815_s1 + $0x644] ss:$8 sps:$4 sm:$0xff]  }
  0xa8   : > { %2868 = vmatprep.mubr.bf16.mxu1 %v4195_v9  ;;  %v4268_v7 = vld [vmem:[%s5815_s1 + $0x750] ss:$8 sps:$4 sm:$0xff]   ;;  %v4279_v9 = vld [vmem:[%s5815_s1 + $0x744] ss:$8 sps:$4 sm:$0xff]  }
  0xa9   : > { %2902 = vmatpush1.bf16.msra.mxu0 %v4180_v10  ;;  %v4280_v10 = vld [vmem:[%s4654_s5 + $0x144] ss:$72 sps:$4 sm:$0xff]  }
  0xaa   : > { %2993 = vmatpush1.bf16.msra.mxu1 %v4183_v11  ;;  %2903 = vmatprep.subr.bf16.mxu0 %v4191_v12  ;;  %v4289_v11 = vld [vmem:[%s4654_s5 + $0x14c] ss:$72 sps:$4 sm:$0xff]   ;;  %v4274_v12 = vld [vmem:[%s5815_s1 + $0x640] ss:$8 sps:$4 sm:$0xff]  }
  0xab   : > { %2994 = vmatprep.subr.bf16.mxu1 %v4194_v14  ;;  %v4282_v14 = vld [vmem:[%s4654_s5 + $0x140] ss:$72 sps:$4 sm:$0xff]  }
  0xac   : > { %2778 = vmatmul.mubr.bf16.gmra.mxu0 %v4188_v13  ;;  %v4277_v13 = vld [vmem:[%s5815_s1 + $0x740] ss:$8 sps:$4 sm:$0xff]  }
  0xad   : > { %2869 = vmatmul.mubr.bf16.gmra.mxu1 %v4197_v17  ;;  %2904 = vmatpush2.bf16.msra.mxu0 %v4189_v15  ;;  %v4285_v15 = vld [vmem:[%s5815_s1 + $0x634] ss:$8 sps:$4 sm:$0xff]   ;;  %v4283_v17 = vld [vmem:[%s5815_s1 + $0x630] ss:$8 sps:$4 sm:$0xff]  }
  0xae   : > { %2995 = vmatpush2.bf16.msra.mxu1 %v4192_v16  ;;  %2905 = vmatprep.subr.bf16.mxu0 %v4200_v20  ;;  %v4288_v16 = vld [vmem:[%s5815_s1 + $0x734] ss:$8 sps:$4 sm:$0xff]   ;;  %v4294_v20 = vld [vmem:[%s5815_s1 + $0x624] ss:$8 sps:$4 sm:$0xff]  }
  0xaf   : > { %2996 = vmatprep.subr.bf16.mxu1 %v4203_v21  ;;  %2787 = vmatprep.mubr.bf16.mxu0 %v3543_v22  ;;  %v4297_v21 = vld [vmem:[%s5815_s1 + $0x724] ss:$8 sps:$4 sm:$0xff]   ;;  %v4298_v22 = vld [vmem:[%s4654_s5 + $0x1d4] ss:$72 sps:$4 sm:$0xff]  }
  0xb0   : > { %2878 = vmatprep.mubr.bf16.mxu1 %v3545_v23  ;;  %v4307_v23 = vld [vmem:[%s4654_s5 + $0x1dc] ss:$72 sps:$4 sm:$0xff]  }
  0xb1   : > { %2906 = vmatpush2.bf16.msra.mxu0 %v4198_v24  ;;  %v4292_v24 = vld [vmem:[%s5815_s1 + $0x620] ss:$8 sps:$4 sm:$0xff]  }
  0xb2   : > { %2997 = vmatpush2.bf16.msra.mxu1 %v4201_v25  ;;  %2907 = vmatprep.subr.bf16.mxu0 %v4208_v26  ;;  %v4295_v25 = vld [vmem:[%s5815_s1 + $0x720] ss:$8 sps:$4 sm:$0xff]   ;;  %v4300_v26 = vld [vmem:[%s4654_s5 + $0x1d0] ss:$72 sps:$4 sm:$0xff]  }
  0xb3   : > { %2998 = vmatprep.subr.bf16.mxu1 %v4211_v27  ;;  %v4303_v27 = vld [vmem:[%s5815_s1 + $0x614] ss:$8 sps:$4 sm:$0xff]  }
  0xb4   : > { %2788 = vmatmul.mubr.bf16.gmra.mxu0 %v3542_v28  ;;  %v4306_v28 = vld [vmem:[%s5815_s1 + $0x714] ss:$8 sps:$4 sm:$0xff]  }
  0xb5   : > { %2879 = vmatmul.mubr.bf16.gmra.mxu1 %v3544_v31  ;;  %2908 = vmatpush2.bf16.msra.mxu0 %v4206_v29  ;;  %v4301_v29 = vld [vmem:[%s5815_s1 + $0x610] ss:$8 sps:$4 sm:$0xff]  }
  0xb6   : > { %2999 = vmatpush2.bf16.msra.mxu1 %v4209_v30  ;;  %2909 = vmatprep.subr.bf16.mxu0 %v4216_v32  ;;  %v4304_v30 = vld [vmem:[%s5815_s1 + $0x710] ss:$8 sps:$4 sm:$0xff]   ;;  %v4312_v32 = vld [vmem:[%s5815_s1 + $0x604] ss:$8 sps:$4 sm:$0xff]  }
  0xb7   : > { %3000 = vmatprep.subr.bf16.mxu1 %v4219_v33  ;;  %2919 = vmatprep.mubr.bf16.mxu0 %v4246_v34  ;;  %v4309_v31 = vld [vmem:[%s4654_s5 + $0x1d8] ss:$72 sps:$4 sm:$0xff]   ;;  %v4315_v33 = vld [vmem:[%s5815_s1 + $0x704] ss:$8 sps:$4 sm:$0xff]  }
  0xb8   : > { %3010 = vmatprep.mubr.bf16.mxu1 %v4249_v35  ;;  %v4316_v34 = vld [vmem:[%s4654_s5 + $0x264] ss:$72 sps:$4 sm:$0xff]  }
  0xb9   : > { %2910 = vmatpush2.bf16.msra.mxu0 %v4214_v36  ;;  %v4325_v35 = vld [vmem:[%s4654_s5 + $0x26c] ss:$72 sps:$4 sm:$0xff]   ;;  %v4310_v36 = vld [vmem:[%s5815_s1 + $0x600] ss:$8 sps:$4 sm:$0xff]  }
  0xba   : > { %3001 = vmatpush2.bf16.msra.mxu1 %v4217_v37  ;;  %2911 = vmatprep.subr.bf16.mxu0 %v4222_v38  ;;  %v4313_v37 = vld [vmem:[%s5815_s1 + $0x700] ss:$8 sps:$4 sm:$0xff]   ;;  %v4321_v38 = vld [vmem:[%s5815_s1 + $0x6f4] ss:$8 sps:$4 sm:$0xff]  }
  0xbb   : > { %3002 = vmatprep.subr.bf16.mxu1 %v4225_v39  ;;  %v4318_v39 = vld [vmem:[%s4654_s5 + $0x260] ss:$72 sps:$4 sm:$0xff]  }
  0xbd   : > { %2912 = vmatpush2.bf16.msra.mxu0 %v4220_v40  ;;  %v4324_v40 = vld [vmem:[%s5815_s1 + $0x7f4] ss:$8 sps:$4 sm:$0xff]  }
  0xbe   : > { %3003 = vmatpush2.bf16.msra.mxu1 %v4223_v41  ;;  %2913 = vmatprep.subr.bf16.mxu0 %v4228_v42  ;;  %v4319_v41 = vld [vmem:[%s5815_s1 + $0x6f0] ss:$8 sps:$4 sm:$0xff]  }
  0xbf   : > { %3004 = vmatprep.subr.bf16.mxu1 %v4231_v43  ;;  %v4327_v42 = vld [vmem:[%s4654_s5 + $0x268] ss:$72 sps:$4 sm:$0xff]  }
  0xc0   : > { %v265_v43 = vld [vmem:[%s4654_s5 + $0x2f0] sm:$0x11] }
  0xc1   : > { %2914 = vmatpush2.bf16.msra.mxu0 %v4226_v44  ;;  %v266_v44 = vld [vmem:[%s4654_s5 + $0x2f8] sm:$0x11] }
  0xc2   : > { %3005 = vmatpush2.bf16.msra.mxu1 %v4229_v45  ;;  %2915 = vmatprep.subr.bf16.mxu0 %v4234_v46  ;;  %v4322_v45 = vld [vmem:[%s5815_s1 + $0x7f0] ss:$8 sps:$4 sm:$0xff]   ;;  %v4330_v46 = vld [vmem:[%s5815_s1 + $0x6e4] ss:$8 sps:$4 sm:$0xff]  }
  0xc3   : > { %3006 = vmatprep.subr.bf16.mxu1 %v4237_v47  ;;  %v4333_v47 = vld [vmem:[%s5815_s1 + $0x7e4] ss:$8 sps:$4 sm:$0xff]  }
  0xc5   : > { %2916 = vmatpush2.bf16.msra.mxu0 %v4232_v48  ;;  %v3547_v48 = vcombine.high %v265_v43, %v265_v43 }
  0xc6   : > { %3007 = vmatpush2.bf16.msra.mxu1 %v4235_v49  ;;  %2917 = vmatprep.subr.bf16.mxu0 %v4240_v50  ;;  %v3549_v49 = vcombine.high %v266_v44, %v266_v44  ;;  %v4328_v50 = vld [vmem:[%s5815_s1 + $0x6e0] ss:$8 sps:$4 sm:$0xff]  }
  0xc7   : > { %3008 = vmatprep.subr.bf16.mxu1 %v4243_v51  ;;  %v4331_v51 = vld [vmem:[%s5815_s1 + $0x7e0] ss:$8 sps:$4 sm:$0xff]  }
  0xc9   : > { %2918 = vmatpush2.bf16.msra.mxu0 %v4238_v52  ;;  %v4338_v52 = vld [vmem:[%s5815_s1 + $0x6d4] ss:$8 sps:$4 sm:$0xff]  }
  0xca   : > { %3009 = vmatpush2.bf16.msra.mxu1 %v4241_v53  ;;  %3069 = vmatprep.subr.bf16.mxu0 %v4252_v54  ;;  %v4341_v53 = vld [vmem:[%s5815_s1 + $0x7d4] ss:$8 sps:$4 sm:$0xff]   ;;  %v3546_v54 = vcombine.low %v265_v43, %v265_v43 }
  0xcb   : > { %3160 = vmatprep.subr.bf16.mxu1 %v4255_v55  ;;  %v4336_v55 = vld [vmem:[%s5815_s1 + $0x6d0] ss:$8 sps:$4 sm:$0xff]  }
  0xcc   : > { %2920 = vmatmul.mubr.bf16.vlgmr.msra.gmra.mxu0 %v4244_v56  ;;  %v4339_v56 = vld [vmem:[%s5815_s1 + $0x7d0] ss:$8 sps:$4 sm:$0xff]  }
  0xcd   : > { %3011 = vmatmul.mubr.bf16.vlgmr.msra.gmra.mxu1 %v4247_v57  ;;  %3070 = vmatpush1.bf16.msra.mxu0 %v4250_v58  ;;  %v3548_v57 = vcombine.low %v266_v44, %v266_v44  ;;  %v4346_v58 = vld [vmem:[%s5815_s1 + $0x6c4] ss:$8 sps:$4 sm:$0xff]  }
  0xce   : > { %3161 = vmatpush1.bf16.msra.mxu1 %v4253_v59  ;;  %3071 = vmatprep.subr.bf16.mxu0 %v4258_v60  ;;  %v4349_v59 = vld [vmem:[%s5815_s1 + $0x7c4] ss:$8 sps:$4 sm:$0xff]   ;;  %v4376_v60 = vld [vmem:[%s4654_s5 + $0x34] ss:$72 sps:$4 sm:$0xff]  }
  0xcf   : > { %3162 = vmatprep.subr.bf16.mxu1 %v4261_v61  ;;  %2929 = vmatprep.mubr.bf16.mxu0 %v4262_v62  ;;  %v4379_v61 = vld [vmem:[%s4654_s5 + $0x3c] ss:$72 sps:$4 sm:$0xff]   ;;  %v4344_v62 = vld [vmem:[%s5815_s1 + $0x6c0] ss:$8 sps:$4 sm:$0xff]  }
  0xd0   : > { %3020 = vmatprep.mubr.bf16.mxu1 %v4271_v63  ;;  %v4347_v63 = vld [vmem:[%s5815_s1 + $0x7c0] ss:$8 sps:$4 sm:$0xff]  }
  0xd1   : > { %3072 = vmatpush1.bf16.msra.mxu0 %v4256_v0  ;;  %v4352_v0 = vld [vmem:[%s5815_s1 + $0x6b4] ss:$8 sps:$4 sm:$0xff]  }
  0xd2   : > { %3163 = vmatpush1.bf16.msra.mxu1 %v4259_v1  ;;  %3073 = vmatprep.subr.bf16.mxu0 %v4267_v2  ;;  %v4355_v1 = vld [vmem:[%s5815_s1 + $0x7b4] ss:$8 sps:$4 sm:$0xff]   ;;  %v4350_v2 = vld [vmem:[%s5815_s1 + $0x6b0] ss:$8 sps:$4 sm:$0xff]  }
  0xd3   : > { %3164 = vmatprep.subr.bf16.mxu1 %v4270_v3  ;;  %v4353_v3 = vld [vmem:[%s5815_s1 + $0x7b0] ss:$8 sps:$4 sm:$0xff]  }
  0xd4   : > { %2930 = vmatmul.mubr.bf16.gmra.mxu0 %v4264_v4  ;;  %v4358_v4 = vld [vmem:[%s5815_s1 + $0x6a4] ss:$8 sps:$4 sm:$0xff]  }
  0xd5   : > { %3021 = vmatmul.mubr.bf16.gmra.mxu1 %v4273_v6  ;;  %3074 = vmatpush1.bf16.msra.mxu0 %v4265_v5  ;;  %v4361_v5 = vld [vmem:[%s5815_s1 + $0x7a4] ss:$8 sps:$4 sm:$0xff]   ;;  %v4356_v6 = vld [vmem:[%s5815_s1 + $0x6a0] ss:$8 sps:$4 sm:$0xff]  }
  0xd6   : > { %3165 = vmatpush1.bf16.msra.mxu1 %v4268_v7  ;;  %3075 = vmatprep.subr.bf16.mxu0 %v4276_v8  ;;  %v4359_v7 = vld [vmem:[%s5815_s1 + $0x7a0] ss:$8 sps:$4 sm:$0xff]   ;;  %v560_v8 = vlaneseq }
  0xd7   : > { %3166 = vmatprep.subr.bf16.mxu1 %v4279_v9  ;;  %2939 = vmatprep.mubr.bf16.mxu0 %v4280_v10  ;;  %v4364_v9 = vld [vmem:[%s5815_s1 + $0x694] ss:$8 sps:$4 sm:$0xff]  }
  0xd8   : > { %3030 = vmatprep.mubr.bf16.mxu1 %v4289_v11  ;;  %v4367_v10 = vld [vmem:[%s5815_s1 + $0x794] ss:$8 sps:$4 sm:$0xff]   ;;  %v4362_v11 = vld [vmem:[%s5815_s1 + $0x690] ss:$8 sps:$4 sm:$0xff]  }
  0xd9   : > { %3076 = vmatpush1.bf16.msra.mxu0 %v4274_v12  ;;  %v4365_v12 = vld [vmem:[%s5815_s1 + $0x790] ss:$8 sps:$4 sm:$0xff]  }
  0xda   : > { %3167 = vmatpush1.bf16.msra.mxu1 %v4277_v13  ;;  %3077 = vmatprep.subr.bf16.mxu0 %v4285_v15  ;;  %v561_v13 = vshrl.u32 %v560_v8, 7  ;;  %v4373_v15 = vld [vmem:[%s5815_s1 + $0x784] ss:$8 sps:$4 sm:$0xff]  }
  0xdb   : > { %3168 = vmatprep.subr.bf16.mxu1 %v4288_v16  ;;  %v4368_v16 = vld [vmem:[%s5815_s1 + $0x680] ss:$8 sps:$4 sm:$0xff]  }
  0xdc   : > { %2940 = vmatmul.mubr.bf16.gmra.mxu0 %v4282_v14  ;;  %v4370_v14 = vld [vmem:[%s5815_s1 + $0x684] ss:$8 sps:$4 sm:$0xff]  }
  0xdd   : > { %3031 = vmatmul.mubr.bf16.gmra.mxu1 %v4291_v18  ;;  %3078 = vmatpush1.bf16.msra.mxu0 %v4283_v17  ;;  %v4371_v17 = vld [vmem:[%s5815_s1 + $0x780] ss:$8 sps:$4 sm:$0xff]   ;;  %v562_v18 = vsub.s32 0, %v561_v13 }
  0xde   : > { %3169 = vmatpush1.bf16.msra.mxu1 %v4286_v19  ;;  %3079 = vmatprep.subr.bf16.mxu0 %v4294_v20  ;;  %v558_v19 = vld [vmem:[%s5816_s2] sm:$0x3]  ;;  %v4382_v20 = vld [vmem:[%s5815_s1 + $0x874] ss:$8 sps:$4 sm:$0xff]  }
  0xdf   : > { %3170 = vmatprep.subr.bf16.mxu1 %v4297_v21  ;;  %2949 = vmatprep.mubr.bf16.mxu0 %v4298_v22  ;;  %v566_v21 = vsub.s32 1, %v561_v13  ;;  %v4374_v22 = vld [vmem:[%s4654_s5 + $0x30] ss:$72 sps:$4 sm:$0xff]  }
  0xe0   : > { %3040 = vmatprep.mubr.bf16.mxu1 %v4307_v23  ;;  %v4377_v23 = vld [vmem:[%s4654_s5 + $0x38] ss:$72 sps:$4 sm:$0xff]  }
  0xe1   : > { %3080 = vmatpush1.bf16.msra.mxu0 %v4292_v24  ;;  %v5365_v24 = vrot.slane %v558_v19, %v562_v18  ;;  %v4415_v18 = vld [vmem:[%s5815_s1 + $0x814] ss:$8 sps:$4 sm:$0xff]  }
  0xe2   : > { %3171 = vmatpush1.bf16.msra.mxu1 %v4295_v25  ;;  %3081 = vmatprep.subr.bf16.mxu0 %v4303_v27  ;;  %v4380_v25 = vld [vmem:[%s5815_s1 + $0x870] ss:$8 sps:$4 sm:$0xff]   ;;  %v5373_v27 = vrot.slane %v558_v19, %v566_v21 }
  0xe3   : > { %3172 = vmatprep.subr.bf16.mxu1 %v4306_v28  ;;  %v4386_v28 = vld [vmem:[%s4654_s5 + $0xc4] ss:$72 sps:$4 sm:$0xff]  }
  0xe4   : > { %2950 = vmatmul.mubr.bf16.gmra.mxu0 %v4300_v26  ;;  %v4385_v26 = vld [vmem:[%s5815_s1 + $0x864] ss:$8 sps:$4 sm:$0xff]  }
  0xe5   : > { %3041 = vmatmul.mubr.bf16.gmra.mxu1 %v4309_v31  ;;  %3082 = vmatpush1.bf16.msra.mxu0 %v4301_v29  ;;  %v4392_v29 = vld [vmem:[%s4654_s5 + $0xcc] ss:$72 sps:$4 sm:$0xff]  }
  0xe6   : > { %3173 = vmatpush1.bf16.msra.mxu1 %v4304_v30  ;;  %3083 = vmatprep.subr.bf16.mxu0 %v4312_v32 }
  0xe7   : > { %3174 = vmatprep.subr.bf16.mxu1 %v4315_v33  ;;  %2959 = vmatprep.mubr.bf16.mxu0 %v4316_v34  ;;  %v4383_v33 = vld [vmem:[%s5815_s1 + $0x860] ss:$8 sps:$4 sm:$0xff]  }
  0xe8   : > { %3050 = vmatprep.mubr.bf16.mxu1 %v4325_v35 }
  0xe9   : > { %3084 = vmatpush1.bf16.msra.mxu0 %v4310_v36  ;;  %v4391_v36 = vld [vmem:[%s5815_s1 + $0x854] ss:$8 sps:$4 sm:$0xff]  }
  0xea   : > { %3175 = vmatpush1.bf16.msra.mxu1 %v4313_v37  ;;  %3085 = vmatprep.subr.bf16.mxu0 %v4321_v38 }
  0xeb   : > { %3176 = vmatprep.subr.bf16.mxu1 %v4324_v40 }
  0xec   : > { %2960 = vmatmul.mubr.bf16.gmra.mxu0 %v4318_v39 }
  0xed   : > { %3051 = vmatmul.mubr.bf16.gmra.mxu1 %v4327_v42  ;;  %3086 = vmatpush2.bf16.msra.mxu0 %v4319_v41  ;;  %v4388_v41 = vld [vmem:[%s4654_s5 + $0xc0] ss:$72 sps:$4 sm:$0xff]  }
  0xee   : > { %3177 = vmatpush2.bf16.msra.mxu1 %v4322_v45  ;;  %3087 = vmatprep.subr.bf16.mxu0 %v4330_v46  ;;  %v4394_v42 = vld [vmem:[%s4654_s5 + $0xc8] ss:$72 sps:$4 sm:$0xff]  }
  0xef   : > { %3178 = vmatprep.subr.bf16.mxu1 %v4333_v47  ;;  %2969 = vmatprep.mubr.bf16.mxu0 %v3547_v48  ;;  %v4389_v45 = vld [vmem:[%s5815_s1 + $0x850] ss:$8 sps:$4 sm:$0xff]   ;;  %v4397_v48 = vld [vmem:[%s5815_s1 + $0x844] ss:$8 sps:$4 sm:$0xff]  }
  0xf0   : > { %3060 = vmatprep.mubr.bf16.mxu1 %v3549_v49 }
  0xf1   : > { %3088 = vmatpush2.bf16.msra.mxu0 %v4328_v50 }
  0xf2   : > { %3179 = vmatpush2.bf16.msra.mxu1 %v4331_v51  ;;  %3089 = vmatprep.subr.bf16.mxu0 %v4338_v52  ;;  %v4398_v51 = vld [vmem:[%s4654_s5 + $0x154] ss:$72 sps:$4 sm:$0xff]  }
  0xf3   : > { %3180 = vmatprep.subr.bf16.mxu1 %v4341_v53  ;;  %v4404_v52 = vld [vmem:[%s4654_s5 + $0x15c] ss:$72 sps:$4 sm:$0xff]  }
  0xf4   : > { %2970 = vmatmul.mubr.bf16.gmra.mxu0 %v3546_v54 }
  0xf5   : > { %3061 = vmatmul.mubr.bf16.gmra.mxu1 %v3548_v57  ;;  %3090 = vmatpush2.bf16.msra.mxu0 %v4336_v55 }
  0xf6   : > { %3181 = vmatpush2.bf16.msra.mxu1 %v4339_v56  ;;  %3091 = vmatprep.subr.bf16.mxu0 %v4346_v58  ;;  %v4395_v56 = vld [vmem:[%s5815_s1 + $0x840] ss:$8 sps:$4 sm:$0xff]   ;;  %v4403_v58 = vld [vmem:[%s5815_s1 + $0x834] ss:$8 sps:$4 sm:$0xff]  }
  0xf7   : > { %3182 = vmatprep.subr.bf16.mxu1 %v4349_v59  ;;  %3101 = vmatprep.mubr.bf16.mxu0 %v4376_v60 }
  0xf8   : > { %3192 = vmatprep.mubr.bf16.mxu1 %v4379_v61 }
  0xf9   : > { %3092 = vmatpush2.bf16.msra.mxu0 %v4344_v62 }
  0xfa   : > { %3183 = vmatpush2.bf16.msra.mxu1 %v4347_v63  ;;  %3093 = vmatprep.subr.bf16.mxu0 %v4352_v0  ;;  %v4400_v63 = vld [vmem:[%s4654_s5 + $0x150] ss:$72 sps:$4 sm:$0xff]  }
  0xfb   : > { %3184 = vmatprep.subr.bf16.mxu1 %v4355_v1  ;;  %v4406_v0 = vld [vmem:[%s4654_s5 + $0x158] ss:$72 sps:$4 sm:$0xff]  }
  0xfd   : > { %3094 = vmatpush2.bf16.msra.mxu0 %v4350_v2 }
  0xfe   : > { %3185 = vmatpush2.bf16.msra.mxu1 %v4353_v3  ;;  %3095 = vmatprep.subr.bf16.mxu0 %v4358_v4  ;;  %v4401_v3 = vld [vmem:[%s5815_s1 + $0x830] ss:$8 sps:$4 sm:$0xff]  }
  0xff   : > { %3186 = vmatprep.subr.bf16.mxu1 %v4361_v5 }
 0x101   : > { %3096 = vmatpush2.bf16.msra.mxu0 %v4356_v6  ;;  %v4409_v6 = vld [vmem:[%s5815_s1 + $0x824] ss:$8 sps:$4 sm:$0xff]  }
 0x102   : > { %3187 = vmatpush2.bf16.msra.mxu1 %v4359_v7  ;;  %3097 = vmatprep.subr.bf16.mxu0 %v4364_v9  ;;  %v4410_v9 = vld [vmem:[%s4654_s5 + $0x1e4] ss:$72 sps:$4 sm:$0xff]  }
 0x103   : > { %3188 = vmatprep.subr.bf16.mxu1 %v4367_v10 }
 0x105   : > { %3098 = vmatpush2.bf16.msra.mxu0 %v4362_v11 }
 0x106   : > { %3189 = vmatpush2.bf16.msra.mxu1 %v4365_v12  ;;  %3099 = vmatprep.subr.bf16.mxu0 %v4370_v14  ;;  %v4416_v12 = vld [vmem:[%s4654_s5 + $0x1ec] ss:$72 sps:$4 sm:$0xff]  }
 0x107   : > { %3190 = vmatprep.subr.bf16.mxu1 %v4373_v15  ;;  %v4407_v15 = vld [vmem:[%s5815_s1 + $0x820] ss:$8 sps:$4 sm:$0xff]  }
 0x109   : > { %3100 = vmatpush2.bf16.msra.mxu0 %v4368_v16 }
 0x10a   : > { %3191 = vmatpush2.bf16.msra.mxu1 %v4371_v17  ;;  %3251 = vmatprep.subr.bf16.mxu0 %v4382_v20 }
 0x10b   : > { %3846 = vmatprep.subr.bf16.mxu1 %v4382_v20 }
 0x10c   : > { %v2557_v30 = vpop.f32.mrf.mxu0  ;;  %3102 = vmatmul.mubr.bf16.vlgmr.msra.gmra.mxu0 %v4374_v22 }
 0x10d   : > { %v2648_v31 = vpop.f32.mrf.mxu1  ;;  %3193 = vmatmul.mubr.bf16.vlgmr.msra.gmra.mxu1 %v4377_v23  ;;  %v2558_v32 = vadd.f32 %v2557_v30, %v5365_v24  ;;  %3252 = vmatpush1.bf16.msra.mxu0 %v4380_v25  ;;  %v4412_v23 = vld [vmem:[%s4654_s5 + $0x1e0] ss:$72 sps:$4 sm:$0xff]  }
 0x10e   : > { %3862 = vmatpush1.bf16.msra.mxu1 %v4380_v25  ;;  %v2559_v34 = vpop.f32.mrf.mxu0  ;;  %3253 = vmatprep.subr.bf16.mxu0 %v4385_v26  ;;  %v4418_v25 = vld [vmem:[%s4654_s5 + $0x1e8] ss:$72 sps:$4 sm:$0xff]  }
 0x10f   : > { %v2650_v35 = vpop.f32.mrf.mxu1  ;;  %3847 = vmatprep.subr.bf16.mxu1 %v4385_v26  ;;  %v5384_v37 = vadd.f32 %v2648_v31, %v2558_v32  ;;  %v2560_v38 = vadd.f32 %v2559_v34, %v5373_v27  ;;  %3111 = vmatprep.mubr.bf16.mxu0 %v4386_v28  ;;  %v4421_v32 = vld [vmem:[%s5815_s1 + $0x804] ss:$8 sps:$4 sm:$0xff]  }
 0x110   : > { %3202 = vmatprep.mubr.bf16.mxu1 %v4392_v29  ;;  %v2561_v39 = vpop.f32.mrf.mxu0  ;;  %v4413_v29 = vld [vmem:[%s5815_s1 + $0x810] ss:$8 sps:$4 sm:$0xff]  }
 0x111   : > { %v2652_v40 = vpop.f32.mrf.mxu1  ;;  %v5389_v43 = vadd.f32 %v2650_v35, %v2560_v38  ;;  %v2562_v44 = vadd.f32 %v2561_v39, %v5365_v24  ;;  %3254 = vmatpush1.bf16.msra.mxu0 %v4383_v33  ;;  %v4422_v35 = vld [vmem:[%s4654_s5 + $0x274] ss:$72 sps:$4 sm:$0xff]  }
 0x112   : > { %3863 = vmatpush1.bf16.msra.mxu1 %v4383_v33  ;;  %v2563_v46 = vpop.f32.mrf.mxu0  ;;  %3255 = vmatprep.subr.bf16.mxu0 %v4391_v36  ;;  %v4428_v39 = vld [vmem:[%s4654_s5 + $0x27c] ss:$72 sps:$4 sm:$0xff]  }
 0x113   : > { %v2654_v47 = vpop.f32.mrf.mxu1  ;;  %3848 = vmatprep.subr.bf16.mxu1 %v4391_v36  ;;  %v5398_v49 = vadd.f32 %v2652_v40, %v2562_v44  ;;  %v2564_v50 = vadd.f32 %v2563_v46, %v5373_v27  ;;  %v4427_v46 = vld [vmem:[%s5815_s1 + $0x8f4] ss:$8 sps:$4 sm:$0xff]  }
 0x114   : > { %3112 = vmatmul.mubr.bf16.gmra.mxu0 %v4388_v41  ;;  %v2567_v53 = vpop.f32.mrf.mxu0 }
 0x115   : > { %3203 = vmatmul.mubr.bf16.gmra.mxu1 %v4394_v42  ;;  %v2658_v54 = vpop.f32.mrf.mxu1  ;;  %v5403_v55 = vadd.f32 %v2654_v47, %v2564_v50  ;;  %3256 = vmatpush1.bf16.msra.mxu0 %v4389_v45  ;;  %v2568_v57 = vadd.f32 %v2567_v53, %v5365_v24  ;;  %v4419_v42 = vld [vmem:[%s5815_s1 + $0x800] ss:$8 sps:$4 sm:$0xff]   ;;  %v4424_v50 = vld [vmem:[%s4654_s5 + $0x270] ss:$72 sps:$4 sm:$0xff]  }
 0x116   : > { %3864 = vmatpush1.bf16.msra.mxu1 %v4389_v45  ;;  %3257 = vmatprep.subr.bf16.mxu0 %v4397_v48  ;;  %v2569_v59 = vpop.f32.mrf.mxu0  ;;  %v4430_v53 = vld [vmem:[%s4654_s5 + $0x278] ss:$72 sps:$4 sm:$0xff]  }
 0x117   : > { %3849 = vmatprep.subr.bf16.mxu1 %v4397_v48  ;;  %v2660_v60 = vpop.f32.mrf.mxu1  ;;  %3121 = vmatprep.mubr.bf16.mxu0 %v4398_v51  ;;  %v2570_v61 = vadd.f32 %v2569_v59, %v5373_v27  ;;  %v5413_v62 = vadd.f32 %v2658_v54, %v2568_v57  ;;  %v4425_v59 = vld [vmem:[%s5815_s1 + $0x8f0] ss:$8 sps:$4 sm:$0xff]  }
 0x118   : > { %3212 = vmatprep.mubr.bf16.mxu1 %v4404_v52  ;;  %v2571_v1 = vpop.f32.mrf.mxu0 }
 0x119   : > { %v2662_v2 = vpop.f32.mrf.mxu1  ;;  %3258 = vmatpush1.bf16.msra.mxu0 %v4395_v56  ;;  %v2572_v4 = vadd.f32 %v2571_v1, %v5365_v24  ;;  %v5421_v5 = vadd.f32 %v2660_v60, %v2570_v61 }
 0x11a   : > { %3865 = vmatpush1.bf16.msra.mxu1 %v4395_v56  ;;  %3259 = vmatprep.subr.bf16.mxu0 %v4403_v58  ;;  %v2573_v7 = vpop.f32.mrf.mxu0  ;;  %v267_v56 = vld [vmem:[%s4654_s5 + $0x300] sm:$0x11] }
 0x11b   : > { %3850 = vmatprep.subr.bf16.mxu1 %v4403_v58  ;;  %v2664_v8 = vpop.f32.mrf.mxu1  ;;  %v2574_v10 = vadd.f32 %v2573_v7, %v5373_v27  ;;  %v5428_v11 = vadd.f32 %v2662_v2, %v2572_v4  ;;  %v268_v58 = vld [vmem:[%s4654_s5 + $0x308] sm:$0x11]  ;;  %v3551_v2 = vcombine.high %v267_v56, %v267_v56 }
 0x11c   : > { %3122 = vmatmul.mubr.bf16.gmra.mxu0 %v4400_v63  ;;  %v2577_v13 = vpop.f32.mrf.mxu0  ;;  %v4433_v63 = vld [vmem:[%s5815_s1 + $0x8e4] ss:$8 sps:$4 sm:$0xff]  }
 0x11d   : > { %3213 = vmatmul.mubr.bf16.gmra.mxu1 %v4406_v0  ;;  %v2668_v14 = vpop.f32.mrf.mxu1  ;;  %3260 = vmatpush1.bf16.msra.mxu0 %v4401_v3  ;;  %v2578_v16 = vadd.f32 %v2577_v13, %v5365_v24  ;;  %v5435_v17 = vadd.f32 %v2664_v8, %v2574_v10  ;;  %v4438_v13 = vld [vmem:[%s5815_s1 + $0x8d4] ss:$8 sps:$4 sm:$0xff]  }
 0x11e   : > { %3866 = vmatpush1.bf16.msra.mxu1 %v4401_v3  ;;  %3261 = vmatprep.subr.bf16.mxu0 %v4409_v6  ;;  %v2579_v19 = vpop.f32.mrf.mxu0 }
 0x11f   : > { %3851 = vmatprep.subr.bf16.mxu1 %v4409_v6  ;;  %v2670_v20 = vpop.f32.mrf.mxu1  ;;  %3131 = vmatprep.mubr.bf16.mxu0 %v4410_v9  ;;  %v2580_v21 = vadd.f32 %v2579_v19, %v5373_v27  ;;  %v5441_v22 = vadd.f32 %v2668_v14, %v2578_v16  ;;  %v3553_v6 = vcombine.high %v268_v58, %v268_v58  ;;  %v4431_v9 = vld [vmem:[%s5815_s1 + $0x8e0] ss:$8 sps:$4 sm:$0xff]  }
 0x120   : > { %3222 = vmatprep.mubr.bf16.mxu1 %v4416_v12  ;;  %v2581_v26 = vpop.f32.mrf.mxu0  ;;  %v3550_v19 = vcombine.low %v267_v56, %v267_v56 }
 0x121   : > { %v2672_v28 = vpop.f32.mrf.mxu1  ;;  %3262 = vmatpush1.bf16.msra.mxu0 %v4407_v15  ;;  %v2582_v30 = vadd.f32 %v2581_v26, %v5365_v24  ;;  %v5449_v31 = vadd.f32 %v2670_v20, %v2580_v21  ;;  %v3552_v20 = vcombine.low %v268_v58, %v268_v58 }
 0x122   : > { %3867 = vmatpush1.bf16.msra.mxu1 %v4407_v15  ;;  %3263 = vmatprep.subr.bf16.mxu0 %v4415_v18  ;;  %v2583_v33 = vpop.f32.mrf.mxu0 }
 0x123   : > { %3852 = vmatprep.subr.bf16.mxu1 %v4415_v18  ;;  %v2674_v34 = vpop.f32.mrf.mxu1  ;;  %v2584_v36 = vadd.f32 %v2583_v33, %v5373_v27  ;;  %v5456_v38 = vadd.f32 %v2672_v28, %v2582_v30 }
 0x124   : > { %3132 = vmatmul.mubr.bf16.gmra.mxu0 %v4412_v23  ;;  %v2587_v40 = vpop.f32.mrf.mxu0 }
 0x125   : > { %3223 = vmatmul.mubr.bf16.gmra.mxu1 %v4418_v25  ;;  %v2678_v41 = vpop.f32.mrf.mxu1  ;;  %3264 = vmatpush1.bf16.msra.mxu0 %v4413_v29  ;;  %v2588_v44 = vadd.f32 %v2587_v40, %v5365_v24  ;;  %v5463_v45 = vadd.f32 %v2674_v34, %v2584_v36  ;;  %v4436_v25 = vld [vmem:[%s5815_s1 + $0x8d0] ss:$8 sps:$4 sm:$0xff]   ;;  %v4461_v36 = vld [vmem:[%s4654_s5 + $0x1f4] ss:$72 sps:$4 sm:$0xff]  }
 0x126   : > { %3868 = vmatpush1.bf16.msra.mxu1 %v4413_v29  ;;  %3265 = vmatprep.subr.bf16.mxu0 %v4421_v32  ;;  %v2589_v47 = vpop.f32.mrf.mxu0  ;;  %v4443_v29 = vld [vmem:[%s5815_s1 + $0x8c4] ss:$8 sps:$4 sm:$0xff]  }
 0x127   : > { %3853 = vmatprep.subr.bf16.mxu1 %v4421_v32  ;;  %v2680_v48 = vpop.f32.mrf.mxu1  ;;  %3141 = vmatprep.mubr.bf16.mxu0 %v4422_v35  ;;  %v2590_v51 = vadd.f32 %v2589_v47, %v5373_v27  ;;  %v5470_v52 = vadd.f32 %v2678_v41, %v2588_v44  ;;  %v4458_v35 = vld [vmem:[%s4654_s5 + $0x44] ss:$72 sps:$4 sm:$0xff]   ;;  %v4441_v41 = vld [vmem:[%s5815_s1 + $0x8c0] ss:$8 sps:$4 sm:$0xff]  }
 0x128   : > { %3232 = vmatprep.mubr.bf16.mxu1 %v4428_v39  ;;  %v2591_v54 = vpop.f32.mrf.mxu0 }
 0x129   : > { %v2682_v57 = vpop.f32.mrf.mxu1  ;;  %3266 = vmatpush1.bf16.msra.mxu0 %v4419_v42  ;;  %v2592_v60 = vadd.f32 %v2591_v54, %v5365_v24  ;;  %v5479_v61 = vadd.f32 %v2680_v48, %v2590_v51 }
 0x12a   : > { %3869 = vmatpush1.bf16.msra.mxu1 %v4419_v42  ;;  %3267 = vmatprep.subr.bf16.mxu0 %v4427_v46  ;;  %v2593_v0 = vpop.f32.mrf.mxu0 }
 0x12b   : > { %3854 = vmatprep.subr.bf16.mxu1 %v4427_v46  ;;  %v2684_v1 = vpop.f32.mrf.mxu1  ;;  %v2594_v3 = vadd.f32 %v2593_v0, %v5373_v27  ;;  %v5485_v4 = vadd.f32 %v2682_v57, %v2592_v60  ;;  %v4446_v46 = vld [vmem:[%s5815_s1 + $0x8b4] ss:$8 sps:$4 sm:$0xff]   ;;  %v4455_v0 = vld [vmem:[%s5815_s1 + $0x884] ss:$8 sps:$4 sm:$0xff]  }
 0x12c   : > { %3142 = vmatmul.mubr.bf16.gmra.mxu0 %v4424_v50  ;;  %v2597_v7 = vpop.f32.mrf.mxu0  ;;  %v4452_v60 = vld [vmem:[%s5815_s1 + $0x894] ss:$8 sps:$4 sm:$0xff]  }
 0x12d   : > { %3233 = vmatmul.mubr.bf16.gmra.mxu1 %v4430_v53  ;;  %v2688_v8 = vpop.f32.mrf.mxu1  ;;  %3268 = vmatpush2.bf16.msra.mxu0 %v4425_v59  ;;  %v2598_v10 = vadd.f32 %v2597_v7, %v5365_v24  ;;  %v5491_v12 = vadd.f32 %v2684_v1, %v2594_v3  ;;  %v4453_v1 = vld [vmem:[%s5815_s1 + $0x880] ss:$8 sps:$4 sm:$0xff]   ;;  %v4459_v3 = vld [vmem:[%s4654_s5 + $0x1f0] ss:$72 sps:$4 sm:$0xff]   ;;  %v4464_v7 = vld [vmem:[%s4654_s5 + $0x284] ss:$72 sps:$4 sm:$0xff]  }
 0x12e   : > { %3870 = vmatpush2.bf16.msra.mxu1 %v4425_v59  ;;  %3269 = vmatprep.subr.bf16.mxu0 %v4433_v63  ;;  %v2599_v14 = vpop.f32.mrf.mxu0  ;;  %v4447_v59 = vld [vmem:[%s5815_s1 + $0x8a0] ss:$8 sps:$4 sm:$0xff]  }
 0x12f   : > { %3855 = vmatprep.subr.bf16.mxu1 %v4433_v63  ;;  %v2690_v15 = vpop.f32.mrf.mxu1  ;;  %3151 = vmatprep.mubr.bf16.mxu0 %v3551_v2  ;;  %v2600_v16 = vadd.f32 %v2599_v14, %v5373_v27  ;;  %v5497_v18 = vadd.f32 %v2688_v8, %v2598_v10  ;;  %v4450_v63 = vld [vmem:[%s5815_s1 + $0x890] ss:$8 sps:$4 sm:$0xff]   ;;  %v4456_v2 = vld [vmem:[%s4654_s5 + $0x40] ss:$72 sps:$4 sm:$0xff]  }
 0x130   : > { %3242 = vmatprep.mubr.bf16.mxu1 %v3553_v6  ;;  %v2601_v21 = vpop.f32.mrf.mxu0  ;;  %v4462_v6 = vld [vmem:[%s4654_s5 + $0xd4] ss:$72 sps:$4 sm:$0xff]  }
 0x131   : > { %v2692_v23 = vpop.f32.mrf.mxu1  ;;  %3270 = vmatpush2.bf16.msra.mxu0 %v4431_v9  ;;  %v2602_v26 = vadd.f32 %v2601_v21, %v5365_v24  ;;  %v5503_v28 = vadd.f32 %v2690_v15, %v2600_v16  ;;  %v269_v15 = vld [vmem:[%s4654_s5 + $0x310] sm:$0x11] }
 0x132   : > { %3871 = vmatpush2.bf16.msra.mxu1 %v4431_v9  ;;  %3271 = vmatprep.subr.bf16.mxu0 %v4438_v13  ;;  %v2603_v30 = vpop.f32.mrf.mxu0 }
 0x133   : > { %3856 = vmatprep.subr.bf16.mxu1 %v4438_v13  ;;  %v2694_v32 = vpop.f32.mrf.mxu1  ;;  %v2604_v33 = vadd.f32 %v2603_v30, %v5373_v27  ;;  %v5509_v34 = vadd.f32 %v2692_v23, %v2602_v26  ;;  %v4466_v23 = vld [vmem:[%s4654_s5 + $0xd0] ss:$72 sps:$4 sm:$0xff]   ;;  %v4468_v30 = vld [vmem:[%s4654_s5 + $0x164] ss:$72 sps:$4 sm:$0xff]  }
 0x134   : > { %3152 = vmatmul.mubr.bf16.gmra.mxu0 %v3550_v19  ;;  %v2607_v39 = vpop.f32.mrf.mxu0 }
 0x135   : > { %3243 = vmatmul.mubr.bf16.gmra.mxu1 %v3552_v20  ;;  %v2698_v40 = vpop.f32.mrf.mxu1  ;;  %3272 = vmatpush2.bf16.msra.mxu0 %v4436_v25  ;;  %v2608_v42 = vadd.f32 %v2607_v39, %v5365_v24  ;;  %v5517_v44 = vadd.f32 %v2694_v32, %v2604_v33  ;;  %v4444_v24 = vld [vmem:[%s5815_s1 + $0x8b0] ss:$8 sps:$4 sm:$0xff]   ;;  %v3555_v32 = vcombine.high %v269_v15, %v269_v15 }
 0x136   : > { %3872 = vmatpush2.bf16.msra.mxu1 %v4436_v25  ;;  %3273 = vmatprep.subr.bf16.mxu0 %v4443_v29  ;;  %v2609_v47 = vpop.f32.mrf.mxu0  ;;  %v4467_v25 = vld [vmem:[%s4654_s5 + $0x280] ss:$72 sps:$4 sm:$0xff]  }
 0x137   : > { %3857 = vmatprep.subr.bf16.mxu1 %v4443_v29  ;;  %v2700_v48 = vpop.f32.mrf.mxu1  ;;  %v2610_v50 = vadd.f32 %v2609_v47, %v5373_v27  ;;  %v5523_v51 = vadd.f32 %v2698_v40, %v2608_v42  ;;  %3283 = vmatprep.mubr.bf16.mxu0 %v4458_v35  ;;  %v4449_v27 = vld [vmem:[%s5815_s1 + $0x8a4] ss:$8 sps:$4 sm:$0xff]  }
 0x138   : > { %3313 = vmatprep.mubr.bf16.mxu1 %v4461_v36  ;;  %v2611_v53 = vpop.f32.mrf.mxu0 }
 0x139   : > { %v2702_v54 = vpop.f32.mrf.mxu1  ;;  %3274 = vmatpush2.bf16.msra.mxu0 %v4441_v41  ;;  %v5528_v56 = vadd.f32 %v2700_v48, %v2610_v50  ;;  %v4471_v53 = vld [vmem:[%s4654_s5 + $0x160] ss:$72 sps:$4 sm:$0xff]   ;;  %s3879_s5 = smul.u32 176, %s5847_s13 }
 0x13a   : > { %3873 = vmatpush2.bf16.msra.mxu1 %v4441_v41  ;;  %3275 = vmatprep.subr.bf16.mxu0 %v4446_v46  ;;  %v2612_v57 = vpop.f32.mrf.mxu0 }
 0x13b   : > { %3858 = vmatprep.subr.bf16.mxu1 %v4446_v46  ;;  %v2703_v58 = vpop.f32.mrf.mxu1  ;;  %s5751_s17 = scalar_lea.vmem %s5817_s3, %s3879_s5 }
 0x13d   : > { %3276 = vmatpush2.bf16.msra.mxu0 %v4444_v24 }
 0x13e   : > { %3874 = vmatpush2.bf16.msra.mxu1 %v4444_v24  ;;  %3277 = vmatprep.subr.bf16.mxu0 %v4449_v27 }
 0x13f   : > { %3859 = vmatprep.subr.bf16.mxu1 %v4449_v27 }
 0x141   : > { %3278 = vmatpush2.bf16.msra.mxu0 %v4447_v59 }
 0x142   : > { %3875 = vmatpush2.bf16.msra.mxu1 %v4447_v59  ;;  %3279 = vmatprep.subr.bf16.mxu0 %v4452_v60 }
 0x143   : > { %3860 = vmatprep.subr.bf16.mxu1 %v4452_v60 }
 0x145   : > { %3280 = vmatpush2.bf16.msra.mxu0 %v4450_v63 }
 0x146   : > { %3876 = vmatpush2.bf16.msra.mxu1 %v4450_v63  ;;  %3281 = vmatprep.subr.bf16.mxu0 %v4455_v0 }
 0x147   : > { %3861 = vmatprep.subr.bf16.mxu1 %v4455_v0 }
 0x149   : > { %3282 = vmatpush2.bf16.msra.mxu0 %v4453_v1 }
 0x14a   : > { %3877 = vmatpush2.bf16.msra.mxu1 %v4453_v1 }
 0x14c   : > { %v2739_v8 = vpop.f32.mrf.mxu0  ;;  %3284 = vmatmul.mubr.bf16.vlgmr.msra.gmra.mxu0 %v4456_v2 }
 0x14d   : > { %v2830_v9 = vpop.f32.mrf.mxu1  ;;  %3314 = vmatmul.mubr.bf16.vlgmr.msra.gmra.mxu1 %v4459_v3  ;;  %v2740_v10 = vadd.f32 %v2739_v8, %v5384_v37  ;;  %3293 = vmatprep.mubr.bf16.mxu0 %v4462_v6 }
 0x14e   : > { %3323 = vmatprep.mubr.bf16.mxu1 %v4464_v7  ;;  %v2741_v13 = vpop.f32.mrf.mxu0 }
 0x14f   : > { %v2832_v14 = vpop.f32.mrf.mxu1  ;;  %v5554_v16 = vadd.f32 %v2830_v9, %v2740_v10  ;;  %v2742_v19 = vadd.f32 %v2741_v13, %v5389_v43 }
 0x150   : > { %v2743_v20 = vpop.f32.mrf.mxu0 }
 0x151   : > { %v2834_v21 = vpop.f32.mrf.mxu1  ;;  %v5559_v26 = vadd.f32 %v2832_v14, %v2742_v19  ;;  %v2744_v29 = vadd.f32 %v2743_v20, %v5398_v49 }
 0x152   : > { %v2745_v37 = vpop.f32.mrf.mxu0 }
 0x153   : > { %v2836_v33 = vpop.f32.mrf.mxu1  ;;  %v5563_v35 = vadd.f32 %v2834_v21, %v2744_v29  ;;  %v2746_v36 = vadd.f32 %v2745_v37, %v5403_v55  ;;  %v3554_v55 = vcombine.low %v269_v15, %v269_v15 }
 0x154   : > { %v2749_v39 = vpop.f32.mrf.mxu0  ;;  %3294 = vmatmul.mubr.bf16.gmra.mxu0 %v4466_v23 }
 0x155   : > { %3324 = vmatmul.mubr.bf16.gmra.mxu1 %v4467_v25  ;;  %v2840_v43 = vpop.f32.mrf.mxu1  ;;  %v5566_v40 = vadd.f32 %v2836_v33, %v2746_v36  ;;  %v2750_v41 = vadd.f32 %v2749_v39, %v5413_v62  ;;  %3303 = vmatprep.mubr.bf16.mxu0 %v4468_v30 }
 0x156   : > { %3333 = vmatprep.mubr.bf16.mxu1 %v3555_v32  ;;  %v2751_v49 = vpop.f32.mrf.mxu0 }
 0x157   : > { %v2842_v42 = vpop.f32.mrf.mxu1  ;;  %v2752_v46 = vadd.f32 %v2751_v49, %v5421_v5  ;;  %v5570_v47 = vadd.f32 %v2840_v43, %v2750_v41 }
 0x158   : > { %v2753_v48 = vpop.f32.mrf.mxu0 }
 0x159   : > { %v2844_v50 = vpop.f32.mrf.mxu1  ;;  %v2754_v54 = vadd.f32 %v2753_v48, %v5428_v11  ;;  %v5574_v24 = vadd.f32 %v2842_v42, %v2752_v46 }
 0x15a   : > { %v2755_v27 = vpop.f32.mrf.mxu0 }
 0x15b   : > { %v2846_v57 = vpop.f32.mrf.mxu1  ;;  %v2756_v62 = vadd.f32 %v2755_v27, %v5435_v17  ;;  %v5577_v58 = vadd.f32 %v2844_v50, %v2754_v54 }
 0x15c   : > { %v2759_v59 = vpop.f32.mrf.mxu0  ;;  %3304 = vmatmul.mubr.bf16.gmra.mxu0 %v4471_v53 }
 0x15d   : > { %3334 = vmatmul.mubr.bf16.gmra.mxu1 %v3554_v55  ;;  %v2850_v5 = vpop.f32.mrf.mxu1  ;;  %v2760_v60 = vadd.f32 %v2759_v59, %v5441_v22  ;;  %v5580_v63 = vadd.f32 %v2846_v57, %v2756_v62 }
 0x15e   : > { %v2761_v0 = vpop.f32.mrf.mxu0 }
 0x15f   : > { %v2852_v1 = vpop.f32.mrf.mxu1  ;;  %v2762_v11 = vadd.f32 %v2761_v0, %v5449_v31  ;;  %v5583_v2 = vadd.f32 %v2850_v5, %v2760_v60 }
 0x160   : > { %v2763_v3 = vpop.f32.mrf.mxu0 }
 0x161   : > { %v2854_v6 = vpop.f32.mrf.mxu1  ;;  %v2764_v17 = vadd.f32 %v2763_v3, %v5456_v38  ;;  %v5586_v7 = vadd.f32 %v2852_v1, %v2762_v11 }
 0x162   : > { %v2765_v8 = vpop.f32.mrf.mxu0 }
 0x163   : > { %v2856_v9 = vpop.f32.mrf.mxu1  ;;  %v2766_v10 = vadd.f32 %v2765_v8, %v5463_v45  ;;  %v5589_v13 = vadd.f32 %v2854_v6, %v2764_v17 }
 0x164   : > { %v2769_v22 = vpop.f32.mrf.mxu0 }
 0x165   : > { %v2860_v14 = vpop.f32.mrf.mxu1  ;;  %v2770_v15 = vadd.f32 %v2769_v22, %v5470_v52  ;;  %v5592_v19 = vadd.f32 %v2856_v9, %v2766_v10 }
 0x166   : > { %v2771_v31 = vpop.f32.mrf.mxu0 }
 0x167   : > { %v2862_v20 = vpop.f32.mrf.mxu1  ;;  %v2772_v21 = vadd.f32 %v2771_v31, %v5479_v61  ;;  %v5595_v23 = vadd.f32 %v2860_v14, %v2770_v15 }
 0x168   : > { %v2773_v38 = vpop.f32.mrf.mxu0 }
 0x169   : > { %v2864_v25 = vpop.f32.mrf.mxu1  ;;  %v2774_v29 = vadd.f32 %v2773_v38, %v5485_v4  ;;  %v5598_v30 = vadd.f32 %v2862_v20, %v2772_v21 }
 0x16a   : > { %v2775_v45 = vpop.f32.mrf.mxu0 }
 0x16b   : > { %v2866_v32 = vpop.f32.mrf.mxu1  ;;  %v2776_v37 = vadd.f32 %v2775_v45, %v5491_v12  ;;  %v5601_v33 = vadd.f32 %v2864_v25, %v2774_v29 }
 0x16c   : > { %v2779_v52 = vpop.f32.mrf.mxu0 }
 0x16d   : > { %v2870_v36 = vpop.f32.mrf.mxu1  ;;  %v2780_v39 = vadd.f32 %v2779_v52, %v5497_v18  ;;  %v5604_v43 = vadd.f32 %v2866_v32, %v2776_v37 }
 0x16e   : > { %v2781_v61 = vpop.f32.mrf.mxu0 }
 0x16f   : > { %v2872_v41 = vpop.f32.mrf.mxu1  ;;  %v2782_v49 = vadd.f32 %v2781_v61, %v5503_v28  ;;  %v5607_v42 = vadd.f32 %v2870_v36, %v2780_v39 }
 0x170   : > { %v2783_v4 = vpop.f32.mrf.mxu0 }
 0x171   : > { %v2874_v46 = vpop.f32.mrf.mxu1  ;;  %v2784_v48 = vadd.f32 %v2783_v4, %v5509_v34  ;;  %v5610_v50 = vadd.f32 %v2872_v41, %v2782_v49 }
 0x172   : > { %v2785_v12 = vpop.f32.mrf.mxu0 }
 0x173   : > { %v2876_v53 = vpop.f32.mrf.mxu1  ;;  %v2786_v55 = vadd.f32 %v2785_v12, %v5517_v44  ;;  %v5613_v54 = vadd.f32 %v2874_v46, %v2784_v48 }
 0x174   : > { %v2789_v18 = vpop.f32.mrf.mxu0 }
 0x175   : > { %v2880_v27 = vpop.f32.mrf.mxu1  ;;  %v2790_v57 = vadd.f32 %v2789_v18, %v5523_v51  ;;  %v5616_v62 = vadd.f32 %v2876_v53, %v2786_v55 }
 0x176   : > { %v2791_v28 = vpop.f32.mrf.mxu0 }
 0x177   : > { %v2882_v59 = vpop.f32.mrf.mxu1  ;;  %v2792_v5 = vadd.f32 %v2791_v28, %v5528_v56  ;;  %v5619_v60 = vadd.f32 %v2880_v27, %v2790_v57 }
 0x178   : > { %v2793_v34 = vpop.f32.mrf.mxu0 }
 0x179   : > { %v2884_v0 = vpop.f32.mrf.mxu1  ;;  %v5621_v1 = vadd.f32 %v2882_v59, %v2792_v5 }
 0x17a   : > { %v2794_v11 = vpop.f32.mrf.mxu0 }
 0x17b   : > { %v2885_v44 = vpop.f32.mrf.mxu1 }
 0x18c   : > { %v2921_v3 = vpop.f32.mrf.mxu0 }
 0x18d   : > { %v3012_v6 = vpop.f32.mrf.mxu1  ;;  %v2922_v17 = vadd.f32 %v2921_v3, %v5554_v16 }
 0x18e   : > { %v2923_v8 = vpop.f32.mrf.mxu0 }
 0x18f   : > { %v3014_v51 = vpop.f32.mrf.mxu1  ;;  %v5624_v9 = vadd.f32 %v3012_v6, %v2922_v17  ;;  %v2924_v10 = vadd.f32 %v2923_v8, %v5559_v26 }
 0x190   : > { %v2925_v22 = vpop.f32.mrf.mxu0 }
 0x191   : > { %v3016_v56 = vpop.f32.mrf.mxu1  ;;  %v5627_v14 = vadd.f32 %v3014_v51, %v2924_v10  ;;  %v2926_v15 = vadd.f32 %v2925_v22, %v5563_v35 }
 0x192   : > { %v2927_v31 = vpop.f32.mrf.mxu0 }
 0x193   : > { %v3018_v20 = vpop.f32.mrf.mxu1  ;;  %v5630_v21 = vadd.f32 %v3016_v56, %v2926_v15  ;;  %v2928_v38 = vadd.f32 %v2927_v31, %v5566_v40 }
 0x194   : > { %v2931_v25 = vpop.f32.mrf.mxu0 }
 0x195   : > { %v3022_v16 = vpop.f32.mrf.mxu1  ;;  %v5633_v29 = vadd.f32 %v3018_v20, %v2928_v38  ;;  %v2932_v45 = vadd.f32 %v2931_v25, %v5570_v47 }
 0x196   : > { %v2933_v32 = vpop.f32.mrf.mxu0 }
 0x197   : > { %v3024_v26 = vpop.f32.mrf.mxu1  ;;  %v2934_v37 = vadd.f32 %v2933_v32, %v5574_v24  ;;  %v5637_v52 = vadd.f32 %v3022_v16, %v2932_v45 }
 0x198   : > { %v2935_v36 = vpop.f32.mrf.mxu0 }
 0x199   : > { %v3026_v35 = vpop.f32.mrf.mxu1  ;;  %v2936_v39 = vadd.f32 %v2935_v36, %v5577_v58  ;;  %v5640_v61 = vadd.f32 %v3024_v26, %v2934_v37 }
 0x19a   : > { %v2937_v41 = vpop.f32.mrf.mxu0 }
 0x19b   : > { %v3028_v40 = vpop.f32.mrf.mxu1  ;;  %v2938_v49 = vadd.f32 %v2937_v41, %v5580_v63  ;;  %v5643_v4 = vadd.f32 %v3026_v35, %v2936_v39 }
 0x19c   : > { %v2941_v46 = vpop.f32.mrf.mxu0 }
 0x19d   : > { %v3032_v47 = vpop.f32.mrf.mxu1  ;;  %v2942_v48 = vadd.f32 %v2941_v46, %v5583_v2  ;;  %v5646_v12 = vadd.f32 %v3028_v40, %v2938_v49 }
 0x19e   : > { %v2943_v24 = vpop.f32.mrf.mxu0 }
 0x19f   : > { %v3034_v53 = vpop.f32.mrf.mxu1  ;;  %v2944_v55 = vadd.f32 %v2943_v24, %v5586_v7  ;;  %v5649_v18 = vadd.f32 %v3032_v47, %v2942_v48 }
 0x1a0   : > { %v2945_v58 = vpop.f32.mrf.mxu0 }
 0x1a1   : > { %v3036_v27 = vpop.f32.mrf.mxu1  ;;  %v2946_v57 = vadd.f32 %v2945_v58, %v5589_v13  ;;  %v5652_v28 = vadd.f32 %v3034_v53, %v2944_v55 }
 0x1a2   : > { %v2947_v63 = vpop.f32.mrf.mxu0 }
 0x1a3   : > { %5818 = vst [vmem:[#allocation2_spill] sm:$0xff] %v5652_v28  ;;  %v3038_v59 = vpop.f32.mrf.mxu1  ;;  %v2948_v5 = vadd.f32 %v2947_v63, %v5592_v19  ;;  %v5655_v34 = vadd.f32 %v3036_v27, %v2946_v57 }
 0x1a4   : > { %v2951_v2 = vpop.f32.mrf.mxu0 }
 0x1a5   : > { %5819 = vst [vmem:[#allocation3_spill] sm:$0xff] %v5655_v34  ;;  %v3042_v0 = vpop.f32.mrf.mxu1  ;;  %v2952_v11 = vadd.f32 %v2951_v2, %v5595_v23  ;;  %v5658_v44 = vadd.f32 %v3038_v59, %v2948_v5 }
 0x1a6   : > { %v2953_v7 = vpop.f32.mrf.mxu0 }
 0x1a7   : > { %5820 = vst [vmem:[#allocation4_spill] sm:$0xff] %v5658_v44  ;;  %v3044_v3 = vpop.f32.mrf.mxu1  ;;  %v2954_v6 = vadd.f32 %v2953_v7, %v5598_v30  ;;  %v5661_v17 = vadd.f32 %v3042_v0, %v2952_v11 }
 0x1a8   : > { %v2955_v13 = vpop.f32.mrf.mxu0 }
 0x1a9   : > { %v3046_v8 = vpop.f32.mrf.mxu1  ;;  %v2956_v51 = vadd.f32 %v2955_v13, %v5601_v33  ;;  %v5664_v10 = vadd.f32 %v3044_v3, %v2954_v6 }
 0x1aa   : > { %v2957_v19 = vpop.f32.mrf.mxu0 }
 0x1ab   : > { %v3048_v22 = vpop.f32.mrf.mxu1  ;;  %v2958_v56 = vadd.f32 %v2957_v19, %v5604_v43  ;;  %v5667_v15 = vadd.f32 %v3046_v8, %v2956_v51 }
 0x1ac   : > { %v2961_v23 = vpop.f32.mrf.mxu0 }
 0x1ad   : > { %v3052_v31 = vpop.f32.mrf.mxu1  ;;  %v2962_v20 = vadd.f32 %v2961_v23, %v5607_v42  ;;  %v5670_v38 = vadd.f32 %v3048_v22, %v2958_v56 }
 0x1ae   : > { %v2963_v30 = vpop.f32.mrf.mxu0 }
 0x1af   : > { %v3054_v25 = vpop.f32.mrf.mxu1  ;;  %v2964_v16 = vadd.f32 %v2963_v30, %v5610_v50  ;;  %v5673_v45 = vadd.f32 %v3052_v31, %v2962_v20 }
 0x1b0   : > { %v2965_v33 = vpop.f32.mrf.mxu0 }
 0x1b1   : > { %v3056_v32 = vpop.f32.mrf.mxu1  ;;  %v2966_v26 = vadd.f32 %v2965_v33, %v5613_v54  ;;  %v5676_v37 = vadd.f32 %v3054_v25, %v2964_v16 }
 0x1b2   : > { %v2967_v43 = vpop.f32.mrf.mxu0 }
 0x1b3   : > { %v3058_v36 = vpop.f32.mrf.mxu1  ;;  %v2968_v35 = vadd.f32 %v2967_v43, %v5616_v62  ;;  %v5679_v39 = vadd.f32 %v3056_v32, %v2966_v26 }
 0x1b4   : > { %v2971_v42 = vpop.f32.mrf.mxu0 }
 0x1b5   : > { %v3062_v41 = vpop.f32.mrf.mxu1  ;;  %v2972_v40 = vadd.f32 %v2971_v42, %v5619_v60  ;;  %v5682_v49 = vadd.f32 %v3058_v36, %v2968_v35 }
 0x1b6   : > { %v2973_v50 = vpop.f32.mrf.mxu0 }
 0x1b7   : > { %v3064_v46 = vpop.f32.mrf.mxu1  ;;  %v2974_v47 = vadd.f32 %v2973_v50, %v5621_v1  ;;  %v5685_v48 = vadd.f32 %v3062_v41, %v2972_v40 }
 0x1b8   : > { %v2975_v54 = vpop.f32.mrf.mxu0 }
 0x1b9   : > { %v3066_v24 = vpop.f32.mrf.mxu1  ;;  %v5687_v53 = vadd.f32 %v3064_v46, %v2974_v47 }
 0x1ba   : > { %v2976_v55 = vpop.f32.mrf.mxu0 }
 0x1bb   : > { %5821 = vst [vmem:[#allocation5_spill] sm:$0xff] %v5687_v53  ;;  %v3067_v62 = vpop.f32.mrf.mxu1 }
 0x1cc   : > { %v3103_v58 = vpop.f32.mrf.mxu0 }
 0x1cd   : > { %v3194_v27 = vpop.f32.mrf.mxu1  ;;  %v3104_v34 = vadd.f32 %v3103_v58, %v5624_v9 }
 0x1ce   : > { %v3105_v57 = vpop.f32.mrf.mxu0 }
 0x1cf   : > { %v3196_v63 = vpop.f32.mrf.mxu1  ;;  %v3106_v53 = vadd.f32 %v3105_v57, %v5627_v14 }
 0x1d0   : > { %v3107_v59 = vpop.f32.mrf.mxu0 }
 0x1d1   : > { %v3198_v60 = vpop.f32.mrf.mxu1  ;;  %v3197_v9 = vadd.f32 %v3196_v63, %v3106_v53 }
 0x1d2   : > { %v3109_v5 = vpop.f32.mrf.mxu0 }
 0x1d3   : > { %v5689_v2 = vpop.f32.mrf.mxu1 }
 0x1d4   : > { %v3113_v0 = vpop.f32.mrf.mxu0 }
 0x1d5   : > { %v5691_v11 = vpop.f32.mrf.mxu1 }
 0x1d6   : > { %v5693_v1 = vpop.f32.mrf.mxu0 }
 0x1d7   : > { %v5695_v7 = vpop.f32.mrf.mxu1 }
 0x1d8   : > { %v5697_v3 = vpop.f32.mrf.mxu0 }
 0x1d9   : > { %v5699_v6 = vpop.f32.mrf.mxu1 }
 0x1da   : > { %v5701_v13 = vpop.f32.mrf.mxu0 }
 0x1db   : > { %v5703_v8 = vpop.f32.mrf.mxu1 }
 0x1dc   : > { %v5705_v51 = vpop.f32.mrf.mxu0 }
 0x1dd   : > { %v5707_v19 = vpop.f32.mrf.mxu1 }
 0x1de   : > { %5822 = vst [vmem:[#allocation6_spill] sm:$0xff] %v5707_v19  ;;  %v5709_v22 = vpop.f32.mrf.mxu0 }
 0x1df   : > { %5823 = vst [vmem:[#allocation7_spill] sm:$0xff] %v5709_v22  ;;  %v5711_v56 = vpop.f32.mrf.mxu1  ;;  %v3108_v22 = vadd.f32 %v3107_v59, %v5630_v21 }
 0x1e0   : > { %5824 = vst [vmem:[#allocation8_spill] sm:$0xff] %v5711_v56  ;;  %v5713_v23 = vpop.f32.mrf.mxu0 }
 0x1e1   : > { %5825 = vst [vmem:[#allocation9_spill] sm:$0xff] %v5713_v23  ;;  %v5715_v31 = vpop.f32.mrf.mxu1  ;;  %v3199_v14 = vadd.f32 %v3198_v60, %v3108_v22 }
 0x1e2   : > { %5826 = vst [vmem:[#allocation10_spill] sm:$0xff] %v5715_v31  ;;  %v5717_v20 = vpop.f32.mrf.mxu0 }
 0x1e3   : > { %5827 = vst [vmem:[#allocation11_spill] sm:$0xff] %v5717_v20  ;;  %v5719_v30 = vpop.f32.mrf.mxu1 }
 0x1e4   : > { %5828 = vst [vmem:[#allocation12_spill] sm:$0xff] %v5719_v30  ;;  %v3133_v25 = vpop.f32.mrf.mxu0 }
 0x1e5   : > { %v3224_v16 = vpop.f32.mrf.mxu1  ;;  %v3134_v19 = vadd.f32 %v3133_v25, %v5661_v17 }
 0x1e6   : > { %v3135_v33 = vpop.f32.mrf.mxu0 }
 0x1e7   : > { %v3226_v32 = vpop.f32.mrf.mxu1  ;;  %v3225_v28 = vadd.f32 %v3224_v16, %v3134_v19 }
 0x1e8   : > { %v3137_v26 = vpop.f32.mrf.mxu0 }
 0x1e9   : > { %v3228_v43 = vpop.f32.mrf.mxu1 }
 0x1ea   : > { %v3139_v36 = vpop.f32.mrf.mxu0 }
 0x1eb   : > { %v3230_v35 = vpop.f32.mrf.mxu1 }
 0x1ec   : > { %v3143_v42 = vpop.f32.mrf.mxu0 }
 0x1ed   : > { %v3234_v41 = vpop.f32.mrf.mxu1  ;;  %v3144_v21 = vadd.f32 %v3143_v42, %v5673_v45 }
 0x1ee   : > { %v3145_v40 = vpop.f32.mrf.mxu0 }
 0x1ef   : > { %v5721_v50 = vpop.f32.mrf.mxu1  ;;  %v3146_v45 = vadd.f32 %v3145_v40, %v5676_v37  ;;  %v3235_v16 = vadd.f32 %v3234_v41, %v3144_v21  ;;  %v5837_v21 = vld [vmem:[#allocation6_spill] sm:$0xff] }
 0x1f0   : > { %v3147_v46 = vpop.f32.mrf.mxu0 }
 0x1f1   : > { %v5723_v47 = vpop.f32.mrf.mxu1 }
 0x1f2   : > { %v5725_v54 = vpop.f32.mrf.mxu0 }
 0x1f3   : > { %v5727_v24 = vpop.f32.mrf.mxu1 }
 0x1f4   : > { %5829 = vst [vmem:[#allocation13_spill] sm:$0xff] %v5727_v24  ;;  %v5729_v55 = vpop.f32.mrf.mxu0  ;;  %v3136_v24 = vadd.f32 %v3135_v33, %v5664_v10  ;;  %v3114_v10 = vadd.f32 %v3113_v0, %v5637_v52  ;;  %v3116_v52 = vadd.f32 %v5693_v1, %v5640_v61  ;;  %v3148_v61 = vadd.f32 %v3147_v46, %v5679_v39 }
 0x1f5   : > { %v5731_v62 = vpop.f32.mrf.mxu1  ;;  %v3150_v39 = vadd.f32 %v5725_v54, %v5682_v49  ;;  %v3154_v49 = vadd.f32 %v5729_v55, %v5685_v48 }
 0x1f6   : > { %5830 = vst [vmem:[#allocation14_spill] sm:$0xff] %v5731_v62  ;;  %v5733_v30 = vpop.f32.mrf.mxu0  ;;  %v3138_v62 = vadd.f32 %v3137_v26, %v5667_v15  ;;  %v3227_v58 = vadd.f32 %v3226_v32, %v3136_v24 }
 0x1f7   : > { %5831 = vst [vmem:[#allocation15_spill] sm:$0xff] %v5733_v30  ;;  %v5735_v31 = vpop.f32.mrf.mxu1  ;;  %v3195_v30 = vadd.f32 %v3194_v27, %v3104_v34 }
 0x1f8   : > { %v3157_v20 = vpop.f32.mrf.mxu0  ;;  %v3229_v57 = vadd.f32 %v3228_v43, %v3138_v62 }
 0x1f9   : > { %v3248_v44 = vpop.f32.mrf.mxu1  ;;  %v3110_v20 = vadd.f32 %v3109_v5, %v5633_v29 }
 0x1fa   : > { %v3158_v56 = vpop.f32.mrf.mxu0  ;;  %v3140_v44 = vadd.f32 %v3139_v36, %v5670_v38  ;;  %v3207_v36 = vadd.f32 %v5695_v7, %v3116_v52 }
 0x1fb   : > { %v3249_v23 = vpop.f32.mrf.mxu1 }
 0x1fc   : > { %v3231_v63 = vadd.f32 %v3230_v35, %v3140_v44 }
 0x20c   : > { %v3285_v56 = vpop.f32.mrf.mxu0 }
 0x20d   : > { %v3315_v23 = vpop.f32.mrf.mxu1  ;;  %v3286_v17 = vadd.f32 %v3285_v56, %v3195_v30  ;;  %v3205_v30 = vadd.f32 %v5691_v11, %v3114_v10  ;;  %v3120_v11 = vadd.f32 %v5701_v13, %v5646_v12  ;;  %v3124_v12 = vadd.f32 %v5705_v51, %v5649_v18  ;;  %v5832_v56 = vld [vmem:[#allocation2_spill] sm:$0xff]  ;;  %v5834_v51 = vld [vmem:[#allocation13_spill] sm:$0xff] }
 0x20e   : > { %v3316_v25 = vadd.f32 %v3315_v23, %v3225_v28  ;;  %v3287_v29 = vpop.f32.mrf.mxu0  ;;  %v3201_v28 = vadd.f32 %v5689_v2, %v3110_v20  ;;  %v3118_v2 = vadd.f32 %v5697_v3, %v5643_v4  ;;  %v3237_v4 = vadd.f32 %v5721_v50, %v3146_v45  ;;  %v5833_v23 = vld [vmem:[#allocation7_spill] sm:$0xff] }
 0x20f   : > { %v3317_v34 = vpop.f32.mrf.mxu1  ;;  %v3342_v15 = vmax.f32 %v3286_v17, 0.0  ;;  %v3288_v53 = vadd.f32 %v3287_v29, %v3197_v9  ;;  %v3239_v13 = vadd.f32 %v5723_v47, %v3148_v61  ;;  %v3126_v18 = vadd.f32 %v5833_v23, %v5832_v56  ;;  %v5835_v9 = vld [vmem:[#allocation5_spill] sm:$0xff]  ;;  %v5838_v29 = vld [vmem:[#allocation3_spill] sm:$0xff] }
 0x210   : > { %v3354_v38 = vmax.f32 %v3316_v25, 0.0  ;;  %v3318_v27 = vadd.f32 %v3317_v34, %v3227_v58  ;;  %v3289_v59 = vpop.f32.mrf.mxu0  ;;  %v3209_v7 = vadd.f32 %v5699_v6, %v3118_v2  ;;  %v3211_v6 = vadd.f32 %v5703_v8, %v3120_v11  ;;  %v5836_v58 = vld [vmem:[#allocation15_spill] sm:$0xff]  ;;  %v5839_v34 = vld [vmem:[#allocation9_spill] sm:$0xff] }
 0x211   : > { %v3319_v60 = vpop.f32.mrf.mxu1  ;;  %3364 = vst [vmem:[%s5751_s17] sm:$0xff] %v3342_v15  ;;  %v3343_v5 = vmax.f32 %v3288_v53, 0.0  ;;  %v3290_v19 = vadd.f32 %v3289_v59, %v3199_v14  ;;  %v3241_v47 = vadd.f32 %v5834_v51, %v3150_v39  ;;  %v3156_v48 = vadd.f32 %v5836_v58, %v5835_v9 }
 0x212   : > { %3376 = vst [vmem:[%s5751_s17 + $0x60] sm:$0xff] %v3354_v38  ;;  %v3355_v0 = vmax.f32 %v3318_v27, 0.0  ;;  %v3320_v22 = vadd.f32 %v3319_v60, %v3229_v57  ;;  %v3291_v37 = vpop.f32.mrf.mxu0  ;;  %v3215_v8 = vadd.f32 %v5837_v21, %v3124_v12  ;;  %v3128_v15 = vadd.f32 %v5839_v34, %v5838_v29  ;;  %v5840_v38 = vld [vmem:[#allocation14_spill] sm:$0xff]  ;;  %v5841_v60 = vld [vmem:[#allocation8_spill] sm:$0xff] }
 0x213   : > { %v3321_v1 = vpop.f32.mrf.mxu1  ;;  %3365 = vst [vmem:[%s5751_s17 + $0x8] sm:$0xff] %v3343_v5  ;;  %v3344_v33 = vmax.f32 %v3290_v19, 0.0  ;;  %v3292_v26 = vadd.f32 %v3291_v37, %v3201_v28  ;;  %v3245_v53 = vadd.f32 %v5840_v38, %v3154_v49  ;;  %v3217_v5 = vadd.f32 %v5841_v60, %v3126_v18  ;;  %v5843_v19 = vld [vmem:[#allocation11_spill] sm:$0xff] }
 0x214   : > { %3377 = vst [vmem:[%s5751_s17 + $0x68] sm:$0xff] %v3355_v0  ;;  %v3356_v32 = vmax.f32 %v3320_v22, 0.0  ;;  %v3322_v43 = vadd.f32 %v3321_v1, %v3231_v63  ;;  %v3295_v3 = vpop.f32.mrf.mxu0  ;;  %v5842_v0 = vld [vmem:[#allocation4_spill] sm:$0xff] }
 0x215   : > { %v3325_v35 = vpop.f32.mrf.mxu1  ;;  %3366 = vst [vmem:[%s5751_s17 + $0x10] sm:$0xff] %v3344_v33  ;;  %v3345_v42 = vmax.f32 %v3292_v26, 0.0  ;;  %v3296_v40 = vadd.f32 %v3295_v3, %v3205_v30  ;;  %v3130_v22 = vadd.f32 %v5843_v19, %v5842_v0  ;;  %v3247_v30 = vadd.f32 %v5735_v31, %v3156_v48 }
 0x216   : > { %3378 = vst [vmem:[%s5751_s17 + $0x70] sm:$0xff] %v3356_v32  ;;  %v3357_v41 = vmax.f32 %v3322_v43, 0.0  ;;  %v3326_v46 = vadd.f32 %v3325_v35, %v3235_v16  ;;  %v3297_v50 = vpop.f32.mrf.mxu0  ;;  %v5844_v32 = vld [vmem:[#allocation10_spill] sm:$0xff] }
 0x217   : > { %v3327_v54 = vpop.f32.mrf.mxu1  ;;  %3367 = vst [vmem:[%s5751_s17 + $0x18] sm:$0xff] %v3345_v42  ;;  %v3346_v24 = vmax.f32 %v3296_v40, 0.0  ;;  %v3298_v20 = vadd.f32 %v3297_v50, %v3207_v36  ;;  %v3219_v26 = vadd.f32 %v5844_v32, %v3128_v15  ;;  %v5845_v42 = vld [vmem:[#allocation12_spill] sm:$0xff] }
 0x218   : > { %3379 = vst [vmem:[%s5751_s17 + $0x78] sm:$0xff] %v3357_v41  ;;  %v3358_v62 = vmax.f32 %v3326_v46, 0.0  ;;  %v3328_v44 = vadd.f32 %v3327_v54, %v3237_v4  ;;  %v3299_v55 = vpop.f32.mrf.mxu0  ;;  %v3221_v41 = vadd.f32 %v5845_v42, %v3130_v22 }
 0x219   : > { %v3329_v17 = vpop.f32.mrf.mxu1  ;;  %3368 = vst [vmem:[%s5751_s17 + $0x20] sm:$0xff] %v3346_v24  ;;  %v3347_v25 = vmax.f32 %v3298_v20, 0.0  ;;  %v3300_v10 = vadd.f32 %v3299_v55, %v3209_v7 }
 0x21a   : > { %3380 = vst [vmem:[%s5751_s17 + $0x80] sm:$0xff] %v3358_v62  ;;  %v3359_v14 = vmax.f32 %v3328_v44, 0.0  ;;  %v3330_v57 = vadd.f32 %v3329_v17, %v3239_v13  ;;  %v3301_v27 = vpop.f32.mrf.mxu0 }
 0x21b   : > { %v3331_v28 = vpop.f32.mrf.mxu1  ;;  %3369 = vst [vmem:[%s5751_s17 + $0x28] sm:$0xff] %v3347_v25  ;;  %v3348_v52 = vmax.f32 %v3300_v10, 0.0  ;;  %v3302_v45 = vadd.f32 %v3301_v27, %v3211_v6 }
 0x21c   : > { %3381 = vst [vmem:[%s5751_s17 + $0x88] sm:$0xff] %v3359_v14  ;;  %v3360_v63 = vmax.f32 %v3330_v57, 0.0  ;;  %v3332_v59 = vadd.f32 %v3331_v28, %v3241_v47  ;;  %v3305_v2 = vpop.f32.mrf.mxu0 }
 0x21d   : > { %v3335_v16 = vpop.f32.mrf.mxu1  ;;  %3370 = vst [vmem:[%s5751_s17 + $0x30] sm:$0xff] %v3348_v52  ;;  %v3349_v61 = vmax.f32 %v3302_v45, 0.0  ;;  %v3306_v1 = vadd.f32 %v3305_v2, %v3215_v8 }
 0x21e   : > { %3382 = vst [vmem:[%s5751_s17 + $0x90] sm:$0xff] %v3360_v63  ;;  %v3361_v37 = vmax.f32 %v3332_v59, 0.0  ;;  %v3336_v33 = vadd.f32 %v3335_v16, %v3245_v53  ;;  %v3307_v43 = vpop.f32.mrf.mxu0 }
 0x21f   : > { %v3337_v36 = vpop.f32.mrf.mxu1  ;;  %3371 = vst [vmem:[%s5751_s17 + $0x38] sm:$0xff] %v3349_v61  ;;  %v3350_v11 = vmax.f32 %v3306_v1, 0.0  ;;  %v3308_v4 = vadd.f32 %v3307_v43, %v3217_v5 }
 0x220   : > { %3383 = vst [vmem:[%s5751_s17 + $0x98] sm:$0xff] %v3361_v37  ;;  %v3362_v31 = vmax.f32 %v3336_v33, 0.0  ;;  %v3338_v39 = vadd.f32 %v3337_v36, %v3247_v30  ;;  %v3309_v3 = vpop.f32.mrf.mxu0 }
 0x221   : > { %v3339_v35 = vpop.f32.mrf.mxu1  ;;  %3372 = vst [vmem:[%s5751_s17 + $0x40] sm:$0xff] %v3350_v11  ;;  %v3351_v40 = vmax.f32 %v3308_v4, 0.0  ;;  %v3310_v7 = vadd.f32 %v3309_v3, %v3219_v26 }
 0x222   : > { %3384 = vst [vmem:[%s5751_s17 + $0xa0] sm:$0x1] %v3362_v31  ;;  %v3363_v46 = vmax.f32 %v3338_v39, 0.0  ;;  %v3311_v12 = vpop.f32.mrf.mxu0 }
 0x223   : > { %v3340_v13 = vpop.f32.mrf.mxu1  ;;  %3373 = vst [vmem:[%s5751_s17 + $0x48] sm:$0xff] %v3351_v40  ;;  %v3352_v49 = vmax.f32 %v3310_v7, 0.0  ;;  %v3312_v50 = vadd.f32 %v3311_v12, %v3221_v41 }
 0x224   : > { %3385 = vst [vmem:[%s5751_s17 + $0xa8] sm:$0x1] %v3363_v46 }
 0x225   : > { %3374 = vst [vmem:[%s5751_s17 + $0x50] sm:$0xff] %v3352_v49  ;;  %v3353_v54 = vmax.f32 %v3312_v50, 0.0 }
 0x227   : > { %3375 = vst [vmem:[%s5751_s17 + $0x58] sm:$0xff] %v3353_v54 }
 0x228 PF: > { %s13_s12 = sadd.s32 1, %s4479_s12  }
 0x229   : > { %p10_p4 = scmp.ge.s32.totalorder %s13_s12, 4  }
 0x22b   :  { %12 = sbr.rel (!%p10_p4) target bundleno = 1 (0x1), region = 62 }

// kernel: mixed_7a_pallas.5
= control target key start
LH: loop header
LB: loop body
LE: loop exit
PB: predicated region body
PF: predicated region fallthrough
CT: control target
= control target key end

     0   :  { %s11537_s24 = smov 0   ;;  %s14859_s0 = inlined_call_operand.vmem [shape: bf16[2,16,2304], index: 0, kind: input, shape index: {}]   ;;  %s14860_s1 = inlined_call_operand.vmem [shape: bf16[2,16,2304], index: 1, kind: input, shape index: {}]   ;;  %s14861_s2 = inlined_call_operand.vmem [shape: bf16[2,16,2304], index: 2, kind: input, shape index: {}]   ;;  %s14862_s3 = inlined_call_operand.vmem [shape: bf16[2304,384], index: 3, kind: input, shape index: {}]   ;;  %s14863_s4 = inlined_call_operand.vmem [shape: bf16[2304,256], index: 4, kind: input, shape index: {}]   ;;  %s14864_s5 = inlined_call_operand.vmem [shape: bf16[2304,256], index: 5, kind: input, shape index: {}]   ;;  %s14865_s6 = inlined_call_operand.vmem [shape: f32[1,896], index: 6, kind: input, shape index: {}]   ;;  %s14866_s7 = inlined_call_operand.vmem [shape: f32[2,16,896], index: 7, kind: output, shape index: {}]  }
   0x1 LB: > { %s8668_s25 = sadd.s32 4294967295, %s11495_s24   ;;  %p8672_p0 = scmp.ge.s32.totalorder %s11495_s24, 1  ;;  %s11495_s24 = sphi %s11537_s24, %s17_s24  }
   0x2   : > { %p257_p1 = scmp.lt.s32.totalorder %s11495_s24, 3 }
   0x4   : > { %p258_p2 = pnand %p8672_p0, %p257_p1 }
   0x5   : > { %p299_p3 = scmp.lt.s32.totalorder (!%p258_p2), %s8668_s25, 1 }
   0x6   : > { %261 = sbr.rel (%p258_p2) target bundleno = 1242 (0x4da), region = 48 }
   0xb   : > { %v9949_v0 = vld [vmem:[%s14862_s3 + $0xac] ss:$12 sps:$4 sm:$0xff]   ;;  %v9953_v2 = vld [vmem:[%s14862_s3 + $0xa8] ss:$12 sps:$4 sm:$0xff]   ;;  %v9959_v6 = vld [vmem:[%s14862_s3 + $0x90] ss:$12 sps:$4 sm:$0xff]  }
   0xc   : > { %v9951_v1 = vld [vmem:[%s14862_s3 + $0x22c] ss:$12 sps:$4 sm:$0xff]   ;;  %3308 = vmatprep.subr.bf16.mxu0 %v9949_v0  ;;  %v9954_v3 = vld [vmem:[%s14862_s3 + $0x228] ss:$12 sps:$4 sm:$0xff]   ;;  %v9960_v7 = vld [vmem:[%s14862_s3 + $0x210] ss:$12 sps:$4 sm:$0xff]  }
   0xd   : > { %3351 = vmatprep.subr.bf16.mxu1 %v9951_v1  ;;  %v9955_v4 = vld [vmem:[%s14862_s3 + $0x94] ss:$12 sps:$4 sm:$0xff]   ;;  %3309 = vmatpush1.bf16.msra.mxu0 %v9953_v2  ;;  %v9961_v8 = vld [vmem:[%s14862_s3 + $0x7c] ss:$12 sps:$4 sm:$0xff]   ;;  %v9965_v10 = vld [vmem:[%s14862_s3 + $0x78] ss:$12 sps:$4 sm:$0xff]  }
   0xe   : > { %3352 = vmatpush1.bf16.msra.mxu1 %v9954_v3  ;;  %v9957_v5 = vld [vmem:[%s14862_s3 + $0x214] ss:$12 sps:$4 sm:$0xff]   ;;  %3310 = vmatprep.subr.bf16.mxu0 %v9955_v4  ;;  %v9963_v9 = vld [vmem:[%s14862_s3 + $0x1fc] ss:$12 sps:$4 sm:$0xff]   ;;  %v9966_v11 = vld [vmem:[%s14862_s3 + $0x1f8] ss:$12 sps:$4 sm:$0xff]  }
   0xf   : > { %3353 = vmatprep.subr.bf16.mxu1 %v9957_v5  ;;  %v9967_v12 = vld [vmem:[%s14862_s3 + $0x64] ss:$12 sps:$4 sm:$0xff]   ;;  %v9971_v14 = vld [vmem:[%s14862_s3 + $0x60] ss:$12 sps:$4 sm:$0xff]   ;;  %v9977_v18 = vld [vmem:[%s14862_s3 + $0x48] ss:$12 sps:$4 sm:$0xff]  }
  0x10   : > { %v9969_v13 = vld [vmem:[%s14862_s3 + $0x1e4] ss:$12 sps:$4 sm:$0xff]   ;;  %v9972_v15 = vld [vmem:[%s14862_s3 + $0x1e0] ss:$12 sps:$4 sm:$0xff]   ;;  %v9978_v19 = vld [vmem:[%s14862_s3 + $0x1c8] ss:$12 sps:$4 sm:$0xff]  }
  0x11   : > { %3311 = vmatpush1.bf16.msra.mxu0 %v9959_v6  ;;  %v9973_v16 = vld [vmem:[%s14862_s3 + $0x4c] ss:$12 sps:$4 sm:$0xff]   ;;  %v9979_v20 = vld [vmem:[%s14862_s3 + $0x34] ss:$12 sps:$4 sm:$0xff]   ;;  %v9983_v22 = vld [vmem:[%s14862_s3 + $0x30] ss:$12 sps:$4 sm:$0xff]  }
  0x12   : > { %3354 = vmatpush1.bf16.msra.mxu1 %v9960_v7  ;;  %3312 = vmatprep.subr.bf16.mxu0 %v9961_v8  ;;  %v9975_v17 = vld [vmem:[%s14862_s3 + $0x1cc] ss:$12 sps:$4 sm:$0xff]   ;;  %v9981_v21 = vld [vmem:[%s14862_s3 + $0x1b4] ss:$12 sps:$4 sm:$0xff]   ;;  %v9984_v23 = vld [vmem:[%s14862_s3 + $0x1b0] ss:$12 sps:$4 sm:$0xff]  }
  0x13   : > { %3355 = vmatprep.subr.bf16.mxu1 %v9963_v9  ;;  %v9985_v24 = vld [vmem:[%s14862_s3 + $0x1c] ss:$12 sps:$4 sm:$0xff]   ;;  %v9989_v26 = vld [vmem:[%s14862_s3 + $0x18] ss:$12 sps:$4 sm:$0xff]   ;;  %v9995_v30 = vld [vmem:[%s14862_s3] ss:$12 sps:$4 sm:$0xff]  }
  0x14   : > { %v9987_v25 = vld [vmem:[%s14862_s3 + $0x19c] ss:$12 sps:$4 sm:$0xff]   ;;  %v9990_v27 = vld [vmem:[%s14862_s3 + $0x198] ss:$12 sps:$4 sm:$0xff]   ;;  %v9996_v31 = vld [vmem:[%s14862_s3 + $0x180] ss:$12 sps:$4 sm:$0xff]  }
  0x15   : > { %3313 = vmatpush1.bf16.msra.mxu0 %v9965_v10  ;;  %v9991_v28 = vld [vmem:[%s14862_s3 + $0x4] ss:$12 sps:$4 sm:$0xff]   ;;  %v9997_v32 = vld [vmem:[%s14862_s3 + $0x16c] ss:$12 sps:$4 sm:$0xff]   ;;  %v10001_v34 = vld [vmem:[%s14862_s3 + $0x168] ss:$12 sps:$4 sm:$0xff]  }
  0x16   : > { %3356 = vmatpush1.bf16.msra.mxu1 %v9966_v11  ;;  %3314 = vmatprep.subr.bf16.mxu0 %v9967_v12  ;;  %v9993_v29 = vld [vmem:[%s14862_s3 + $0x184] ss:$12 sps:$4 sm:$0xff]   ;;  %v9999_v33 = vld [vmem:[%s14862_s3 + $0x2ec] ss:$12 sps:$4 sm:$0xff]   ;;  %v10002_v35 = vld [vmem:[%s14862_s3 + $0x2e8] ss:$12 sps:$4 sm:$0xff]  }
  0x17   : > { %3357 = vmatprep.subr.bf16.mxu1 %v9969_v13  ;;  %v10003_v36 = vld [vmem:[%s14862_s3 + $0x154] ss:$12 sps:$4 sm:$0xff]   ;;  %s14868_s25 = smov (!%p299_p3, %s8668_s25), 1  ;;  %v10007_v38 = vld [vmem:[%s14862_s3 + $0x150] ss:$12 sps:$4 sm:$0xff]  }
  0x18   : > { %v10005_v37 = vld [vmem:[%s14862_s3 + $0x2d4] ss:$12 sps:$4 sm:$0xff]   ;;  %v10008_v39 = vld [vmem:[%s14862_s3 + $0x2d0] ss:$12 sps:$4 sm:$0xff]   ;;  %s11675_s22 = smul.u32 144, %s14868_s25 }
  0x19   : > { %3315 = vmatpush1.bf16.msra.mxu0 %v9971_v14  ;;  %v10009_v40 = vld [vmem:[%s14862_s3 + $0x13c] ss:$12 sps:$4 sm:$0xff]   ;;  %v10013_v42 = vld [vmem:[%s14862_s3 + $0x138] ss:$12 sps:$4 sm:$0xff]   ;;  %v10019_v46 = vld [vmem:[%s14862_s3 + $0x120] ss:$12 sps:$4 sm:$0xff]  }
  0x1a   : > { %3358 = vmatpush1.bf16.msra.mxu1 %v9972_v15  ;;  %3316 = vmatprep.subr.bf16.mxu0 %v9973_v16  ;;  %v10011_v41 = vld [vmem:[%s14862_s3 + $0x2bc] ss:$12 sps:$4 sm:$0xff]   ;;  %v10014_v43 = vld [vmem:[%s14862_s3 + $0x2b8] ss:$12 sps:$4 sm:$0xff]   ;;  %s11693_s12 = scalar_lea.vmem %s14859_s0, %s11675_s22  ;;  %v10020_v47 = vld [vmem:[%s14862_s3 + $0x2a0] ss:$12 sps:$4 sm:$0xff]   ;;  %s12747_s8 = scalar_lea.vmem %s14860_s1, %s11675_s22 }
  0x1b   : > { %3359 = vmatprep.subr.bf16.mxu1 %v9975_v17  ;;  %v10015_v44 = vld [vmem:[%s14862_s3 + $0x124] ss:$12 sps:$4 sm:$0xff]   ;;  %v10021_v48 = vld [vmem:[%s14862_s3 + $0x10c] ss:$12 sps:$4 sm:$0xff]   ;;  %v10025_v52 = vld [vmem:[%s14862_s3 + $0x108] ss:$12 sps:$4 sm:$0xff]   ;;  %s13652_s29 = scalar_lea.vmem %s14861_s2, %s11675_s22 }
  0x1c   : > { %v10017_v45 = vld [vmem:[%s14862_s3 + $0x2a4] ss:$12 sps:$4 sm:$0xff]   ;;  %v10023_v50 = vld [vmem:[%s14862_s3 + $0x28c] ss:$12 sps:$4 sm:$0xff]   ;;  %v10026_v53 = vld [vmem:[%s14862_s3 + $0x288] ss:$12 sps:$4 sm:$0xff]  }
  0x1d   : > { %3317 = vmatpush1.bf16.msra.mxu0 %v9977_v18  ;;  %v10047_v49 = vld [vmem:[%s11693_s12 + $0x4] ss:$72 sps:$4 sm:$0xff]   ;;  %v10027_v54 = vld [vmem:[%s14862_s3 + $0xf4] ss:$12 sps:$4 sm:$0xff]   ;;  %v10031_v56 = vld [vmem:[%s14862_s3 + $0xf0] ss:$12 sps:$4 sm:$0xff]  }
  0x1e   : > { %3360 = vmatpush1.bf16.msra.mxu1 %v9978_v19  ;;  %3318 = vmatprep.subr.bf16.mxu0 %v9979_v20  ;;  %v10050_v51 = vld [vmem:[%s11693_s12 + $0xc] ss:$72 sps:$4 sm:$0xff]   ;;  %v10032_v57 = vld [vmem:[%s14862_s3 + $0x270] ss:$12 sps:$4 sm:$0xff]   ;;  %v10037_v60 = vld [vmem:[%s14862_s3 + $0xd8] ss:$12 sps:$4 sm:$0xff]  }
  0x1f   : > { %3361 = vmatprep.subr.bf16.mxu1 %v9981_v21  ;;  %3340 = vmatprep.mubr.bf16.mxu0 %v10047_v49  ;;  %v10029_v55 = vld [vmem:[%s14862_s3 + $0x274] ss:$12 sps:$4 sm:$0xff]   ;;  %v10033_v58 = vld [vmem:[%s14862_s3 + $0xdc] ss:$12 sps:$4 sm:$0xff]   ;;  %v10038_v61 = vld [vmem:[%s14862_s3 + $0x258] ss:$12 sps:$4 sm:$0xff]  }
  0x20   : > { %3383 = vmatprep.mubr.bf16.mxu1 %v10050_v51  ;;  %v10035_v59 = vld [vmem:[%s14862_s3 + $0x25c] ss:$12 sps:$4 sm:$0xff]   ;;  %v10039_v62 = vld [vmem:[%s14862_s3 + $0xc4] ss:$12 sps:$4 sm:$0xff]   ;;  %v10043_v0 = vld [vmem:[%s14862_s3 + $0xc0] ss:$12 sps:$4 sm:$0xff]  }
  0x21   : > { %3319 = vmatpush1.bf16.msra.mxu0 %v9983_v22  ;;  %v10041_v63 = vld [vmem:[%s14862_s3 + $0x244] ss:$12 sps:$4 sm:$0xff]   ;;  %v10044_v1 = vld [vmem:[%s14862_s3 + $0x240] ss:$12 sps:$4 sm:$0xff]   ;;  %v10051_v6 = vld [vmem:[%s14862_s3 + $0x3a8] ss:$12 sps:$4 sm:$0xff]  }
  0x22   : > { %3362 = vmatpush1.bf16.msra.mxu1 %v9984_v23  ;;  %3320 = vmatprep.subr.bf16.mxu0 %v9985_v24  ;;  %v10053_v2 = vld [vmem:[%s14862_s3 + $0x3ac] ss:$12 sps:$4 sm:$0xff]   ;;  %v10045_v4 = vld [vmem:[%s11693_s12] ss:$72 sps:$4 sm:$0xff]   ;;  %v10057_v10 = vld [vmem:[%s14862_s3 + $0x390] ss:$12 sps:$4 sm:$0xff]  }
  0x23   : > { %3363 = vmatprep.subr.bf16.mxu1 %v9987_v25  ;;  %v10056_v3 = vld [vmem:[%s14862_s3 + $0x52c] ss:$12 sps:$4 sm:$0xff]   ;;  %v10048_v5 = vld [vmem:[%s11693_s12 + $0x8] ss:$72 sps:$4 sm:$0xff]   ;;  %v10059_v8 = vld [vmem:[%s14862_s3 + $0x394] ss:$12 sps:$4 sm:$0xff]  }
  0x24   : > { %v10054_v7 = vld [vmem:[%s14862_s3 + $0x528] ss:$12 sps:$4 sm:$0xff]   ;;  %v10060_v11 = vld [vmem:[%s14862_s3 + $0x510] ss:$12 sps:$4 sm:$0xff]   ;;  %v10063_v14 = vld [vmem:[%s14862_s3 + $0x378] ss:$12 sps:$4 sm:$0xff]  }
  0x25   : > { %3321 = vmatpush1.bf16.msra.mxu0 %v9989_v26  ;;  %v10062_v9 = vld [vmem:[%s14862_s3 + $0x514] ss:$12 sps:$4 sm:$0xff]   ;;  %v10065_v12 = vld [vmem:[%s14862_s3 + $0x37c] ss:$12 sps:$4 sm:$0xff]   ;;  %v10066_v15 = vld [vmem:[%s14862_s3 + $0x4f8] ss:$12 sps:$4 sm:$0xff]  }
  0x26   : > { %3364 = vmatpush1.bf16.msra.mxu1 %v9990_v27  ;;  %3322 = vmatprep.subr.bf16.mxu0 %v9991_v28  ;;  %v10068_v13 = vld [vmem:[%s14862_s3 + $0x4fc] ss:$12 sps:$4 sm:$0xff]   ;;  %v10071_v16 = vld [vmem:[%s14862_s3 + $0x364] ss:$12 sps:$4 sm:$0xff]   ;;  %v10069_v18 = vld [vmem:[%s14862_s3 + $0x360] ss:$12 sps:$4 sm:$0xff]  }
  0x27   : > { %3365 = vmatprep.subr.bf16.mxu1 %v9993_v29  ;;  %v10074_v17 = vld [vmem:[%s14862_s3 + $0x4e4] ss:$12 sps:$4 sm:$0xff]   ;;  %v10072_v19 = vld [vmem:[%s14862_s3 + $0x4e0] ss:$12 sps:$4 sm:$0xff]   ;;  %v10075_v22 = vld [vmem:[%s14862_s3 + $0x348] ss:$12 sps:$4 sm:$0xff]  }
  0x28   : > { %v10077_v20 = vld [vmem:[%s14862_s3 + $0x34c] ss:$12 sps:$4 sm:$0xff]   ;;  %v10078_v23 = vld [vmem:[%s14862_s3 + $0x4c8] ss:$12 sps:$4 sm:$0xff]   ;;  %v10081_v26 = vld [vmem:[%s14862_s3 + $0x330] ss:$12 sps:$4 sm:$0xff]  }
  0x29   : > { %3323 = vmatpush1.bf16.msra.mxu0 %v9995_v30  ;;  %v10080_v21 = vld [vmem:[%s14862_s3 + $0x4cc] ss:$12 sps:$4 sm:$0xff]   ;;  %v10083_v24 = vld [vmem:[%s14862_s3 + $0x334] ss:$12 sps:$4 sm:$0xff]   ;;  %v10084_v27 = vld [vmem:[%s14862_s3 + $0x4b0] ss:$12 sps:$4 sm:$0xff]  }
  0x2a   : > { %3366 = vmatpush1.bf16.msra.mxu1 %v9996_v31  ;;  %3324 = vmatprep.subr.bf16.mxu0 %v9997_v32  ;;  %v10086_v25 = vld [vmem:[%s14862_s3 + $0x4b4] ss:$12 sps:$4 sm:$0xff]   ;;  %v10089_v28 = vld [vmem:[%s14862_s3 + $0x31c] ss:$12 sps:$4 sm:$0xff]   ;;  %v10087_v30 = vld [vmem:[%s14862_s3 + $0x318] ss:$12 sps:$4 sm:$0xff]  }
  0x2b   : > { %3367 = vmatprep.subr.bf16.mxu1 %v9999_v33  ;;  %v10092_v29 = vld [vmem:[%s14862_s3 + $0x49c] ss:$12 sps:$4 sm:$0xff]   ;;  %v10090_v31 = vld [vmem:[%s14862_s3 + $0x498] ss:$12 sps:$4 sm:$0xff]   ;;  %s9940_s23 = smul.u32 112, %s14868_s25 }
  0x2c   : > { %v10095_v32 = vld [vmem:[%s14862_s3 + $0x304] ss:$12 sps:$4 sm:$0xff]  }
  0x2d   : > { %3325 = vmatpush2.bf16.msra.mxu0 %v10001_v34  ;;  %v10098_v33 = vld [vmem:[%s14862_s3 + $0x484] ss:$12 sps:$4 sm:$0xff]   ;;  %v10149_v34 = vld [vmem:[%s11693_s12 + $0x14] ss:$72 sps:$4 sm:$0xff]   ;;  %s13236_s13 = scalar_lea.vmem %s14866_s7, %s9940_s23 }
  0x2e   : > { %3368 = vmatpush2.bf16.msra.mxu1 %v10002_v35  ;;  %3326 = vmatprep.subr.bf16.mxu0 %v10003_v36  ;;  %v10152_v35 = vld [vmem:[%s11693_s12 + $0x1c] ss:$72 sps:$4 sm:$0xff]   ;;  %v10093_v36 = vld [vmem:[%s14862_s3 + $0x300] ss:$12 sps:$4 sm:$0xff]  }
  0x2f   : > { %3369 = vmatprep.subr.bf16.mxu1 %v10005_v37  ;;  %v10096_v37 = vld [vmem:[%s14862_s3 + $0x480] ss:$12 sps:$4 sm:$0xff]   ;;  %v10114_v49 = vld [vmem:[%s14862_s3 + $0x5b8] ss:$12 sps:$4 sm:$0xff]  }
  0x30   : > { %v10122_v51 = vld [vmem:[%s14862_s3 + $0x5a4] ss:$12 sps:$4 sm:$0xff]  }
  0x31   : > { %3327 = vmatpush2.bf16.msra.mxu0 %v10007_v38  ;;  %v10101_v38 = vld [vmem:[%s14862_s3 + $0x46c] ss:$12 sps:$4 sm:$0xff]  }
  0x32   : > { %3370 = vmatpush2.bf16.msra.mxu1 %v10008_v39  ;;  %3328 = vmatprep.subr.bf16.mxu0 %v10009_v40  ;;  %v10104_v39 = vld [vmem:[%s14862_s3 + $0x5ec] ss:$12 sps:$4 sm:$0xff]   ;;  %v10099_v40 = vld [vmem:[%s14862_s3 + $0x468] ss:$12 sps:$4 sm:$0xff]  }
  0x33   : > { %3371 = vmatprep.subr.bf16.mxu1 %v10011_v41  ;;  %v10102_v41 = vld [vmem:[%s14862_s3 + $0x5e8] ss:$12 sps:$4 sm:$0xff]  }
  0x35   : > { %3329 = vmatpush2.bf16.msra.mxu0 %v10013_v42  ;;  %v10107_v42 = vld [vmem:[%s14862_s3 + $0x454] ss:$12 sps:$4 sm:$0xff]  }
  0x36   : > { %3372 = vmatpush2.bf16.msra.mxu1 %v10014_v43  ;;  %3330 = vmatprep.subr.bf16.mxu0 %v10015_v44  ;;  %v10110_v43 = vld [vmem:[%s14862_s3 + $0x5d4] ss:$12 sps:$4 sm:$0xff]   ;;  %v10105_v44 = vld [vmem:[%s14862_s3 + $0x450] ss:$12 sps:$4 sm:$0xff]  }
  0x37   : > { %3373 = vmatprep.subr.bf16.mxu1 %v10017_v45  ;;  %v10108_v45 = vld [vmem:[%s14862_s3 + $0x5d0] ss:$12 sps:$4 sm:$0xff]  }
  0x39   : > { %3331 = vmatpush2.bf16.msra.mxu0 %v10019_v46  ;;  %v10113_v46 = vld [vmem:[%s14862_s3 + $0x43c] ss:$12 sps:$4 sm:$0xff]  }
  0x3a   : > { %3374 = vmatpush2.bf16.msra.mxu1 %v10020_v47  ;;  %3332 = vmatprep.subr.bf16.mxu0 %v10021_v48  ;;  %v10116_v47 = vld [vmem:[%s14862_s3 + $0x5bc] ss:$12 sps:$4 sm:$0xff]   ;;  %v10111_v48 = vld [vmem:[%s14862_s3 + $0x438] ss:$12 sps:$4 sm:$0xff]  }
  0x3b   : > { %3375 = vmatprep.subr.bf16.mxu1 %v10023_v50  ;;  %v10119_v50 = vld [vmem:[%s14862_s3 + $0x424] ss:$12 sps:$4 sm:$0xff]  }
  0x3d   : > { %3333 = vmatpush2.bf16.msra.mxu0 %v10025_v52  ;;  %v10117_v52 = vld [vmem:[%s14862_s3 + $0x420] ss:$12 sps:$4 sm:$0xff]  }
  0x3e   : > { %3376 = vmatpush2.bf16.msra.mxu1 %v10026_v53  ;;  %3334 = vmatprep.subr.bf16.mxu0 %v10027_v54  ;;  %v10120_v53 = vld [vmem:[%s14862_s3 + $0x5a0] ss:$12 sps:$4 sm:$0xff]  }
  0x3f   : > { %3377 = vmatprep.subr.bf16.mxu1 %v10029_v55  ;;  %v10125_v54 = vld [vmem:[%s14862_s3 + $0x40c] ss:$12 sps:$4 sm:$0xff]  }
  0x40   : > { %v10128_v55 = vld [vmem:[%s14862_s3 + $0x58c] ss:$12 sps:$4 sm:$0xff]  }
  0x41   : > { %3335 = vmatpush2.bf16.msra.mxu0 %v10031_v56  ;;  %v10123_v56 = vld [vmem:[%s14862_s3 + $0x408] ss:$12 sps:$4 sm:$0xff]  }
  0x42   : > { %3378 = vmatpush2.bf16.msra.mxu1 %v10032_v57  ;;  %3336 = vmatprep.subr.bf16.mxu0 %v10033_v58  ;;  %v10126_v57 = vld [vmem:[%s14862_s3 + $0x588] ss:$12 sps:$4 sm:$0xff]  }
  0x43   : > { %3379 = vmatprep.subr.bf16.mxu1 %v10035_v59  ;;  %v10131_v58 = vld [vmem:[%s14862_s3 + $0x3f4] ss:$12 sps:$4 sm:$0xff]  }
  0x44   : > { %v10134_v59 = vld [vmem:[%s14862_s3 + $0x574] ss:$12 sps:$4 sm:$0xff]  }
  0x45   : > { %3337 = vmatpush2.bf16.msra.mxu0 %v10037_v60  ;;  %v10129_v60 = vld [vmem:[%s14862_s3 + $0x3f0] ss:$12 sps:$4 sm:$0xff]  }
  0x46   : > { %3380 = vmatpush2.bf16.msra.mxu1 %v10038_v61  ;;  %3338 = vmatprep.subr.bf16.mxu0 %v10039_v62  ;;  %v10132_v61 = vld [vmem:[%s14862_s3 + $0x570] ss:$12 sps:$4 sm:$0xff]  }
  0x47   : > { %3381 = vmatprep.subr.bf16.mxu1 %v10041_v63  ;;  %v10137_v62 = vld [vmem:[%s14862_s3 + $0x3dc] ss:$12 sps:$4 sm:$0xff]  }
  0x48   : > { %v10140_v63 = vld [vmem:[%s14862_s3 + $0x55c] ss:$12 sps:$4 sm:$0xff]  }
  0x49   : > { %3339 = vmatpush2.bf16.msra.mxu0 %v10043_v0  ;;  %v10135_v0 = vld [vmem:[%s14862_s3 + $0x3d8] ss:$12 sps:$4 sm:$0xff]  }
  0x4a   : > { %3382 = vmatpush2.bf16.msra.mxu1 %v10044_v1  ;;  %3394 = vmatprep.subr.bf16.mxu0 %v10053_v2  ;;  %v10138_v1 = vld [vmem:[%s14862_s3 + $0x558] ss:$12 sps:$4 sm:$0xff]  }
  0x4b   : > { %3437 = vmatprep.subr.bf16.mxu1 %v10056_v3  ;;  %v10143_v2 = vld [vmem:[%s14862_s3 + $0x3c4] ss:$12 sps:$4 sm:$0xff]  }
  0x4c   : > { %3341 = vmatmul.mubr.bf16.vlgmr.msra.gmra.mxu0 %v10045_v4  ;;  %v10146_v3 = vld [vmem:[%s14862_s3 + $0x544] ss:$12 sps:$4 sm:$0xff]   ;;  %v10141_v4 = vld [vmem:[%s14862_s3 + $0x3c0] ss:$12 sps:$4 sm:$0xff]  }
  0x4d   : > { %3384 = vmatmul.mubr.bf16.vlgmr.msra.gmra.mxu1 %v10048_v5  ;;  %3395 = vmatpush1.bf16.msra.mxu0 %v10051_v6  ;;  %v10144_v5 = vld [vmem:[%s14862_s3 + $0x540] ss:$12 sps:$4 sm:$0xff]  }
  0x4e   : > { %3438 = vmatpush1.bf16.msra.mxu1 %v10054_v7  ;;  %3396 = vmatprep.subr.bf16.mxu0 %v10059_v8  ;;  %v10155_v6 = vld [vmem:[%s14862_s3 + $0x6ac] ss:$12 sps:$4 sm:$0xff]  }
  0x4f   : > { %3439 = vmatprep.subr.bf16.mxu1 %v10062_v9  ;;  %3426 = vmatprep.mubr.bf16.mxu0 %v10149_v34  ;;  %v10158_v7 = vld [vmem:[%s14862_s3 + $0x82c] ss:$12 sps:$4 sm:$0xff]   ;;  %v10191_v34 = vld [vmem:[%s14862_s3 + $0x61c] ss:$12 sps:$4 sm:$0xff]  }
  0x50   : > { %3469 = vmatprep.mubr.bf16.mxu1 %v10152_v35  ;;  %v10147_v8 = vld [vmem:[%s11693_s12 + $0x10] ss:$72 sps:$4 sm:$0xff]   ;;  %v10194_v35 = vld [vmem:[%s14862_s3 + $0x79c] ss:$12 sps:$4 sm:$0xff]  }
  0x51   : > { %3397 = vmatpush1.bf16.msra.mxu0 %v10057_v10  ;;  %v10150_v9 = vld [vmem:[%s11693_s12 + $0x18] ss:$72 sps:$4 sm:$0xff]   ;;  %v10153_v10 = vld [vmem:[%s14862_s3 + $0x6a8] ss:$12 sps:$4 sm:$0xff]  }
  0x52   : > { %3440 = vmatpush1.bf16.msra.mxu1 %v10060_v11  ;;  %3398 = vmatprep.subr.bf16.mxu0 %v10065_v12  ;;  %v10156_v11 = vld [vmem:[%s14862_s3 + $0x828] ss:$12 sps:$4 sm:$0xff]  }
  0x53   : > { %3441 = vmatprep.subr.bf16.mxu1 %v10068_v13  ;;  %v10161_v12 = vld [vmem:[%s14862_s3 + $0x694] ss:$12 sps:$4 sm:$0xff]  }
  0x54   : > { %v10164_v13 = vld [vmem:[%s14862_s3 + $0x814] ss:$12 sps:$4 sm:$0xff]  }
  0x55   : > { %3399 = vmatpush1.bf16.msra.mxu0 %v10063_v14  ;;  %v10159_v14 = vld [vmem:[%s14862_s3 + $0x690] ss:$12 sps:$4 sm:$0xff]  }
  0x56   : > { %3442 = vmatpush1.bf16.msra.mxu1 %v10066_v15  ;;  %3400 = vmatprep.subr.bf16.mxu0 %v10071_v16  ;;  %v10162_v15 = vld [vmem:[%s14862_s3 + $0x810] ss:$12 sps:$4 sm:$0xff]  }
  0x57   : > { %3443 = vmatprep.subr.bf16.mxu1 %v10074_v17  ;;  %v10167_v16 = vld [vmem:[%s14862_s3 + $0x67c] ss:$12 sps:$4 sm:$0xff]  }
  0x58   : > { %v10170_v17 = vld [vmem:[%s14862_s3 + $0x7fc] ss:$12 sps:$4 sm:$0xff]  }
  0x59   : > { %3401 = vmatpush1.bf16.msra.mxu0 %v10069_v18  ;;  %v10165_v18 = vld [vmem:[%s14862_s3 + $0x678] ss:$12 sps:$4 sm:$0xff]  }
  0x5a   : > { %3444 = vmatpush1.bf16.msra.mxu1 %v10072_v19  ;;  %3402 = vmatprep.subr.bf16.mxu0 %v10077_v20  ;;  %v10251_v19 = vld [vmem:[%s11693_s12 + $0x24] ss:$72 sps:$4 sm:$0xff]  }
  0x5b   : > { %3445 = vmatprep.subr.bf16.mxu1 %v10080_v21  ;;  %v10168_v20 = vld [vmem:[%s14862_s3 + $0x7f8] ss:$12 sps:$4 sm:$0xff]   ;;  %v10254_v21 = vld [vmem:[%s11693_s12 + $0x2c] ss:$72 sps:$4 sm:$0xff]  }
  0x5d   : > { %3403 = vmatpush1.bf16.msra.mxu0 %v10075_v22  ;;  %v10173_v22 = vld [vmem:[%s14862_s3 + $0x664] ss:$12 sps:$4 sm:$0xff]  }
  0x5e   : > { %3446 = vmatpush1.bf16.msra.mxu1 %v10078_v23  ;;  %3404 = vmatprep.subr.bf16.mxu0 %v10083_v24  ;;  %v10176_v23 = vld [vmem:[%s14862_s3 + $0x7e4] ss:$12 sps:$4 sm:$0xff]   ;;  %v10171_v24 = vld [vmem:[%s14862_s3 + $0x660] ss:$12 sps:$4 sm:$0xff]  }
  0x5f   : > { %3447 = vmatprep.subr.bf16.mxu1 %v10086_v25  ;;  %v10174_v25 = vld [vmem:[%s14862_s3 + $0x7e0] ss:$12 sps:$4 sm:$0xff]  }
  0x61   : > { %3405 = vmatpush1.bf16.msra.mxu0 %v10081_v26  ;;  %v10179_v26 = vld [vmem:[%s14862_s3 + $0x64c] ss:$12 sps:$4 sm:$0xff]  }
  0x62   : > { %3448 = vmatpush1.bf16.msra.mxu1 %v10084_v27  ;;  %3406 = vmatprep.subr.bf16.mxu0 %v10089_v28  ;;  %v10182_v27 = vld [vmem:[%s14862_s3 + $0x7cc] ss:$12 sps:$4 sm:$0xff]   ;;  %v10177_v28 = vld [vmem:[%s14862_s3 + $0x648] ss:$12 sps:$4 sm:$0xff]  }
  0x63   : > { %3449 = vmatprep.subr.bf16.mxu1 %v10092_v29  ;;  %v10180_v29 = vld [vmem:[%s14862_s3 + $0x7c8] ss:$12 sps:$4 sm:$0xff]  }
  0x65   : > { %3407 = vmatpush1.bf16.msra.mxu0 %v10087_v30  ;;  %v10185_v30 = vld [vmem:[%s14862_s3 + $0x634] ss:$12 sps:$4 sm:$0xff]  }
  0x66   : > { %3450 = vmatpush1.bf16.msra.mxu1 %v10090_v31  ;;  %3408 = vmatprep.subr.bf16.mxu0 %v10095_v32  ;;  %v10188_v31 = vld [vmem:[%s14862_s3 + $0x7b4] ss:$12 sps:$4 sm:$0xff]   ;;  %v10183_v32 = vld [vmem:[%s14862_s3 + $0x630] ss:$12 sps:$4 sm:$0xff]  }
  0x67   : > { %3451 = vmatprep.subr.bf16.mxu1 %v10098_v33  ;;  %v10186_v33 = vld [vmem:[%s14862_s3 + $0x7b0] ss:$12 sps:$4 sm:$0xff]  }
  0x69   : > { %3409 = vmatpush1.bf16.msra.mxu0 %v10093_v36  ;;  %v10189_v36 = vld [vmem:[%s14862_s3 + $0x618] ss:$12 sps:$4 sm:$0xff]  }
  0x6a   : > { %3452 = vmatpush1.bf16.msra.mxu1 %v10096_v37  ;;  %3410 = vmatprep.subr.bf16.mxu0 %v10101_v38  ;;  %v10192_v37 = vld [vmem:[%s14862_s3 + $0x798] ss:$12 sps:$4 sm:$0xff]  }
  0x6b   : > { %3453 = vmatprep.subr.bf16.mxu1 %v10104_v39  ;;  %v10197_v38 = vld [vmem:[%s14862_s3 + $0x604] ss:$12 sps:$4 sm:$0xff]  }
  0x6c   : > { %v10200_v39 = vld [vmem:[%s14862_s3 + $0x784] ss:$12 sps:$4 sm:$0xff]  }
  0x6d   : > { %3411 = vmatpush2.bf16.msra.mxu0 %v10099_v40  ;;  %v10195_v40 = vld [vmem:[%s14862_s3 + $0x600] ss:$12 sps:$4 sm:$0xff]  }
  0x6e   : > { %3454 = vmatpush2.bf16.msra.mxu1 %v10102_v41  ;;  %3412 = vmatprep.subr.bf16.mxu0 %v10107_v42  ;;  %v10198_v41 = vld [vmem:[%s14862_s3 + $0x780] ss:$12 sps:$4 sm:$0xff]  }
  0x6f   : > { %3455 = vmatprep.subr.bf16.mxu1 %v10110_v43  ;;  %v10203_v42 = vld [vmem:[%s14862_s3 + $0x76c] ss:$12 sps:$4 sm:$0xff]  }
  0x70   : > { %v10206_v43 = vld [vmem:[%s14862_s3 + $0x8ec] ss:$12 sps:$4 sm:$0xff]  }
  0x71   : > { %3413 = vmatpush2.bf16.msra.mxu0 %v10105_v44  ;;  %v10201_v44 = vld [vmem:[%s14862_s3 + $0x768] ss:$12 sps:$4 sm:$0xff]  }
  0x72   : > { %3456 = vmatpush2.bf16.msra.mxu1 %v10108_v45  ;;  %3414 = vmatprep.subr.bf16.mxu0 %v10113_v46  ;;  %v10204_v45 = vld [vmem:[%s14862_s3 + $0x8e8] ss:$12 sps:$4 sm:$0xff]  }
  0x73   : > { %3457 = vmatprep.subr.bf16.mxu1 %v10116_v47  ;;  %v10209_v46 = vld [vmem:[%s14862_s3 + $0x754] ss:$12 sps:$4 sm:$0xff]  }
  0x74   : > { %v10212_v47 = vld [vmem:[%s14862_s3 + $0x8d4] ss:$12 sps:$4 sm:$0xff]  }
  0x75   : > { %3415 = vmatpush2.bf16.msra.mxu0 %v10111_v48  ;;  %v10207_v48 = vld [vmem:[%s14862_s3 + $0x750] ss:$12 sps:$4 sm:$0xff]  }
  0x76   : > { %3458 = vmatpush2.bf16.msra.mxu1 %v10114_v49  ;;  %3416 = vmatprep.subr.bf16.mxu0 %v10119_v50  ;;  %v10210_v49 = vld [vmem:[%s14862_s3 + $0x8d0] ss:$12 sps:$4 sm:$0xff]  }
  0x77   : > { %3459 = vmatprep.subr.bf16.mxu1 %v10122_v51  ;;  %v10215_v50 = vld [vmem:[%s14862_s3 + $0x73c] ss:$12 sps:$4 sm:$0xff]  }
  0x78   : > { %v10218_v51 = vld [vmem:[%s14862_s3 + $0x8bc] ss:$12 sps:$4 sm:$0xff]  }
  0x79   : > { %3417 = vmatpush2.bf16.msra.mxu0 %v10117_v52  ;;  %v10213_v52 = vld [vmem:[%s14862_s3 + $0x738] ss:$12 sps:$4 sm:$0xff]  }
  0x7a   : > { %3460 = vmatpush2.bf16.msra.mxu1 %v10120_v53  ;;  %3418 = vmatprep.subr.bf16.mxu0 %v10125_v54  ;;  %v10216_v53 = vld [vmem:[%s14862_s3 + $0x8b8] ss:$12 sps:$4 sm:$0xff]  }
  0x7b   : > { %3461 = vmatprep.subr.bf16.mxu1 %v10128_v55  ;;  %v10221_v54 = vld [vmem:[%s14862_s3 + $0x724] ss:$12 sps:$4 sm:$0xff]  }
  0x7c   : > { %v10224_v55 = vld [vmem:[%s14862_s3 + $0x8a4] ss:$12 sps:$4 sm:$0xff]  }
  0x7d   : > { %3419 = vmatpush2.bf16.msra.mxu0 %v10123_v56  ;;  %v10219_v56 = vld [vmem:[%s14862_s3 + $0x720] ss:$12 sps:$4 sm:$0xff]  }
  0x7e   : > { %3462 = vmatpush2.bf16.msra.mxu1 %v10126_v57  ;;  %3420 = vmatprep.subr.bf16.mxu0 %v10131_v58  ;;  %v10222_v57 = vld [vmem:[%s14862_s3 + $0x8a0] ss:$12 sps:$4 sm:$0xff]  }
  0x7f   : > { %3463 = vmatprep.subr.bf16.mxu1 %v10134_v59  ;;  %v10227_v58 = vld [vmem:[%s14862_s3 + $0x70c] ss:$12 sps:$4 sm:$0xff]  }
  0x80   : > { %v10230_v59 = vld [vmem:[%s14862_s3 + $0x88c] ss:$12 sps:$4 sm:$0xff]  }
  0x81   : > { %3421 = vmatpush2.bf16.msra.mxu0 %v10129_v60  ;;  %v10225_v60 = vld [vmem:[%s14862_s3 + $0x708] ss:$12 sps:$4 sm:$0xff]  }
  0x82   : > { %3464 = vmatpush2.bf16.msra.mxu1 %v10132_v61  ;;  %3422 = vmatprep.subr.bf16.mxu0 %v10137_v62  ;;  %v10228_v61 = vld [vmem:[%s14862_s3 + $0x888] ss:$12 sps:$4 sm:$0xff]  }
  0x83   : > { %3465 = vmatprep.subr.bf16.mxu1 %v10140_v63  ;;  %v10233_v62 = vld [vmem:[%s14862_s3 + $0x6f4] ss:$12 sps:$4 sm:$0xff]  }
  0x84   : > { %v10236_v63 = vld [vmem:[%s14862_s3 + $0x874] ss:$12 sps:$4 sm:$0xff]  }
  0x85   : > { %3423 = vmatpush2.bf16.msra.mxu0 %v10135_v0  ;;  %v10231_v0 = vld [vmem:[%s14862_s3 + $0x6f0] ss:$12 sps:$4 sm:$0xff]  }
  0x86   : > { %3466 = vmatpush2.bf16.msra.mxu1 %v10138_v1  ;;  %3424 = vmatprep.subr.bf16.mxu0 %v10143_v2  ;;  %v10234_v1 = vld [vmem:[%s14862_s3 + $0x870] ss:$12 sps:$4 sm:$0xff]  }
  0x87   : > { %3467 = vmatprep.subr.bf16.mxu1 %v10146_v3  ;;  %v10239_v2 = vld [vmem:[%s14862_s3 + $0x6dc] ss:$12 sps:$4 sm:$0xff]  }
  0x88   : > { %v10242_v3 = vld [vmem:[%s14862_s3 + $0x85c] ss:$12 sps:$4 sm:$0xff]  }
  0x89   : > { %3425 = vmatpush2.bf16.msra.mxu0 %v10141_v4  ;;  %v10237_v4 = vld [vmem:[%s14862_s3 + $0x6d8] ss:$12 sps:$4 sm:$0xff]  }
  0x8a   : > { %3468 = vmatpush2.bf16.msra.mxu1 %v10144_v5  ;;  %3480 = vmatprep.subr.bf16.mxu0 %v10155_v6  ;;  %v10240_v5 = vld [vmem:[%s14862_s3 + $0x858] ss:$12 sps:$4 sm:$0xff]  }
  0x8b   : > { %3523 = vmatprep.subr.bf16.mxu1 %v10158_v7  ;;  %v10245_v6 = vld [vmem:[%s14862_s3 + $0x6c4] ss:$12 sps:$4 sm:$0xff]  }
  0x8c   : > { %3427 = vmatmul.mubr.bf16.vlgmr.msra.gmra.mxu0 %v10147_v8  ;;  %v10248_v7 = vld [vmem:[%s14862_s3 + $0x844] ss:$12 sps:$4 sm:$0xff]   ;;  %v10243_v8 = vld [vmem:[%s14862_s3 + $0x6c0] ss:$12 sps:$4 sm:$0xff]  }
  0x8d   : > { %3470 = vmatmul.mubr.bf16.vlgmr.msra.gmra.mxu1 %v10150_v9  ;;  %3481 = vmatpush1.bf16.msra.mxu0 %v10153_v10  ;;  %v10246_v9 = vld [vmem:[%s14862_s3 + $0x840] ss:$12 sps:$4 sm:$0xff]  }
  0x8e   : > { %3524 = vmatpush1.bf16.msra.mxu1 %v10156_v11  ;;  %3482 = vmatprep.subr.bf16.mxu0 %v10161_v12  ;;  %v10257_v10 = vld [vmem:[%s14862_s3 + $0x9ac] ss:$12 sps:$4 sm:$0xff]   ;;  %v10249_v11 = vld [vmem:[%s11693_s12 + $0x20] ss:$72 sps:$4 sm:$0xff]  }
  0x8f   : > { %3525 = vmatprep.subr.bf16.mxu1 %v10164_v13  ;;  %3512 = vmatprep.mubr.bf16.mxu0 %v10251_v19  ;;  %v10252_v12 = vld [vmem:[%s11693_s12 + $0x28] ss:$72 sps:$4 sm:$0xff]   ;;  %v10260_v13 = vld [vmem:[%s14862_s3 + $0xb2c] ss:$12 sps:$4 sm:$0xff]   ;;  %v10356_v19 = vld [vmem:[%s11693_s12 + $0x3c] ss:$72 sps:$4 sm:$0xff]  }
  0x90   : > { %3555 = vmatprep.mubr.bf16.mxu1 %v10254_v21  ;;  %v10264_v21 = vld [vmem:[%s14862_s3 + $0xb10] ss:$12 sps:$4 sm:$0xff]  }
  0x91   : > { %3483 = vmatpush1.bf16.msra.mxu0 %v10159_v14  ;;  %v10255_v14 = vld [vmem:[%s14862_s3 + $0x9a8] ss:$12 sps:$4 sm:$0xff]  }
  0x92   : > { %3526 = vmatpush1.bf16.msra.mxu1 %v10162_v15  ;;  %3484 = vmatprep.subr.bf16.mxu0 %v10167_v16  ;;  %v10258_v15 = vld [vmem:[%s14862_s3 + $0xb28] ss:$12 sps:$4 sm:$0xff]  }
  0x93   : > { %3527 = vmatprep.subr.bf16.mxu1 %v10170_v17  ;;  %v10263_v16 = vld [vmem:[%s14862_s3 + $0x994] ss:$12 sps:$4 sm:$0xff]  }
  0x94   : > { %v10266_v17 = vld [vmem:[%s14862_s3 + $0xb14] ss:$12 sps:$4 sm:$0xff]  }
  0x95   : > { %3485 = vmatpush1.bf16.msra.mxu0 %v10165_v18  ;;  %v10353_v18 = vld [vmem:[%s11693_s12 + $0x34] ss:$72 sps:$4 sm:$0xff]  }
  0x96   : > { %3528 = vmatpush1.bf16.msra.mxu1 %v10168_v20  ;;  %3486 = vmatprep.subr.bf16.mxu0 %v10173_v22  ;;  %v10261_v20 = vld [vmem:[%s14862_s3 + $0x990] ss:$12 sps:$4 sm:$0xff]  }
  0x97   : > { %3529 = vmatprep.subr.bf16.mxu1 %v10176_v23  ;;  %v10269_v22 = vld [vmem:[%s14862_s3 + $0x97c] ss:$12 sps:$4 sm:$0xff]  }
  0x98   : > { %v10272_v23 = vld [vmem:[%s14862_s3 + $0xafc] ss:$12 sps:$4 sm:$0xff]  }
  0x99   : > { %3487 = vmatpush1.bf16.msra.mxu0 %v10171_v24  ;;  %v10267_v24 = vld [vmem:[%s14862_s3 + $0x978] ss:$12 sps:$4 sm:$0xff]  }
  0x9a   : > { %3530 = vmatpush1.bf16.msra.mxu1 %v10174_v25  ;;  %3488 = vmatprep.subr.bf16.mxu0 %v10179_v26  ;;  %v10270_v25 = vld [vmem:[%s14862_s3 + $0xaf8] ss:$12 sps:$4 sm:$0xff]  }
  0x9b   : > { %3531 = vmatprep.subr.bf16.mxu1 %v10182_v27  ;;  %v10275_v26 = vld [vmem:[%s14862_s3 + $0x964] ss:$12 sps:$4 sm:$0xff]  }
  0x9c   : > { %v10278_v27 = vld [vmem:[%s14862_s3 + $0xae4] ss:$12 sps:$4 sm:$0xff]  }
  0x9d   : > { %3489 = vmatpush1.bf16.msra.mxu0 %v10177_v28  ;;  %v10273_v28 = vld [vmem:[%s14862_s3 + $0x960] ss:$12 sps:$4 sm:$0xff]  }
  0x9e   : > { %3532 = vmatpush1.bf16.msra.mxu1 %v10180_v29  ;;  %3490 = vmatprep.subr.bf16.mxu0 %v10185_v30  ;;  %v10276_v29 = vld [vmem:[%s14862_s3 + $0xae0] ss:$12 sps:$4 sm:$0xff]  }
  0x9f   : > { %3533 = vmatprep.subr.bf16.mxu1 %v10188_v31  ;;  %v10281_v30 = vld [vmem:[%s14862_s3 + $0x94c] ss:$12 sps:$4 sm:$0xff]  }
  0xa0   : > { %v10284_v31 = vld [vmem:[%s14862_s3 + $0xacc] ss:$12 sps:$4 sm:$0xff]  }
  0xa1   : > { %3491 = vmatpush1.bf16.msra.mxu0 %v10183_v32  ;;  %v10279_v32 = vld [vmem:[%s14862_s3 + $0x948] ss:$12 sps:$4 sm:$0xff]  }
  0xa2   : > { %3534 = vmatpush1.bf16.msra.mxu1 %v10186_v33  ;;  %3492 = vmatprep.subr.bf16.mxu0 %v10191_v34  ;;  %v10282_v33 = vld [vmem:[%s14862_s3 + $0xac8] ss:$12 sps:$4 sm:$0xff]  }
  0xa3   : > { %3535 = vmatprep.subr.bf16.mxu1 %v10194_v35  ;;  %v10287_v34 = vld [vmem:[%s14862_s3 + $0x934] ss:$12 sps:$4 sm:$0xff]  }
  0xa4   : > { %v10290_v35 = vld [vmem:[%s14862_s3 + $0xab4] ss:$12 sps:$4 sm:$0xff]  }
  0xa5   : > { %3493 = vmatpush1.bf16.msra.mxu0 %v10189_v36  ;;  %v10285_v36 = vld [vmem:[%s14862_s3 + $0x930] ss:$12 sps:$4 sm:$0xff]  }
  0xa6   : > { %3536 = vmatpush1.bf16.msra.mxu1 %v10192_v37  ;;  %3494 = vmatprep.subr.bf16.mxu0 %v10197_v38  ;;  %v10288_v37 = vld [vmem:[%s14862_s3 + $0xab0] ss:$12 sps:$4 sm:$0xff]  }
  0xa7   : > { %3537 = vmatprep.subr.bf16.mxu1 %v10200_v39  ;;  %v10293_v38 = vld [vmem:[%s14862_s3 + $0x91c] ss:$12 sps:$4 sm:$0xff]  }
  0xa8   : > { %v10296_v39 = vld [vmem:[%s14862_s3 + $0xa9c] ss:$12 sps:$4 sm:$0xff]  }
  0xa9   : > { %3495 = vmatpush1.bf16.msra.mxu0 %v10195_v40  ;;  %v10291_v40 = vld [vmem:[%s14862_s3 + $0x918] ss:$12 sps:$4 sm:$0xff]  }
  0xaa   : > { %3538 = vmatpush1.bf16.msra.mxu1 %v10198_v41  ;;  %3496 = vmatprep.subr.bf16.mxu0 %v10203_v42  ;;  %v10294_v41 = vld [vmem:[%s14862_s3 + $0xa98] ss:$12 sps:$4 sm:$0xff]  }
  0xab   : > { %3539 = vmatprep.subr.bf16.mxu1 %v10206_v43  ;;  %v10299_v42 = vld [vmem:[%s14862_s3 + $0x904] ss:$12 sps:$4 sm:$0xff]  }
  0xac   : > { %v10302_v43 = vld [vmem:[%s14862_s3 + $0xa84] ss:$12 sps:$4 sm:$0xff]  }
  0xad   : > { %3497 = vmatpush2.bf16.msra.mxu0 %v10201_v44  ;;  %v10297_v44 = vld [vmem:[%s14862_s3 + $0x900] ss:$12 sps:$4 sm:$0xff]  }
  0xae   : > { %3540 = vmatpush2.bf16.msra.mxu1 %v10204_v45  ;;  %3498 = vmatprep.subr.bf16.mxu0 %v10209_v46  ;;  %v10300_v45 = vld [vmem:[%s14862_s3 + $0xa80] ss:$12 sps:$4 sm:$0xff]  }
  0xaf   : > { %3541 = vmatprep.subr.bf16.mxu1 %v10212_v47  ;;  %v10305_v46 = vld [vmem:[%s14862_s3 + $0xa6c] ss:$12 sps:$4 sm:$0xff]  }
  0xb0   : > { %v10308_v47 = vld [vmem:[%s14862_s3 + $0xbec] ss:$12 sps:$4 sm:$0xff]  }
  0xb1   : > { %3499 = vmatpush2.bf16.msra.mxu0 %v10207_v48  ;;  %v10303_v48 = vld [vmem:[%s14862_s3 + $0xa68] ss:$12 sps:$4 sm:$0xff]  }
  0xb2   : > { %3542 = vmatpush2.bf16.msra.mxu1 %v10210_v49  ;;  %3500 = vmatprep.subr.bf16.mxu0 %v10215_v50  ;;  %v10306_v49 = vld [vmem:[%s14862_s3 + $0xbe8] ss:$12 sps:$4 sm:$0xff]  }
  0xb3   : > { %3543 = vmatprep.subr.bf16.mxu1 %v10218_v51  ;;  %v10311_v50 = vld [vmem:[%s14862_s3 + $0xa54] ss:$12 sps:$4 sm:$0xff]  }
  0xb4   : > { %v10314_v51 = vld [vmem:[%s14862_s3 + $0xbd4] ss:$12 sps:$4 sm:$0xff]  }
  0xb5   : > { %3501 = vmatpush2.bf16.msra.mxu0 %v10213_v52  ;;  %v10309_v52 = vld [vmem:[%s14862_s3 + $0xa50] ss:$12 sps:$4 sm:$0xff]  }
  0xb6   : > { %3544 = vmatpush2.bf16.msra.mxu1 %v10216_v53  ;;  %3502 = vmatprep.subr.bf16.mxu0 %v10221_v54  ;;  %v10312_v53 = vld [vmem:[%s14862_s3 + $0xbd0] ss:$12 sps:$4 sm:$0xff]  }
  0xb7   : > { %3545 = vmatprep.subr.bf16.mxu1 %v10224_v55  ;;  %v10317_v54 = vld [vmem:[%s14862_s3 + $0xa3c] ss:$12 sps:$4 sm:$0xff]  }
  0xb8   : > { %v10320_v55 = vld [vmem:[%s14862_s3 + $0xbbc] ss:$12 sps:$4 sm:$0xff]  }
  0xb9   : > { %3503 = vmatpush2.bf16.msra.mxu0 %v10219_v56  ;;  %v10315_v56 = vld [vmem:[%s14862_s3 + $0xa38] ss:$12 sps:$4 sm:$0xff]  }
  0xba   : > { %3546 = vmatpush2.bf16.msra.mxu1 %v10222_v57  ;;  %3504 = vmatprep.subr.bf16.mxu0 %v10227_v58  ;;  %v10318_v57 = vld [vmem:[%s14862_s3 + $0xbb8] ss:$12 sps:$4 sm:$0xff]  }
  0xbb   : > { %3547 = vmatprep.subr.bf16.mxu1 %v10230_v59  ;;  %v10323_v58 = vld [vmem:[%s14862_s3 + $0xa24] ss:$12 sps:$4 sm:$0xff]  }
  0xbc   : > { %v10326_v59 = vld [vmem:[%s14862_s3 + $0xba4] ss:$12 sps:$4 sm:$0xff]  }
  0xbd   : > { %3505 = vmatpush2.bf16.msra.mxu0 %v10225_v60  ;;  %v10321_v60 = vld [vmem:[%s14862_s3 + $0xa20] ss:$12 sps:$4 sm:$0xff]  }
  0xbe   : > { %3548 = vmatpush2.bf16.msra.mxu1 %v10228_v61  ;;  %3506 = vmatprep.subr.bf16.mxu0 %v10233_v62  ;;  %v10324_v61 = vld [vmem:[%s14862_s3 + $0xba0] ss:$12 sps:$4 sm:$0xff]  }
  0xbf   : > { %3549 = vmatprep.subr.bf16.mxu1 %v10236_v63  ;;  %v10329_v62 = vld [vmem:[%s14862_s3 + $0xa0c] ss:$12 sps:$4 sm:$0xff]  }
  0xc0   : > { %v10332_v63 = vld [vmem:[%s14862_s3 + $0xb8c] ss:$12 sps:$4 sm:$0xff]  }
  0xc1   : > { %3507 = vmatpush2.bf16.msra.mxu0 %v10231_v0  ;;  %v10327_v0 = vld [vmem:[%s14862_s3 + $0xa08] ss:$12 sps:$4 sm:$0xff]  }
  0xc2   : > { %3550 = vmatpush2.bf16.msra.mxu1 %v10234_v1  ;;  %3508 = vmatprep.subr.bf16.mxu0 %v10239_v2  ;;  %v10330_v1 = vld [vmem:[%s14862_s3 + $0xb88] ss:$12 sps:$4 sm:$0xff]  }
  0xc3   : > { %3551 = vmatprep.subr.bf16.mxu1 %v10242_v3  ;;  %v10335_v2 = vld [vmem:[%s14862_s3 + $0x9f4] ss:$12 sps:$4 sm:$0xff]  }
  0xc4   : > { %v10338_v3 = vld [vmem:[%s14862_s3 + $0xb74] ss:$12 sps:$4 sm:$0xff]  }
  0xc5   : > { %3509 = vmatpush2.bf16.msra.mxu0 %v10237_v4  ;;  %v10333_v4 = vld [vmem:[%s14862_s3 + $0x9f0] ss:$12 sps:$4 sm:$0xff]  }
  0xc6   : > { %3552 = vmatpush2.bf16.msra.mxu1 %v10240_v5  ;;  %3510 = vmatprep.subr.bf16.mxu0 %v10245_v6  ;;  %v10336_v5 = vld [vmem:[%s14862_s3 + $0xb70] ss:$12 sps:$4 sm:$0xff]  }
  0xc7   : > { %3553 = vmatprep.subr.bf16.mxu1 %v10248_v7  ;;  %v10341_v6 = vld [vmem:[%s14862_s3 + $0x9dc] ss:$12 sps:$4 sm:$0xff]  }
  0xc8   : > { %v10344_v7 = vld [vmem:[%s14862_s3 + $0xb5c] ss:$12 sps:$4 sm:$0xff]  }
  0xc9   : > { %3511 = vmatpush2.bf16.msra.mxu0 %v10243_v8  ;;  %v10339_v8 = vld [vmem:[%s14862_s3 + $0x9d8] ss:$12 sps:$4 sm:$0xff]  }
  0xca   : > { %3554 = vmatpush2.bf16.msra.mxu1 %v10246_v9  ;;  %3566 = vmatprep.subr.bf16.mxu0 %v10257_v10  ;;  %v10342_v9 = vld [vmem:[%s14862_s3 + $0xb58] ss:$12 sps:$4 sm:$0xff]  }
  0xcb   : > { %3609 = vmatprep.subr.bf16.mxu1 %v10260_v13  ;;  %v10347_v10 = vld [vmem:[%s14862_s3 + $0x9c4] ss:$12 sps:$4 sm:$0xff]   ;;  %v10348_v13 = vld [vmem:[%s14862_s3 + $0xb40] ss:$12 sps:$4 sm:$0xff]  }
  0xcc   : > { %3513 = vmatmul.mubr.bf16.vlgmr.msra.gmra.mxu0 %v10249_v11  ;;  %v10350_v11 = vld [vmem:[%s14862_s3 + $0xb44] ss:$12 sps:$4 sm:$0xff]  }
  0xcd   : > { %3556 = vmatmul.mubr.bf16.vlgmr.msra.gmra.mxu1 %v10252_v12  ;;  %3567 = vmatpush1.bf16.msra.mxu0 %v10255_v14  ;;  %v10345_v12 = vld [vmem:[%s14862_s3 + $0x9c0] ss:$12 sps:$4 sm:$0xff]  }
  0xce   : > { %3610 = vmatpush1.bf16.msra.mxu1 %v10258_v15  ;;  %3568 = vmatprep.subr.bf16.mxu0 %v10263_v16  ;;  %v10359_v14 = vld [vmem:[%s14862_s3 + $0xcac] ss:$12 sps:$4 sm:$0xff]  }
  0xcf   : > { %3611 = vmatprep.subr.bf16.mxu1 %v10266_v17  ;;  %3598 = vmatprep.mubr.bf16.mxu0 %v10353_v18  ;;  %v10351_v15 = vld [vmem:[%s11693_s12 + $0x30] ss:$72 sps:$4 sm:$0xff]   ;;  %v10357_v18 = vld [vmem:[%s14862_s3 + $0xca8] ss:$12 sps:$4 sm:$0xff]  }
  0xd0   : > { %3641 = vmatprep.mubr.bf16.mxu1 %v10356_v19  ;;  %v10354_v16 = vld [vmem:[%s11693_s12 + $0x38] ss:$72 sps:$4 sm:$0xff]   ;;  %v10360_v17 = vld [vmem:[%s14862_s3 + $0x170] ss:$12 sps:$4 sm:$0xff]  }
  0xd1   : > { %3569 = vmatpush1.bf16.msra.mxu0 %v10261_v20  ;;  %v10361_v19 = vld [vmem:[%s14862_s3 + $0xb0] ss:$12 sps:$4 sm:$0xff]   ;;  %v10364_v20 = vld [vmem:[%s14862_s3 + $0xc94] ss:$12 sps:$4 sm:$0xff]  }
  0xd2   : > { %3612 = vmatpush1.bf16.msra.mxu1 %v10264_v21  ;;  %3570 = vmatprep.subr.bf16.mxu0 %v10269_v22  ;;  %v10365_v21 = vld [vmem:[%s14862_s3 + $0x158] ss:$12 sps:$4 sm:$0xff]   ;;  %v10362_v22 = vld [vmem:[%s14862_s3 + $0xc90] ss:$12 sps:$4 sm:$0xff]  }
  0xd3   : > { %3613 = vmatprep.subr.bf16.mxu1 %v10272_v23  ;;  %v10439_v23 = vld [vmem:[%s11693_s12 + $0x44] ss:$72 sps:$4 sm:$0xff]  }
  0xd5   : > { %3571 = vmatpush1.bf16.msra.mxu0 %v10267_v24  ;;  %v10366_v24 = vld [vmem:[%s14862_s3 + $0x98] ss:$12 sps:$4 sm:$0xff]  }
  0xd6   : > { %3614 = vmatpush1.bf16.msra.mxu1 %v10270_v25  ;;  %3572 = vmatprep.subr.bf16.mxu0 %v10275_v26  ;;  %v10369_v25 = vld [vmem:[%s14862_s3 + $0xc7c] ss:$12 sps:$4 sm:$0xff]   ;;  %v10370_v26 = vld [vmem:[%s14862_s3 + $0x140] ss:$12 sps:$4 sm:$0xff]  }
  0xd7   : > { %3615 = vmatprep.subr.bf16.mxu1 %v10278_v27  ;;  %v10367_v27 = vld [vmem:[%s14862_s3 + $0xc78] ss:$12 sps:$4 sm:$0xff]  }
  0xd9   : > { %3573 = vmatpush1.bf16.msra.mxu0 %v10273_v28  ;;  %v11470_v28 = vld [vmem:[%s11693_s12 + $0x4] ss:$72 sps:$4 sm:$0xff]  }
  0xda   : > { %3616 = vmatpush1.bf16.msra.mxu1 %v10276_v29  ;;  %3574 = vmatprep.subr.bf16.mxu0 %v10281_v30  ;;  %v10371_v29 = vld [vmem:[%s14862_s3 + $0x80] ss:$12 sps:$4 sm:$0xff]   ;;  %v10374_v30 = vld [vmem:[%s14862_s3 + $0xc64] ss:$12 sps:$4 sm:$0xff]  }
  0xdb   : > { %3617 = vmatprep.subr.bf16.mxu1 %v10284_v31  ;;  %v10375_v31 = vld [vmem:[%s14862_s3 + $0x128] ss:$12 sps:$4 sm:$0xff]  }
  0xdd   : > { %3575 = vmatpush1.bf16.msra.mxu0 %v10279_v32  ;;  %v10372_v32 = vld [vmem:[%s14862_s3 + $0xc60] ss:$12 sps:$4 sm:$0xff]  }
  0xde   : > { %3618 = vmatpush1.bf16.msra.mxu1 %v10282_v33  ;;  %3576 = vmatprep.subr.bf16.mxu0 %v10287_v34  ;;  %v10376_v33 = vld [vmem:[%s14862_s3 + $0x68] ss:$12 sps:$4 sm:$0xff]   ;;  %v10379_v34 = vld [vmem:[%s14862_s3 + $0xc4c] ss:$12 sps:$4 sm:$0xff]  }
  0xdf   : > { %3619 = vmatprep.subr.bf16.mxu1 %v10290_v35  ;;  %v10380_v35 = vld [vmem:[%s14862_s3 + $0x110] ss:$12 sps:$4 sm:$0xff]  }
  0xe1   : > { %3577 = vmatpush1.bf16.msra.mxu0 %v10285_v36  ;;  %v10377_v36 = vld [vmem:[%s14862_s3 + $0xc48] ss:$12 sps:$4 sm:$0xff]  }
  0xe2   : > { %3620 = vmatpush1.bf16.msra.mxu1 %v10288_v37  ;;  %3578 = vmatprep.subr.bf16.mxu0 %v10293_v38  ;;  %v10381_v37 = vld [vmem:[%s14862_s3 + $0x50] ss:$12 sps:$4 sm:$0xff]   ;;  %v10384_v38 = vld [vmem:[%s14862_s3 + $0xc34] ss:$12 sps:$4 sm:$0xff]  }
  0xe3   : > { %3621 = vmatprep.subr.bf16.mxu1 %v10296_v39  ;;  %v10385_v39 = vld [vmem:[%s14862_s3 + $0xf8] ss:$12 sps:$4 sm:$0xff]  }
  0xe5   : > { %3579 = vmatpush1.bf16.msra.mxu0 %v10291_v40  ;;  %v10382_v40 = vld [vmem:[%s14862_s3 + $0xc30] ss:$12 sps:$4 sm:$0xff]  }
  0xe6   : > { %3622 = vmatpush1.bf16.msra.mxu1 %v10294_v41  ;;  %3580 = vmatprep.subr.bf16.mxu0 %v10299_v42  ;;  %v10386_v41 = vld [vmem:[%s14862_s3 + $0x38] ss:$12 sps:$4 sm:$0xff]   ;;  %v10389_v42 = vld [vmem:[%s14862_s3 + $0xc1c] ss:$12 sps:$4 sm:$0xff]  }
  0xe7   : > { %3623 = vmatprep.subr.bf16.mxu1 %v10302_v43  ;;  %v10390_v43 = vld [vmem:[%s14862_s3 + $0xe0] ss:$12 sps:$4 sm:$0xff]  }
  0xe9   : > { %3581 = vmatpush1.bf16.msra.mxu0 %v10297_v44  ;;  %v10387_v44 = vld [vmem:[%s14862_s3 + $0xc18] ss:$12 sps:$4 sm:$0xff]  }
  0xea   : > { %3624 = vmatpush1.bf16.msra.mxu1 %v10300_v45  ;;  %3582 = vmatprep.subr.bf16.mxu0 %v10305_v46  ;;  %v10391_v45 = vld [vmem:[%s14862_s3 + $0x20] ss:$12 sps:$4 sm:$0xff]   ;;  %v10394_v46 = vld [vmem:[%s14862_s3 + $0xc04] ss:$12 sps:$4 sm:$0xff]  }
  0xeb   : > { %3625 = vmatprep.subr.bf16.mxu1 %v10308_v47  ;;  %v10395_v47 = vld [vmem:[%s14862_s3 + $0xc8] ss:$12 sps:$4 sm:$0xff]  }
  0xed   : > { %3583 = vmatpush2.bf16.msra.mxu0 %v10303_v48  ;;  %v10392_v48 = vld [vmem:[%s14862_s3 + $0xc00] ss:$12 sps:$4 sm:$0xff]  }
  0xee   : > { %3626 = vmatpush2.bf16.msra.mxu1 %v10306_v49  ;;  %3584 = vmatprep.subr.bf16.mxu0 %v10311_v50  ;;  %v10396_v49 = vld [vmem:[%s14862_s3 + $0x8] ss:$12 sps:$4 sm:$0xff]   ;;  %v10399_v50 = vld [vmem:[%s14862_s3 + $0xd6c] ss:$12 sps:$4 sm:$0xff]  }
  0xef   : > { %3627 = vmatprep.subr.bf16.mxu1 %v10314_v51  ;;  %v10400_v51 = vld [vmem:[%s14862_s3 + $0x2f0] ss:$12 sps:$4 sm:$0xff]  }
  0xf1   : > { %3585 = vmatpush2.bf16.msra.mxu0 %v10309_v52  ;;  %v10397_v52 = vld [vmem:[%s14862_s3 + $0xd68] ss:$12 sps:$4 sm:$0xff]  }
  0xf2   : > { %3628 = vmatpush2.bf16.msra.mxu1 %v10312_v53  ;;  %3586 = vmatprep.subr.bf16.mxu0 %v10317_v54  ;;  %v10401_v53 = vld [vmem:[%s14862_s3 + $0x230] ss:$12 sps:$4 sm:$0xff]   ;;  %v10404_v54 = vld [vmem:[%s14862_s3 + $0xd54] ss:$12 sps:$4 sm:$0xff]  }
  0xf3   : > { %3629 = vmatprep.subr.bf16.mxu1 %v10320_v55  ;;  %v10405_v55 = vld [vmem:[%s14862_s3 + $0x2d8] ss:$12 sps:$4 sm:$0xff]  }
  0xf5   : > { %3587 = vmatpush2.bf16.msra.mxu0 %v10315_v56  ;;  %v10402_v56 = vld [vmem:[%s14862_s3 + $0xd50] ss:$12 sps:$4 sm:$0xff]  }
  0xf6   : > { %3630 = vmatpush2.bf16.msra.mxu1 %v10318_v57  ;;  %3588 = vmatprep.subr.bf16.mxu0 %v10323_v58  ;;  %v11471_v57 = vld [vmem:[%s11693_s12] ss:$72 sps:$4 sm:$0xff]   ;;  %v10406_v58 = vld [vmem:[%s14862_s3 + $0x218] ss:$12 sps:$4 sm:$0xff]  }
  0xf7   : > { %3631 = vmatprep.subr.bf16.mxu1 %v10326_v59  ;;  %v10409_v59 = vld [vmem:[%s14862_s3 + $0xd3c] ss:$12 sps:$4 sm:$0xff]  }
  0xf9   : > { %3589 = vmatpush2.bf16.msra.mxu0 %v10321_v60  ;;  %v10410_v60 = vld [vmem:[%s14862_s3 + $0x2c0] ss:$12 sps:$4 sm:$0xff]  }
  0xfa   : > { %3632 = vmatpush2.bf16.msra.mxu1 %v10324_v61  ;;  %3590 = vmatprep.subr.bf16.mxu0 %v10329_v62  ;;  %v10407_v61 = vld [vmem:[%s14862_s3 + $0xd38] ss:$12 sps:$4 sm:$0xff]   ;;  %v11472_v62 = vld [vmem:[%s11693_s12 + $0xc] ss:$72 sps:$4 sm:$0xff]  }
  0xfb   : > { %3633 = vmatprep.subr.bf16.mxu1 %v10332_v63  ;;  %v10411_v63 = vld [vmem:[%s14862_s3 + $0x200] ss:$12 sps:$4 sm:$0xff]  }
  0xfd   : > { %3591 = vmatpush2.bf16.msra.mxu0 %v10327_v0  ;;  %v10414_v0 = vld [vmem:[%s14862_s3 + $0xd24] ss:$12 sps:$4 sm:$0xff]  }
  0xfe   : > { %3634 = vmatpush2.bf16.msra.mxu1 %v10330_v1  ;;  %3592 = vmatprep.subr.bf16.mxu0 %v10335_v2  ;;  %v10415_v1 = vld [vmem:[%s14862_s3 + $0x2a8] ss:$12 sps:$4 sm:$0xff]   ;;  %v10412_v2 = vld [vmem:[%s14862_s3 + $0xd20] ss:$12 sps:$4 sm:$0xff]  }
  0xff   : > { %3635 = vmatprep.subr.bf16.mxu1 %v10338_v3  ;;  %v10416_v3 = vld [vmem:[%s14862_s3 + $0x1e8] ss:$12 sps:$4 sm:$0xff]  }
 0x101   : > { %3593 = vmatpush2.bf16.msra.mxu0 %v10333_v4  ;;  %v10419_v4 = vld [vmem:[%s14862_s3 + $0xd0c] ss:$12 sps:$4 sm:$0xff]  }
 0x102   : > { %3636 = vmatpush2.bf16.msra.mxu1 %v10336_v5  ;;  %3594 = vmatprep.subr.bf16.mxu0 %v10341_v6  ;;  %v10420_v5 = vld [vmem:[%s14862_s3 + $0x290] ss:$12 sps:$4 sm:$0xff]   ;;  %v10417_v6 = vld [vmem:[%s14862_s3 + $0xd08] ss:$12 sps:$4 sm:$0xff]  }
 0x103   : > { %3637 = vmatprep.subr.bf16.mxu1 %v10344_v7  ;;  %v10421_v7 = vld [vmem:[%s14862_s3 + $0x1d0] ss:$12 sps:$4 sm:$0xff]  }
 0x105   : > { %3595 = vmatpush2.bf16.msra.mxu0 %v10339_v8  ;;  %v10424_v8 = vld [vmem:[%s14862_s3 + $0xcf4] ss:$12 sps:$4 sm:$0xff]  }
 0x106   : > { %3638 = vmatpush2.bf16.msra.mxu1 %v10342_v9  ;;  %3596 = vmatprep.subr.bf16.mxu0 %v10347_v10  ;;  %v10425_v9 = vld [vmem:[%s14862_s3 + $0x278] ss:$12 sps:$4 sm:$0xff]   ;;  %v10422_v10 = vld [vmem:[%s14862_s3 + $0xcf0] ss:$12 sps:$4 sm:$0xff]  }
 0x107   : > { %3639 = vmatprep.subr.bf16.mxu1 %v10350_v11  ;;  %v10426_v11 = vld [vmem:[%s14862_s3 + $0x1b8] ss:$12 sps:$4 sm:$0xff]  }
 0x109   : > { %3597 = vmatpush2.bf16.msra.mxu0 %v10345_v12  ;;  %v10429_v12 = vld [vmem:[%s14862_s3 + $0xcdc] ss:$12 sps:$4 sm:$0xff]  }
 0x10a   : > { %3640 = vmatpush2.bf16.msra.mxu1 %v10348_v13  ;;  %3652 = vmatprep.subr.bf16.mxu0 %v10359_v14  ;;  %v10430_v13 = vld [vmem:[%s14862_s3 + $0x260] ss:$12 sps:$4 sm:$0xff]   ;;  %v10427_v14 = vld [vmem:[%s14862_s3 + $0xcd8] ss:$12 sps:$4 sm:$0xff]  }
 0x10b   : > { %9741 = vmatprep.subr.bf16.mxu1 %v10360_v17  ;;  %v10435_v17 = vld [vmem:[%s14862_s3 + $0x248] ss:$12 sps:$4 sm:$0xff]  }
 0x10c   : > { %3599 = vmatmul.mubr.bf16.vlgmr.msra.gmra.mxu0 %v10351_v15  ;;  %v10431_v15 = vld [vmem:[%s14862_s3 + $0x1a0] ss:$12 sps:$4 sm:$0xff]  }
 0x10d   : > { %3642 = vmatmul.mubr.bf16.vlgmr.msra.gmra.mxu1 %v10354_v16  ;;  %3653 = vmatpush1.bf16.msra.mxu0 %v10357_v18  ;;  %v10434_v16 = vld [vmem:[%s14862_s3 + $0xcc4] ss:$12 sps:$4 sm:$0xff]   ;;  %v10432_v18 = vld [vmem:[%s14862_s3 + $0xcc0] ss:$12 sps:$4 sm:$0xff]  }
 0x10e   : > { %9742 = vmatpush3.bf16.msra.mxu1 %v10361_v19  ;;  %3654 = vmatprep.subr.bf16.mxu0 %v10364_v20  ;;  %v10436_v19 = vld [vmem:[%s14862_s3 + $0x188] ss:$12 sps:$4 sm:$0xff]   ;;  %v10440_v20 = vld [vmem:[%s14862_s3 + $0x470] ss:$12 sps:$4 sm:$0xff]  }
 0x10f   : > { %9743 = vmatprep.subr.bf16.mxu1 %v10365_v21  ;;  %3727 = vmatprep.mubr.bf16.mxu1 %v11470_v28  ;;  %v12544_v21 = vld [vmem:[%s11693_s12 + $0x40] ss:$72 sps:$4 sm:$0xff]  }
 0x110   : > { %3684 = vmatprep.mubr.bf16.mxu0 %v10439_v23  ;;  %v10442_v23 = vld [vmem:[%s14862_s3 + $0x3b0] ss:$12 sps:$4 sm:$0xff]  }
 0x111   : > { %3655 = vmatpush1.bf16.msra.mxu0 %v10362_v22  ;;  %v10441_v22 = vld [vmem:[%s14862_s3 + $0x5f0] ss:$12 sps:$4 sm:$0xff]  }
 0x112   : > { %9744 = vmatpush3.bf16.msra.mxu1 %v10366_v24  ;;  %3656 = vmatprep.subr.bf16.mxu0 %v10369_v25  ;;  %v10443_v24 = vld [vmem:[%s14862_s3 + $0x530] ss:$12 sps:$4 sm:$0xff]   ;;  %v10444_v25 = vld [vmem:[%s14862_s3 + $0x458] ss:$12 sps:$4 sm:$0xff]  }
 0x113   : > { %9745 = vmatprep.subr.bf16.mxu1 %v10370_v26  ;;  %v10445_v26 = vld [vmem:[%s14862_s3 + $0x5d8] ss:$12 sps:$4 sm:$0xff]   ;;  %v11473_v28 = vld [vmem:[%s11693_s12 + $0x8] ss:$72 sps:$4 sm:$0xff]  }
 0x115   : > { %3657 = vmatpush1.bf16.msra.mxu0 %v10367_v27  ;;  %v10446_v27 = vld [vmem:[%s14862_s3 + $0x398] ss:$12 sps:$4 sm:$0xff]  }
 0x116   : > { %9746 = vmatpush3.bf16.msra.mxu1 %v10371_v29  ;;  %3658 = vmatprep.subr.bf16.mxu0 %v10374_v30  ;;  %v10447_v29 = vld [vmem:[%s14862_s3 + $0x518] ss:$12 sps:$4 sm:$0xff]   ;;  %v10448_v30 = vld [vmem:[%s14862_s3 + $0x440] ss:$12 sps:$4 sm:$0xff]  }
 0x117   : > { %9747 = vmatprep.subr.bf16.mxu1 %v10375_v31  ;;  %v10449_v31 = vld [vmem:[%s14862_s3 + $0x5c0] ss:$12 sps:$4 sm:$0xff]  }
 0x119   : > { %3659 = vmatpush1.bf16.msra.mxu0 %v10372_v32  ;;  %v10450_v32 = vld [vmem:[%s14862_s3 + $0x380] ss:$12 sps:$4 sm:$0xff]  }
 0x11a   : > { %9748 = vmatpush3.bf16.msra.mxu1 %v10376_v33  ;;  %3660 = vmatprep.subr.bf16.mxu0 %v10379_v34  ;;  %v11474_v33 = vld [vmem:[%s11693_s12 + $0x14] ss:$72 sps:$4 sm:$0xff]  }
 0x11b   : > { %9749 = vmatprep.subr.bf16.mxu1 %v10380_v35  ;;  %v11475_v34 = vld [vmem:[%s11693_s12 + $0x1c] ss:$72 sps:$4 sm:$0xff]   ;;  %v10451_v35 = vld [vmem:[%s14862_s3 + $0x500] ss:$12 sps:$4 sm:$0xff]  }
 0x11d   : > { %3661 = vmatpush1.bf16.msra.mxu0 %v10377_v36  ;;  %v10452_v36 = vld [vmem:[%s14862_s3 + $0x428] ss:$12 sps:$4 sm:$0xff]  }
 0x11e   : > { %9750 = vmatpush3.bf16.msra.mxu1 %v10381_v37  ;;  %3662 = vmatprep.subr.bf16.mxu0 %v10384_v38  ;;  %v10453_v37 = vld [vmem:[%s14862_s3 + $0x5a8] ss:$12 sps:$4 sm:$0xff]  }
 0x11f   : > { %9751 = vmatprep.subr.bf16.mxu1 %v10385_v39  ;;  %v10454_v38 = vld [vmem:[%s14862_s3 + $0x368] ss:$12 sps:$4 sm:$0xff]  }
 0x120   : > { %v10455_v39 = vld [vmem:[%s14862_s3 + $0x4e8] ss:$12 sps:$4 sm:$0xff]  }
 0x121   : > { %3663 = vmatpush1.bf16.msra.mxu0 %v10382_v40  ;;  %v10456_v40 = vld [vmem:[%s14862_s3 + $0x410] ss:$12 sps:$4 sm:$0xff]  }
 0x122   : > { %9752 = vmatpush3.bf16.msra.mxu1 %v10386_v41  ;;  %3664 = vmatprep.subr.bf16.mxu0 %v10389_v42  ;;  %v10457_v41 = vld [vmem:[%s14862_s3 + $0x590] ss:$12 sps:$4 sm:$0xff]  }
 0x123   : > { %9753 = vmatprep.subr.bf16.mxu1 %v10390_v43  ;;  %v10458_v42 = vld [vmem:[%s14862_s3 + $0x350] ss:$12 sps:$4 sm:$0xff]  }
 0x124   : > { %v10459_v43 = vld [vmem:[%s14862_s3 + $0x4d0] ss:$12 sps:$4 sm:$0xff]  }
 0x125   : > { %3665 = vmatpush1.bf16.msra.mxu0 %v10387_v44  ;;  %v10460_v44 = vld [vmem:[%s14862_s3 + $0x3f8] ss:$12 sps:$4 sm:$0xff]  }
 0x126   : > { %9754 = vmatpush3.bf16.msra.mxu1 %v10391_v45  ;;  %3666 = vmatprep.subr.bf16.mxu0 %v10394_v46  ;;  %v10461_v45 = vld [vmem:[%s14862_s3 + $0x578] ss:$12 sps:$4 sm:$0xff]  }
 0x127   : > { %9755 = vmatprep.subr.bf16.mxu1 %v10395_v47  ;;  %v10462_v46 = vld [vmem:[%s14862_s3 + $0x338] ss:$12 sps:$4 sm:$0xff]  }
 0x128   : > { %v10463_v47 = vld [vmem:[%s14862_s3 + $0x4b8] ss:$12 sps:$4 sm:$0xff]  }
 0x129   : > { %3667 = vmatpush1.bf16.msra.mxu0 %v10392_v48  ;;  %v10464_v48 = vld [vmem:[%s14862_s3 + $0x3e0] ss:$12 sps:$4 sm:$0xff]  }
 0x12a   : > { %9756 = vmatpush3.bf16.msra.mxu1 %v10396_v49  ;;  %3668 = vmatprep.subr.bf16.mxu0 %v10399_v50  ;;  %v10465_v49 = vld [vmem:[%s14862_s3 + $0x560] ss:$12 sps:$4 sm:$0xff]  }
 0x12b   : > { %9763 = vmatprep.subr.bf16.mxu1 %v10400_v51  ;;  %v10466_v50 = vld [vmem:[%s14862_s3 + $0x320] ss:$12 sps:$4 sm:$0xff]  }
 0x12c   : > { %v10467_v51 = vld [vmem:[%s14862_s3 + $0x4a0] ss:$12 sps:$4 sm:$0xff]  }
 0x12d   : > { %3728 = vmatmul.mubr.bf16.vlgmr.msra.gmra.mxu1 %v11471_v57  ;;  %3669 = vmatpush2.bf16.msra.mxu0 %v10397_v52  ;;  %v10468_v52 = vld [vmem:[%s14862_s3 + $0x3c8] ss:$12 sps:$4 sm:$0xff]   ;;  %v10473_v57 = vld [vmem:[%s14862_s3 + $0x8f0] ss:$12 sps:$4 sm:$0xff]  }
 0x12e   : > { %9764 = vmatpush3.bf16.msra.mxu1 %v10401_v53  ;;  %3670 = vmatprep.subr.bf16.mxu0 %v10404_v54  ;;  %v10469_v53 = vld [vmem:[%s14862_s3 + $0x548] ss:$12 sps:$4 sm:$0xff]  }
 0x12f   : > { %9765 = vmatprep.subr.bf16.mxu1 %v10405_v55  ;;  %3768 = vmatprep.mubr.bf16.mxu1 %v11472_v62  ;;  %v10470_v54 = vld [vmem:[%s14862_s3 + $0x308] ss:$12 sps:$4 sm:$0xff]   ;;  %v11476_v62 = vld [vmem:[%s11693_s12 + $0x10] ss:$72 sps:$4 sm:$0xff]  }
 0x130   : > { %v10471_v55 = vld [vmem:[%s14862_s3 + $0x488] ss:$12 sps:$4 sm:$0xff]  }
 0x131   : > { %3671 = vmatpush2.bf16.msra.mxu0 %v10402_v56  ;;  %v10472_v56 = vld [vmem:[%s14862_s3 + $0x770] ss:$12 sps:$4 sm:$0xff]  }
 0x132   : > { %9766 = vmatpush3.bf16.msra.mxu1 %v10406_v58  ;;  %3672 = vmatprep.subr.bf16.mxu0 %v10409_v59  ;;  %v10474_v58 = vld [vmem:[%s14862_s3 + $0x6b0] ss:$12 sps:$4 sm:$0xff]  }
 0x133   : > { %9767 = vmatprep.subr.bf16.mxu1 %v10410_v60  ;;  %v10475_v59 = vld [vmem:[%s14862_s3 + $0x830] ss:$12 sps:$4 sm:$0xff]   ;;  %v10476_v60 = vld [vmem:[%s14862_s3 + $0x758] ss:$12 sps:$4 sm:$0xff]  }
 0x135   : > { %3673 = vmatpush2.bf16.msra.mxu0 %v10407_v61  ;;  %v10477_v61 = vld [vmem:[%s14862_s3 + $0x8d8] ss:$12 sps:$4 sm:$0xff]  }
 0x136   : > { %9768 = vmatpush3.bf16.msra.mxu1 %v10411_v63  ;;  %3674 = vmatprep.subr.bf16.mxu0 %v10414_v0  ;;  %v11477_v63 = vld [vmem:[%s11693_s12 + $0x18] ss:$72 sps:$4 sm:$0xff]  }
 0x137   : > { %9769 = vmatprep.subr.bf16.mxu1 %v10415_v1  ;;  %v10478_v0 = vld [vmem:[%s14862_s3 + $0x698] ss:$12 sps:$4 sm:$0xff]  }
 0x138   : > { %v10479_v1 = vld [vmem:[%s14862_s3 + $0x818] ss:$12 sps:$4 sm:$0xff]  }
 0x139   : > { %3675 = vmatpush2.bf16.msra.mxu0 %v10412_v2  ;;  %v10480_v2 = vld [vmem:[%s14862_s3 + $0x740] ss:$12 sps:$4 sm:$0xff]  }
 0x13a   : > { %9770 = vmatpush3.bf16.msra.mxu1 %v10416_v3  ;;  %3676 = vmatprep.subr.bf16.mxu0 %v10419_v4  ;;  %v10481_v3 = vld [vmem:[%s14862_s3 + $0x8c0] ss:$12 sps:$4 sm:$0xff]  }
 0x13b   : > { %9771 = vmatprep.subr.bf16.mxu1 %v10420_v5  ;;  %v11478_v4 = vld [vmem:[%s11693_s12 + $0x24] ss:$72 sps:$4 sm:$0xff]  }
 0x13c   : > { %v11479_v5 = vld [vmem:[%s11693_s12 + $0x2c] ss:$72 sps:$4 sm:$0xff]  }
 0x13d   : > { %3677 = vmatpush2.bf16.msra.mxu0 %v10417_v6  ;;  %v10482_v6 = vld [vmem:[%s14862_s3 + $0x680] ss:$12 sps:$4 sm:$0xff]  }
 0x13e   : > { %9772 = vmatpush3.bf16.msra.mxu1 %v10421_v7  ;;  %3678 = vmatprep.subr.bf16.mxu0 %v10424_v8  ;;  %v10483_v7 = vld [vmem:[%s14862_s3 + $0x800] ss:$12 sps:$4 sm:$0xff]   ;;  %v10484_v8 = vld [vmem:[%s14862_s3 + $0x728] ss:$12 sps:$4 sm:$0xff]  }
 0x13f   : > { %9773 = vmatprep.subr.bf16.mxu1 %v10425_v9  ;;  %v10485_v9 = vld [vmem:[%s14862_s3 + $0x8a8] ss:$12 sps:$4 sm:$0xff]  }
 0x141   : > { %3679 = vmatpush2.bf16.msra.mxu0 %v10422_v10  ;;  %v10486_v10 = vld [vmem:[%s14862_s3 + $0x668] ss:$12 sps:$4 sm:$0xff]  }
 0x142   : > { %9774 = vmatpush3.bf16.msra.mxu1 %v10426_v11  ;;  %3680 = vmatprep.subr.bf16.mxu0 %v10429_v12  ;;  %v10487_v11 = vld [vmem:[%s14862_s3 + $0x7e8] ss:$12 sps:$4 sm:$0xff]   ;;  %v10488_v12 = vld [vmem:[%s14862_s3 + $0x710] ss:$12 sps:$4 sm:$0xff]  }
 0x143   : > { %9775 = vmatprep.subr.bf16.mxu1 %v10430_v13  ;;  %v10489_v13 = vld [vmem:[%s14862_s3 + $0x890] ss:$12 sps:$4 sm:$0xff]  }
 0x145   : > { %3681 = vmatpush2.bf16.msra.mxu0 %v10427_v14  ;;  %v10490_v14 = vld [vmem:[%s14862_s3 + $0x650] ss:$12 sps:$4 sm:$0xff]  }
 0x146   : > { %9776 = vmatpush3.bf16.msra.mxu1 %v10431_v15  ;;  %3682 = vmatprep.subr.bf16.mxu0 %v10434_v16  ;;  %v10491_v15 = vld [vmem:[%s14862_s3 + $0x7d0] ss:$12 sps:$4 sm:$0xff]   ;;  %v10492_v16 = vld [vmem:[%s14862_s3 + $0x6f8] ss:$12 sps:$4 sm:$0xff]  }
 0x147   : > { %9777 = vmatprep.subr.bf16.mxu1 %v10435_v17  ;;  %v10493_v17 = vld [vmem:[%s14862_s3 + $0x878] ss:$12 sps:$4 sm:$0xff]  }
 0x149   : > { %3683 = vmatpush2.bf16.msra.mxu0 %v10432_v18  ;;  %v10494_v18 = vld [vmem:[%s14862_s3 + $0x638] ss:$12 sps:$4 sm:$0xff]  }
 0x14a   : > { %9778 = vmatpush3.bf16.msra.mxu1 %v10436_v19  ;;  %9785 = vmatprep.subr.bf16.mxu0 %v10440_v20  ;;  %v10495_v19 = vld [vmem:[%s14862_s3 + $0x7b8] ss:$12 sps:$4 sm:$0xff]   ;;  %v10496_v20 = vld [vmem:[%s14862_s3 + $0x6e0] ss:$12 sps:$4 sm:$0xff]  }
 0x14b   : > { %9807 = vmatprep.subr.bf16.mxu1 %v10441_v22  ;;  %v10497_v22 = vld [vmem:[%s14862_s3 + $0x860] ss:$12 sps:$4 sm:$0xff]  }
 0x14c   : > { %3685 = vmatmul.mubr.bf16.vlgmr.msra.gmra.mxu0 %v12544_v21 }
 0x14d   : > { %3769 = vmatmul.mubr.bf16.vlgmr.msra.gmra.mxu1 %v11473_v28  ;;  %9786 = vmatpush3.bf16.msra.mxu0 %v10442_v23  ;;  %v10498_v23 = vld [vmem:[%s14862_s3 + $0x620] ss:$12 sps:$4 sm:$0xff]   ;;  %v10503_v28 = vld [vmem:[%s14862_s3 + $0x788] ss:$12 sps:$4 sm:$0xff]  }
 0x14e   : > { %9808 = vmatpush3.bf16.msra.mxu1 %v10443_v24  ;;  %9787 = vmatprep.subr.bf16.mxu0 %v10444_v25  ;;  %v10499_v24 = vld [vmem:[%s14862_s3 + $0x7a0] ss:$12 sps:$4 sm:$0xff]   ;;  %v10500_v25 = vld [vmem:[%s14862_s3 + $0x6c8] ss:$12 sps:$4 sm:$0xff]  }
 0x14f   : > { %9809 = vmatprep.subr.bf16.mxu1 %v10445_v26  ;;  %3809 = vmatprep.mubr.bf16.mxu0 %v11474_v33  ;;  %v10501_v26 = vld [vmem:[%s14862_s3 + $0x848] ss:$12 sps:$4 sm:$0xff]   ;;  %v10508_v33 = vld [vmem:[%s14862_s3 + $0xa58] ss:$12 sps:$4 sm:$0xff]  }
 0x150   : > { %3850 = vmatprep.mubr.bf16.mxu1 %v11475_v34  ;;  %v10509_v34 = vld [vmem:[%s14862_s3 + $0xbd8] ss:$12 sps:$4 sm:$0xff]  }
 0x151   : > { %9788 = vmatpush3.bf16.msra.mxu0 %v10446_v27  ;;  %v10502_v27 = vld [vmem:[%s14862_s3 + $0x608] ss:$12 sps:$4 sm:$0xff]  }
 0x152   : > { %9810 = vmatpush3.bf16.msra.mxu1 %v10447_v29  ;;  %9789 = vmatprep.subr.bf16.mxu0 %v10448_v30  ;;  %v10504_v29 = vld [vmem:[%s14862_s3 + $0xa70] ss:$12 sps:$4 sm:$0xff]  }
 0x153   : > { %9811 = vmatprep.subr.bf16.mxu1 %v10449_v31  ;;  %v10505_v30 = vld [vmem:[%s14862_s3 + $0xbf0] ss:$12 sps:$4 sm:$0xff]  }
 0x154   : > { %v10506_v31 = vld [vmem:[%s14862_s3 + $0x9b0] ss:$12 sps:$4 sm:$0xff]  }
 0x155   : > { %9790 = vmatpush3.bf16.msra.mxu0 %v10450_v32  ;;  %v10507_v32 = vld [vmem:[%s14862_s3 + $0xb30] ss:$12 sps:$4 sm:$0xff]  }
 0x156   : > { %9812 = vmatpush3.bf16.msra.mxu1 %v10451_v35  ;;  %9791 = vmatprep.subr.bf16.mxu0 %v10452_v36  ;;  %v11480_v35 = vld [vmem:[%s11693_s12 + $0x20] ss:$72 sps:$4 sm:$0xff]  }
 0x157   : > { %9813 = vmatprep.subr.bf16.mxu1 %v10453_v37  ;;  %v11481_v36 = vld [vmem:[%s11693_s12 + $0x28] ss:$72 sps:$4 sm:$0xff]   ;;  %v10510_v37 = vld [vmem:[%s14862_s3 + $0x998] ss:$12 sps:$4 sm:$0xff]  }
 0x159   : > { %9792 = vmatpush3.bf16.msra.mxu0 %v10454_v38  ;;  %v10511_v38 = vld [vmem:[%s14862_s3 + $0xb18] ss:$12 sps:$4 sm:$0xff]  }
 0x15a   : > { %9814 = vmatpush3.bf16.msra.mxu1 %v10455_v39  ;;  %9793 = vmatprep.subr.bf16.mxu0 %v10456_v40  ;;  %v10512_v39 = vld [vmem:[%s14862_s3 + $0xa40] ss:$12 sps:$4 sm:$0xff]  }
 0x15b   : > { %9815 = vmatprep.subr.bf16.mxu1 %v10457_v41  ;;  %v10513_v40 = vld [vmem:[%s14862_s3 + $0xbc0] ss:$12 sps:$4 sm:$0xff]   ;;  %v11482_v41 = vld [vmem:[%s11693_s12 + $0x34] ss:$72 sps:$4 sm:$0xff]  }
 0x15d   : > { %9794 = vmatpush3.bf16.msra.mxu0 %v10458_v42  ;;  %v11483_v42 = vld [vmem:[%s11693_s12 + $0x3c] ss:$72 sps:$4 sm:$0xff]  }
 0x15e   : > { %9816 = vmatpush3.bf16.msra.mxu1 %v10459_v43  ;;  %9795 = vmatprep.subr.bf16.mxu0 %v10460_v44  ;;  %v10514_v43 = vld [vmem:[%s14862_s3 + $0x980] ss:$12 sps:$4 sm:$0xff]  }
 0x15f   : > { %9817 = vmatprep.subr.bf16.mxu1 %v10461_v45  ;;  %v10515_v44 = vld [vmem:[%s14862_s3 + $0xb00] ss:$12 sps:$4 sm:$0xff]   ;;  %v10516_v45 = vld [vmem:[%s14862_s3 + $0xa28] ss:$12 sps:$4 sm:$0xff]  }
 0x161   : > { %9796 = vmatpush3.bf16.msra.mxu0 %v10462_v46  ;;  %v10517_v46 = vld [vmem:[%s14862_s3 + $0xba8] ss:$12 sps:$4 sm:$0xff]  }
 0x162   : > { %9818 = vmatpush3.bf16.msra.mxu1 %v10463_v47  ;;  %9797 = vmatprep.subr.bf16.mxu0 %v10464_v48  ;;  %v10518_v47 = vld [vmem:[%s14862_s3 + $0x968] ss:$12 sps:$4 sm:$0xff]  }
 0x163   : > { %9819 = vmatprep.subr.bf16.mxu1 %v10465_v49  ;;  %v10519_v48 = vld [vmem:[%s14862_s3 + $0xae8] ss:$12 sps:$4 sm:$0xff]   ;;  %v10520_v49 = vld [vmem:[%s14862_s3 + $0xa10] ss:$12 sps:$4 sm:$0xff]  }
 0x165   : > { %9798 = vmatpush3.bf16.msra.mxu0 %v10466_v50  ;;  %v10521_v50 = vld [vmem:[%s14862_s3 + $0xb90] ss:$12 sps:$4 sm:$0xff]  }
 0x166   : > { %9820 = vmatpush3.bf16.msra.mxu1 %v10467_v51  ;;  %9799 = vmatprep.subr.bf16.mxu0 %v10468_v52  ;;  %v10522_v51 = vld [vmem:[%s14862_s3 + $0x950] ss:$12 sps:$4 sm:$0xff]  }
 0x167   : > { %9821 = vmatprep.subr.bf16.mxu1 %v10469_v53  ;;  %v10523_v52 = vld [vmem:[%s14862_s3 + $0xad0] ss:$12 sps:$4 sm:$0xff]   ;;  %v10524_v53 = vld [vmem:[%s14862_s3 + $0x9f8] ss:$12 sps:$4 sm:$0xff]  }
 0x169   : > { %9800 = vmatpush3.bf16.msra.mxu0 %v10470_v54  ;;  %v10525_v54 = vld [vmem:[%s14862_s3 + $0xb78] ss:$12 sps:$4 sm:$0xff]  }
 0x16a   : > { %9822 = vmatpush3.bf16.msra.mxu1 %v10471_v55  ;;  %9829 = vmatprep.subr.bf16.mxu0 %v10472_v56  ;;  %v10526_v55 = vld [vmem:[%s14862_s3 + $0x938] ss:$12 sps:$4 sm:$0xff]  }
 0x16b   : > { %9851 = vmatprep.subr.bf16.mxu1 %v10473_v57  ;;  %v10527_v56 = vld [vmem:[%s14862_s3 + $0xab8] ss:$12 sps:$4 sm:$0xff]   ;;  %v10528_v57 = vld [vmem:[%s14862_s3 + $0x9e0] ss:$12 sps:$4 sm:$0xff]  }
 0x16c   : > { %3810 = vmatmul.mubr.bf16.vlgmr.msra.gmra.mxu0 %v11476_v62  ;;  %v10533_v62 = vld [vmem:[%s14862_s3 + $0xb48] ss:$12 sps:$4 sm:$0xff]  }
 0x16d   : > { %3851 = vmatmul.mubr.bf16.vlgmr.msra.gmra.mxu1 %v11477_v63  ;;  %9830 = vmatpush3.bf16.msra.mxu0 %v10474_v58  ;;  %v10529_v58 = vld [vmem:[%s14862_s3 + $0xb60] ss:$12 sps:$4 sm:$0xff]   ;;  %v10534_v63 = vld [vmem:[%s14862_s3 + $0x908] ss:$12 sps:$4 sm:$0xff]  }
 0x16e   : > { %9852 = vmatpush3.bf16.msra.mxu1 %v10475_v59  ;;  %9831 = vmatprep.subr.bf16.mxu0 %v10476_v60  ;;  %v10530_v59 = vld [vmem:[%s14862_s3 + $0x920] ss:$12 sps:$4 sm:$0xff]  }
 0x16f   : > { %9853 = vmatprep.subr.bf16.mxu1 %v10477_v61  ;;  %3891 = vmatprep.mubr.bf16.mxu0 %v11478_v4  ;;  %v10531_v60 = vld [vmem:[%s14862_s3 + $0xaa0] ss:$12 sps:$4 sm:$0xff]   ;;  %v10532_v61 = vld [vmem:[%s14862_s3 + $0x9c8] ss:$12 sps:$4 sm:$0xff]   ;;  %v10540_v4 = vld [vmem:[%s14862_s3 + $0xcb0] ss:$12 sps:$4 sm:$0xff]  }
 0x170   : > { %3932 = vmatprep.mubr.bf16.mxu1 %v11479_v5  ;;  %v10541_v5 = vld [vmem:[%s14862_s3 + $0xd58] ss:$12 sps:$4 sm:$0xff]  }
 0x171   : > { %9832 = vmatpush3.bf16.msra.mxu0 %v10478_v0  ;;  %v10535_v0 = vld [vmem:[%s14862_s3 + $0xa88] ss:$12 sps:$4 sm:$0xff]  }
 0x172   : > { %9854 = vmatpush3.bf16.msra.mxu1 %v10479_v1  ;;  %9833 = vmatprep.subr.bf16.mxu0 %v10480_v2  ;;  %v10536_v1 = vld [vmem:[%s14862_s3 + $0xd70] ss:$12 sps:$4 sm:$0xff]  }
 0x173   : > { %9855 = vmatprep.subr.bf16.mxu1 %v10481_v3  ;;  %v10539_v2 = vld [vmem:[%s14863_s4 + $0x74] ss:$8 sps:$4 sm:$0xff]   ;;  %v10537_v3 = vld [vmem:[%s14863_s4 + $0x70] ss:$8 sps:$4 sm:$0xff]  }
 0x175   : > { %9834 = vmatpush3.bf16.msra.mxu0 %v10482_v6  ;;  %v10544_v6 = vld [vmem:[%s14863_s4 + $0x64] ss:$8 sps:$4 sm:$0xff]  }
 0x176   : > { %9856 = vmatpush3.bf16.msra.mxu1 %v10483_v7  ;;  %9835 = vmatprep.subr.bf16.mxu0 %v10484_v8  ;;  %v10626_v7 = vld [vmem:[%s12747_s8 + $0x4] ss:$72 sps:$4 sm:$0xff]   ;;  %v11484_v8 = vld [vmem:[%s11693_s12 + $0x30] ss:$72 sps:$4 sm:$0xff]  }
 0x177   : > { %9857 = vmatprep.subr.bf16.mxu1 %v10485_v9  ;;  %v11485_v9 = vld [vmem:[%s11693_s12 + $0x38] ss:$72 sps:$4 sm:$0xff]  }
 0x179   : > { %9836 = vmatpush3.bf16.msra.mxu0 %v10486_v10  ;;  %v10542_v10 = vld [vmem:[%s14863_s4 + $0x60] ss:$8 sps:$4 sm:$0xff]  }
 0x17a   : > { %9858 = vmatpush3.bf16.msra.mxu1 %v10487_v11  ;;  %9837 = vmatprep.subr.bf16.mxu0 %v10488_v12  ;;  %v10545_v11 = vld [vmem:[%s14862_s3 + $0xc98] ss:$12 sps:$4 sm:$0xff]   ;;  %v10546_v12 = vld [vmem:[%s14862_s3 + $0xd40] ss:$12 sps:$4 sm:$0xff]  }
 0x17b   : > { %9859 = vmatprep.subr.bf16.mxu1 %v10489_v13  ;;  %v10549_v13 = vld [vmem:[%s14863_s4 + $0x54] ss:$8 sps:$4 sm:$0xff]  }
 0x17d   : > { %9838 = vmatpush3.bf16.msra.mxu0 %v10490_v14  ;;  %v11486_v14 = vld [vmem:[%s11693_s12 + $0x44] ss:$72 sps:$4 sm:$0xff]  }
 0x17e   : > { %9860 = vmatpush3.bf16.msra.mxu1 %v10491_v15  ;;  %9839 = vmatprep.subr.bf16.mxu0 %v10492_v16  ;;  %v10547_v15 = vld [vmem:[%s14863_s4 + $0x50] ss:$8 sps:$4 sm:$0xff]   ;;  %v10550_v16 = vld [vmem:[%s14862_s3 + $0xc80] ss:$12 sps:$4 sm:$0xff]  }
 0x17f   : > { %9861 = vmatprep.subr.bf16.mxu1 %v10493_v17  ;;  %v10551_v17 = vld [vmem:[%s14862_s3 + $0xd28] ss:$12 sps:$4 sm:$0xff]  }
 0x181   : > { %9840 = vmatpush3.bf16.msra.mxu0 %v10494_v18  ;;  %v10554_v18 = vld [vmem:[%s14863_s4 + $0x44] ss:$8 sps:$4 sm:$0xff]  }
 0x182   : > { %9862 = vmatpush3.bf16.msra.mxu1 %v10495_v19  ;;  %9841 = vmatprep.subr.bf16.mxu0 %v10496_v20  ;;  %v10552_v19 = vld [vmem:[%s14863_s4 + $0x40] ss:$8 sps:$4 sm:$0xff]  }
 0x183   : > { %9863 = vmatprep.subr.bf16.mxu1 %v10497_v22  ;;  %v10555_v20 = vld [vmem:[%s14862_s3 + $0xc68] ss:$12 sps:$4 sm:$0xff]   ;;  %v10556_v22 = vld [vmem:[%s14862_s3 + $0xd10] ss:$12 sps:$4 sm:$0xff]  }
 0x185   : > { %9842 = vmatpush3.bf16.msra.mxu0 %v10498_v23  ;;  %v10559_v23 = vld [vmem:[%s14863_s4 + $0x34] ss:$8 sps:$4 sm:$0xff]  }
 0x186   : > { %9864 = vmatpush3.bf16.msra.mxu1 %v10499_v24  ;;  %9843 = vmatprep.subr.bf16.mxu0 %v10500_v25  ;;  %v10557_v24 = vld [vmem:[%s14863_s4 + $0x30] ss:$8 sps:$4 sm:$0xff]  }
 0x187   : > { %9865 = vmatprep.subr.bf16.mxu1 %v10501_v26  ;;  %v10560_v25 = vld [vmem:[%s14862_s3 + $0xc50] ss:$12 sps:$4 sm:$0xff]   ;;  %v10561_v26 = vld [vmem:[%s14862_s3 + $0xcf8] ss:$12 sps:$4 sm:$0xff]  }
 0x189   : > { %9844 = vmatpush3.bf16.msra.mxu0 %v10502_v27  ;;  %v10564_v27 = vld [vmem:[%s14863_s4 + $0x24] ss:$8 sps:$4 sm:$0xff]  }
 0x18a   : > { %9866 = vmatpush3.bf16.msra.mxu1 %v10503_v28  ;;  %9873 = vmatprep.subr.bf16.mxu0 %v10504_v29  ;;  %v10562_v28 = vld [vmem:[%s14863_s4 + $0x20] ss:$8 sps:$4 sm:$0xff]   ;;  %v10565_v29 = vld [vmem:[%s14862_s3 + $0xc38] ss:$12 sps:$4 sm:$0xff]  }
 0x18b   : > { %9895 = vmatprep.subr.bf16.mxu1 %v10505_v30  ;;  %v10566_v30 = vld [vmem:[%s14862_s3 + $0xce0] ss:$12 sps:$4 sm:$0xff]  }
 0x18c   : > { %3892 = vmatmul.mubr.bf16.vlgmr.msra.gmra.mxu0 %v11480_v35  ;;  %v10574_v35 = vld [vmem:[%s14863_s4 + $0x4] ss:$8 sps:$4 sm:$0xff]  }
 0x18d   : > { %3933 = vmatmul.mubr.bf16.vlgmr.msra.gmra.mxu1 %v11481_v36  ;;  %9874 = vmatpush3.bf16.msra.mxu0 %v10506_v31  ;;  %v10569_v31 = vld [vmem:[%s14863_s4 + $0x14] ss:$8 sps:$4 sm:$0xff]   ;;  %v10572_v36 = vld [vmem:[%s14863_s4] ss:$8 sps:$4 sm:$0xff]  }
 0x18e   : > { %9896 = vmatpush3.bf16.msra.mxu1 %v10507_v32  ;;  %9875 = vmatprep.subr.bf16.mxu0 %v10508_v33  ;;  %v10567_v32 = vld [vmem:[%s14863_s4 + $0x10] ss:$8 sps:$4 sm:$0xff]   ;;  %v10570_v33 = vld [vmem:[%s14862_s3 + $0xc20] ss:$12 sps:$4 sm:$0xff]  }
 0x18f   : > { %9897 = vmatprep.subr.bf16.mxu1 %v10509_v34  ;;  %3973 = vmatprep.mubr.bf16.mxu0 %v11482_v41  ;;  %v10571_v34 = vld [vmem:[%s14862_s3 + $0xcc8] ss:$12 sps:$4 sm:$0xff]   ;;  %v10579_v41 = vld [vmem:[%s14863_s4 + $0x170] ss:$8 sps:$4 sm:$0xff]  }
 0x190   : > { %4014 = vmatprep.mubr.bf16.mxu1 %v11483_v42  ;;  %v10584_v42 = vld [vmem:[%s14863_s4 + $0xe4] ss:$8 sps:$4 sm:$0xff]  }
 0x191   : > { %9876 = vmatpush3.bf16.msra.mxu0 %v10510_v37  ;;  %v10575_v37 = vld [vmem:[%s14862_s3 + $0xc08] ss:$12 sps:$4 sm:$0xff]  }
 0x192   : > { %9898 = vmatpush3.bf16.msra.mxu1 %v10511_v38  ;;  %9877 = vmatprep.subr.bf16.mxu0 %v10512_v39  ;;  %v10578_v38 = vld [vmem:[%s14863_s4 + $0xf4] ss:$8 sps:$4 sm:$0xff]  }
 0x193   : > { %9899 = vmatprep.subr.bf16.mxu1 %v10513_v40  ;;  %v10581_v39 = vld [vmem:[%s14863_s4 + $0x174] ss:$8 sps:$4 sm:$0xff]   ;;  %v10576_v40 = vld [vmem:[%s14863_s4 + $0xf0] ss:$8 sps:$4 sm:$0xff]  }
 0x195   : > { %9878 = vmatpush3.bf16.msra.mxu0 %v10514_v43  ;;  %v10587_v43 = vld [vmem:[%s14863_s4 + $0x164] ss:$8 sps:$4 sm:$0xff]  }
 0x196   : > { %9900 = vmatpush3.bf16.msra.mxu1 %v10515_v44  ;;  %9879 = vmatprep.subr.bf16.mxu0 %v10516_v45  ;;  %v10582_v44 = vld [vmem:[%s14863_s4 + $0xe0] ss:$8 sps:$4 sm:$0xff]   ;;  %v10677_v45 = vld [vmem:[%s12747_s8 + $0xc] ss:$72 sps:$4 sm:$0xff]  }
 0x197   : > { %9901 = vmatprep.subr.bf16.mxu1 %v10517_v46  ;;  %v10585_v46 = vld [vmem:[%s14863_s4 + $0x160] ss:$8 sps:$4 sm:$0xff]  }
 0x199   : > { %9880 = vmatpush3.bf16.msra.mxu0 %v10518_v47  ;;  %v10590_v47 = vld [vmem:[%s14863_s4 + $0xd4] ss:$8 sps:$4 sm:$0xff]  }
 0x19a   : > { %9902 = vmatpush3.bf16.msra.mxu1 %v10519_v48  ;;  %9881 = vmatprep.subr.bf16.mxu0 %v10520_v49  ;;  %v10593_v48 = vld [vmem:[%s14863_s4 + $0x154] ss:$8 sps:$4 sm:$0xff]   ;;  %v10591_v49 = vld [vmem:[%s14863_s4 + $0x150] ss:$8 sps:$4 sm:$0xff]  }
 0x19b   : > { %9903 = vmatprep.subr.bf16.mxu1 %v10521_v50  ;;  %v10596_v50 = vld [vmem:[%s14863_s4 + $0xc4] ss:$8 sps:$4 sm:$0xff]  }
 0x19d   : > { %9882 = vmatpush3.bf16.msra.mxu0 %v10522_v51  ;;  %v10599_v51 = vld [vmem:[%s14863_s4 + $0x144] ss:$8 sps:$4 sm:$0xff]  }
 0x19e   : > { %9904 = vmatpush3.bf16.msra.mxu1 %v10523_v52  ;;  %9883 = vmatprep.subr.bf16.mxu0 %v10524_v53  ;;  %v10594_v52 = vld [vmem:[%s14863_s4 + $0xc0] ss:$8 sps:$4 sm:$0xff]  }
 0x19f   : > { %9905 = vmatprep.subr.bf16.mxu1 %v10525_v54  ;;  %v10597_v53 = vld [vmem:[%s14863_s4 + $0x140] ss:$8 sps:$4 sm:$0xff]   ;;  %v12999_v54 = vpop.f32.mrf.mxu0 }
 0x1a1   : > { %9884 = vmatpush3.bf16.msra.mxu0 %v10526_v55  ;;  %v10602_v55 = vld [vmem:[%s14863_s4 + $0xb4] ss:$8 sps:$4 sm:$0xff]  }
 0x1a2   : > { %9906 = vmatpush3.bf16.msra.mxu1 %v10527_v56  ;;  %9885 = vmatprep.subr.bf16.mxu0 %v10528_v57  ;;  %v10605_v56 = vld [vmem:[%s14863_s4 + $0x134] ss:$8 sps:$4 sm:$0xff]   ;;  %v13007_v57 = vpop.f32.mrf.mxu1 }
 0x1a3   : > { %9907 = vmatprep.subr.bf16.mxu1 %v10529_v58  ;;  %v13009_v58 = vpop.f32.mrf.mxu0 }
 0x1a5   : > { %9886 = vmatpush3.bf16.msra.mxu0 %v10530_v59  ;;  %v10600_v59 = vld [vmem:[%s14863_s4 + $0xb0] ss:$8 sps:$4 sm:$0xff]  }
 0x1a6   : > { %9908 = vmatpush3.bf16.msra.mxu1 %v10531_v60  ;;  %9887 = vmatprep.subr.bf16.mxu0 %v10532_v61  ;;  %v10603_v60 = vld [vmem:[%s14863_s4 + $0x130] ss:$8 sps:$4 sm:$0xff]   ;;  %v10608_v61 = vld [vmem:[%s14863_s4 + $0xa4] ss:$8 sps:$4 sm:$0xff]  }
 0x1a7   : > { %9909 = vmatprep.subr.bf16.mxu1 %v10533_v62  ;;  %v10611_v62 = vld [vmem:[%s14863_s4 + $0x124] ss:$8 sps:$4 sm:$0xff]  }
 0x1a9   : > { %9888 = vmatpush3.bf16.msra.mxu0 %v10534_v63  ;;  %v13023_v63 = vpop.f32.mrf.mxu1 }
 0x1aa   : > { %9910 = vmatpush3.bf16.msra.mxu1 %v10535_v0  ;;  %9917 = vmatprep.subr.bf16.mxu0 %v10536_v1  ;;  %v13025_v0 = vpop.f32.mrf.mxu0  ;;  %v10606_v1 = vld [vmem:[%s14863_s4 + $0xa0] ss:$8 sps:$4 sm:$0xff]  }
 0x1ab   : > { %5900 = vmatprep.subr.bf16.mxu1 %v10539_v2  ;;  %v10609_v2 = vld [vmem:[%s14863_s4 + $0x120] ss:$8 sps:$4 sm:$0xff]  }
 0x1ac   : > { %3974 = vmatmul.mubr.bf16.vlgmr.msra.gmra.mxu0 %v11484_v8  ;;  %v10615_v8 = vld [vmem:[%s14863_s4 + $0x110] ss:$8 sps:$4 sm:$0xff]  }
 0x1ad   : > { %4015 = vmatmul.mubr.bf16.vlgmr.msra.gmra.mxu1 %v11485_v9  ;;  %9918 = vmatpush3.bf16.msra.mxu0 %v10540_v4  ;;  %v10617_v4 = vld [vmem:[%s14863_s4 + $0x114] ss:$8 sps:$4 sm:$0xff]  }
 0x1ae   : > { %5901 = vmatpush1.bf16.msra.mxu1 %v10537_v3  ;;  %9919 = vmatprep.subr.bf16.mxu0 %v10541_v5  ;;  %v10614_v3 = vld [vmem:[%s14863_s4 + $0x94] ss:$8 sps:$4 sm:$0xff]   ;;  %v13039_v5 = vpop.f32.mrf.mxu1 }
 0x1af   : > { %5902 = vmatprep.subr.bf16.mxu1 %v10544_v6  ;;  %4055 = vmatprep.mubr.bf16.mxu0 %v11486_v14  ;;  %v13041_v6 = vpop.f32.mrf.mxu0  ;;  %v10621_v14 = vld [vmem:[%s14863_s4 + $0x100] ss:$8 sps:$4 sm:$0xff]  }
 0x1b0   : > { %5932 = vmatprep.mubr.bf16.mxu1 %v10626_v7  ;;  %v10612_v7 = vld [vmem:[%s14863_s4 + $0x90] ss:$8 sps:$4 sm:$0xff]  }
 0x1b1   : > { %9920 = vmatpush3.bf16.msra.mxu0 %v10545_v11  ;;  %v13049_v9 = vpop.f32.mrf.mxu0  ;;  %v10623_v11 = vld [vmem:[%s14863_s4 + $0x104] ss:$8 sps:$4 sm:$0xff]  }
 0x1b2   : > { %5903 = vmatpush1.bf16.msra.mxu1 %v10542_v10  ;;  %9921 = vmatprep.subr.bf16.mxu0 %v10546_v12  ;;  %v10620_v10 = vld [vmem:[%s14863_s4 + $0x84] ss:$8 sps:$4 sm:$0xff]   ;;  %v13057_v12 = vpop.f32.mrf.mxu1 }
 0x1b3   : > { %5904 = vmatprep.subr.bf16.mxu1 %v10549_v13  ;;  %v10618_v13 = vld [vmem:[%s14863_s4 + $0x80] ss:$8 sps:$4 sm:$0xff]  }
 0x1b5   : > { %9922 = vmatpush3.bf16.msra.mxu0 %v10550_v16  ;;  %v13067_v16 = vpop.f32.mrf.mxu1 }
 0x1b6   : > { %5905 = vmatpush1.bf16.msra.mxu1 %v10547_v15  ;;  %9923 = vmatprep.subr.bf16.mxu0 %v10551_v17  ;;  %v13065_v15 = vpop.f32.mrf.mxu0  ;;  %v10624_v17 = vld [vmem:[%s12747_s8] ss:$72 sps:$4 sm:$0xff]  }
 0x1b7   : > { %5906 = vmatprep.subr.bf16.mxu1 %v10554_v18  ;;  %v10629_v18 = vld [vmem:[%s14863_s4 + $0x1f4] ss:$8 sps:$4 sm:$0xff]  }
 0x1b9   : > { %9924 = vmatpush3.bf16.msra.mxu0 %v10555_v20  ;;  %v10627_v20 = vld [vmem:[%s14863_s4 + $0x1f0] ss:$8 sps:$4 sm:$0xff]  }
 0x1ba   : > { %5907 = vmatpush1.bf16.msra.mxu1 %v10552_v19  ;;  %9925 = vmatprep.subr.bf16.mxu0 %v10556_v22  ;;  %v10632_v19 = vld [vmem:[%s14863_s4 + $0x274] ss:$8 sps:$4 sm:$0xff]   ;;  %v10630_v22 = vld [vmem:[%s14863_s4 + $0x270] ss:$8 sps:$4 sm:$0xff]  }
 0x1bb   : > { %5908 = vmatprep.subr.bf16.mxu1 %v10559_v23  ;;  %v13082_v23 = vpop.f32.mrf.mxu0 }
 0x1bd   : > { %9926 = vmatpush3.bf16.msra.mxu0 %v10560_v25  ;;  %v10635_v25 = vld [vmem:[%s14863_s4 + $0x1e4] ss:$8 sps:$4 sm:$0xff]  }
 0x1be   : > { %5909 = vmatpush1.bf16.msra.mxu1 %v10557_v24  ;;  %9927 = vmatprep.subr.bf16.mxu0 %v10561_v26  ;;  %v13084_v24 = vpop.f32.mrf.mxu1  ;;  %v10638_v26 = vld [vmem:[%s14863_s4 + $0x264] ss:$8 sps:$4 sm:$0xff]  }
 0x1bf   : > { %5910 = vmatprep.subr.bf16.mxu1 %v10564_v27  ;;  %v10633_v27 = vld [vmem:[%s14863_s4 + $0x1e0] ss:$8 sps:$4 sm:$0xff]  }
 0x1c1   : > { %9928 = vmatpush3.bf16.msra.mxu0 %v10565_v29  ;;  %v10728_v29 = vld [vmem:[%s12747_s8 + $0x14] ss:$72 sps:$4 sm:$0xff]  }
 0x1c2   : > { %5911 = vmatpush1.bf16.msra.mxu1 %v10562_v28  ;;  %9929 = vmatprep.subr.bf16.mxu0 %v10566_v30  ;;  %v10636_v28 = vld [vmem:[%s14863_s4 + $0x260] ss:$8 sps:$4 sm:$0xff]   ;;  %v3434_v30 = vpop.f32.mrf.mxu0 }
 0x1c3   : > { %5912 = vmatprep.subr.bf16.mxu1 %v10569_v31  ;;  %v13099_v31 = vpop.f32.mrf.mxu1 }
 0x1c5   : > { %9930 = vmatpush3.bf16.msra.mxu0 %v10570_v33  ;;  %v10644_v33 = vld [vmem:[%s14863_s4 + $0x254] ss:$8 sps:$4 sm:$0xff]  }
 0x1c6   : > { %5913 = vmatpush1.bf16.msra.mxu1 %v10567_v32  ;;  %9931 = vmatprep.subr.bf16.mxu0 %v10571_v34  ;;  %v10641_v32 = vld [vmem:[%s14863_s4 + $0x1d4] ss:$8 sps:$4 sm:$0xff]   ;;  %v10639_v34 = vld [vmem:[%s14863_s4 + $0x1d0] ss:$8 sps:$4 sm:$0xff]  }
 0x1c7   : > { %5914 = vmatprep.subr.bf16.mxu1 %v10574_v35  ;;  %v10642_v35 = vld [vmem:[%s14863_s4 + $0x250] ss:$8 sps:$4 sm:$0xff]  }
 0x1c9   : > { %9932 = vmatpush3.bf16.msra.mxu0 %v10575_v37  ;;  %v3477_v37 = vpop.f32.mrf.mxu1 }
 0x1ca   : > { %5915 = vmatpush1.bf16.msra.mxu1 %v10572_v36  ;;  %5943 = vmatprep.subr.bf16.mxu0 %v10581_v39  ;;  %v3514_v36 = vpop.f32.mrf.mxu0  ;;  %v10650_v39 = vld [vmem:[%s14863_s4 + $0x244] ss:$8 sps:$4 sm:$0xff]  }
 0x1cb   : > { %5916 = vmatprep.subr.bf16.mxu1 %v10578_v38  ;;  %v10647_v38 = vld [vmem:[%s14863_s4 + $0x1c4] ss:$8 sps:$4 sm:$0xff]  }
 0x1cc   : > { %4056 = vmatmul.mubr.bf16.vlgmr.msra.gmra.mxu0 %v12544_v21  ;;  %v10588_v21 = vld [vmem:[%s14863_s4 + $0xd0] ss:$8 sps:$4 sm:$0xff]  }
 0x1cd   : > { %5944 = vmatpush1.bf16.msra.mxu0 %v10579_v41  ;;  %5975 = vmatprep.mubr.bf16.mxu0 %v10677_v45  ;;  %v10648_v41 = vld [vmem:[%s14863_s4 + $0x240] ss:$8 sps:$4 sm:$0xff]   ;;  %v10656_v45 = vld [vmem:[%s14863_s4 + $0x234] ss:$8 sps:$4 sm:$0xff]  }
 0x1ce   : > { %5917 = vmatpush2.bf16.msra.mxu1 %v10576_v40  ;;  %5945 = vmatprep.subr.bf16.mxu0 %v10587_v43  ;;  %v10645_v40 = vld [vmem:[%s14863_s4 + $0x1c0] ss:$8 sps:$4 sm:$0xff]   ;;  %v3557_v43 = vpop.f32.mrf.mxu1 }
 0x1cf   : > { %5918 = vmatprep.subr.bf16.mxu1 %v10584_v42  ;;  %v3516_v42 = vpop.f32.mrf.mxu0 }
 0x1d1   : > { %5946 = vmatpush1.bf16.msra.mxu0 %v10585_v46  ;;  %v3518_v46 = vpop.f32.mrf.mxu0 }
 0x1d2   : > { %5919 = vmatpush2.bf16.msra.mxu1 %v10582_v44  ;;  %5947 = vmatprep.subr.bf16.mxu0 %v10593_v48  ;;  %v10653_v44 = vld [vmem:[%s14863_s4 + $0x1b4] ss:$8 sps:$4 sm:$0xff]   ;;  %v3386_v48 = vadd.f32 %v13007_v57, %v12999_v54 }
 0x1d3   : > { %5920 = vmatprep.subr.bf16.mxu1 %v10590_v47  ;;  %v3559_v47 = vpop.f32.mrf.mxu1  ;;  %v3520_v54 = vpop.f32.mrf.mxu0 }
 0x1d5   : > { %5948 = vmatpush1.bf16.msra.mxu0 %v10591_v49  ;;  %v10654_v49 = vld [vmem:[%s14863_s4 + $0x230] ss:$8 sps:$4 sm:$0xff]  }
 0x1d6   : > { %5921 = vmatpush2.bf16.msra.mxu1 %v10588_v21  ;;  %5949 = vmatprep.subr.bf16.mxu0 %v10599_v51  ;;  %v10651_v21 = vld [vmem:[%s14863_s4 + $0x1b0] ss:$8 sps:$4 sm:$0xff]   ;;  %v10662_v51 = vld [vmem:[%s14863_s4 + $0x224] ss:$8 sps:$4 sm:$0xff]  }
 0x1d7   : > { %5922 = vmatprep.subr.bf16.mxu1 %v10596_v50  ;;  %v10659_v50 = vld [vmem:[%s14863_s4 + $0x1a4] ss:$8 sps:$4 sm:$0xff]  }
 0x1d9   : > { %5950 = vmatpush1.bf16.msra.mxu0 %v10597_v53  ;;  %v3429_v53 = vadd.f32 %v13049_v9, %v3386_v48 }
 0x1da   : > { %5923 = vmatpush2.bf16.msra.mxu1 %v10594_v52  ;;  %5951 = vmatprep.subr.bf16.mxu0 %v10605_v56  ;;  %v3388_v52 = vadd.f32 %v13023_v63, %v13009_v58  ;;  %v3390_v56 = vadd.f32 %v13039_v5, %v13025_v0  ;;  %v3600_v58 = vpop.f32.mrf.mxu0  ;;  %v3392_v63 = vadd.f32 %v13057_v12, %v13041_v6  ;;  %v10666_v6 = vld [vmem:[%s14863_s4 + $0x210] ss:$8 sps:$4 sm:$0xff]   ;;  %v10674_v12 = vld [vmem:[%s14863_s4 + $0x204] ss:$8 sps:$4 sm:$0xff]  }
 0x1db   : > { %5924 = vmatprep.subr.bf16.mxu1 %v10602_v55  ;;  %v3561_v55 = vpop.f32.mrf.mxu1  ;;  %v3472_v0 = vadd.f32 %v13067_v16, %v3429_v53 }
 0x1dc   : > { %v3431_v57 = vadd.f32 %v13065_v15, %v3388_v52  ;;  %v3435_v5 = vadd.f32 %v3434_v30, %v3392_v63  ;;  %v3602_v9 = vpop.f32.mrf.mxu0 }
 0x1dd   : > { %5952 = vmatpush1.bf16.msra.mxu0 %v10603_v60  ;;  %v10660_v60 = vld [vmem:[%s14863_s4 + $0x220] ss:$8 sps:$4 sm:$0xff]  }
 0x1de   : > { %5925 = vmatpush2.bf16.msra.mxu1 %v10600_v59  ;;  %5953 = vmatprep.subr.bf16.mxu0 %v10611_v62  ;;  %v10657_v59 = vld [vmem:[%s14863_s4 + $0x1a0] ss:$8 sps:$4 sm:$0xff]   ;;  %v10668_v62 = vld [vmem:[%s14863_s4 + $0x214] ss:$8 sps:$4 sm:$0xff]   ;;  %v3478_v16 = vadd.f32 %v3477_v37, %v3435_v5 }
 0x1df   : > { %5926 = vmatprep.subr.bf16.mxu1 %v10608_v61  ;;  %v10665_v61 = vld [vmem:[%s14863_s4 + $0x194] ss:$8 sps:$4 sm:$0xff]  }
 0x1e1   : > { %5954 = vmatpush1.bf16.msra.mxu0 %v10609_v2  ;;  %v8512_v2 = vlaneseq }
 0x1e2   : > { %5927 = vmatpush2.bf16.msra.mxu1 %v10606_v1  ;;  %5955 = vmatprep.subr.bf16.mxu0 %v10617_v4  ;;  %v3433_v1 = vadd.f32 %v13082_v23, %v3390_v56  ;;  %v3474_v4 = vadd.f32 %v13084_v24, %v3431_v57  ;;  %v10675_v24 = vld [vmem:[%s12747_s8 + $0x8] ss:$72 sps:$4 sm:$0xff]  }
 0x1e3   : > { %5928 = vmatprep.subr.bf16.mxu1 %v10614_v3  ;;  %v3563_v3 = vpop.f32.mrf.mxu1  ;;  %v13181_v15 = vshrl.u32 %v8512_v2, 7 }
 0x1e5   : > { %5956 = vmatpush1.bf16.msra.mxu0 %v10615_v8  ;;  %v10663_v8 = vld [vmem:[%s14863_s4 + $0x190] ss:$8 sps:$4 sm:$0xff]  }
 0x1e6   : > { %5929 = vmatpush2.bf16.msra.mxu1 %v10612_v7  ;;  %5957 = vmatprep.subr.bf16.mxu0 %v10623_v11  ;;  %v3515_v7 = vadd.f32 %v3514_v36, %v3472_v0  ;;  %v10671_v11 = vld [vmem:[%s14863_s4 + $0x184] ss:$8 sps:$4 sm:$0xff]   ;;  %v10681_v36 = vld [vmem:[%s14863_s4 + $0x370] ss:$8 sps:$4 sm:$0xff]  }
 0x1e7   : > { %5930 = vmatprep.subr.bf16.mxu1 %v10620_v10  ;;  %v3643_v10 = vpop.f32.mrf.mxu1 }
 0x1e9   : > { %5958 = vmatpush1.bf16.msra.mxu0 %v10621_v14  ;;  %v3517_v14 = vadd.f32 %v3516_v42, %v3474_v4  ;;  %v3645_v23 = vpop.f32.mrf.mxu1  ;;  %v10701_v4 = vld [vmem:[%s14863_s4 + $0x344] ss:$8 sps:$4 sm:$0xff]  }
 0x1ea   : > { %5931 = vmatpush2.bf16.msra.mxu1 %v10618_v13  ;;  %5959 = vmatprep.subr.bf16.mxu0 %v10629_v18  ;;  %v3476_v13 = vadd.f32 %v13099_v31, %v3433_v1  ;;  %v8514_v31 = vsub.s32 0, %v13181_v15 }
 0x1eb   : > { %5986 = vmatprep.subr.bf16.mxu1 %v10632_v19  ;;  %v10669_v19 = vld [vmem:[%s14863_s4 + $0x180] ss:$8 sps:$4 sm:$0xff]  }
 0x1ec   : > { %v3519_v18 = vadd.f32 %v3518_v46, %v3476_v13  ;;  %v10687_v46 = vld [vmem:[%s14863_s4 + $0x360] ss:$8 sps:$4 sm:$0xff]   ;;  %v10707_v13 = vld [vmem:[%s14863_s4 + $0x334] ss:$8 sps:$4 sm:$0xff]  }
 0x1ed   : > { %5933 = vmatmul.mubr.bf16.vlgmr.msra.gmra.mxu1 %v10624_v17  ;;  %5960 = vmatpush2.bf16.msra.mxu0 %v10627_v20  ;;  %v3558_v17 = vadd.f32 %v3557_v43, %v3515_v7  ;;  %v10672_v20 = vld [vmem:[%s14863_s4 + $0x200] ss:$8 sps:$4 sm:$0xff]  }
 0x1ee   : > { %5987 = vmatpush1.bf16.msra.mxu1 %v10630_v22  ;;  %5961 = vmatprep.subr.bf16.mxu0 %v10635_v25  ;;  %v3604_v22 = vpop.f32.mrf.mxu0  ;;  %v8510_v25 = vld [vmem:[%s14865_s6] sm:$0xff] }
 0x1ef   : > { %5988 = vmatprep.subr.bf16.mxu1 %v10638_v26  ;;  %6018 = vmatprep.mubr.bf16.mxu1 %v10728_v29  ;;  %v10680_v26 = vld [vmem:[%s14863_s4 + $0x2f4] ss:$8 sps:$4 sm:$0xff]   ;;  %v3521_v29 = vadd.f32 %v3520_v54, %v3478_v16  ;;  %v3601_v30 = vadd.f32 %v3600_v58, %v3558_v17  ;;  %v10693_v58 = vld [vmem:[%s14863_s4 + $0x350] ss:$8 sps:$4 sm:$0xff]  }
 0x1f0   : > { %v3606_v37 = vpop.f32.mrf.mxu0  ;;  %v10692_v54 = vld [vmem:[%s14863_s4 + $0x2d4] ss:$8 sps:$4 sm:$0xff]   ;;  %v10702_v16 = vld [vmem:[%s14863_s4 + $0x2b0] ss:$8 sps:$4 sm:$0xff]  }
 0x1f1   : > { %5962 = vmatpush2.bf16.msra.mxu0 %v10633_v27  ;;  %v10683_v27 = vld [vmem:[%s14863_s4 + $0x374] ss:$8 sps:$4 sm:$0xff]   ;;  %v3644_v42 = vadd.f32 %v3643_v10, %v3601_v30  ;;  %v10705_v17 = vld [vmem:[%s14863_s4 + $0x330] ss:$8 sps:$4 sm:$0xff]   ;;  %v10723_v30 = vld [vmem:[%s14863_s4 + $0x300] ss:$8 sps:$4 sm:$0xff]  }
 0x1f2   : > { %5989 = vmatpush1.bf16.msra.mxu1 %v10636_v28  ;;  %5963 = vmatprep.subr.bf16.mxu0 %v10641_v32  ;;  %v3560_v28 = vadd.f32 %v3559_v47, %v3517_v14  ;;  %v8518_v32 = vsub.s32 1, %v13181_v15  ;;  %v10779_v47 = vld [vmem:[%s12747_s8 + $0x1c] ss:$72 sps:$4 sm:$0xff]  }
 0x1f3   : > { %5990 = vmatprep.subr.bf16.mxu1 %v10644_v33  ;;  %v3562_v33 = vadd.f32 %v3561_v55, %v3519_v18  ;;  %v10695_v55 = vld [vmem:[%s14863_s4 + $0x354] ss:$8 sps:$4 sm:$0xff]   ;;  %v10710_v18 = vld [vmem:[%s14863_s4 + $0x2a4] ss:$8 sps:$4 sm:$0xff]  }
 0x1f5   : > { %5964 = vmatpush2.bf16.msra.mxu0 %v10639_v34  ;;  %v3603_v34 = vadd.f32 %v3602_v9, %v3560_v28  ;;  %v3605_v43 = vadd.f32 %v3604_v22, %v3562_v33  ;;  %v10699_v9 = vld [vmem:[%s14863_s4 + $0x340] ss:$8 sps:$4 sm:$0xff]   ;;  %v10725_v28 = vld [vmem:[%s14863_s4 + $0x304] ss:$8 sps:$4 sm:$0xff]   ;;  %v10734_v33 = vld [vmem:[%s14863_s4 + $0x474] ss:$8 sps:$4 sm:$0xff]  }
 0x1f6   : > { %5991 = vmatpush1.bf16.msra.mxu1 %v10642_v35  ;;  %5965 = vmatprep.subr.bf16.mxu0 %v10647_v38  ;;  %v10678_v35 = vld [vmem:[%s14863_s4 + $0x2f0] ss:$8 sps:$4 sm:$0xff]   ;;  %v3647_v38 = vpop.f32.mrf.mxu1  ;;  %v10711_v22 = vld [vmem:[%s14863_s4 + $0x320] ss:$8 sps:$4 sm:$0xff]  }
 0x1f7   : > { %5992 = vmatprep.subr.bf16.mxu1 %v10650_v39  ;;  %v10686_v39 = vld [vmem:[%s14863_s4 + $0x2e4] ss:$8 sps:$4 sm:$0xff]   ;;  %v3648_v56 = vadd.f32 %v3647_v38, %v3605_v43  ;;  %v10741_v43 = vld [vmem:[%s14863_s4 + $0x3d0] ss:$8 sps:$4 sm:$0xff]  }
 0x1f8   : > { %v3649_v52 = vpop.f32.mrf.mxu1  ;;  %v10830_v38 = vld [vmem:[%s12747_s8 + $0x24] ss:$72 sps:$4 sm:$0xff]  }
 0x1f9   : > { %5966 = vmatpush2.bf16.msra.mxu0 %v10645_v40  ;;  %v10689_v40 = vld [vmem:[%s14863_s4 + $0x364] ss:$8 sps:$4 sm:$0xff]  }
 0x1fa   : > { %5993 = vmatpush1.bf16.msra.mxu1 %v10648_v41  ;;  %5967 = vmatprep.subr.bf16.mxu0 %v10653_v44  ;;  %v3564_v41 = vadd.f32 %v3563_v3, %v3521_v29  ;;  %v8515_v44 = vrot.slane %v8510_v25, %v8514_v31  ;;  %v10698_v3 = vld [vmem:[%s14863_s4 + $0x2c4] ss:$8 sps:$4 sm:$0xff]   ;;  %v10720_v29 = vld [vmem:[%s14863_s4 + $0x280] ss:$8 sps:$4 sm:$0xff]   ;;  %v10726_v31 = vld [vmem:[%s12747_s8 + $0x10] ss:$72 sps:$4 sm:$0xff]  }
 0x1fb   : > { %5994 = vmatprep.subr.bf16.mxu1 %v10656_v45  ;;  %v10684_v45 = vld [vmem:[%s14863_s4 + $0x2e0] ss:$8 sps:$4 sm:$0xff]  }
 0x1fd   : > { %5968 = vmatpush2.bf16.msra.mxu0 %v10651_v21  ;;  %v8519_v21 = vrot.slane %v8510_v25, %v8518_v32  ;;  %v10714_v25 = vld [vmem:[%s14863_s4 + $0x290] ss:$8 sps:$4 sm:$0xff]   ;;  %v10731_v32 = vld [vmem:[%s14863_s4 + $0x3f4] ss:$8 sps:$4 sm:$0xff]  }
 0x1fe   : > { %5995 = vmatpush1.bf16.msra.mxu1 %v10654_v49  ;;  %5969 = vmatprep.subr.bf16.mxu0 %v10659_v50  ;;  %v3646_v49 = vadd.f32 %v3645_v23, %v3603_v34  ;;  %v3607_v50 = vadd.f32 %v3606_v37, %v3564_v41  ;;  %v10716_v23 = vld [vmem:[%s14863_s4 + $0x294] ss:$8 sps:$4 sm:$0xff]   ;;  %v10729_v34 = vld [vmem:[%s14863_s4 + $0x3f0] ss:$8 sps:$4 sm:$0xff]   ;;  %v10740_v37 = vld [vmem:[%s14863_s4 + $0x464] ss:$8 sps:$4 sm:$0xff]  }
 0x1ff   : > { %5996 = vmatprep.subr.bf16.mxu1 %v10662_v51  ;;  %v10743_v41 = vld [vmem:[%s14863_s4 + $0x3d4] ss:$8 sps:$4 sm:$0xff]  }
 0x201   : > { %5970 = vmatpush2.bf16.msra.mxu0 %v10657_v59 }
 0x202   : > { %5997 = vmatpush1.bf16.msra.mxu1 %v10660_v60  ;;  %5971 = vmatprep.subr.bf16.mxu0 %v10665_v61  ;;  %v10690_v60 = vld [vmem:[%s14863_s4 + $0x2d0] ss:$8 sps:$4 sm:$0xff]  }
 0x203   : > { %5998 = vmatprep.subr.bf16.mxu1 %v10668_v62  ;;  %v3650_v62 = vadd.f32 %v3649_v52, %v3607_v50  ;;  %v10753_v50 = vld [vmem:[%s14863_s4 + $0x3b0] ss:$8 sps:$4 sm:$0xff]   ;;  %v10761_v52 = vld [vmem:[%s14863_s4 + $0x3a4] ss:$8 sps:$4 sm:$0xff]  }
 0x205   : > { %5972 = vmatpush2.bf16.msra.mxu0 %v10663_v8 }
 0x206   : > { %5999 = vmatpush1.bf16.msra.mxu1 %v10666_v6  ;;  %5973 = vmatprep.subr.bf16.mxu0 %v10671_v11  ;;  %v10696_v6 = vld [vmem:[%s14863_s4 + $0x2c0] ss:$8 sps:$4 sm:$0xff]  }
 0x207   : > { %6000 = vmatprep.subr.bf16.mxu1 %v10674_v12  ;;  %v10704_v12 = vld [vmem:[%s14863_s4 + $0x2b4] ss:$8 sps:$4 sm:$0xff]  }
 0x209   : > { %5974 = vmatpush2.bf16.msra.mxu0 %v10669_v19  ;;  %v10713_v19 = vld [vmem:[%s14863_s4 + $0x324] ss:$8 sps:$4 sm:$0xff]  }
 0x20a   : > { %6001 = vmatpush1.bf16.msra.mxu1 %v10672_v20  ;;  %6029 = vmatprep.subr.bf16.mxu0 %v10683_v27  ;;  %v10708_v20 = vld [vmem:[%s14863_s4 + $0x2a0] ss:$8 sps:$4 sm:$0xff]   ;;  %v10722_v27 = vld [vmem:[%s14863_s4 + $0x284] ss:$8 sps:$4 sm:$0xff]  }
 0x20b   : > { %6002 = vmatprep.subr.bf16.mxu1 %v10680_v26  ;;  %v10717_v26 = vld [vmem:[%s14863_s4 + $0x310] ss:$8 sps:$4 sm:$0xff]  }
 0x20c   : > { %v3686_v48 = vpop.f32.mrf.mxu0  ;;  %5976 = vmatmul.mubr.bf16.vlgmr.msra.gmra.mxu0 %v10675_v24  ;;  %v10719_v24 = vld [vmem:[%s14863_s4 + $0x314] ss:$8 sps:$4 sm:$0xff]  }
 0x20d   : > { %v3687_v51 = vadd.f32 %v3686_v48, %v3644_v42  ;;  %6030 = vmatpush1.bf16.msra.mxu0 %v10681_v36  ;;  %6061 = vmatprep.mubr.bf16.mxu0 %v10779_v47  ;;  %v10737_v36 = vld [vmem:[%s14863_s4 + $0x3e4] ss:$8 sps:$4 sm:$0xff]   ;;  %v10746_v42 = vld [vmem:[%s14863_s4 + $0x454] ss:$8 sps:$4 sm:$0xff]   ;;  %v10747_v47 = vld [vmem:[%s14863_s4 + $0x3c0] ss:$8 sps:$4 sm:$0xff]  }
 0x20e   : > { %6003 = vmatpush2.bf16.msra.mxu1 %v10678_v35  ;;  %v3688_v53 = vpop.f32.mrf.mxu0  ;;  %6031 = vmatprep.subr.bf16.mxu0 %v10689_v40  ;;  %v10732_v35 = vld [vmem:[%s14863_s4 + $0x470] ss:$8 sps:$4 sm:$0xff]   ;;  %v10738_v40 = vld [vmem:[%s14863_s4 + $0x460] ss:$8 sps:$4 sm:$0xff]  }
 0x20f   : > { %6004 = vmatprep.subr.bf16.mxu1 %v10686_v39  ;;  %v8547_v57 = vadd.f32 %v8515_v44, %v3687_v51  ;;  %v3689_v59 = vadd.f32 %v3688_v53, %v3646_v49  ;;  %v10735_v39 = vld [vmem:[%s14863_s4 + $0x3e0] ss:$8 sps:$4 sm:$0xff]   ;;  %v10758_v49 = vld [vmem:[%s14863_s4 + $0x434] ss:$8 sps:$4 sm:$0xff]   ;;  %v10756_v51 = vld [vmem:[%s14863_s4 + $0x430] ss:$8 sps:$4 sm:$0xff]  }
 0x210   : > { %v3690_v61 = vpop.f32.mrf.mxu0  ;;  %v10750_v48 = vld [vmem:[%s14863_s4 + $0x440] ss:$8 sps:$4 sm:$0xff]   ;;  %v10764_v53 = vld [vmem:[%s14863_s4 + $0x424] ss:$8 sps:$4 sm:$0xff]  }
 0x211   : > { %v8561_v63 = vmax.f32 %v8547_v57, 0.0  ;;  %v8548_v0 = vadd.f32 %v8519_v21, %v3689_v59  ;;  %v3691_v1 = vadd.f32 %v3690_v61, %v3648_v56  ;;  %6032 = vmatpush1.bf16.msra.mxu0 %v10687_v46  ;;  %v10752_v46 = vld [vmem:[%s14863_s4 + $0x444] ss:$8 sps:$4 sm:$0xff]   ;;  %v10767_v56 = vld [vmem:[%s14863_s4 + $0x394] ss:$8 sps:$4 sm:$0xff]  }
 0x212   : > { %6005 = vmatpush2.bf16.msra.mxu1 %v10684_v45  ;;  %v3692_v2 = vpop.f32.mrf.mxu0  ;;  %6033 = vmatprep.subr.bf16.mxu0 %v10695_v55  ;;  %v10749_v45 = vld [vmem:[%s14863_s4 + $0x3c4] ss:$8 sps:$4 sm:$0xff]   ;;  %v10762_v55 = vld [vmem:[%s14863_s4 + $0x420] ss:$8 sps:$4 sm:$0xff]   ;;  %v10770_v57 = vld [vmem:[%s14863_s4 + $0x414] ss:$8 sps:$4 sm:$0xff]  }
 0x213   : > { %6006 = vmatprep.subr.bf16.mxu1 %v10692_v54  ;;  %8575 = vst [vmem:[%s13236_s13] sm:$0xff] %v8561_v63  ;;  %v8562_v5 = vmax.f32 %v8548_v0, 0.0  ;;  %v8554_v7 = vadd.f32 %v8515_v44, %v3691_v1  ;;  %v3693_v8 = vadd.f32 %v3692_v2, %v3650_v62  ;;  %v10744_v44 = vld [vmem:[%s14863_s4 + $0x450] ss:$8 sps:$4 sm:$0xff]   ;;  %v10759_v54 = vld [vmem:[%s14863_s4 + $0x3a0] ss:$8 sps:$4 sm:$0xff]   ;;  %v13400_v0 = vpop.f32.mrf.mxu1 }
 0x214   : > { %v10765_v59 = vld [vmem:[%s14863_s4 + $0x390] ss:$8 sps:$4 sm:$0xff]   ;;  %v10776_v61 = vld [vmem:[%s14863_s4 + $0x404] ss:$8 sps:$4 sm:$0xff]   ;;  %v10771_v62 = vld [vmem:[%s14863_s4 + $0x380] ss:$8 sps:$4 sm:$0xff]  }
 0x215   : > { %8576 = vst [vmem:[%s13236_s13 + $0x8] sm:$0xff] %v8562_v5  ;;  %v8568_v10 = vmax.f32 %v8554_v7, 0.0  ;;  %v8555_v11 = vadd.f32 %v8519_v21, %v3693_v8  ;;  %6034 = vmatpush1.bf16.msra.mxu0 %v10693_v58  ;;  %v10755_v21 = vld [vmem:[%s14863_s4 + $0x3b4] ss:$8 sps:$4 sm:$0xff]   ;;  %v10773_v58 = vld [vmem:[%s14863_s4 + $0x384] ss:$8 sps:$4 sm:$0xff]   ;;  %v13415_v7 = vpop.f32.mrf.mxu1 }
 0x216   : > { %6007 = vmatpush2.bf16.msra.mxu1 %v10690_v60  ;;  %6035 = vmatprep.subr.bf16.mxu0 %v10701_v4  ;;  %v10768_v60 = vld [vmem:[%s14863_s4 + $0x410] ss:$8 sps:$4 sm:$0xff]   ;;  %v10774_v63 = vld [vmem:[%s14863_s4 + $0x400] ss:$8 sps:$4 sm:$0xff]   ;;  %v10782_v2 = vld [vmem:[%s14863_s4 + $0x4f4] ss:$8 sps:$4 sm:$0xff]  }
 0x217   : > { %6008 = vmatprep.subr.bf16.mxu1 %v10698_v3  ;;  %8582 = vst [vmem:[%s13236_s13 + $0x38] sm:$0xff] %v8568_v10  ;;  %v8569_v14 = vmax.f32 %v8555_v11, 0.0  ;;  %v10777_v1 = vld [vmem:[%s12747_s8 + $0x18] ss:$72 sps:$4 sm:$0xff]   ;;  %v10785_v3 = vld [vmem:[%s14863_s4 + $0x574] ss:$8 sps:$4 sm:$0xff]  }
 0x218   : > { %v10780_v4 = vld [vmem:[%s14863_s4 + $0x4f0] ss:$8 sps:$4 sm:$0xff]   ;;  %v10788_v8 = vld [vmem:[%s14863_s4 + $0x4e4] ss:$8 sps:$4 sm:$0xff]   ;;  %v10789_v10 = vld [vmem:[%s14863_s4 + $0x560] ss:$8 sps:$4 sm:$0xff]  }
 0x219   : > { %8583 = vst [vmem:[%s13236_s13 + $0x40] sm:$0xff] %v8569_v14  ;;  %6036 = vmatpush1.bf16.msra.mxu0 %v10699_v9  ;;  %v10783_v5 = vld [vmem:[%s14863_s4 + $0x570] ss:$8 sps:$4 sm:$0xff]   ;;  %v10786_v9 = vld [vmem:[%s14863_s4 + $0x4e0] ss:$8 sps:$4 sm:$0xff]  }
 0x21a   : > { %6009 = vmatpush2.bf16.msra.mxu1 %v10696_v6  ;;  %6037 = vmatprep.subr.bf16.mxu0 %v10707_v13  ;;  %v10791_v6 = vld [vmem:[%s14863_s4 + $0x564] ss:$8 sps:$4 sm:$0xff]   ;;  %v10794_v13 = vld [vmem:[%s14863_s4 + $0x4d4] ss:$8 sps:$4 sm:$0xff]  }
 0x21b   : > { %6010 = vmatprep.subr.bf16.mxu1 %v10704_v12  ;;  %v10881_v11 = vld [vmem:[%s12747_s8 + $0x2c] ss:$72 sps:$4 sm:$0xff]   ;;  %v13430_v12 = vpop.f32.mrf.mxu1 }
 0x21c   : > { %v10797_v14 = vld [vmem:[%s14863_s4 + $0x554] ss:$8 sps:$4 sm:$0xff]  }
 0x21d   : > { %6038 = vmatpush1.bf16.msra.mxu0 %v10705_v17  ;;  %v10795_v17 = vld [vmem:[%s14863_s4 + $0x550] ss:$8 sps:$4 sm:$0xff]  }
 0x21e   : > { %6011 = vmatpush2.bf16.msra.mxu1 %v10702_v16  ;;  %6039 = vmatprep.subr.bf16.mxu0 %v10713_v19  ;;  %v10792_v16 = vld [vmem:[%s14863_s4 + $0x4d0] ss:$8 sps:$4 sm:$0xff]   ;;  %v10800_v19 = vld [vmem:[%s14863_s4 + $0x4c4] ss:$8 sps:$4 sm:$0xff]  }
 0x21f   : > { %6012 = vmatprep.subr.bf16.mxu1 %v10710_v18  ;;  %v13444_v18 = vpop.f32.mrf.mxu1 }
 0x221   : > { %6040 = vmatpush1.bf16.msra.mxu0 %v10711_v22  ;;  %v10798_v22 = vld [vmem:[%s14863_s4 + $0x4c0] ss:$8 sps:$4 sm:$0xff]  }
 0x222   : > { %6013 = vmatpush2.bf16.msra.mxu1 %v10708_v20  ;;  %6041 = vmatprep.subr.bf16.mxu0 %v10719_v24  ;;  %v10803_v20 = vld [vmem:[%s14863_s4 + $0x544] ss:$8 sps:$4 sm:$0xff]   ;;  %v13458_v24 = vpop.f32.mrf.mxu1 }
 0x223   : > { %6014 = vmatprep.subr.bf16.mxu1 %v10716_v23  ;;  %v10801_v23 = vld [vmem:[%s14863_s4 + $0x540] ss:$8 sps:$4 sm:$0xff]  }
 0x225   : > { %6042 = vmatpush1.bf16.msra.mxu0 %v10717_v26  ;;  %v10809_v26 = vld [vmem:[%s14863_s4 + $0x534] ss:$8 sps:$4 sm:$0xff]  }
 0x226   : > { %6015 = vmatpush2.bf16.msra.mxu1 %v10714_v25  ;;  %6043 = vmatprep.subr.bf16.mxu0 %v10725_v28  ;;  %v10806_v25 = vld [vmem:[%s14863_s4 + $0x4b4] ss:$8 sps:$4 sm:$0xff]   ;;  %v10807_v28 = vld [vmem:[%s14863_s4 + $0x530] ss:$8 sps:$4 sm:$0xff]  }
 0x227   : > { %6016 = vmatprep.subr.bf16.mxu1 %v10722_v27  ;;  %v10804_v27 = vld [vmem:[%s14863_s4 + $0x4b0] ss:$8 sps:$4 sm:$0xff]  }
 0x229   : > { %6044 = vmatpush1.bf16.msra.mxu0 %v10723_v30  ;;  %v10812_v30 = vld [vmem:[%s14863_s4 + $0x4a4] ss:$8 sps:$4 sm:$0xff]  }
 0x22a   : > { %6017 = vmatpush2.bf16.msra.mxu1 %v10720_v29  ;;  %6045 = vmatprep.subr.bf16.mxu0 %v10731_v32  ;;  %v13472_v29 = vpop.f32.mrf.mxu1  ;;  %v10810_v32 = vld [vmem:[%s14863_s4 + $0x4a0] ss:$8 sps:$4 sm:$0xff]  }
 0x22b   : > { %6072 = vmatprep.subr.bf16.mxu1 %v10734_v33  ;;  %v10813_v33 = vld [vmem:[%s14863_s4 + $0x520] ss:$8 sps:$4 sm:$0xff]  }
 0x22d   : > { %6019 = vmatmul.mubr.bf16.vlgmr.msra.gmra.mxu1 %v10726_v31  ;;  %6046 = vmatpush2.bf16.msra.mxu0 %v10729_v34  ;;  %v10815_v31 = vld [vmem:[%s14863_s4 + $0x524] ss:$8 sps:$4 sm:$0xff]   ;;  %v13486_v34 = vpop.f32.mrf.mxu1 }
 0x22e   : > { %6073 = vmatpush1.bf16.msra.mxu1 %v10732_v35  ;;  %6047 = vmatprep.subr.bf16.mxu0 %v10737_v36  ;;  %v10818_v35 = vld [vmem:[%s14863_s4 + $0x494] ss:$8 sps:$4 sm:$0xff]  }
 0x22f   : > { %6074 = vmatprep.subr.bf16.mxu1 %v10740_v37  ;;  %6104 = vmatprep.mubr.bf16.mxu1 %v10830_v38  ;;  %v10821_v36 = vld [vmem:[%s14863_s4 + $0x514] ss:$8 sps:$4 sm:$0xff]   ;;  %v13494_v37 = vpop.f32.mrf.mxu0  ;;  %v10816_v38 = vld [vmem:[%s14863_s4 + $0x490] ss:$8 sps:$4 sm:$0xff]  }
 0x231   : > { %6048 = vmatpush2.bf16.msra.mxu0 %v10735_v39  ;;  %v10819_v39 = vld [vmem:[%s14863_s4 + $0x510] ss:$8 sps:$4 sm:$0xff]  }
 0x232   : > { %6075 = vmatpush1.bf16.msra.mxu1 %v10738_v40  ;;  %6049 = vmatprep.subr.bf16.mxu0 %v10743_v41  ;;  %v13502_v40 = vpop.f32.mrf.mxu1  ;;  %v10824_v41 = vld [vmem:[%s14863_s4 + $0x484] ss:$8 sps:$4 sm:$0xff]  }
 0x233   : > { %6076 = vmatprep.subr.bf16.mxu1 %v10746_v42  ;;  %v10827_v42 = vld [vmem:[%s14863_s4 + $0x504] ss:$8 sps:$4 sm:$0xff]  }
 0x235   : > { %6050 = vmatpush2.bf16.msra.mxu0 %v10741_v43  ;;  %v13510_v43 = vpop.f32.mrf.mxu0 }
 0x236   : > { %6077 = vmatpush1.bf16.msra.mxu1 %v10744_v44  ;;  %6051 = vmatprep.subr.bf16.mxu0 %v10749_v45  ;;  %v13512_v44 = vpop.f32.mrf.mxu1  ;;  %v10822_v45 = vld [vmem:[%s14863_s4 + $0x480] ss:$8 sps:$4 sm:$0xff]  }
 0x237   : > { %6078 = vmatprep.subr.bf16.mxu1 %v10752_v46  ;;  %v10825_v46 = vld [vmem:[%s14863_s4 + $0x500] ss:$8 sps:$4 sm:$0xff]  }
 0x239   : > { %6052 = vmatpush2.bf16.msra.mxu0 %v10747_v47  ;;  %v10828_v47 = vld [vmem:[%s12747_s8 + $0x20] ss:$72 sps:$4 sm:$0xff]  }
 0x23a   : > { %6079 = vmatpush1.bf16.msra.mxu1 %v10750_v48  ;;  %6053 = vmatprep.subr.bf16.mxu0 %v10755_v21  ;;  %v10833_v48 = vld [vmem:[%s14863_s4 + $0x5f4] ss:$8 sps:$4 sm:$0xff]  }
 0x23b   : > { %6080 = vmatprep.subr.bf16.mxu1 %v10758_v49  ;;  %v10836_v21 = vld [vmem:[%s14863_s4 + $0x674] ss:$8 sps:$4 sm:$0xff]   ;;  %v13527_v49 = vpop.f32.mrf.mxu0 }
 0x23d   : > { %6054 = vmatpush2.bf16.msra.mxu0 %v10753_v50  ;;  %v13529_v50 = vpop.f32.mrf.mxu1 }
 0x23e   : > { %6081 = vmatpush1.bf16.msra.mxu1 %v10756_v51  ;;  %6055 = vmatprep.subr.bf16.mxu0 %v10761_v52  ;;  %v10831_v51 = vld [vmem:[%s14863_s4 + $0x5f0] ss:$8 sps:$4 sm:$0xff]  }
 0x23f   : > { %6082 = vmatprep.subr.bf16.mxu1 %v10764_v53  ;;  %v10834_v52 = vld [vmem:[%s14863_s4 + $0x670] ss:$8 sps:$4 sm:$0xff]   ;;  %v10839_v53 = vld [vmem:[%s14863_s4 + $0x5e4] ss:$8 sps:$4 sm:$0xff]  }
 0x241   : > { %6056 = vmatpush2.bf16.msra.mxu0 %v10759_v54  ;;  %v10842_v54 = vld [vmem:[%s14863_s4 + $0x664] ss:$8 sps:$4 sm:$0xff]  }
 0x242   : > { %6083 = vmatpush1.bf16.msra.mxu1 %v10762_v55  ;;  %6057 = vmatprep.subr.bf16.mxu0 %v10767_v56  ;;  %v10837_v55 = vld [vmem:[%s14863_s4 + $0x5e0] ss:$8 sps:$4 sm:$0xff]  }
 0x243   : > { %6084 = vmatprep.subr.bf16.mxu1 %v10770_v57  ;;  %v10840_v56 = vld [vmem:[%s14863_s4 + $0x660] ss:$8 sps:$4 sm:$0xff]   ;;  %v10932_v57 = vld [vmem:[%s12747_s8 + $0x34] ss:$72 sps:$4 sm:$0xff]  }
 0x245   : > { %6058 = vmatpush2.bf16.msra.mxu0 %v10765_v59  ;;  %v9805_v59 = vpop.f32.mrf.mxu0 }
 0x246   : > { %6085 = vmatpush1.bf16.msra.mxu1 %v10768_v60  ;;  %6059 = vmatprep.subr.bf16.mxu0 %v10773_v58  ;;  %v13550_v60 = vpop.f32.mrf.mxu1 }
 0x247   : > { %6086 = vmatprep.subr.bf16.mxu1 %v10776_v61  ;;  %v10845_v61 = vld [vmem:[%s14863_s4 + $0x5d4] ss:$8 sps:$4 sm:$0xff]  }
 0x249   : > { %6060 = vmatpush2.bf16.msra.mxu0 %v10771_v62  ;;  %v10848_v62 = vld [vmem:[%s14863_s4 + $0x654] ss:$8 sps:$4 sm:$0xff]  }
 0x24a   : > { %6087 = vmatpush1.bf16.msra.mxu1 %v10774_v63  ;;  %6115 = vmatprep.subr.bf16.mxu0 %v10785_v3  ;;  %v10843_v63 = vld [vmem:[%s14863_s4 + $0x5d0] ss:$8 sps:$4 sm:$0xff]  }
 0x24b   : > { %6088 = vmatprep.subr.bf16.mxu1 %v10782_v2  ;;  %v9827_v2 = vpop.f32.mrf.mxu1 }
 0x24c   : > { %6062 = vmatmul.mubr.bf16.vlgmr.msra.gmra.mxu0 %v10777_v1  ;;  %v9845_v58 = vpop.f32.mrf.mxu0  ;;  %v10846_v1 = vld [vmem:[%s14863_s4 + $0x650] ss:$8 sps:$4 sm:$0xff]  }
 0x24d   : > { %6116 = vmatpush1.bf16.msra.mxu0 %v10783_v5  ;;  %6147 = vmatprep.mubr.bf16.mxu0 %v10881_v11  ;;  %v10851_v5 = vld [vmem:[%s14863_s4 + $0x5c4] ss:$8 sps:$4 sm:$0xff]  }
 0x24e   : > { %6089 = vmatpush2.bf16.msra.mxu1 %v10780_v4  ;;  %6117 = vmatprep.subr.bf16.mxu0 %v10791_v6  ;;  %v9846_v3 = vpop.f32.mrf.mxu0  ;;  %v9867_v4 = vpop.f32.mrf.mxu1  ;;  %v10849_v6 = vld [vmem:[%s14863_s4 + $0x5c0] ss:$8 sps:$4 sm:$0xff]  }
 0x24f   : > { %6090 = vmatprep.subr.bf16.mxu1 %v10788_v8  ;;  %v10854_v8 = vld [vmem:[%s14863_s4 + $0x644] ss:$8 sps:$4 sm:$0xff]  }
 0x250   : > { %v9868_v11 = vpop.f32.mrf.mxu1 }
 0x251   : > { %6118 = vmatpush1.bf16.msra.mxu0 %v10789_v10  ;;  %v9848_v10 = vpop.f32.mrf.mxu0 }
 0x252   : > { %6091 = vmatpush2.bf16.msra.mxu1 %v10786_v9  ;;  %6119 = vmatprep.subr.bf16.mxu0 %v10797_v14  ;;  %v10852_v9 = vld [vmem:[%s14863_s4 + $0x640] ss:$8 sps:$4 sm:$0xff]   ;;  %v10860_v14 = vld [vmem:[%s14863_s4 + $0x634] ss:$8 sps:$4 sm:$0xff]  }
 0x253   : > { %6092 = vmatprep.subr.bf16.mxu1 %v10794_v13  ;;  %v10857_v13 = vld [vmem:[%s14863_s4 + $0x5b4] ss:$8 sps:$4 sm:$0xff]  }
 0x255   : > { %6120 = vmatpush1.bf16.msra.mxu0 %v10795_v17  ;;  %v10855_v17 = vld [vmem:[%s14863_s4 + $0x5b0] ss:$8 sps:$4 sm:$0xff]  }
 0x256   : > { %6093 = vmatpush2.bf16.msra.mxu1 %v10792_v16  ;;  %6121 = vmatprep.subr.bf16.mxu0 %v10803_v20  ;;  %v9781_v16 = vadd.f32 %v13472_v29, %v13458_v24  ;;  %v9849_v20 = vpop.f32.mrf.mxu0  ;;  %v10866_v24 = vld [vmem:[%s14863_s4 + $0x624] ss:$8 sps:$4 sm:$0xff]   ;;  %v9784_v29 = vadd.f32 %v13502_v40, %v13486_v34  ;;  %v9847_v40 = vadd.f32 %v9846_v3, %v9845_v58 }
 0x257   : > { %6094 = vmatprep.subr.bf16.mxu1 %v10800_v19  ;;  %v10858_v19 = vld [vmem:[%s14863_s4 + $0x630] ss:$8 sps:$4 sm:$0xff]   ;;  %v10893_v3 = vld [vmem:[%s14863_s4 + $0x764] ss:$8 sps:$4 sm:$0xff]  }
 0x259   : > { %6122 = vmatpush1.bf16.msra.mxu0 %v10801_v23  ;;  %v10863_v23 = vld [vmem:[%s14863_s4 + $0x5a4] ss:$8 sps:$4 sm:$0xff]  }
 0x25a   : > { %6095 = vmatpush2.bf16.msra.mxu1 %v10798_v22  ;;  %6123 = vmatprep.subr.bf16.mxu0 %v10809_v26  ;;  %v9870_v22 = vpop.f32.mrf.mxu1  ;;  %v9803_v26 = vadd.f32 %v13510_v43, %v13494_v37 }
 0x25b   : > { %6096 = vmatprep.subr.bf16.mxu1 %v10806_v25  ;;  %v9759_v25 = vadd.f32 %v13415_v7, %v13400_v0  ;;  %v10869_v0 = vld [vmem:[%s14863_s4 + $0x594] ss:$8 sps:$4 sm:$0xff]  }
 0x25c   : > { %v10872_v7 = vld [vmem:[%s14863_s4 + $0x614] ss:$8 sps:$4 sm:$0xff]  }
 0x25d   : > { %6124 = vmatpush1.bf16.msra.mxu0 %v10807_v28  ;;  %v3771_v28 = vadd.f32 %v9781_v16, %v9759_v25 }
 0x25e   : > { %6097 = vmatpush2.bf16.msra.mxu1 %v10804_v27  ;;  %6125 = vmatprep.subr.bf16.mxu0 %v10815_v31  ;;  %v10864_v31 = vld [vmem:[%s14863_s4 + $0x620] ss:$8 sps:$4 sm:$0xff]  }
 0x25f   : > { %6098 = vmatprep.subr.bf16.mxu1 %v10812_v30  ;;  %v10861_v30 = vld [vmem:[%s14863_s4 + $0x5a0] ss:$8 sps:$4 sm:$0xff]   ;;  %v3812_v34 = vadd.f32 %v9803_v26, %v3771_v28  ;;  %v10897_v28 = vld [vmem:[%s14863_s4 + $0x750] ss:$8 sps:$4 sm:$0xff]  }
 0x261   : > { %6126 = vmatpush1.bf16.msra.mxu0 %v10813_v33  ;;  %v9762_v33 = vadd.f32 %v13444_v18, %v13430_v12  ;;  %v10870_v12 = vld [vmem:[%s14863_s4 + $0x610] ss:$8 sps:$4 sm:$0xff]   ;;  %v10875_v18 = vld [vmem:[%s14863_s4 + $0x584] ss:$8 sps:$4 sm:$0xff]  }
 0x262   : > { %6099 = vmatpush2.bf16.msra.mxu1 %v10810_v32  ;;  %6127 = vmatprep.subr.bf16.mxu0 %v10821_v36  ;;  %v9871_v32 = vpop.f32.mrf.mxu1  ;;  %v9806_v36 = vadd.f32 %v9805_v59, %v13527_v49  ;;  %v9850_v49 = vadd.f32 %v9849_v20, %v9848_v10  ;;  %v10983_v10 = vld [vmem:[%s12747_s8 + $0x3c] ss:$72 sps:$4 sm:$0xff]  }
 0x263   : > { %6100 = vmatprep.subr.bf16.mxu1 %v10818_v35  ;;  %v9825_v35 = vadd.f32 %v13529_v50, %v13512_v44  ;;  %v10873_v50 = vld [vmem:[%s14863_s4 + $0x580] ss:$8 sps:$4 sm:$0xff]   ;;  %v10896_v20 = vld [vmem:[%s14863_s4 + $0x6d4] ss:$8 sps:$4 sm:$0xff]  }
 0x265   : > { %6128 = vmatpush1.bf16.msra.mxu0 %v10819_v39  ;;  %v3774_v39 = vadd.f32 %v9784_v29, %v9762_v33  ;;  %v3853_v43 = vadd.f32 %v9825_v35, %v3812_v34 }
 0x266   : > { %6101 = vmatpush2.bf16.msra.mxu1 %v10816_v38  ;;  %6129 = vmatprep.subr.bf16.mxu0 %v10827_v42  ;;  %v10878_v42 = vld [vmem:[%s14863_s4 + $0x604] ss:$8 sps:$4 sm:$0xff]  }
 0x267   : > { %6102 = vmatprep.subr.bf16.mxu1 %v10824_v41  ;;  %v10867_v41 = vld [vmem:[%s14863_s4 + $0x590] ss:$8 sps:$4 sm:$0xff]   ;;  %v3815_v44 = vadd.f32 %v9806_v36, %v3774_v39  ;;  %v10908_v39 = vld [vmem:[%s14863_s4 + $0x6b4] ss:$8 sps:$4 sm:$0xff]  }
 0x269   : > { %6130 = vmatpush1.bf16.msra.mxu0 %v10825_v46 }
 0x26a   : > { %6103 = vmatpush2.bf16.msra.mxu1 %v10822_v45  ;;  %6131 = vmatprep.subr.bf16.mxu0 %v10833_v48  ;;  %v9828_v45 = vadd.f32 %v9827_v2, %v13550_v60  ;;  %v3894_v48 = vadd.f32 %v9847_v40, %v3853_v43  ;;  %v10890_v2 = vld [vmem:[%s14863_s4 + $0x6e4] ss:$8 sps:$4 sm:$0xff]   ;;  %v10911_v40 = vld [vmem:[%s14863_s4 + $0x734] ss:$8 sps:$4 sm:$0xff]  }
 0x26b   : > { %6158 = vmatprep.subr.bf16.mxu1 %v10836_v21  ;;  %v9869_v21 = vadd.f32 %v9868_v11, %v9867_v4  ;;  %v10914_v43 = vld [vmem:[%s14863_s4 + $0x6a4] ss:$8 sps:$4 sm:$0xff]  }
 0x26c   : > { %v9889_v27 = vpop.f32.mrf.mxu0 }
 0x26d   : > { %6105 = vmatmul.mubr.bf16.vlgmr.msra.gmra.mxu1 %v10828_v47  ;;  %6132 = vmatpush2.bf16.msra.mxu0 %v10831_v51  ;;  %v9911_v38 = vpop.f32.mrf.mxu1  ;;  %v10876_v51 = vld [vmem:[%s14863_s4 + $0x600] ss:$8 sps:$4 sm:$0xff]   ;;  %v3935_v58 = vadd.f32 %v9869_v21, %v3894_v48  ;;  %v10923_v48 = vld [vmem:[%s14863_s4 + $0x714] ss:$8 sps:$4 sm:$0xff]   ;;  %v10918_v21 = vld [vmem:[%s14863_s4 + $0x690] ss:$8 sps:$4 sm:$0xff]  }
 0x26e   : > { %6159 = vmatpush1.bf16.msra.mxu1 %v10834_v52  ;;  %6133 = vmatprep.subr.bf16.mxu0 %v10839_v53  ;;  %v9890_v37 = vpop.f32.mrf.mxu0  ;;  %v10879_v52 = vld [vmem:[%s12747_s8 + $0x28] ss:$72 sps:$4 sm:$0xff]   ;;  %v10884_v53 = vld [vmem:[%s14863_s4 + $0x6f4] ss:$8 sps:$4 sm:$0xff]  }
 0x26f   : > { %6160 = vmatprep.subr.bf16.mxu1 %v10842_v54  ;;  %6190 = vmatprep.mubr.bf16.mxu1 %v10932_v57  ;;  %v9912_v47 = vpop.f32.mrf.mxu1  ;;  %v10887_v54 = vld [vmem:[%s14863_s4 + $0x774] ss:$8 sps:$4 sm:$0xff]   ;;  %v10882_v57 = vld [vmem:[%s14863_s4 + $0x6f0] ss:$8 sps:$4 sm:$0xff]  }
 0x270   : > { %v9892_v46 = vpop.f32.mrf.mxu0 }
 0x271   : > { %6134 = vmatpush2.bf16.msra.mxu0 %v10837_v55  ;;  %v3856_v55 = vadd.f32 %v9828_v45, %v3815_v44  ;;  %v9914_v60 = vpop.f32.mrf.mxu1  ;;  %v10917_v44 = vld [vmem:[%s14863_s4 + $0x724] ss:$8 sps:$4 sm:$0xff]   ;;  %v10912_v45 = vld [vmem:[%s14863_s4 + $0x6a0] ss:$8 sps:$4 sm:$0xff]  }
 0x272   : > { %6161 = vmatpush1.bf16.msra.mxu1 %v10840_v56  ;;  %6135 = vmatprep.subr.bf16.mxu0 %v10845_v61  ;;  %v9891_v56 = vadd.f32 %v9890_v37, %v9889_v27  ;;  %v9893_v59 = vpop.f32.mrf.mxu0  ;;  %v10894_v27 = vld [vmem:[%s14863_s4 + $0x6d0] ss:$8 sps:$4 sm:$0xff]   ;;  %v10900_v37 = vld [vmem:[%s14863_s4 + $0x6c0] ss:$8 sps:$4 sm:$0xff]  }
 0x273   : > { %6162 = vmatprep.subr.bf16.mxu1 %v10848_v62  ;;  %v3897_v61 = vadd.f32 %v9850_v49, %v3856_v55  ;;  %v9872_v62 = vadd.f32 %v9871_v32, %v9870_v22  ;;  %v9915_v11 = vpop.f32.mrf.mxu1  ;;  %v10899_v22 = vld [vmem:[%s14863_s4 + $0x754] ss:$8 sps:$4 sm:$0xff]   ;;  %v10902_v32 = vld [vmem:[%s14863_s4 + $0x6c4] ss:$8 sps:$4 sm:$0xff]   ;;  %v10921_v49 = vld [vmem:[%s14863_s4 + $0x710] ss:$8 sps:$4 sm:$0xff]  }
 0x274   : > { %v3976_v4 = vadd.f32 %v9891_v56, %v3935_v58  ;;  %v9916_v25 = vadd.f32 %v9915_v11, %v9914_v60  ;;  %v10935_v55 = vld [vmem:[%s14863_s4 + $0x7f4] ss:$8 sps:$4 sm:$0xff]   ;;  %v10941_v60 = vld [vmem:[%s14863_s4 + $0x7e4] ss:$8 sps:$4 sm:$0xff]  }
 0x275   : > { %6136 = vmatpush2.bf16.msra.mxu0 %v10843_v63  ;;  %v10885_v63 = vld [vmem:[%s14863_s4 + $0x770] ss:$8 sps:$4 sm:$0xff]   ;;  %v10938_v56 = vld [vmem:[%s14863_s4 + $0x874] ss:$8 sps:$4 sm:$0xff]   ;;  %v10944_v58 = vld [vmem:[%s14863_s4 + $0x864] ss:$8 sps:$4 sm:$0xff]  }
 0x276   : > { %6163 = vmatpush1.bf16.msra.mxu1 %v10846_v1  ;;  %6137 = vmatprep.subr.bf16.mxu0 %v10851_v5  ;;  %v8522_v1 = vsub.s32 2, %v13181_v15  ;;  %v9913_v5 = vadd.f32 %v9912_v47, %v9911_v38  ;;  %v10903_v38 = vld [vmem:[%s14863_s4 + $0x740] ss:$8 sps:$4 sm:$0xff]   ;;  %v10920_v47 = vld [vmem:[%s14863_s4 + $0x694] ss:$8 sps:$4 sm:$0xff]  }
 0x277   : > { %6164 = vmatprep.subr.bf16.mxu1 %v10854_v8  ;;  %v9894_v8 = vadd.f32 %v9893_v59, %v9892_v46  ;;  %v10915_v46 = vld [vmem:[%s14863_s4 + $0x720] ss:$8 sps:$4 sm:$0xff]   ;;  %v10936_v59 = vld [vmem:[%s14863_s4 + $0x870] ss:$8 sps:$4 sm:$0xff]   ;;  %v10962_v11 = vld [vmem:[%s14863_s4 + $0x834] ss:$8 sps:$4 sm:$0xff]  }
 0x279   : > { %6138 = vmatpush2.bf16.msra.mxu0 %v10849_v6  ;;  %v10888_v6 = vld [vmem:[%s14863_s4 + $0x6e0] ss:$8 sps:$4 sm:$0xff]  }
 0x27a   : > { %6165 = vmatpush1.bf16.msra.mxu1 %v10852_v9  ;;  %6139 = vmatprep.subr.bf16.mxu0 %v10857_v13  ;;  %v10891_v9 = vld [vmem:[%s14863_s4 + $0x760] ss:$8 sps:$4 sm:$0xff]  }
 0x27b   : > { %6166 = vmatprep.subr.bf16.mxu1 %v10860_v14  ;;  %v3938_v14 = vadd.f32 %v9872_v62, %v3897_v61  ;;  %v10939_v61 = vld [vmem:[%s14863_s4 + $0x7e0] ss:$8 sps:$4 sm:$0xff]  }
 0x27c   : > { %v10942_v62 = vld [vmem:[%s14863_s4 + $0x860] ss:$8 sps:$4 sm:$0xff]  }
 0x27d   : > { %6140 = vmatpush2.bf16.msra.mxu0 %v10855_v17  ;;  %v11487_v17 = vld [vmem:[%s14865_s6] sm:$0xff] }
 0x27e   : > { %6167 = vmatpush1.bf16.msra.mxu1 %v10858_v19  ;;  %6141 = vmatprep.subr.bf16.mxu0 %v10863_v23  ;;  %v8523_v19 = vrot.slane %v11487_v17, %v8522_v1  ;;  %v4017_v23 = vadd.f32 %v9913_v5, %v3976_v4  ;;  %v10947_v1 = vld [vmem:[%s14863_s4 + $0x7d4] ss:$8 sps:$4 sm:$0xff]   ;;  %v10948_v4 = vld [vmem:[%s14863_s4 + $0x850] ss:$8 sps:$4 sm:$0xff]   ;;  %v10953_v5 = vld [vmem:[%s14863_s4 + $0x7c4] ss:$8 sps:$4 sm:$0xff]  }
 0x27f   : > { %6168 = vmatprep.subr.bf16.mxu1 %v10866_v24  ;;  %v3979_v24 = vadd.f32 %v9894_v8, %v3938_v14  ;;  %v10956_v8 = vld [vmem:[%s14863_s4 + $0x844] ss:$8 sps:$4 sm:$0xff]   ;;  %v10960_v14 = vld [vmem:[%s14863_s4 + $0x830] ss:$8 sps:$4 sm:$0xff]  }
 0x280   : > { %v10968_v17 = vld [vmem:[%s14863_s4 + $0x824] ss:$8 sps:$4 sm:$0xff]  }
 0x281   : > { %6142 = vmatpush2.bf16.msra.mxu0 %v10861_v30 }
 0x282   : > { %6169 = vmatpush1.bf16.msra.mxu1 %v10864_v31  ;;  %6143 = vmatprep.subr.bf16.mxu0 %v10869_v0  ;;  %v10905_v0 = vld [vmem:[%s14863_s4 + $0x744] ss:$8 sps:$4 sm:$0xff]  }
 0x283   : > { %6170 = vmatprep.subr.bf16.mxu1 %v10872_v7  ;;  %v4020_v7 = vadd.f32 %v9916_v25, %v3979_v24  ;;  %v10969_v24 = vld [vmem:[%s14863_s4 + $0x790] ss:$8 sps:$4 sm:$0xff]  }
 0x284   : > { %v10972_v25 = vld [vmem:[%s14863_s4 + $0x810] ss:$8 sps:$4 sm:$0xff]  }
 0x285   : > { %6144 = vmatpush2.bf16.msra.mxu0 %v10867_v41 }
 0x286   : > { %6171 = vmatpush1.bf16.msra.mxu1 %v10870_v12  ;;  %6145 = vmatprep.subr.bf16.mxu0 %v10875_v18  ;;  %v10906_v18 = vld [vmem:[%s14863_s4 + $0x6b0] ss:$8 sps:$4 sm:$0xff]  }
 0x287   : > { %6172 = vmatprep.subr.bf16.mxu1 %v10878_v42  ;;  %v10909_v42 = vld [vmem:[%s14863_s4 + $0x730] ss:$8 sps:$4 sm:$0xff]  }
 0x289   : > { %6146 = vmatpush2.bf16.msra.mxu0 %v10873_v50  ;;  %v10926_v50 = vld [vmem:[%s14863_s4 + $0x684] ss:$8 sps:$4 sm:$0xff]  }
 0x28a   : > { %6173 = vmatpush1.bf16.msra.mxu1 %v10876_v51  ;;  %6201 = vmatprep.subr.bf16.mxu0 %v10887_v54  ;;  %v10929_v51 = vld [vmem:[%s14863_s4 + $0x704] ss:$8 sps:$4 sm:$0xff]   ;;  %v10930_v54 = vld [vmem:[%s12747_s8 + $0x30] ss:$72 sps:$4 sm:$0xff]  }
 0x28b   : > { %6174 = vmatprep.subr.bf16.mxu1 %v10884_v53  ;;  %v10927_v53 = vld [vmem:[%s14863_s4 + $0x700] ss:$8 sps:$4 sm:$0xff]  }
 0x28c   : > { %v9933_v13 = vpop.f32.mrf.mxu0  ;;  %6148 = vmatmul.mubr.bf16.vlgmr.msra.gmra.mxu0 %v10879_v52  ;;  %v10924_v52 = vld [vmem:[%s14863_s4 + $0x680] ss:$8 sps:$4 sm:$0xff]  }
 0x28d   : > { %6202 = vmatpush1.bf16.msra.mxu0 %v10885_v63  ;;  %6233 = vmatprep.mubr.bf16.mxu0 %v10983_v10  ;;  %v11034_v63 = vld [vmem:[%s12747_s8 + $0x44] ss:$72 sps:$4 sm:$0xff]   ;;  %v10959_v10 = vld [vmem:[%s14863_s4 + $0x7b4] ss:$8 sps:$4 sm:$0xff]  }
 0x28e   : > { %6175 = vmatpush2.bf16.msra.mxu1 %v10882_v57  ;;  %v9934_v16 = vpop.f32.mrf.mxu0  ;;  %6203 = vmatprep.subr.bf16.mxu0 %v10893_v3  ;;  %v10933_v57 = vld [vmem:[%s14863_s4 + $0x7f0] ss:$8 sps:$4 sm:$0xff]  }
 0x28f   : > { %6176 = vmatprep.subr.bf16.mxu1 %v10890_v2  ;;  %v9935_v26 = vadd.f32 %v9934_v16, %v9933_v13  ;;  %v10950_v2 = vld [vmem:[%s14863_s4 + $0x854] ss:$8 sps:$4 sm:$0xff]   ;;  %v10945_v3 = vld [vmem:[%s14863_s4 + $0x7d0] ss:$8 sps:$4 sm:$0xff]   ;;  %v10965_v16 = vld [vmem:[%s14863_s4 + $0x7a4] ss:$8 sps:$4 sm:$0xff]  }
 0x290   : > { %v9936_v29 = vpop.f32.mrf.mxu0  ;;  %v10957_v13 = vld [vmem:[%s14863_s4 + $0x7b0] ss:$8 sps:$4 sm:$0xff]  }
 0x291   : > { %v4058_v30 = vadd.f32 %v9935_v26, %v4017_v23  ;;  %6204 = vmatpush1.bf16.msra.mxu0 %v10891_v9  ;;  %v10954_v9 = vld [vmem:[%s14863_s4 + $0x840] ss:$8 sps:$4 sm:$0xff]   ;;  %v10974_v23 = vld [vmem:[%s14863_s4 + $0x814] ss:$8 sps:$4 sm:$0xff]   ;;  %v10977_v26 = vld [vmem:[%s14863_s4 + $0x784] ss:$8 sps:$4 sm:$0xff]  }
 0x292   : > { %6177 = vmatpush2.bf16.msra.mxu1 %v10888_v6  ;;  %v9937_v31 = vpop.f32.mrf.mxu0  ;;  %6205 = vmatprep.subr.bf16.mxu0 %v10899_v22  ;;  %v10951_v6 = vld [vmem:[%s14863_s4 + $0x7c0] ss:$8 sps:$4 sm:$0xff]   ;;  %v10971_v22 = vld [vmem:[%s14863_s4 + $0x794] ss:$8 sps:$4 sm:$0xff]  }
 0x293   : > { %6178 = vmatprep.subr.bf16.mxu1 %v10896_v20  ;;  %v8549_v33 = vadd.f32 %v8523_v19, %v4058_v30  ;;  %v9938_v34 = vadd.f32 %v9937_v31, %v9936_v29  ;;  %v10966_v20 = vld [vmem:[%s14863_s4 + $0x820] ss:$8 sps:$4 sm:$0xff]   ;;  %v10986_v30 = vld [vmem:[%s14863_s4 + $0x8f4] ss:$8 sps:$4 sm:$0xff]  }
 0x294   : > { %v10978_v29 = vld [vmem:[%s14863_s4 + $0x800] ss:$8 sps:$4 sm:$0xff]   ;;  %v10989_v31 = vld [vmem:[%s14864_s5 + $0x74] ss:$8 sps:$4 sm:$0xff]  }
 0x295   : > { %v8563_v35 = vmax.f32 %v8549_v33, 0.0  ;;  %v4061_v36 = vadd.f32 %v9938_v34, %v4020_v7  ;;  %6206 = vmatpush1.bf16.msra.mxu0 %v10897_v28  ;;  %v10975_v28 = vld [vmem:[%s14863_s4 + $0x780] ss:$8 sps:$4 sm:$0xff]   ;;  %v10987_v7 = vld [vmem:[%s14864_s5 + $0x70] ss:$8 sps:$4 sm:$0xff]  }
 0x296   : > { %6179 = vmatpush2.bf16.msra.mxu1 %v10894_v27  ;;  %6207 = vmatprep.subr.bf16.mxu0 %v10905_v0  ;;  %v10980_v27 = vld [vmem:[%s14863_s4 + $0x804] ss:$8 sps:$4 sm:$0xff]   ;;  %v10984_v0 = vld [vmem:[%s14863_s4 + $0x8f0] ss:$8 sps:$4 sm:$0xff]  }
 0x297   : > { %6180 = vmatprep.subr.bf16.mxu1 %v10902_v32  ;;  %8577 = vst [vmem:[%s13236_s13 + $0x10] sm:$0xff] %v8563_v35  ;;  %v8556_v41 = vadd.f32 %v8523_v19, %v4061_v36  ;;  %v10963_v19 = vld [vmem:[%s14863_s4 + $0x7a0] ss:$8 sps:$4 sm:$0xff]   ;;  %v10992_v33 = vld [vmem:[%s14863_s4 + $0x8e4] ss:$8 sps:$4 sm:$0xff]  }
 0x298   : > { %v10981_v32 = vld [vmem:[%s12747_s8 + $0x38] ss:$72 sps:$4 sm:$0xff]   ;;  %v10995_v34 = vld [vmem:[%s14864_s5 + $0x64] ss:$8 sps:$4 sm:$0xff]  }
 0x299   : > { %v8570_v12 = vmax.f32 %v8556_v41, 0.0  ;;  %6208 = vmatpush1.bf16.msra.mxu0 %v10903_v38  ;;  %v11085_v35 = vld [vmem:[%s13652_s29 + $0x4] ss:$72 sps:$4 sm:$0xff]   ;;  %v10990_v36 = vld [vmem:[%s14863_s4 + $0x8e0] ss:$8 sps:$4 sm:$0xff]  }
 0x29a   : > { %6181 = vmatpush2.bf16.msra.mxu1 %v10900_v37  ;;  %6209 = vmatprep.subr.bf16.mxu0 %v10911_v40  ;;  %v10993_v37 = vld [vmem:[%s14864_s5 + $0x60] ss:$8 sps:$4 sm:$0xff]   ;;  %v10998_v38 = vld [vmem:[%s14863_s4 + $0x8d4] ss:$8 sps:$4 sm:$0xff]   ;;  %v10996_v40 = vld [vmem:[%s14863_s4 + $0x8d0] ss:$8 sps:$4 sm:$0xff]  }
 0x29b   : > { %6182 = vmatprep.subr.bf16.mxu1 %v10908_v39  ;;  %8584 = vst [vmem:[%s13236_s13 + $0x48] sm:$0xff] %v8570_v12  ;;  %v11001_v39 = vld [vmem:[%s14864_s5 + $0x54] ss:$8 sps:$4 sm:$0xff]   ;;  %v10999_v41 = vld [vmem:[%s14864_s5 + $0x50] ss:$8 sps:$4 sm:$0xff]  }
 0x29c   : > { %v11004_v12 = vld [vmem:[%s14863_s4 + $0x8c4] ss:$8 sps:$4 sm:$0xff]  }
 0x29d   : > { %6210 = vmatpush1.bf16.msra.mxu0 %v10909_v42  ;;  %v11002_v42 = vld [vmem:[%s14863_s4 + $0x8c0] ss:$8 sps:$4 sm:$0xff]  }
 0x29e   : > { %6183 = vmatpush2.bf16.msra.mxu1 %v10906_v18  ;;  %6211 = vmatprep.subr.bf16.mxu0 %v10917_v44  ;;  %v11007_v18 = vld [vmem:[%s14864_s5 + $0x44] ss:$8 sps:$4 sm:$0xff]   ;;  %v11010_v44 = vld [vmem:[%s14863_s4 + $0x8b4] ss:$8 sps:$4 sm:$0xff]  }
 0x29f   : > { %6184 = vmatprep.subr.bf16.mxu1 %v10914_v43  ;;  %v11005_v43 = vld [vmem:[%s14864_s5 + $0x40] ss:$8 sps:$4 sm:$0xff]  }
 0x2a1   : > { %6212 = vmatpush1.bf16.msra.mxu0 %v10915_v46  ;;  %v11008_v46 = vld [vmem:[%s14863_s4 + $0x8b0] ss:$8 sps:$4 sm:$0xff]  }
 0x2a2   : > { %6185 = vmatpush2.bf16.msra.mxu1 %v10912_v45  ;;  %6213 = vmatprep.subr.bf16.mxu0 %v10923_v48  ;;  %v11013_v45 = vld [vmem:[%s14864_s5 + $0x34] ss:$8 sps:$4 sm:$0xff]   ;;  %v11016_v48 = vld [vmem:[%s14863_s4 + $0x8a4] ss:$8 sps:$4 sm:$0xff]  }
 0x2a3   : > { %6186 = vmatprep.subr.bf16.mxu1 %v10920_v47  ;;  %v11011_v47 = vld [vmem:[%s14864_s5 + $0x30] ss:$8 sps:$4 sm:$0xff]  }
 0x2a5   : > { %6214 = vmatpush1.bf16.msra.mxu0 %v10921_v49  ;;  %v11014_v49 = vld [vmem:[%s14863_s4 + $0x8a0] ss:$8 sps:$4 sm:$0xff]  }
 0x2a6   : > { %6187 = vmatpush2.bf16.msra.mxu1 %v10918_v21  ;;  %6215 = vmatprep.subr.bf16.mxu0 %v10929_v51  ;;  %v11019_v21 = vld [vmem:[%s14864_s5 + $0x24] ss:$8 sps:$4 sm:$0xff]   ;;  %v11022_v51 = vld [vmem:[%s14863_s4 + $0x894] ss:$8 sps:$4 sm:$0xff]  }
 0x2a7   : > { %6188 = vmatprep.subr.bf16.mxu1 %v10926_v50  ;;  %v11017_v50 = vld [vmem:[%s14864_s5 + $0x20] ss:$8 sps:$4 sm:$0xff]  }
 0x2a9   : > { %6216 = vmatpush1.bf16.msra.mxu0 %v10927_v53  ;;  %v11020_v53 = vld [vmem:[%s14863_s4 + $0x890] ss:$8 sps:$4 sm:$0xff]  }
 0x2aa   : > { %6189 = vmatpush2.bf16.msra.mxu1 %v10924_v52  ;;  %6217 = vmatprep.subr.bf16.mxu0 %v10935_v55  ;;  %v11025_v52 = vld [vmem:[%s14864_s5 + $0x14] ss:$8 sps:$4 sm:$0xff]   ;;  %v11028_v55 = vld [vmem:[%s14863_s4 + $0x884] ss:$8 sps:$4 sm:$0xff]  }
 0x2ab   : > { %6244 = vmatprep.subr.bf16.mxu1 %v10938_v56  ;;  %v11031_v56 = vld [vmem:[%s14864_s5 + $0x4] ss:$8 sps:$4 sm:$0xff]  }
 0x2ad   : > { %6191 = vmatmul.mubr.bf16.vlgmr.msra.gmra.mxu1 %v10930_v54  ;;  %6218 = vmatpush2.bf16.msra.mxu0 %v10933_v57  ;;  %v11023_v54 = vld [vmem:[%s14864_s5 + $0x10] ss:$8 sps:$4 sm:$0xff]   ;;  %v11026_v57 = vld [vmem:[%s14863_s4 + $0x880] ss:$8 sps:$4 sm:$0xff]  }
 0x2ae   : > { %6245 = vmatpush1.bf16.msra.mxu1 %v10936_v59  ;;  %6219 = vmatprep.subr.bf16.mxu0 %v10941_v60  ;;  %v11029_v59 = vld [vmem:[%s14864_s5] ss:$8 sps:$4 sm:$0xff]   ;;  %v11037_v60 = vld [vmem:[%s14864_s5 + $0xf4] ss:$8 sps:$4 sm:$0xff]  }
 0x2af   : > { %6246 = vmatprep.subr.bf16.mxu1 %v10944_v58  ;;  %6276 = vmatprep.mubr.bf16.mxu1 %v11034_v63  ;;  %v11040_v58 = vld [vmem:[%s14864_s5 + $0x174] ss:$8 sps:$4 sm:$0xff]   ;;  %v11038_v63 = vld [vmem:[%s14864_s5 + $0x170] ss:$8 sps:$4 sm:$0xff]  }
 0x2b1   : > { %6220 = vmatpush2.bf16.msra.mxu0 %v10939_v61  ;;  %v11032_v61 = vld [vmem:[%s12747_s8 + $0x40] ss:$72 sps:$4 sm:$0xff]  }
 0x2b2   : > { %6247 = vmatpush1.bf16.msra.mxu1 %v10942_v62  ;;  %6221 = vmatprep.subr.bf16.mxu0 %v10947_v1  ;;  %v11035_v62 = vld [vmem:[%s14864_s5 + $0xf0] ss:$8 sps:$4 sm:$0xff]   ;;  %v11043_v1 = vld [vmem:[%s14864_s5 + $0xe4] ss:$8 sps:$4 sm:$0xff]  }
 0x2b3   : > { %6248 = vmatprep.subr.bf16.mxu1 %v10950_v2  ;;  %v11046_v2 = vld [vmem:[%s14864_s5 + $0x164] ss:$8 sps:$4 sm:$0xff]  }
 0x2b5   : > { %6222 = vmatpush2.bf16.msra.mxu0 %v10945_v3  ;;  %v11136_v3 = vld [vmem:[%s13652_s29 + $0xc] ss:$72 sps:$4 sm:$0xff]  }
 0x2b6   : > { %6249 = vmatpush1.bf16.msra.mxu1 %v10948_v4  ;;  %6223 = vmatprep.subr.bf16.mxu0 %v10953_v5  ;;  %v11041_v4 = vld [vmem:[%s14864_s5 + $0xe0] ss:$8 sps:$4 sm:$0xff]  }
 0x2b7   : > { %6250 = vmatprep.subr.bf16.mxu1 %v10956_v8  ;;  %v11044_v5 = vld [vmem:[%s14864_s5 + $0x160] ss:$8 sps:$4 sm:$0xff]   ;;  %v11049_v8 = vld [vmem:[%s14864_s5 + $0xd4] ss:$8 sps:$4 sm:$0xff]  }
 0x2b9   : > { %6224 = vmatpush2.bf16.msra.mxu0 %v10951_v6  ;;  %v11052_v6 = vld [vmem:[%s14864_s5 + $0x154] ss:$8 sps:$4 sm:$0xff]  }
 0x2ba   : > { %6251 = vmatpush1.bf16.msra.mxu1 %v10954_v9  ;;  %6225 = vmatprep.subr.bf16.mxu0 %v10959_v10  ;;  %v11047_v9 = vld [vmem:[%s14864_s5 + $0xd0] ss:$8 sps:$4 sm:$0xff]  }
 0x2bb   : > { %6252 = vmatprep.subr.bf16.mxu1 %v10962_v11  ;;  %v11050_v10 = vld [vmem:[%s14864_s5 + $0x150] ss:$8 sps:$4 sm:$0xff]   ;;  %v11055_v11 = vld [vmem:[%s14864_s5 + $0xc4] ss:$8 sps:$4 sm:$0xff]  }
 0x2bd   : > { %6226 = vmatpush2.bf16.msra.mxu0 %v10957_v13  ;;  %v11058_v13 = vld [vmem:[%s14864_s5 + $0x144] ss:$8 sps:$4 sm:$0xff]  }
 0x2be   : > { %6253 = vmatpush1.bf16.msra.mxu1 %v10960_v14  ;;  %6227 = vmatprep.subr.bf16.mxu0 %v10965_v16  ;;  %v11053_v14 = vld [vmem:[%s14864_s5 + $0xc0] ss:$8 sps:$4 sm:$0xff]  }
 0x2bf   : > { %6254 = vmatprep.subr.bf16.mxu1 %v10968_v17  ;;  %v11056_v16 = vld [vmem:[%s14864_s5 + $0x140] ss:$8 sps:$4 sm:$0xff]   ;;  %v11061_v17 = vld [vmem:[%s14864_s5 + $0xb4] ss:$8 sps:$4 sm:$0xff]  }
 0x2c1   : > { %6228 = vmatpush2.bf16.msra.mxu0 %v10963_v19  ;;  %v11064_v19 = vld [vmem:[%s14864_s5 + $0x134] ss:$8 sps:$4 sm:$0xff]  }
 0x2c2   : > { %6255 = vmatpush1.bf16.msra.mxu1 %v10966_v20  ;;  %6229 = vmatprep.subr.bf16.mxu0 %v10971_v22  ;;  %v11059_v20 = vld [vmem:[%s14864_s5 + $0xb0] ss:$8 sps:$4 sm:$0xff]  }
 0x2c3   : > { %6256 = vmatprep.subr.bf16.mxu1 %v10974_v23  ;;  %v11062_v22 = vld [vmem:[%s14864_s5 + $0x130] ss:$8 sps:$4 sm:$0xff]   ;;  %v11067_v23 = vld [vmem:[%s14864_s5 + $0xa4] ss:$8 sps:$4 sm:$0xff]  }
 0x2c5   : > { %6230 = vmatpush2.bf16.msra.mxu0 %v10969_v24  ;;  %v11070_v24 = vld [vmem:[%s14864_s5 + $0x124] ss:$8 sps:$4 sm:$0xff]  }
 0x2c6   : > { %6257 = vmatpush1.bf16.msra.mxu1 %v10972_v25  ;;  %6231 = vmatprep.subr.bf16.mxu0 %v10977_v26  ;;  %v11065_v25 = vld [vmem:[%s14864_s5 + $0xa0] ss:$8 sps:$4 sm:$0xff]  }
 0x2c7   : > { %6258 = vmatprep.subr.bf16.mxu1 %v10980_v27  ;;  %v11068_v26 = vld [vmem:[%s14864_s5 + $0x120] ss:$8 sps:$4 sm:$0xff]   ;;  %v11073_v27 = vld [vmem:[%s14864_s5 + $0x94] ss:$8 sps:$4 sm:$0xff]  }
 0x2c9   : > { %6232 = vmatpush2.bf16.msra.mxu0 %v10975_v28  ;;  %v11076_v28 = vld [vmem:[%s14864_s5 + $0x114] ss:$8 sps:$4 sm:$0xff]  }
 0x2ca   : > { %6259 = vmatpush1.bf16.msra.mxu1 %v10978_v29  ;;  %8123 = vmatprep.subr.bf16.mxu0 %v10989_v31  ;;  %v11071_v29 = vld [vmem:[%s14864_s5 + $0x90] ss:$8 sps:$4 sm:$0xff]   ;;  %v11079_v31 = vld [vmem:[%s14864_s5 + $0x84] ss:$8 sps:$4 sm:$0xff]  }
 0x2cb   : > { %6260 = vmatprep.subr.bf16.mxu1 %v10986_v30  ;;  %v11074_v30 = vld [vmem:[%s14864_s5 + $0x110] ss:$8 sps:$4 sm:$0xff]  }
 0x2cc   : > { %6234 = vmatmul.mubr.bf16.vlgmr.msra.gmra.mxu0 %v10981_v32  ;;  %v11082_v32 = vld [vmem:[%s14864_s5 + $0x104] ss:$8 sps:$4 sm:$0xff]  }
 0x2cd   : > { %8124 = vmatpush1.bf16.msra.mxu0 %v10987_v7  ;;  %8155 = vmatprep.mubr.bf16.mxu0 %v11085_v35  ;;  %v11080_v7 = vld [vmem:[%s14864_s5 + $0x100] ss:$8 sps:$4 sm:$0xff]  }
 0x2ce   : > { %6261 = vmatpush2.bf16.msra.mxu1 %v10984_v0  ;;  %8125 = vmatprep.subr.bf16.mxu0 %v10995_v34  ;;  %v11077_v0 = vld [vmem:[%s14864_s5 + $0x80] ss:$8 sps:$4 sm:$0xff]   ;;  %v11091_v34 = vld [vmem:[%s14864_s5 + $0x274] ss:$8 sps:$4 sm:$0xff]  }
 0x2cf   : > { %6262 = vmatprep.subr.bf16.mxu1 %v10992_v33  ;;  %v11088_v33 = vld [vmem:[%s14864_s5 + $0x1f4] ss:$8 sps:$4 sm:$0xff]   ;;  %v11083_v35 = vld [vmem:[%s13652_s29] ss:$72 sps:$4 sm:$0xff]  }
 0x2d1   : > { %8126 = vmatpush1.bf16.msra.mxu0 %v10993_v37  ;;  %v11089_v37 = vld [vmem:[%s14864_s5 + $0x270] ss:$8 sps:$4 sm:$0xff]  }
 0x2d2   : > { %6263 = vmatpush2.bf16.msra.mxu1 %v10990_v36  ;;  %8127 = vmatprep.subr.bf16.mxu0 %v11001_v39  ;;  %v11086_v36 = vld [vmem:[%s14864_s5 + $0x1f0] ss:$8 sps:$4 sm:$0xff]   ;;  %v11097_v39 = vld [vmem:[%s14864_s5 + $0x264] ss:$8 sps:$4 sm:$0xff]  }
 0x2d3   : > { %6264 = vmatprep.subr.bf16.mxu1 %v10998_v38  ;;  %v11094_v38 = vld [vmem:[%s14864_s5 + $0x1e4] ss:$8 sps:$4 sm:$0xff]  }
 0x2d5   : > { %8128 = vmatpush1.bf16.msra.mxu0 %v10999_v41  ;;  %v11092_v41 = vld [vmem:[%s14864_s5 + $0x1e0] ss:$8 sps:$4 sm:$0xff]  }
 0x2d6   : > { %6265 = vmatpush2.bf16.msra.mxu1 %v10996_v40  ;;  %8129 = vmatprep.subr.bf16.mxu0 %v11007_v18  ;;  %v11187_v40 = vld [vmem:[%s13652_s29 + $0x14] ss:$72 sps:$4 sm:$0xff]  }
 0x2d7   : > { %6266 = vmatprep.subr.bf16.mxu1 %v11004_v12  ;;  %v11095_v12 = vld [vmem:[%s14864_s5 + $0x260] ss:$8 sps:$4 sm:$0xff]   ;;  %v11100_v18 = vld [vmem:[%s14864_s5 + $0x1d4] ss:$8 sps:$4 sm:$0xff]  }
 0x2d9   : > { %8130 = vmatpush1.bf16.msra.mxu0 %v11005_v43  ;;  %v11098_v43 = vld [vmem:[%s14864_s5 + $0x1d0] ss:$8 sps:$4 sm:$0xff]  }
 0x2da   : > { %6267 = vmatpush2.bf16.msra.mxu1 %v11002_v42  ;;  %8131 = vmatprep.subr.bf16.mxu0 %v11013_v45  ;;  %v11103_v42 = vld [vmem:[%s14864_s5 + $0x254] ss:$8 sps:$4 sm:$0xff]   ;;  %v11106_v45 = vld [vmem:[%s14864_s5 + $0x1c4] ss:$8 sps:$4 sm:$0xff]  }
 0x2db   : > { %6268 = vmatprep.subr.bf16.mxu1 %v11010_v44  ;;  %v11101_v44 = vld [vmem:[%s14864_s5 + $0x250] ss:$8 sps:$4 sm:$0xff]  }
 0x2dd   : > { %8132 = vmatpush1.bf16.msra.mxu0 %v11011_v47  ;;  %v11104_v47 = vld [vmem:[%s14864_s5 + $0x1c0] ss:$8 sps:$4 sm:$0xff]  }
 0x2de   : > { %6269 = vmatpush2.bf16.msra.mxu1 %v11008_v46  ;;  %8133 = vmatprep.subr.bf16.mxu0 %v11019_v21  ;;  %v11109_v46 = vld [vmem:[%s14864_s5 + $0x244] ss:$8 sps:$4 sm:$0xff]   ;;  %v11112_v21 = vld [vmem:[%s14864_s5 + $0x1b4] ss:$8 sps:$4 sm:$0xff]  }
 0x2df   : > { %6270 = vmatprep.subr.bf16.mxu1 %v11016_v48  ;;  %v11107_v48 = vld [vmem:[%s14864_s5 + $0x240] ss:$8 sps:$4 sm:$0xff]  }
 0x2e1   : > { %8134 = vmatpush1.bf16.msra.mxu0 %v11017_v50  ;;  %v11110_v50 = vld [vmem:[%s14864_s5 + $0x1b0] ss:$8 sps:$4 sm:$0xff]  }
 0x2e2   : > { %6271 = vmatpush2.bf16.msra.mxu1 %v11014_v49  ;;  %8135 = vmatprep.subr.bf16.mxu0 %v11025_v52  ;;  %v11115_v49 = vld [vmem:[%s14864_s5 + $0x234] ss:$8 sps:$4 sm:$0xff]   ;;  %v11118_v52 = vld [vmem:[%s14864_s5 + $0x1a4] ss:$8 sps:$4 sm:$0xff]  }
 0x2e3   : > { %6272 = vmatprep.subr.bf16.mxu1 %v11022_v51  ;;  %v11113_v51 = vld [vmem:[%s14864_s5 + $0x230] ss:$8 sps:$4 sm:$0xff]  }
 0x2e5   : > { %8136 = vmatpush1.bf16.msra.mxu0 %v11023_v54  ;;  %v11116_v54 = vld [vmem:[%s14864_s5 + $0x1a0] ss:$8 sps:$4 sm:$0xff]  }
 0x2e6   : > { %6273 = vmatpush2.bf16.msra.mxu1 %v11020_v53  ;;  %8137 = vmatprep.subr.bf16.mxu0 %v11031_v56  ;;  %v11121_v53 = vld [vmem:[%s14864_s5 + $0x224] ss:$8 sps:$4 sm:$0xff]   ;;  %v11124_v56 = vld [vmem:[%s14864_s5 + $0x194] ss:$8 sps:$4 sm:$0xff]  }
 0x2e7   : > { %6274 = vmatprep.subr.bf16.mxu1 %v11028_v55  ;;  %v11119_v55 = vld [vmem:[%s14864_s5 + $0x220] ss:$8 sps:$4 sm:$0xff]  }
 0x2e9   : > { %8138 = vmatpush1.bf16.msra.mxu0 %v11029_v59  ;;  %v11122_v59 = vld [vmem:[%s14864_s5 + $0x190] ss:$8 sps:$4 sm:$0xff]  }
 0x2ea   : > { %6275 = vmatpush2.bf16.msra.mxu1 %v11026_v57  ;;  %8139 = vmatprep.subr.bf16.mxu0 %v11037_v60  ;;  %v11127_v57 = vld [vmem:[%s14864_s5 + $0x214] ss:$8 sps:$4 sm:$0xff]   ;;  %v11125_v60 = vld [vmem:[%s14864_s5 + $0x210] ss:$8 sps:$4 sm:$0xff]  }
 0x2eb   : > { %8166 = vmatprep.subr.bf16.mxu1 %v11040_v58  ;;  %v11130_v58 = vld [vmem:[%s14864_s5 + $0x184] ss:$8 sps:$4 sm:$0xff]  }
 0x2ed   : > { %6277 = vmatmul.mubr.bf16.vlgmr.msra.gmra.mxu1 %v11032_v61  ;;  %8140 = vmatpush2.bf16.msra.mxu0 %v11035_v62  ;;  %v11133_v61 = vld [vmem:[%s14864_s5 + $0x204] ss:$8 sps:$4 sm:$0xff]   ;;  %v11128_v62 = vld [vmem:[%s14864_s5 + $0x180] ss:$8 sps:$4 sm:$0xff]  }
 0x2ee   : > { %8167 = vmatpush1.bf16.msra.mxu1 %v11038_v63  ;;  %8141 = vmatprep.subr.bf16.mxu0 %v11043_v1  ;;  %v11131_v63 = vld [vmem:[%s14864_s5 + $0x200] ss:$8 sps:$4 sm:$0xff]   ;;  %v11139_v1 = vld [vmem:[%s14864_s5 + $0x2f4] ss:$8 sps:$4 sm:$0xff]  }
 0x2ef   : > { %8168 = vmatprep.subr.bf16.mxu1 %v11046_v2  ;;  %8198 = vmatprep.mubr.bf16.mxu1 %v11136_v3  ;;  %v11142_v2 = vld [vmem:[%s14864_s5 + $0x374] ss:$8 sps:$4 sm:$0xff]   ;;  %v11134_v3 = vld [vmem:[%s13652_s29 + $0x8] ss:$72 sps:$4 sm:$0xff]  }
 0x2f1   : > { %8142 = vmatpush2.bf16.msra.mxu0 %v11041_v4  ;;  %v11137_v4 = vld [vmem:[%s14864_s5 + $0x2f0] ss:$8 sps:$4 sm:$0xff]  }
 0x2f2   : > { %8169 = vmatpush1.bf16.msra.mxu1 %v11044_v5  ;;  %8143 = vmatprep.subr.bf16.mxu0 %v11049_v8  ;;  %v11140_v5 = vld [vmem:[%s14864_s5 + $0x370] ss:$8 sps:$4 sm:$0xff]   ;;  %v11145_v8 = vld [vmem:[%s14864_s5 + $0x2e4] ss:$8 sps:$4 sm:$0xff]  }
 0x2f3   : > { %8170 = vmatprep.subr.bf16.mxu1 %v11052_v6  ;;  %v11148_v6 = vld [vmem:[%s14864_s5 + $0x364] ss:$8 sps:$4 sm:$0xff]  }
 0x2f5   : > { %8144 = vmatpush2.bf16.msra.mxu0 %v11047_v9  ;;  %v11238_v9 = vld [vmem:[%s13652_s29 + $0x1c] ss:$72 sps:$4 sm:$0xff]  }
 0x2f6   : > { %8171 = vmatpush1.bf16.msra.mxu1 %v11050_v10  ;;  %8145 = vmatprep.subr.bf16.mxu0 %v11055_v11  ;;  %v11143_v10 = vld [vmem:[%s14864_s5 + $0x2e0] ss:$8 sps:$4 sm:$0xff]  }
 0x2f7   : > { %8172 = vmatprep.subr.bf16.mxu1 %v11058_v13  ;;  %v11146_v11 = vld [vmem:[%s14864_s5 + $0x360] ss:$8 sps:$4 sm:$0xff]   ;;  %v11151_v13 = vld [vmem:[%s14864_s5 + $0x2d4] ss:$8 sps:$4 sm:$0xff]  }
 0x2f9   : > { %8146 = vmatpush2.bf16.msra.mxu0 %v11053_v14  ;;  %v11154_v14 = vld [vmem:[%s14864_s5 + $0x354] ss:$8 sps:$4 sm:$0xff]  }
 0x2fa   : > { %8173 = vmatpush1.bf16.msra.mxu1 %v11056_v16  ;;  %8147 = vmatprep.subr.bf16.mxu0 %v11061_v17  ;;  %v11149_v16 = vld [vmem:[%s14864_s5 + $0x2d0] ss:$8 sps:$4 sm:$0xff]  }
 0x2fb   : > { %8174 = vmatprep.subr.bf16.mxu1 %v11064_v19  ;;  %v11152_v17 = vld [vmem:[%s14864_s5 + $0x350] ss:$8 sps:$4 sm:$0xff]   ;;  %v11157_v19 = vld [vmem:[%s14864_s5 + $0x2c4] ss:$8 sps:$4 sm:$0xff]  }
 0x2fd   : > { %8148 = vmatpush2.bf16.msra.mxu0 %v11059_v20  ;;  %v11160_v20 = vld [vmem:[%s14864_s5 + $0x344] ss:$8 sps:$4 sm:$0xff]  }
 0x2fe   : > { %8175 = vmatpush1.bf16.msra.mxu1 %v11062_v22  ;;  %8149 = vmatprep.subr.bf16.mxu0 %v11067_v23  ;;  %v11155_v22 = vld [vmem:[%s14864_s5 + $0x2c0] ss:$8 sps:$4 sm:$0xff]  }
 0x2ff   : > { %8176 = vmatprep.subr.bf16.mxu1 %v11070_v24  ;;  %v11158_v23 = vld [vmem:[%s14864_s5 + $0x340] ss:$8 sps:$4 sm:$0xff]   ;;  %v11163_v24 = vld [vmem:[%s14864_s5 + $0x2b4] ss:$8 sps:$4 sm:$0xff]  }
 0x301   : > { %8150 = vmatpush2.bf16.msra.mxu0 %v11065_v25  ;;  %v11166_v25 = vld [vmem:[%s14864_s5 + $0x334] ss:$8 sps:$4 sm:$0xff]  }
 0x302   : > { %8177 = vmatpush1.bf16.msra.mxu1 %v11068_v26  ;;  %8151 = vmatprep.subr.bf16.mxu0 %v11073_v27  ;;  %v11161_v26 = vld [vmem:[%s14864_s5 + $0x2b0] ss:$8 sps:$4 sm:$0xff]  }
 0x303   : > { %8178 = vmatprep.subr.bf16.mxu1 %v11076_v28  ;;  %v11164_v27 = vld [vmem:[%s14864_s5 + $0x330] ss:$8 sps:$4 sm:$0xff]   ;;  %v11169_v28 = vld [vmem:[%s14864_s5 + $0x2a4] ss:$8 sps:$4 sm:$0xff]  }
 0x305   : > { %8152 = vmatpush2.bf16.msra.mxu0 %v11071_v29  ;;  %v11172_v29 = vld [vmem:[%s14864_s5 + $0x324] ss:$8 sps:$4 sm:$0xff]  }
 0x306   : > { %8179 = vmatpush1.bf16.msra.mxu1 %v11074_v30  ;;  %8153 = vmatprep.subr.bf16.mxu0 %v11079_v31  ;;  %v11167_v30 = vld [vmem:[%s14864_s5 + $0x2a0] ss:$8 sps:$4 sm:$0xff]  }
 0x307   : > { %8180 = vmatprep.subr.bf16.mxu1 %v11082_v32  ;;  %v11170_v31 = vld [vmem:[%s14864_s5 + $0x320] ss:$8 sps:$4 sm:$0xff]   ;;  %v11175_v32 = vld [vmem:[%s14864_s5 + $0x294] ss:$8 sps:$4 sm:$0xff]  }
 0x309   : > { %8154 = vmatpush2.bf16.msra.mxu0 %v11077_v0  ;;  %v11178_v0 = vld [vmem:[%s14864_s5 + $0x314] ss:$8 sps:$4 sm:$0xff]  }
 0x30a   : > { %8181 = vmatpush1.bf16.msra.mxu1 %v11080_v7  ;;  %8209 = vmatprep.subr.bf16.mxu0 %v11091_v34  ;;  %v11173_v7 = vld [vmem:[%s14864_s5 + $0x290] ss:$8 sps:$4 sm:$0xff]   ;;  %v11181_v34 = vld [vmem:[%s14864_s5 + $0x284] ss:$8 sps:$4 sm:$0xff]  }
 0x30b   : > { %8182 = vmatprep.subr.bf16.mxu1 %v11088_v33  ;;  %v11176_v33 = vld [vmem:[%s14864_s5 + $0x310] ss:$8 sps:$4 sm:$0xff]  }
 0x30c   : > { %8156 = vmatmul.mubr.bf16.vlgmr.msra.gmra.mxu0 %v11083_v35  ;;  %v11184_v35 = vld [vmem:[%s14864_s5 + $0x304] ss:$8 sps:$4 sm:$0xff]  }
 0x30d   : > { %8210 = vmatpush1.bf16.msra.mxu0 %v11089_v37  ;;  %8241 = vmatprep.mubr.bf16.mxu0 %v11187_v40  ;;  %v11182_v37 = vld [vmem:[%s14864_s5 + $0x300] ss:$8 sps:$4 sm:$0xff]   ;;  %v11185_v40 = vld [vmem:[%s13652_s29 + $0x10] ss:$72 sps:$4 sm:$0xff]  }
 0x30e   : > { %8183 = vmatpush2.bf16.msra.mxu1 %v11086_v36  ;;  %8211 = vmatprep.subr.bf16.mxu0 %v11097_v39  ;;  %v11179_v36 = vld [vmem:[%s14864_s5 + $0x280] ss:$8 sps:$4 sm:$0xff]   ;;  %v11193_v39 = vld [vmem:[%s14864_s5 + $0x474] ss:$8 sps:$4 sm:$0xff]  }
 0x30f   : > { %8184 = vmatprep.subr.bf16.mxu1 %v11094_v38  ;;  %v11190_v38 = vld [vmem:[%s14864_s5 + $0x3f4] ss:$8 sps:$4 sm:$0xff]  }
 0x311   : > { %8212 = vmatpush1.bf16.msra.mxu0 %v11095_v12  ;;  %v11191_v12 = vld [vmem:[%s14864_s5 + $0x470] ss:$8 sps:$4 sm:$0xff]  }
 0x312   : > { %8185 = vmatpush2.bf16.msra.mxu1 %v11092_v41  ;;  %8213 = vmatprep.subr.bf16.mxu0 %v11103_v42  ;;  %v11188_v41 = vld [vmem:[%s14864_s5 + $0x3f0] ss:$8 sps:$4 sm:$0xff]   ;;  %v11199_v42 = vld [vmem:[%s14864_s5 + $0x464] ss:$8 sps:$4 sm:$0xff]  }
 0x313   : > { %8186 = vmatprep.subr.bf16.mxu1 %v11100_v18  ;;  %v11196_v18 = vld [vmem:[%s14864_s5 + $0x3e4] ss:$8 sps:$4 sm:$0xff]  }
 0x315   : > { %8214 = vmatpush1.bf16.msra.mxu0 %v11101_v44  ;;  %v11194_v44 = vld [vmem:[%s14864_s5 + $0x3e0] ss:$8 sps:$4 sm:$0xff]  }
 0x316   : > { %8187 = vmatpush2.bf16.msra.mxu1 %v11098_v43  ;;  %8215 = vmatprep.subr.bf16.mxu0 %v11109_v46  ;;  %v11289_v43 = vld [vmem:[%s13652_s29 + $0x24] ss:$72 sps:$4 sm:$0xff]   ;;  %v11202_v46 = vld [vmem:[%s14864_s5 + $0x3d4] ss:$8 sps:$4 sm:$0xff]  }
 0x317   : > { %8188 = vmatprep.subr.bf16.mxu1 %v11106_v45  ;;  %v11197_v45 = vld [vmem:[%s14864_s5 + $0x460] ss:$8 sps:$4 sm:$0xff]  }
 0x319   : > { %8216 = vmatpush1.bf16.msra.mxu0 %v11107_v48  ;;  %v11200_v48 = vld [vmem:[%s14864_s5 + $0x3d0] ss:$8 sps:$4 sm:$0xff]  }
 0x31a   : > { %8189 = vmatpush2.bf16.msra.mxu1 %v11104_v47  ;;  %8217 = vmatprep.subr.bf16.mxu0 %v11115_v49  ;;  %v11205_v47 = vld [vmem:[%s14864_s5 + $0x454] ss:$8 sps:$4 sm:$0xff]   ;;  %v11208_v49 = vld [vmem:[%s14864_s5 + $0x3c4] ss:$8 sps:$4 sm:$0xff]  }
 0x31b   : > { %8190 = vmatprep.subr.bf16.mxu1 %v11112_v21  ;;  %v11203_v21 = vld [vmem:[%s14864_s5 + $0x450] ss:$8 sps:$4 sm:$0xff]  }
 0x31d   : > { %8218 = vmatpush1.bf16.msra.mxu0 %v11113_v51  ;;  %v11206_v51 = vld [vmem:[%s14864_s5 + $0x3c0] ss:$8 sps:$4 sm:$0xff]  }
 0x31e   : > { %8191 = vmatpush2.bf16.msra.mxu1 %v11110_v50  ;;  %8219 = vmatprep.subr.bf16.mxu0 %v11121_v53  ;;  %v11211_v50 = vld [vmem:[%s14864_s5 + $0x444] ss:$8 sps:$4 sm:$0xff]   ;;  %v11214_v53 = vld [vmem:[%s14864_s5 + $0x3b4] ss:$8 sps:$4 sm:$0xff]  }
 0x31f   : > { %8192 = vmatprep.subr.bf16.mxu1 %v11118_v52  ;;  %v11209_v52 = vld [vmem:[%s14864_s5 + $0x440] ss:$8 sps:$4 sm:$0xff]  }
 0x321   : > { %8220 = vmatpush1.bf16.msra.mxu0 %v11119_v55  ;;  %v11212_v55 = vld [vmem:[%s14864_s5 + $0x3b0] ss:$8 sps:$4 sm:$0xff]  }
 0x322   : > { %8193 = vmatpush2.bf16.msra.mxu1 %v11116_v54  ;;  %8221 = vmatprep.subr.bf16.mxu0 %v11127_v57  ;;  %v11217_v54 = vld [vmem:[%s14864_s5 + $0x434] ss:$8 sps:$4 sm:$0xff]   ;;  %v11220_v57 = vld [vmem:[%s14864_s5 + $0x3a4] ss:$8 sps:$4 sm:$0xff]  }
 0x323   : > { %8194 = vmatprep.subr.bf16.mxu1 %v11124_v56  ;;  %v11215_v56 = vld [vmem:[%s14864_s5 + $0x430] ss:$8 sps:$4 sm:$0xff]  }
 0x325   : > { %8222 = vmatpush1.bf16.msra.mxu0 %v11125_v60  ;;  %v11218_v60 = vld [vmem:[%s14864_s5 + $0x3a0] ss:$8 sps:$4 sm:$0xff]  }
 0x326   : > { %8195 = vmatpush2.bf16.msra.mxu1 %v11122_v59  ;;  %8223 = vmatprep.subr.bf16.mxu0 %v11133_v61  ;;  %v11223_v59 = vld [vmem:[%s14864_s5 + $0x424] ss:$8 sps:$4 sm:$0xff]   ;;  %v11226_v61 = vld [vmem:[%s14864_s5 + $0x394] ss:$8 sps:$4 sm:$0xff]  }
 0x327   : > { %8196 = vmatprep.subr.bf16.mxu1 %v11130_v58  ;;  %v11221_v58 = vld [vmem:[%s14864_s5 + $0x420] ss:$8 sps:$4 sm:$0xff]  }
 0x329   : > { %8224 = vmatpush1.bf16.msra.mxu0 %v11131_v63  ;;  %v11224_v63 = vld [vmem:[%s14864_s5 + $0x390] ss:$8 sps:$4 sm:$0xff]  }
 0x32a   : > { %8197 = vmatpush2.bf16.msra.mxu1 %v11128_v62  ;;  %8225 = vmatprep.subr.bf16.mxu0 %v11139_v1  ;;  %v11229_v62 = vld [vmem:[%s14864_s5 + $0x414] ss:$8 sps:$4 sm:$0xff]   ;;  %v11227_v1 = vld [vmem:[%s14864_s5 + $0x410] ss:$8 sps:$4 sm:$0xff]  }
 0x32b   : > { %8252 = vmatprep.subr.bf16.mxu1 %v11142_v2  ;;  %v11232_v2 = vld [vmem:[%s14864_s5 + $0x384] ss:$8 sps:$4 sm:$0xff]  }
 0x32d   : > { %8199 = vmatmul.mubr.bf16.vlgmr.msra.gmra.mxu1 %v11134_v3  ;;  %8226 = vmatpush2.bf16.msra.mxu0 %v11137_v4  ;;  %v11235_v3 = vld [vmem:[%s14864_s5 + $0x404] ss:$8 sps:$4 sm:$0xff]   ;;  %v11230_v4 = vld [vmem:[%s14864_s5 + $0x380] ss:$8 sps:$4 sm:$0xff]  }
 0x32e   : > { %8253 = vmatpush1.bf16.msra.mxu1 %v11140_v5  ;;  %8227 = vmatprep.subr.bf16.mxu0 %v11145_v8  ;;  %v11233_v5 = vld [vmem:[%s14864_s5 + $0x400] ss:$8 sps:$4 sm:$0xff]   ;;  %v11241_v8 = vld [vmem:[%s14864_s5 + $0x4f4] ss:$8 sps:$4 sm:$0xff]  }
 0x32f   : > { %8254 = vmatprep.subr.bf16.mxu1 %v11148_v6  ;;  %8284 = vmatprep.mubr.bf16.mxu1 %v11238_v9  ;;  %v11244_v6 = vld [vmem:[%s14864_s5 + $0x574] ss:$8 sps:$4 sm:$0xff]   ;;  %v11236_v9 = vld [vmem:[%s13652_s29 + $0x18] ss:$72 sps:$4 sm:$0xff]  }
 0x331   : > { %8228 = vmatpush2.bf16.msra.mxu0 %v11143_v10  ;;  %v11239_v10 = vld [vmem:[%s14864_s5 + $0x4f0] ss:$8 sps:$4 sm:$0xff]  }
 0x332   : > { %8255 = vmatpush1.bf16.msra.mxu1 %v11146_v11  ;;  %8229 = vmatprep.subr.bf16.mxu0 %v11151_v13  ;;  %v11242_v11 = vld [vmem:[%s14864_s5 + $0x570] ss:$8 sps:$4 sm:$0xff]   ;;  %v11247_v13 = vld [vmem:[%s14864_s5 + $0x4e4] ss:$8 sps:$4 sm:$0xff]  }
 0x333   : > { %8256 = vmatprep.subr.bf16.mxu1 %v11154_v14  ;;  %v11250_v14 = vld [vmem:[%s14864_s5 + $0x564] ss:$8 sps:$4 sm:$0xff]  }
 0x335   : > { %8230 = vmatpush2.bf16.msra.mxu0 %v11149_v16  ;;  %v11340_v16 = vld [vmem:[%s13652_s29 + $0x2c] ss:$72 sps:$4 sm:$0xff]  }
 0x336   : > { %8257 = vmatpush1.bf16.msra.mxu1 %v11152_v17  ;;  %8231 = vmatprep.subr.bf16.mxu0 %v11157_v19  ;;  %v11245_v17 = vld [vmem:[%s14864_s5 + $0x4e0] ss:$8 sps:$4 sm:$0xff]  }
 0x337   : > { %8258 = vmatprep.subr.bf16.mxu1 %v11160_v20  ;;  %v11248_v19 = vld [vmem:[%s14864_s5 + $0x560] ss:$8 sps:$4 sm:$0xff]   ;;  %v11253_v20 = vld [vmem:[%s14864_s5 + $0x4d4] ss:$8 sps:$4 sm:$0xff]  }
 0x339   : > { %8232 = vmatpush2.bf16.msra.mxu0 %v11155_v22  ;;  %v11256_v22 = vld [vmem:[%s14864_s5 + $0x554] ss:$8 sps:$4 sm:$0xff]  }
 0x33a   : > { %8259 = vmatpush1.bf16.msra.mxu1 %v11158_v23  ;;  %8233 = vmatprep.subr.bf16.mxu0 %v11163_v24  ;;  %v11251_v23 = vld [vmem:[%s14864_s5 + $0x4d0] ss:$8 sps:$4 sm:$0xff]  }
 0x33b   : > { %8260 = vmatprep.subr.bf16.mxu1 %v11166_v25  ;;  %v11254_v24 = vld [vmem:[%s14864_s5 + $0x550] ss:$8 sps:$4 sm:$0xff]   ;;  %v11259_v25 = vld [vmem:[%s14864_s5 + $0x4c4] ss:$8 sps:$4 sm:$0xff]  }
 0x33d   : > { %8234 = vmatpush2.bf16.msra.mxu0 %v11161_v26  ;;  %v11262_v26 = vld [vmem:[%s14864_s5 + $0x544] ss:$8 sps:$4 sm:$0xff]  }
 0x33e   : > { %8261 = vmatpush1.bf16.msra.mxu1 %v11164_v27  ;;  %8235 = vmatprep.subr.bf16.mxu0 %v11169_v28  ;;  %v14380_v27 = vpop.f32.mrf.mxu1  ;;  %v11257_v28 = vld [vmem:[%s14864_s5 + $0x4c0] ss:$8 sps:$4 sm:$0xff]  }
 0x33f   : > { %8262 = vmatprep.subr.bf16.mxu1 %v11172_v29  ;;  %v11260_v29 = vld [vmem:[%s14864_s5 + $0x540] ss:$8 sps:$4 sm:$0xff]  }
 0x341   : > { %8236 = vmatpush2.bf16.msra.mxu0 %v11167_v30  ;;  %v11265_v30 = vld [vmem:[%s14864_s5 + $0x4b4] ss:$8 sps:$4 sm:$0xff]  }
 0x342   : > { %8263 = vmatpush1.bf16.msra.mxu1 %v11170_v31  ;;  %8237 = vmatprep.subr.bf16.mxu0 %v11175_v32  ;;  %v11268_v31 = vld [vmem:[%s14864_s5 + $0x534] ss:$8 sps:$4 sm:$0xff]   ;;  %v14394_v32 = vpop.f32.mrf.mxu1 }
 0x343   : > { %8264 = vmatprep.subr.bf16.mxu1 %v11178_v0  ;;  %v14396_v0 = vpop.f32.mrf.mxu0 }
 0x345   : > { %8238 = vmatpush2.bf16.msra.mxu0 %v11173_v7  ;;  %v11263_v7 = vld [vmem:[%s14864_s5 + $0x4b0] ss:$8 sps:$4 sm:$0xff]  }
 0x346   : > { %8265 = vmatpush1.bf16.msra.mxu1 %v11176_v33  ;;  %8239 = vmatprep.subr.bf16.mxu0 %v11181_v34  ;;  %v11266_v33 = vld [vmem:[%s14864_s5 + $0x530] ss:$8 sps:$4 sm:$0xff]   ;;  %v11271_v34 = vld [vmem:[%s14864_s5 + $0x4a4] ss:$8 sps:$4 sm:$0xff]  }
 0x347   : > { %8266 = vmatprep.subr.bf16.mxu1 %v11184_v35  ;;  %v11274_v35 = vld [vmem:[%s14864_s5 + $0x524] ss:$8 sps:$4 sm:$0xff]  }
 0x349   : > { %8240 = vmatpush2.bf16.msra.mxu0 %v11179_v36  ;;  %v14410_v36 = vpop.f32.mrf.mxu1 }
 0x34a   : > { %8267 = vmatpush1.bf16.msra.mxu1 %v11182_v37  ;;  %8295 = vmatprep.subr.bf16.mxu0 %v11193_v39  ;;  %v14412_v37 = vpop.f32.mrf.mxu0  ;;  %v11272_v39 = vld [vmem:[%s14864_s5 + $0x520] ss:$8 sps:$4 sm:$0xff]  }
 0x34b   : > { %8268 = vmatprep.subr.bf16.mxu1 %v11190_v38  ;;  %v11269_v38 = vld [vmem:[%s14864_s5 + $0x4a0] ss:$8 sps:$4 sm:$0xff]  }
 0x34c   : > { %8242 = vmatmul.mubr.bf16.vlgmr.msra.gmra.mxu0 %v11185_v40  ;;  %v11277_v40 = vld [vmem:[%s14864_s5 + $0x494] ss:$8 sps:$4 sm:$0xff]  }
 0x34d   : > { %8296 = vmatpush1.bf16.msra.mxu0 %v11191_v12  ;;  %8327 = vmatprep.mubr.bf16.mxu0 %v11289_v43  ;;  %v14426_v12 = vpop.f32.mrf.mxu1  ;;  %v11278_v43 = vld [vmem:[%s14864_s5 + $0x510] ss:$8 sps:$4 sm:$0xff]  }
 0x34e   : > { %8269 = vmatpush2.bf16.msra.mxu1 %v11188_v41  ;;  %8297 = vmatprep.subr.bf16.mxu0 %v11199_v42  ;;  %v11280_v41 = vld [vmem:[%s14864_s5 + $0x514] ss:$8 sps:$4 sm:$0xff]   ;;  %v11275_v42 = vld [vmem:[%s14864_s5 + $0x490] ss:$8 sps:$4 sm:$0xff]  }
 0x34f   : > { %8270 = vmatprep.subr.bf16.mxu1 %v11196_v18  ;;  %v14428_v18 = vpop.f32.mrf.mxu0 }
 0x351   : > { %8298 = vmatpush1.bf16.msra.mxu0 %v11197_v45  ;;  %v11283_v45 = vld [vmem:[%s14864_s5 + $0x484] ss:$8 sps:$4 sm:$0xff]  }
 0x352   : > { %8271 = vmatpush2.bf16.msra.mxu1 %v11194_v44  ;;  %8299 = vmatprep.subr.bf16.mxu0 %v11205_v47  ;;  %v14436_v44 = vpop.f32.mrf.mxu1  ;;  %v14444_v47 = vpop.f32.mrf.mxu0 }
 0x353   : > { %8272 = vmatprep.subr.bf16.mxu1 %v11202_v46  ;;  %v11286_v46 = vld [vmem:[%s14864_s5 + $0x504] ss:$8 sps:$4 sm:$0xff]  }
 0x355   : > { %8300 = vmatpush1.bf16.msra.mxu0 %v11203_v21  ;;  %v11284_v21 = vld [vmem:[%s14864_s5 + $0x500] ss:$8 sps:$4 sm:$0xff]  }
 0x356   : > { %8273 = vmatpush2.bf16.msra.mxu1 %v11200_v48  ;;  %8301 = vmatprep.subr.bf16.mxu0 %v11211_v50  ;;  %v11281_v48 = vld [vmem:[%s14864_s5 + $0x480] ss:$8 sps:$4 sm:$0xff]   ;;  %v14454_v50 = vpop.f32.mrf.mxu0 }
 0x357   : > { %8274 = vmatprep.subr.bf16.mxu1 %v11208_v49  ;;  %v14452_v49 = vpop.f32.mrf.mxu1 }
 0x359   : > { %8302 = vmatpush1.bf16.msra.mxu0 %v11209_v52  ;;  %v11295_v52 = vld [vmem:[%s14864_s5 + $0x674] ss:$8 sps:$4 sm:$0xff]  }
 0x35a   : > { %8275 = vmatpush2.bf16.msra.mxu1 %v11206_v51  ;;  %8303 = vmatprep.subr.bf16.mxu0 %v11217_v54  ;;  %v11292_v51 = vld [vmem:[%s14864_s5 + $0x5f4] ss:$8 sps:$4 sm:$0xff]   ;;  %v11290_v54 = vld [vmem:[%s14864_s5 + $0x5f0] ss:$8 sps:$4 sm:$0xff]  }
 0x35b   : > { %8276 = vmatprep.subr.bf16.mxu1 %v11214_v53  ;;  %v11287_v53 = vld [vmem:[%s13652_s29 + $0x20] ss:$72 sps:$4 sm:$0xff]  }
 0x35d   : > { %8304 = vmatpush1.bf16.msra.mxu0 %v11215_v56  ;;  %v14469_v56 = vpop.f32.mrf.mxu1 }
 0x35e   : > { %8277 = vmatpush2.bf16.msra.mxu1 %v11212_v55  ;;  %8305 = vmatprep.subr.bf16.mxu0 %v11223_v59  ;;  %v11293_v55 = vld [vmem:[%s14864_s5 + $0x670] ss:$8 sps:$4 sm:$0xff]   ;;  %v11298_v59 = vld [vmem:[%s14864_s5 + $0x5e4] ss:$8 sps:$4 sm:$0xff]  }
 0x35f   : > { %8278 = vmatprep.subr.bf16.mxu1 %v11220_v57  ;;  %v14471_v57 = vpop.f32.mrf.mxu0 }
 0x361   : > { %8306 = vmatpush1.bf16.msra.mxu0 %v11221_v58  ;;  %v11391_v58 = vld [vmem:[%s13652_s29 + $0x34] ss:$72 sps:$4 sm:$0xff]  }
 0x362   : > { %8279 = vmatpush2.bf16.msra.mxu1 %v11218_v60  ;;  %8307 = vmatprep.subr.bf16.mxu0 %v11229_v62  ;;  %v11301_v60 = vld [vmem:[%s14864_s5 + $0x664] ss:$8 sps:$4 sm:$0xff]   ;;  %v11299_v62 = vld [vmem:[%s14864_s5 + $0x660] ss:$8 sps:$4 sm:$0xff]  }
 0x363   : > { %8280 = vmatprep.subr.bf16.mxu1 %v11226_v61  ;;  %v11296_v61 = vld [vmem:[%s14864_s5 + $0x5e0] ss:$8 sps:$4 sm:$0xff]  }
 0x365   : > { %8308 = vmatpush1.bf16.msra.mxu0 %v11227_v1  ;;  %v14488_v1 = vpop.f32.mrf.mxu0 }
 0x366   : > { %8281 = vmatpush2.bf16.msra.mxu1 %v11224_v63  ;;  %8309 = vmatprep.subr.bf16.mxu0 %v11235_v3  ;;  %v14486_v63 = vpop.f32.mrf.mxu1  ;;  %v11307_v3 = vld [vmem:[%s14864_s5 + $0x654] ss:$8 sps:$4 sm:$0xff]  }
 0x367   : > { %8282 = vmatprep.subr.bf16.mxu1 %v11232_v2  ;;  %v11304_v2 = vld [vmem:[%s14864_s5 + $0x5d4] ss:$8 sps:$4 sm:$0xff]  }
 0x369   : > { %8310 = vmatpush1.bf16.msra.mxu0 %v11233_v5  ;;  %v11302_v5 = vld [vmem:[%s14864_s5 + $0x5d0] ss:$8 sps:$4 sm:$0xff]  }
 0x36a   : > { %8283 = vmatpush2.bf16.msra.mxu1 %v11230_v4  ;;  %8311 = vmatprep.subr.bf16.mxu0 %v11241_v8  ;;  %v6106_v4 = vpop.f32.mrf.mxu1  ;;  %v11305_v8 = vld [vmem:[%s14864_s5 + $0x650] ss:$8 sps:$4 sm:$0xff]  }
 0x36b   : > { %8338 = vmatprep.subr.bf16.mxu1 %v11244_v6  ;;  %v14502_v6 = vpop.f32.mrf.mxu0 }
 0x36d   : > { %8285 = vmatmul.mubr.bf16.vlgmr.msra.gmra.mxu1 %v11236_v9  ;;  %8312 = vmatpush2.bf16.msra.mxu0 %v11239_v10  ;;  %v11310_v9 = vld [vmem:[%s14864_s5 + $0x5c4] ss:$8 sps:$4 sm:$0xff]  }
 0x36e   : > { %8339 = vmatpush1.bf16.msra.mxu1 %v11242_v11  ;;  %8313 = vmatprep.subr.bf16.mxu0 %v11247_v13  ;;  %v11313_v10 = vld [vmem:[%s14864_s5 + $0x644] ss:$8 sps:$4 sm:$0xff]   ;;  %v14510_v11 = vpop.f32.mrf.mxu1  ;;  %v14512_v13 = vpop.f32.mrf.mxu0 }
 0x36f   : > { %8340 = vmatprep.subr.bf16.mxu1 %v11250_v14  ;;  %8370 = vmatprep.mubr.bf16.mxu1 %v11340_v16  ;;  %v11308_v14 = vld [vmem:[%s14864_s5 + $0x5c0] ss:$8 sps:$4 sm:$0xff]  }
 0x370   : > { %v11311_v16 = vld [vmem:[%s14864_s5 + $0x640] ss:$8 sps:$4 sm:$0xff]  }
 0x371   : > { %8314 = vmatpush2.bf16.msra.mxu0 %v11245_v17  ;;  %v11316_v17 = vld [vmem:[%s14864_s5 + $0x5b4] ss:$8 sps:$4 sm:$0xff]  }
 0x372   : > { %8341 = vmatpush1.bf16.msra.mxu1 %v11248_v19  ;;  %8315 = vmatprep.subr.bf16.mxu0 %v11253_v20  ;;  %v11319_v19 = vld [vmem:[%s14864_s5 + $0x634] ss:$8 sps:$4 sm:$0xff]   ;;  %v6110_v20 = vpop.f32.mrf.mxu1 }
 0x373   : > { %8342 = vmatprep.subr.bf16.mxu1 %v11256_v22  ;;  %v6151_v22 = vpop.f32.mrf.mxu0 }
 0x375   : > { %8316 = vmatpush2.bf16.msra.mxu0 %v11251_v23  ;;  %v11314_v23 = vld [vmem:[%s14864_s5 + $0x5b0] ss:$8 sps:$4 sm:$0xff]  }
 0x376   : > { %8343 = vmatpush1.bf16.msra.mxu1 %v11254_v24  ;;  %8317 = vmatprep.subr.bf16.mxu0 %v11259_v25  ;;  %v11317_v24 = vld [vmem:[%s14864_s5 + $0x630] ss:$8 sps:$4 sm:$0xff]   ;;  %v11322_v25 = vld [vmem:[%s14864_s5 + $0x5a4] ss:$8 sps:$4 sm:$0xff]  }
 0x377   : > { %8344 = vmatprep.subr.bf16.mxu1 %v11262_v26  ;;  %v11325_v26 = vld [vmem:[%s14864_s5 + $0x624] ss:$8 sps:$4 sm:$0xff]  }
 0x379   : > { %8318 = vmatpush2.bf16.msra.mxu0 %v11257_v28  ;;  %v6112_v28 = vpop.f32.mrf.mxu1 }
 0x37a   : > { %8345 = vmatpush1.bf16.msra.mxu1 %v11260_v29  ;;  %8319 = vmatprep.subr.bf16.mxu0 %v11265_v30  ;;  %v14538_v29 = vpop.f32.mrf.mxu0  ;;  %v11320_v30 = vld [vmem:[%s14864_s5 + $0x5a0] ss:$8 sps:$4 sm:$0xff]  }
 0x37b   : > { %8346 = vmatprep.subr.bf16.mxu1 %v11268_v31  ;;  %v11323_v31 = vld [vmem:[%s14864_s5 + $0x620] ss:$8 sps:$4 sm:$0xff]  }
 0x37d   : > { %8320 = vmatpush2.bf16.msra.mxu0 %v11263_v7  ;;  %v6192_v7 = vpop.f32.mrf.mxu1 }
 0x37e   : > { %8347 = vmatpush1.bf16.msra.mxu1 %v11266_v33  ;;  %8321 = vmatprep.subr.bf16.mxu0 %v11271_v34  ;;  %v11328_v33 = vld [vmem:[%s14864_s5 + $0x594] ss:$8 sps:$4 sm:$0xff]  }
 0x37f   : > { %8348 = vmatprep.subr.bf16.mxu1 %v11274_v35  ;;  %v11331_v34 = vld [vmem:[%s14864_s5 + $0x614] ss:$8 sps:$4 sm:$0xff]   ;;  %v5978_v35 = vadd.f32 %v14396_v0, %v14380_v27  ;;  %v11334_v27 = vld [vmem:[%s14864_s5 + $0x584] ss:$8 sps:$4 sm:$0xff]   ;;  %v5982_v0 = vadd.f32 %v14428_v18, %v14410_v36  ;;  %v11335_v36 = vld [vmem:[%s14864_s5 + $0x600] ss:$8 sps:$4 sm:$0xff]  }
 0x381   : > { %8322 = vmatpush2.bf16.msra.mxu0 %v11269_v38  ;;  %v6155_v38 = vpop.f32.mrf.mxu0 }
 0x382   : > { %8349 = vmatpush1.bf16.msra.mxu1 %v11272_v39  ;;  %8323 = vmatprep.subr.bf16.mxu0 %v11277_v40  ;;  %v5980_v39 = vadd.f32 %v14412_v37, %v14394_v32  ;;  %v6021_v40 = vadd.f32 %v14436_v44, %v5978_v35  ;;  %v11337_v32 = vld [vmem:[%s14864_s5 + $0x604] ss:$8 sps:$4 sm:$0xff]  }
 0x383   : > { %8350 = vmatprep.subr.bf16.mxu1 %v11280_v41  ;;  %v11326_v41 = vld [vmem:[%s14864_s5 + $0x590] ss:$8 sps:$4 sm:$0xff]  }
 0x384   : > { %v6023_v37 = vadd.f32 %v14452_v49, %v5980_v39  ;;  %v6064_v44 = vadd.f32 %v14454_v50, %v6021_v40  ;;  %v11346_v50 = vld [vmem:[%s14864_s5 + $0x774] ss:$8 sps:$4 sm:$0xff]  }
 0x385   : > { %8324 = vmatpush2.bf16.msra.mxu0 %v11275_v42  ;;  %v11329_v42 = vld [vmem:[%s14864_s5 + $0x610] ss:$8 sps:$4 sm:$0xff]  }
 0x386   : > { %8351 = vmatpush1.bf16.msra.mxu1 %v11278_v43  ;;  %8325 = vmatprep.subr.bf16.mxu0 %v11283_v45  ;;  %v6194_v43 = vpop.f32.mrf.mxu1 }
 0x387   : > { %8352 = vmatprep.subr.bf16.mxu1 %v11286_v46  ;;  %v5984_v46 = vadd.f32 %v14444_v47, %v14426_v12  ;;  %v11343_v47 = vld [vmem:[%s14864_s5 + $0x6f4] ss:$8 sps:$4 sm:$0xff]  }
 0x388   : > { %v6196_v49 = vpop.f32.mrf.mxu1 }
 0x389   : > { %8326 = vmatpush2.bf16.msra.mxu0 %v11281_v48  ;;  %v6025_v48 = vadd.f32 %v14469_v56, %v5982_v0  ;;  %v6027_v18 = vadd.f32 %v14486_v63, %v5984_v46  ;;  %v8526_v56 = vsub.s32 3, %v13181_v15  ;;  %v11341_v63 = vld [vmem:[%s14864_s5 + $0x6f0] ss:$8 sps:$4 sm:$0xff]  }
 0x38a   : > { %8353 = vmatpush1.bf16.msra.mxu1 %v11284_v21  ;;  %8381 = vmatprep.subr.bf16.mxu0 %v11295_v52  ;;  %v6066_v21 = vadd.f32 %v14471_v57, %v6023_v37  ;;  %v11332_v52 = vld [vmem:[%s14864_s5 + $0x580] ss:$8 sps:$4 sm:$0xff]  }
 0x38b   : > { %8354 = vmatprep.subr.bf16.mxu1 %v11292_v51  ;;  %v6107_v51 = vadd.f32 %v6106_v4, %v6064_v44  ;;  %v6070_v57 = vadd.f32 %v14502_v6, %v6027_v18 }
 0x38c   : > { %8328 = vmatmul.mubr.bf16.vlgmr.msra.gmra.mxu0 %v11287_v53  ;;  %v6235_v45 = vpop.f32.mrf.mxu0  ;;  %v6068_v53 = vadd.f32 %v14488_v1, %v6025_v48  ;;  %v11344_v1 = vld [vmem:[%s14864_s5 + $0x770] ss:$8 sps:$4 sm:$0xff]  }
 0x38d   : > { %8382 = vmatpush1.bf16.msra.mxu0 %v11293_v55  ;;  %8413 = vmatprep.mubr.bf16.mxu0 %v11391_v58  ;;  %v6150_v55 = vadd.f32 %v14512_v13, %v6107_v51  ;;  %v11362_v51 = vld [vmem:[%s14864_s5 + $0x740] ss:$8 sps:$4 sm:$0xff]  }
 0x38e   : > { %8355 = vmatpush2.bf16.msra.mxu1 %v11290_v54  ;;  %8383 = vmatprep.subr.bf16.mxu0 %v11301_v60  ;;  %v6237_v12 = vpop.f32.mrf.mxu0  ;;  %v6109_v54 = vadd.f32 %v14510_v11, %v6066_v21  ;;  %v8530_v60 = vsub.s32 4, %v13181_v15  ;;  %v6111_v58 = vadd.f32 %v6110_v20, %v6068_v53  ;;  %v14613_v11 = vld [vmem:[%s14865_s6] sm:$0xff] }
 0x38f   : > { %8356 = vmatprep.subr.bf16.mxu1 %v11298_v59  ;;  %v11338_v59 = vld [vmem:[%s13652_s29 + $0x28] ss:$72 sps:$4 sm:$0xff]   ;;  %v8527_v13 = vrot.slane %v14613_v11, %v8526_v56  ;;  %v11382_v56 = vld [vmem:[%s14864_s5 + $0x714] ss:$8 sps:$4 sm:$0xff]  }
 0x390   : > { %v6239_v4 = vpop.f32.mrf.mxu0  ;;  %v6154_v6 = vadd.f32 %v14538_v29, %v6111_v58  ;;  %v11355_v29 = vld [vmem:[%s14864_s5 + $0x6d4] ss:$8 sps:$4 sm:$0xff]   ;;  %v11359_v21 = vld [vmem:[%s14864_s5 + $0x6c0] ss:$8 sps:$4 sm:$0xff]   ;;  %v11388_v58 = vld [vmem:[%s14864_s5 + $0x704] ss:$8 sps:$4 sm:$0xff]  }
 0x391   : > { %8384 = vmatpush1.bf16.msra.mxu0 %v11299_v62  ;;  %v6193_v62 = vadd.f32 %v6192_v7, %v6150_v55  ;;  %v11371_v53 = vld [vmem:[%s14864_s5 + $0x6a0] ss:$8 sps:$4 sm:$0xff]   ;;  %v11379_v55 = vld [vmem:[%s14864_s5 + $0x694] ss:$8 sps:$4 sm:$0xff]  }
 0x392   : > { %8357 = vmatpush2.bf16.msra.mxu1 %v11296_v61  ;;  %8385 = vmatprep.subr.bf16.mxu0 %v11307_v3  ;;  %v6152_v61 = vadd.f32 %v6151_v22, %v6109_v54  ;;  %v6198_v3 = vpop.f32.mrf.mxu1  ;;  %v6197_v20 = vadd.f32 %v6196_v49, %v6154_v6  ;;  %v11365_v49 = vld [vmem:[%s14864_s5 + $0x6b0] ss:$8 sps:$4 sm:$0xff]   ;;  %v11374_v54 = vld [vmem:[%s14864_s5 + $0x720] ss:$8 sps:$4 sm:$0xff]   ;;  %v11469_v6 = vld [vmem:[%s13652_s29 + $0x44] ss:$72 sps:$4 sm:$0xff]  }
 0x393   : > { %8358 = vmatprep.subr.bf16.mxu1 %v11304_v2  ;;  %v6113_v2 = vadd.f32 %v6112_v28, %v6070_v57  ;;  %v11377_v57 = vld [vmem:[%s14864_s5 + $0x690] ss:$8 sps:$4 sm:$0xff]  }
 0x394   : > { %v6240_v7 = vadd.f32 %v6239_v4, %v6197_v20  ;;  %v11395_v4 = vld [vmem:[%s14864_s5 + $0x870] ss:$8 sps:$4 sm:$0xff]   ;;  %v11415_v20 = vld [vmem:[%s14864_s5 + $0x844] ss:$8 sps:$4 sm:$0xff]  }
 0x395   : > { %8386 = vmatpush1.bf16.msra.mxu0 %v11305_v8  ;;  %v11352_v8 = vld [vmem:[%s14864_s5 + $0x764] ss:$8 sps:$4 sm:$0xff]  }
 0x396   : > { %8359 = vmatpush2.bf16.msra.mxu1 %v11302_v5  ;;  %8387 = vmatprep.subr.bf16.mxu0 %v11313_v10  ;;  %v11349_v5 = vld [vmem:[%s14864_s5 + $0x6e4] ss:$8 sps:$4 sm:$0xff]   ;;  %v6236_v10 = vadd.f32 %v6235_v45, %v6193_v62  ;;  %v11386_v62 = vld [vmem:[%s14864_s5 + $0x700] ss:$8 sps:$4 sm:$0xff]  }
 0x397   : > { %8360 = vmatprep.subr.bf16.mxu1 %v11310_v9  ;;  %v6195_v9 = vadd.f32 %v6194_v43, %v6152_v61  ;;  %v11356_v43 = vld [vmem:[%s14864_s5 + $0x750] ss:$8 sps:$4 sm:$0xff]   ;;  %v11383_v61 = vld [vmem:[%s14864_s5 + $0x680] ss:$8 sps:$4 sm:$0xff]  }
 0x399   : > { %8388 = vmatpush1.bf16.msra.mxu0 %v11311_v16  ;;  %v6156_v16 = vadd.f32 %v6155_v38, %v6113_v2  ;;  %v6238_v22 = vadd.f32 %v6237_v12, %v6195_v9  ;;  %v11368_v12 = vld [vmem:[%s14864_s5 + $0x730] ss:$8 sps:$4 sm:$0xff]   ;;  %v11398_v9 = vld [vmem:[%s14864_s5 + $0x7e0] ss:$8 sps:$4 sm:$0xff]  }
 0x39a   : > { %8361 = vmatpush2.bf16.msra.mxu1 %v11308_v14  ;;  %8389 = vmatprep.subr.bf16.mxu0 %v11319_v19  ;;  %v11442_v14 = vld [vmem:[%s13652_s29 + $0x3c] ss:$72 sps:$4 sm:$0xff]   ;;  %v8531_v19 = vrot.slane %v14613_v11, %v8530_v60  ;;  %v11389_v2 = vld [vmem:[%s13652_s29 + $0x30] ss:$72 sps:$4 sm:$0xff]  }
 0x39b   : > { %8362 = vmatprep.subr.bf16.mxu1 %v11316_v17  ;;  %v11385_v60 = vld [vmem:[%s14864_s5 + $0x684] ss:$8 sps:$4 sm:$0xff]  }
 0x39d   : > { %8390 = vmatpush1.bf16.msra.mxu0 %v11317_v24  ;;  %v11347_v24 = vld [vmem:[%s14864_s5 + $0x6e0] ss:$8 sps:$4 sm:$0xff]  }
 0x39e   : > { %8363 = vmatpush2.bf16.msra.mxu1 %v11314_v23  ;;  %8391 = vmatprep.subr.bf16.mxu0 %v11325_v26  ;;  %v6241_v26 = vpop.f32.mrf.mxu0 }
 0x39f   : > { %8364 = vmatprep.subr.bf16.mxu1 %v11322_v25  ;;  %v11350_v25 = vld [vmem:[%s14864_s5 + $0x760] ss:$8 sps:$4 sm:$0xff]  }
 0x3a1   : > { %8392 = vmatpush1.bf16.msra.mxu0 %v11323_v31  ;;  %v6199_v31 = vadd.f32 %v6198_v3, %v6156_v16  ;;  %v11392_v3 = vld [vmem:[%s14864_s5 + $0x7f0] ss:$8 sps:$4 sm:$0xff]  }
 0x3a2   : > { %8365 = vmatpush2.bf16.msra.mxu1 %v11320_v30  ;;  %8393 = vmatprep.subr.bf16.mxu0 %v11331_v34  ;;  %v11358_v30 = vld [vmem:[%s14864_s5 + $0x754] ss:$8 sps:$4 sm:$0xff]   ;;  %v11404_v16 = vld [vmem:[%s14864_s5 + $0x7d0] ss:$8 sps:$4 sm:$0xff]  }
 0x3a3   : > { %8366 = vmatprep.subr.bf16.mxu1 %v11328_v33  ;;  %v6242_v38 = vadd.f32 %v6241_v26, %v6199_v31  ;;  %v11416_v26 = vld [vmem:[%s14864_s5 + $0x7b0] ss:$8 sps:$4 sm:$0xff]   ;;  %v11422_v31 = vld [vmem:[%s14864_s5 + $0x7a0] ss:$8 sps:$4 sm:$0xff]  }
 0x3a5   : > { %8394 = vmatpush1.bf16.msra.mxu0 %v11329_v42  ;;  %v11353_v42 = vld [vmem:[%s14864_s5 + $0x6d0] ss:$8 sps:$4 sm:$0xff]  }
 0x3a6   : > { %8367 = vmatpush2.bf16.msra.mxu1 %v11326_v41  ;;  %8395 = vmatprep.subr.bf16.mxu0 %v11337_v32  ;;  %v11364_v32 = vld [vmem:[%s14864_s5 + $0x744] ss:$8 sps:$4 sm:$0xff]  }
 0x3a7   : > { %8368 = vmatprep.subr.bf16.mxu1 %v11334_v27  ;;  %v11361_v27 = vld [vmem:[%s14864_s5 + $0x6c4] ss:$8 sps:$4 sm:$0xff]  }
 0x3a9   : > { %8396 = vmatpush1.bf16.msra.mxu0 %v11335_v36  ;;  %v11370_v36 = vld [vmem:[%s14864_s5 + $0x734] ss:$8 sps:$4 sm:$0xff]  }
 0x3aa   : > { %8369 = vmatpush2.bf16.msra.mxu1 %v11332_v52  ;;  %8397 = vmatprep.subr.bf16.mxu0 %v11343_v47  ;;  %v11367_v52 = vld [vmem:[%s14864_s5 + $0x6b4] ss:$8 sps:$4 sm:$0xff]   ;;  %v11373_v47 = vld [vmem:[%s14864_s5 + $0x6a4] ss:$8 sps:$4 sm:$0xff]  }
 0x3ab   : > { %8424 = vmatprep.subr.bf16.mxu1 %v11346_v50  ;;  %v11376_v50 = vld [vmem:[%s14864_s5 + $0x724] ss:$8 sps:$4 sm:$0xff]  }
 0x3ad   : > { %v6278_v17 = vpop.f32.mrf.mxu1  ;;  %8371 = vmatmul.mubr.bf16.vlgmr.msra.gmra.mxu1 %v11338_v59  ;;  %8398 = vmatpush2.bf16.msra.mxu0 %v11341_v63  ;;  %v11380_v59 = vld [vmem:[%s14864_s5 + $0x710] ss:$8 sps:$4 sm:$0xff]   ;;  %v11394_v63 = vld [vmem:[%s14864_s5 + $0x7f4] ss:$8 sps:$4 sm:$0xff]  }
 0x3ae   : > { %v6279_v23 = vadd.f32 %v6278_v17, %v6236_v10  ;;  %8425 = vmatpush1.bf16.msra.mxu1 %v11344_v1  ;;  %8399 = vmatprep.subr.bf16.mxu0 %v11349_v5  ;;  %v11397_v1 = vld [vmem:[%s14864_s5 + $0x874] ss:$8 sps:$4 sm:$0xff]   ;;  %v11400_v5 = vld [vmem:[%s14864_s5 + $0x7e4] ss:$8 sps:$4 sm:$0xff]   ;;  %v11401_v10 = vld [vmem:[%s14864_s5 + $0x860] ss:$8 sps:$4 sm:$0xff]  }
 0x3af   : > { %v6280_v28 = vpop.f32.mrf.mxu1  ;;  %8426 = vmatprep.subr.bf16.mxu1 %v11352_v8  ;;  %8456 = vmatprep.mubr.bf16.mxu1 %v11442_v14  ;;  %v11403_v8 = vld [vmem:[%s14864_s5 + $0x864] ss:$8 sps:$4 sm:$0xff]   ;;  %v11409_v14 = vld [vmem:[%s14864_s5 + $0x854] ss:$8 sps:$4 sm:$0xff]   ;;  %v11407_v17 = vld [vmem:[%s14864_s5 + $0x850] ss:$8 sps:$4 sm:$0xff]  }
 0x3b0   : > { %v8550_v33 = vadd.f32 %v8527_v13, %v6279_v23  ;;  %v6281_v34 = vadd.f32 %v6280_v28, %v6238_v22  ;;  %v11410_v22 = vld [vmem:[%s14864_s5 + $0x7c0] ss:$8 sps:$4 sm:$0xff]   ;;  %v11419_v28 = vld [vmem:[%s14864_s5 + $0x830] ss:$8 sps:$4 sm:$0xff]  }
 0x3b1   : > { %v6282_v35 = vpop.f32.mrf.mxu1  ;;  %8400 = vmatpush2.bf16.msra.mxu0 %v11347_v24  ;;  %v11413_v23 = vld [vmem:[%s14864_s5 + $0x840] ss:$8 sps:$4 sm:$0xff]   ;;  %v11418_v24 = vld [vmem:[%s14864_s5 + $0x7b4] ss:$8 sps:$4 sm:$0xff]  }
 0x3b2   : > { %v8564_v39 = vmax.f32 %v8550_v33, 0.0  ;;  %v8551_v40 = vadd.f32 %v8531_v19, %v6281_v34  ;;  %v6283_v41 = vadd.f32 %v6282_v35, %v6240_v7  ;;  %8427 = vmatpush1.bf16.msra.mxu1 %v11350_v25  ;;  %8401 = vmatprep.subr.bf16.mxu0 %v11355_v29  ;;  %v11421_v25 = vld [vmem:[%s14864_s5 + $0x834] ss:$8 sps:$4 sm:$0xff]   ;;  %v11424_v29 = vld [vmem:[%s14864_s5 + $0x7a4] ss:$8 sps:$4 sm:$0xff]  }
 0x3b3   : > { %v6284_v45 = vpop.f32.mrf.mxu1  ;;  %8428 = vmatprep.subr.bf16.mxu1 %v11358_v30  ;;  %v11427_v30 = vld [vmem:[%s14864_s5 + $0x824] ss:$8 sps:$4 sm:$0xff]   ;;  %v11425_v7 = vld [vmem:[%s14864_s5 + $0x820] ss:$8 sps:$4 sm:$0xff]   ;;  %v11430_v33 = vld [vmem:[%s14864_s5 + $0x794] ss:$8 sps:$4 sm:$0xff]  }
 0x3b4   : > { %8578 = vst [vmem:[%s13236_s13 + $0x18] sm:$0xff] %v8564_v39  ;;  %v8565_v0 = vmax.f32 %v8551_v40, 0.0  ;;  %v8557_v37 = vadd.f32 %v8527_v13, %v6283_v41  ;;  %v6285_v44 = vadd.f32 %v6284_v45, %v6242_v38  ;;  %v11406_v13 = vld [vmem:[%s14864_s5 + $0x7d4] ss:$8 sps:$4 sm:$0xff]   ;;  %v11428_v35 = vld [vmem:[%s14864_s5 + $0x790] ss:$8 sps:$4 sm:$0xff]  }
 0x3b5   : > { %8402 = vmatpush2.bf16.msra.mxu0 %v11353_v42  ;;  %v11433_v34 = vld [vmem:[%s14864_s5 + $0x814] ss:$8 sps:$4 sm:$0xff]   ;;  %v11431_v38 = vld [vmem:[%s14864_s5 + $0x810] ss:$8 sps:$4 sm:$0xff]   ;;  %v11436_v39 = vld [vmem:[%s14864_s5 + $0x784] ss:$8 sps:$4 sm:$0xff]  }
 0x3b6   : > { %8579 = vst [vmem:[%s13236_s13 + $0x20] sm:$0xff] %v8565_v0  ;;  %v8571_v46 = vmax.f32 %v8557_v37, 0.0  ;;  %v8558_v48 = vadd.f32 %v8531_v19, %v6285_v44  ;;  %8429 = vmatpush1.bf16.msra.mxu1 %v11356_v43  ;;  %8403 = vmatprep.subr.bf16.mxu0 %v11361_v27  ;;  %v11412_v19 = vld [vmem:[%s14864_s5 + $0x7c4] ss:$8 sps:$4 sm:$0xff]   ;;  %v11434_v41 = vld [vmem:[%s14864_s5 + $0x780] ss:$8 sps:$4 sm:$0xff]  }
 0x3b7   : > { %8430 = vmatprep.subr.bf16.mxu1 %v11364_v32  ;;  %v11439_v40 = vld [vmem:[%s14864_s5 + $0x804] ss:$8 sps:$4 sm:$0xff]   ;;  %v11437_v42 = vld [vmem:[%s14864_s5 + $0x800] ss:$8 sps:$4 sm:$0xff]   ;;  %v11445_v43 = vld [vmem:[%s14864_s5 + $0x8f4] ss:$8 sps:$4 sm:$0xff]  }
 0x3b8   : > { %8585 = vst [vmem:[%s13236_s13 + $0x50] sm:$0xff] %v8571_v46  ;;  %v8572_v18 = vmax.f32 %v8558_v48, 0.0  ;;  %v11440_v45 = vld [vmem:[%s13652_s29 + $0x38] ss:$72 sps:$4 sm:$0xff]   ;;  %v11448_v32 = vld [vmem:[%s14864_s5 + $0x8e4] ss:$8 sps:$4 sm:$0xff]  }
 0x3b9   : > { %8404 = vmatpush2.bf16.msra.mxu0 %v11359_v21  ;;  %v11443_v27 = vld [vmem:[%s14864_s5 + $0x8f0] ss:$8 sps:$4 sm:$0xff]   ;;  %v11446_v0 = vld [vmem:[%s14864_s5 + $0x8e0] ss:$8 sps:$4 sm:$0xff]   ;;  %v11451_v37 = vld [vmem:[%s14864_s5 + $0x8d4] ss:$8 sps:$4 sm:$0xff]  }
 0x3ba   : > { %8586 = vst [vmem:[%s13236_s13 + $0x58] sm:$0xff] %v8572_v18  ;;  %8431 = vmatpush1.bf16.msra.mxu1 %v11362_v51  ;;  %8405 = vmatprep.subr.bf16.mxu0 %v11367_v52  ;;  %v11449_v44 = vld [vmem:[%s14864_s5 + $0x8d0] ss:$8 sps:$4 sm:$0xff]   ;;  %v11454_v46 = vld [vmem:[%s14864_s5 + $0x8c4] ss:$8 sps:$4 sm:$0xff]  }
 0x3bb   : > { %8432 = vmatprep.subr.bf16.mxu1 %v11370_v36  ;;  %v11452_v48 = vld [vmem:[%s14864_s5 + $0x8c0] ss:$8 sps:$4 sm:$0xff]   ;;  %v11457_v21 = vld [vmem:[%s14864_s5 + $0x8b4] ss:$8 sps:$4 sm:$0xff]   ;;  %v11455_v51 = vld [vmem:[%s14864_s5 + $0x8b0] ss:$8 sps:$4 sm:$0xff]  }
 0x3bc   : > { %v11460_v52 = vld [vmem:[%s14864_s5 + $0x8a4] ss:$8 sps:$4 sm:$0xff]   ;;  %v11458_v36 = vld [vmem:[%s14864_s5 + $0x8a0] ss:$8 sps:$4 sm:$0xff]   ;;  %v11463_v18 = vld [vmem:[%s14864_s5 + $0x894] ss:$8 sps:$4 sm:$0xff]  }
 0x3bd   : > { %8406 = vmatpush2.bf16.msra.mxu0 %v11365_v49  ;;  %v11461_v49 = vld [vmem:[%s14864_s5 + $0x890] ss:$8 sps:$4 sm:$0xff]  }
 0x3be   : > { %8433 = vmatpush1.bf16.msra.mxu1 %v11368_v12  ;;  %8407 = vmatprep.subr.bf16.mxu0 %v11373_v47  ;;  %v11466_v12 = vld [vmem:[%s14864_s5 + $0x884] ss:$8 sps:$4 sm:$0xff]   ;;  %v11464_v47 = vld [vmem:[%s14864_s5 + $0x880] ss:$8 sps:$4 sm:$0xff]  }
 0x3bf   : > { %8434 = vmatprep.subr.bf16.mxu1 %v11376_v50  ;;  %v11467_v50 = vld [vmem:[%s13652_s29 + $0x40] ss:$72 sps:$4 sm:$0xff]  }
 0x3c1   : > { %8408 = vmatpush2.bf16.msra.mxu0 %v11371_v53 }
 0x3c2   : > { %8435 = vmatpush1.bf16.msra.mxu1 %v11374_v54  ;;  %8409 = vmatprep.subr.bf16.mxu0 %v11379_v55 }
 0x3c3   : > { %8436 = vmatprep.subr.bf16.mxu1 %v11382_v56 }
 0x3c5   : > { %8410 = vmatpush2.bf16.msra.mxu0 %v11377_v57 }
 0x3c6   : > { %8437 = vmatpush1.bf16.msra.mxu1 %v11380_v59  ;;  %8411 = vmatprep.subr.bf16.mxu0 %v11385_v60 }
 0x3c7   : > { %8438 = vmatprep.subr.bf16.mxu1 %v11388_v58 }
 0x3c9   : > { %8412 = vmatpush2.bf16.msra.mxu0 %v11383_v61 }
 0x3ca   : > { %8439 = vmatpush1.bf16.msra.mxu1 %v11386_v62  ;;  %8467 = vmatprep.subr.bf16.mxu0 %v11397_v1 }
 0x3cb   : > { %8440 = vmatprep.subr.bf16.mxu1 %v11394_v63 }
 0x3cc   : > { %8414 = vmatmul.mubr.bf16.vlgmr.msra.gmra.mxu0 %v11389_v2  ;;  %v8157_v53 = vpop.f32.mrf.mxu0 }
 0x3cd   : > { %8468 = vmatpush1.bf16.msra.mxu0 %v11395_v4  ;;  %8499 = vmatprep.mubr.bf16.mxu0 %v11469_v6 }
 0x3ce   : > { %8441 = vmatpush2.bf16.msra.mxu1 %v11392_v3  ;;  %8469 = vmatprep.subr.bf16.mxu0 %v11403_v8  ;;  %v8159_v54 = vpop.f32.mrf.mxu0 }
 0x3cf   : > { %8442 = vmatprep.subr.bf16.mxu1 %v11400_v5 }
 0x3d0   : > { %v8161_v56 = vpop.f32.mrf.mxu0 }
 0x3d1   : > { %8470 = vmatpush1.bf16.msra.mxu0 %v11401_v10 }
 0x3d2   : > { %8443 = vmatpush2.bf16.msra.mxu1 %v11398_v9  ;;  %8471 = vmatprep.subr.bf16.mxu0 %v11409_v14  ;;  %v8163_v59 = vpop.f32.mrf.mxu0 }
 0x3d3   : > { %8444 = vmatprep.subr.bf16.mxu1 %v11406_v13 }
 0x3d5   : > { %8472 = vmatpush1.bf16.msra.mxu0 %v11407_v17 }
 0x3d6   : > { %8445 = vmatpush2.bf16.msra.mxu1 %v11404_v16  ;;  %8473 = vmatprep.subr.bf16.mxu0 %v11415_v20 }
 0x3d7   : > { %8446 = vmatprep.subr.bf16.mxu1 %v11412_v19 }
 0x3d9   : > { %8474 = vmatpush1.bf16.msra.mxu0 %v11413_v23 }
 0x3da   : > { %8447 = vmatpush2.bf16.msra.mxu1 %v11410_v22  ;;  %8475 = vmatprep.subr.bf16.mxu0 %v11421_v25 }
 0x3db   : > { %8448 = vmatprep.subr.bf16.mxu1 %v11418_v24 }
 0x3dd   : > { %8476 = vmatpush1.bf16.msra.mxu0 %v11419_v28 }
 0x3de   : > { %8449 = vmatpush2.bf16.msra.mxu1 %v11416_v26  ;;  %8477 = vmatprep.subr.bf16.mxu0 %v11427_v30 }
 0x3df   : > { %8450 = vmatprep.subr.bf16.mxu1 %v11424_v29 }
 0x3e1   : > { %8478 = vmatpush1.bf16.msra.mxu0 %v11425_v7 }
 0x3e2   : > { %8451 = vmatpush2.bf16.msra.mxu1 %v11422_v31  ;;  %8479 = vmatprep.subr.bf16.mxu0 %v11433_v34 }
 0x3e3   : > { %8452 = vmatprep.subr.bf16.mxu1 %v11430_v33 }
 0x3e5   : > { %8480 = vmatpush1.bf16.msra.mxu0 %v11431_v38  ;;  %v8534_v38 = vsub.s32 5, %v13181_v15 }
 0x3e6   : > { %8453 = vmatpush2.bf16.msra.mxu1 %v11428_v35  ;;  %8481 = vmatprep.subr.bf16.mxu0 %v11439_v40 }
 0x3e7   : > { %8454 = vmatprep.subr.bf16.mxu1 %v11436_v39 }
 0x3e9   : > { %8482 = vmatpush1.bf16.msra.mxu0 %v11437_v42 }
 0x3ea   : > { %8455 = vmatpush2.bf16.msra.mxu1 %v11434_v41  ;;  %8483 = vmatprep.subr.bf16.mxu0 %v11445_v43  ;;  %v8538_v43 = vsub.s32 6, %v13181_v15 }
 0x3ed   : > { %8457 = vmatmul.mubr.bf16.vlgmr.msra.gmra.mxu1 %v11440_v45  ;;  %8484 = vmatpush2.bf16.msra.mxu0 %v11443_v27  ;;  %v8200_v55 = vpop.f32.mrf.mxu1 }
 0x3ee   : > { %8485 = vmatprep.subr.bf16.mxu0 %v11448_v32  ;;  %v8201_v19 = vadd.f32 %v8200_v55, %v8157_v53 }
 0x3ef   : > { %v8202_v57 = vpop.f32.mrf.mxu1 }
 0x3f0   : > { %v8203_v22 = vadd.f32 %v8202_v57, %v8159_v54 }
 0x3f1   : > { %8486 = vmatpush2.bf16.msra.mxu0 %v11446_v0  ;;  %v8204_v60 = vpop.f32.mrf.mxu1 }
 0x3f2   : > { %8487 = vmatprep.subr.bf16.mxu0 %v11451_v37  ;;  %v8205_v26 = vadd.f32 %v8204_v60, %v8161_v56 }
 0x3f3   : > { %v8206_v61 = vpop.f32.mrf.mxu1 }
 0x3f4   : > { %v8207_v30 = vadd.f32 %v8206_v61, %v8163_v59 }
 0x3f5   : > { %8488 = vmatpush2.bf16.msra.mxu0 %v11449_v44 }
 0x3f6   : > { %8489 = vmatprep.subr.bf16.mxu0 %v11454_v46  ;;  %v8535_v46 = vrot.slane %v14613_v11, %v8534_v38 }
 0x3f9   : > { %8490 = vmatpush2.bf16.msra.mxu0 %v11452_v48 }
 0x3fa   : > { %8491 = vmatprep.subr.bf16.mxu0 %v11457_v21 }
 0x3fd   : > { %8492 = vmatpush2.bf16.msra.mxu0 %v11455_v51 }
 0x3fe   : > { %8493 = vmatprep.subr.bf16.mxu0 %v11460_v52 }
 0x401   : > { %8494 = vmatpush2.bf16.msra.mxu0 %v11458_v36 }
 0x402   : > { %8495 = vmatprep.subr.bf16.mxu0 %v11463_v18  ;;  %v8539_v18 = vrot.slane %v14613_v11, %v8538_v43 }
 0x405   : > { %8496 = vmatpush2.bf16.msra.mxu0 %v11461_v49 }
 0x406   : > { %8497 = vmatprep.subr.bf16.mxu0 %v11466_v12 }
 0x409   : > { %8498 = vmatpush2.bf16.msra.mxu0 %v11464_v47 }
 0x40c   : > { %8500 = vmatmul.mubr.bf16.vlgmr.msra.gmra.mxu0 %v11467_v50  ;;  %v8243_v58 = vpop.f32.mrf.mxu0 }
 0x40d   : > { %v8244_v23 = vadd.f32 %v8243_v58, %v8201_v19 }
 0x40e   : > { %v8245_v62 = vpop.f32.mrf.mxu0 }
 0x40f   : > { %v8246_v28 = vadd.f32 %v8245_v62, %v8203_v22 }
 0x410   : > { %v8247_v1 = vpop.f32.mrf.mxu0 }
 0x411   : > { %v8248_v31 = vadd.f32 %v8247_v1, %v8205_v26 }
 0x412   : > { %v8249_v3 = vpop.f32.mrf.mxu0 }
 0x413   : > { %v8250_v39 = vadd.f32 %v8249_v3, %v8207_v30 }
 0x42d   : > { %v8286_v63 = vpop.f32.mrf.mxu1 }
 0x42e   : > { %v8287_v29 = vadd.f32 %v8286_v63, %v8244_v23 }
 0x42f   : > { %v8288_v2 = vpop.f32.mrf.mxu1 }
 0x430   : > { %v8289_v7 = vadd.f32 %v8288_v2, %v8246_v28 }
 0x431   : > { %v8290_v4 = vpop.f32.mrf.mxu1 }
 0x432   : > { %v8291_v40 = vadd.f32 %v8290_v4, %v8248_v31 }
 0x433   : > { %v8292_v8 = vpop.f32.mrf.mxu1 }
 0x434   : > { %v8293_v45 = vadd.f32 %v8292_v8, %v8250_v39 }
 0x44c   : > { %v8329_v5 = vpop.f32.mrf.mxu0 }
 0x44d   : > { %v8330_v33 = vadd.f32 %v8329_v5, %v8287_v29 }
 0x44e   : > { %v8331_v6 = vpop.f32.mrf.mxu0 }
 0x44f   : > { %v8332_v41 = vadd.f32 %v8331_v6, %v8289_v7 }
 0x450   : > { %v8333_v10 = vpop.f32.mrf.mxu0 }
 0x451   : > { %v8334_v27 = vadd.f32 %v8333_v10, %v8291_v40 }
 0x452   : > { %v8335_v14 = vpop.f32.mrf.mxu0 }
 0x453   : > { %v8336_v48 = vadd.f32 %v8335_v14, %v8293_v45 }
 0x46d   : > { %v8372_v9 = vpop.f32.mrf.mxu1 }
 0x46e   : > { %v8373_v42 = vadd.f32 %v8372_v9, %v8330_v33 }
 0x46f   : > { %v8374_v13 = vpop.f32.mrf.mxu1 }
 0x470   : > { %v8375_v32 = vadd.f32 %v8374_v13, %v8332_v41 }
 0x471   : > { %v8376_v16 = vpop.f32.mrf.mxu1 }
 0x472   : > { %v8377_v21 = vadd.f32 %v8376_v16, %v8334_v27 }
 0x473   : > { %v8378_v20 = vpop.f32.mrf.mxu1 }
 0x474   : > { %v8379_v49 = vadd.f32 %v8378_v20, %v8336_v48 }
 0x48c   : > { %v8415_v17 = vpop.f32.mrf.mxu0 }
 0x48d   : > { %v8416_v0 = vadd.f32 %v8415_v17, %v8373_v42 }
 0x48e   : > { %v8417_v24 = vpop.f32.mrf.mxu0 }
 0x48f   : > { %v8418_v51 = vadd.f32 %v8417_v24, %v8375_v32 }
 0x490   : > { %v8419_v34 = vpop.f32.mrf.mxu0 }
 0x491   : > { %v8420_v12 = vadd.f32 %v8419_v34, %v8377_v21 }
 0x492   : > { %v8421_v37 = vpop.f32.mrf.mxu0 }
 0x493   : > { %v8422_v54 = vadd.f32 %v8421_v37, %v8379_v49 }
 0x4ad   : > { %v8458_v25 = vpop.f32.mrf.mxu1 }
 0x4ae   : > { %v8459_v52 = vadd.f32 %v8458_v25, %v8416_v0 }
 0x4af   : > { %v8460_v35 = vpop.f32.mrf.mxu1 }
 0x4b0   : > { %v8461_v47 = vadd.f32 %v8460_v35, %v8418_v51 }
 0x4b1   : > { %v8462_v44 = vpop.f32.mrf.mxu1 }
 0x4b2   : > { %v8463_v55 = vadd.f32 %v8462_v44, %v8420_v12 }
 0x4b3   : > { %v8464_v50 = vpop.f32.mrf.mxu1 }
 0x4b4   : > { %v8465_v60 = vadd.f32 %v8464_v50, %v8422_v54 }
 0x4cc   : > { %v8501_v36 = vpop.f32.mrf.mxu0 }
 0x4cd   : > { %v8502_v15 = vadd.f32 %v8501_v36, %v8459_v52 }
 0x4ce   : > { %v8503_v53 = vpop.f32.mrf.mxu0 }
 0x4cf   : > { %v8552_v56 = vadd.f32 %v8535_v46, %v8502_v15  ;;  %v8504_v57 = vadd.f32 %v8503_v53, %v8461_v47 }
 0x4d0   : > { %v8505_v59 = vpop.f32.mrf.mxu0 }
 0x4d1   : > { %v8566_v58 = vmax.f32 %v8552_v56, 0.0  ;;  %v8553_v61 = vadd.f32 %v8539_v18, %v8504_v57  ;;  %v8506_v62 = vadd.f32 %v8505_v59, %v8463_v55 }
 0x4d2   : > { %v8507_v11 = vpop.f32.mrf.mxu0 }
 0x4d3   : > { %8580 = vst [vmem:[%s13236_s13 + $0x28] sm:$0xff] %v8566_v58  ;;  %v8567_v63 = vmax.f32 %v8553_v61, 0.0  ;;  %v8559_v1 = vadd.f32 %v8535_v46, %v8506_v62  ;;  %v8508_v2 = vadd.f32 %v8507_v11, %v8465_v60 }
 0x4d5   : > { %8581 = vst [vmem:[%s13236_s13 + $0x30] sm:$0xff] %v8567_v63  ;;  %v8573_v3 = vmax.f32 %v8559_v1, 0.0  ;;  %v8560_v4 = vadd.f32 %v8539_v18, %v8508_v2 }
 0x4d7   : > { %8587 = vst [vmem:[%s13236_s13 + $0x60] sm:$0xff] %v8573_v3  ;;  %v8574_v5 = vmax.f32 %v8560_v4, 0.0 }
 0x4d9   : > { %8588 = vst [vmem:[%s13236_s13 + $0x68] sm:$0xff] %v8574_v5 }
 0x4da PF: > { %s17_s24 = sadd.s32 1, %s11495_s24  }
 0x4db   : > { %p14_p4 = scmp.ge.s32.totalorder %s17_s24, 4  }
 0x4dd   :  { %16 = sbr.rel (!%p14_p4) target bundleno = 1 (0x1), region = 84 }

</bundles_post_ra>
